<compile_context>
chip_gen: v5e
topology: v5e:2x2
jax: 0.10.0
libtpu: 0.0.40
codegen_flags: <defaults>
</compile_context>

<pallas_src>
import jax
import jax.numpy as jnp
from jax.experimental import pallas as pl
from jax.experimental.pallas import tpu as pltpu

_VMEM_LIMIT_BYTES = 32 * 1024 * 1024


def _pick_tile(dim, preferred):
    """Largest preferred tile that divides `dim`, else the full extent."""
    for t in preferred:
        if dim % t == 0:
            return t
    return dim  # full-extent block (always legal)


# --------------------------- kernel 1: Y = P @ Wall --------------------------
def _fused_pr_matmul_kernel(a_ref, b_ref, o_ref):
    # Single-shot K (=2048) MXU matmul, f32 accumulate, bf16 writeback.
    o_ref[...] = jnp.dot(a_ref[...], b_ref[...],
                         preferred_element_type=jnp.float32).astype(o_ref.dtype)


def fused_part_rest_matmul(p_flat_bf16, w_all_bf16):
    """(4*N*W, 2048) @ (2048, 4096) -> bf16 (4*N*W, 4096)."""
    m, k = p_flat_bf16.shape
    k2, n = w_all_bf16.shape
    assert k == k2
    tm = _pick_tile(m, (1024, 512, 256, 128))
    tn = _pick_tile(n, (512, 256, 128))
    grid = (m // tm, n // tn)
    return pl.pallas_call(
        _fused_pr_matmul_kernel,
        out_shape=jax.ShapeDtypeStruct((m, n), jnp.bfloat16),
        grid=grid,
        in_specs=[pl.BlockSpec((tm, k), lambda i, j: (i, 0)),
                  pl.BlockSpec((k, tn), lambda i, j: (0, j))],
        out_specs=pl.BlockSpec((tm, tn), lambda i, j: (i, j)),
        compiler_params=pltpu.CompilerParams(
            dimension_semantics=("parallel", "parallel"),
            vmem_limit_bytes=_VMEM_LIMIT_BYTES),
    )(p_flat_bf16, w_all_bf16)


# --------------- kernel 2: rel_i = p_i * tanh( (sum_k Y slices) @ Wa ) --------
def _relation_kernel(y0_ref, y1_ref, y2_ref, y3_ref, wa_ref, g_ref, o_ref):
    # S tile = sum of the four permuted 1024-wide Y slices (f32 VPU adds).
    s = (y0_ref[...].astype(jnp.float32) + y1_ref[...].astype(jnp.float32)
         + y2_ref[...].astype(jnp.float32) + y3_ref[...].astype(jnp.float32))
    # addconv (K=1024 fits in one MXU pass) + tanh + gating, all fused.
    full = jnp.dot(s.astype(jnp.bfloat16), wa_ref[...],
                   preferred_element_type=jnp.float32)
    o_ref[...] = (g_ref[...] * jnp.tanh(full)).astype(o_ref.dtype)


def relation_gate(y, gate, wa_bf16):
    """y: (4, Mp, 4096) bf16, gate: (4, Mp, 2048) f32, wa: (1024, 2048) bf16."""
    nparts, mp, n4 = y.shape
    assert nparts == 4 and n4 % 4 == 0
    ns = n4 // 4                                   # 1024
    kq, c_out = wa_bf16.shape
    assert kq == ns and gate.shape == (4, mp, c_out)
    tm = _pick_tile(mp, (512, 256, 128))
    tn = _pick_tile(c_out, (512, 256, 128))
    grid = (4, mp // tm, c_out // tn)              # (part, M tiles, N tiles)

    # Slice k of S_i comes from part (i + k) % 4, columns [k*1024:(k+1)*1024].
    # The slice index_maps don't depend on the N-axis (last, fastest) grid
    # index, so the Y tiles are fetched once per (part, m) and reused.
    y_specs = [pl.BlockSpec((None, tm, ns),
                            (lambda i, m, j, kk=k: ((i + kk) % 4, m, kk)))
               for k in range(4)]

    return pl.pallas_call(
        _relation_kernel,
        out_shape=jax.ShapeDtypeStruct((4, mp, c_out), jnp.float32),
        grid=grid,
        in_specs=y_specs + [
            pl.BlockSpec((ns, tn), lambda i, m, j: (0, j)),          # Wa
            pl.BlockSpec((None, tm, tn), lambda i, m, j: (i, m, j)),  # gate
        ],
        out_specs=pl.BlockSpec((None, tm, tn), lambda i, m, j: (i, m, j)),
        compiler_params=pltpu.CompilerParams(
            dimension_semantics=("parallel", "parallel", "parallel"),
            vmem_limit_bytes=_VMEM_LIMIT_BYTES),
    )(y, y, y, y, wa_bf16, gate)


# --------------------------------- forward ----------------------------------
def _split_parts(x):
    """x: (N, 2048, H, W) NCHW -> (4, N*W, 2048) f32 (rows 0..3, like PyTorch)."""
    n, c, h, w = x.shape
    assert c == 2048 and h >= 4, "PRM expects 2048 channels and H >= 4"
    parts = jnp.stack(
        [jnp.transpose(x[:, :, i, :], (0, 2, 1)).reshape(n * w, c)
         for i in range(4)], axis=0)
    return parts, n, c, w


def _w_all(params):
    """[Wp | Wr0 | Wr1 | Wr2] : (2048, 4096) bf16."""
    wr = params["Wr"]
    return jnp.concatenate(
        [params["Wp"], wr[0:2048], wr[2048:4096], wr[4096:6144]],
        axis=1).astype(jnp.bfloat16)


def prm_forward(params, x_nchw):
    x = x_nchw.astype(jnp.float32)
    parts, n, c, w = _split_parts(x)               # (4, N*W, 2048) f32 (= gate)
    mp = n * w

    w_all = _w_all(params)                                        # (2048, 4096)
    p_flat = parts.reshape(4 * mp, c).astype(jnp.bfloat16)        # (4*Mp, 2048)

    # Kernel 1: all per-part conv_part / conv_rest partial scores in one matmul.
    y = fused_part_rest_matmul(p_flat, w_all).reshape(4, mp, 4 * 1024)

    # Kernel 2: permuted-slice sum + addconv + tanh + gating, fused.
    rel = relation_gate(y, parts, params["Wa"].astype(jnp.bfloat16))  # (4, Mp, 2048)

    outs = tuple(
        jnp.transpose(rel[i].reshape(n, w, c), (0, 2, 1)).reshape(n, c, 1, w)
        for i in range(4))
    return outs


# --------------------------- pure-JAX references -----------------------------
def prm_reference_faithful(params, x_nchw):
    """Mirrors the PyTorch forward structure (rest concats, bf16 matmul ops)."""
    x = x_nchw.astype(jnp.float32)
    parts, n, c, w = _split_parts(x)
    parts = [parts[i] for i in range(4)]
    rests = [
        jnp.concatenate([parts[1], parts[2], parts[3]], axis=1),
        jnp.concatenate([parts[2], parts[3], parts[0]], axis=1),
        jnp.concatenate([parts[3], parts[0], parts[1]], axis=1),
        jnp.concatenate([parts[0], parts[1], parts[2]], axis=1),
    ]
    wp = params["Wp"].astype(jnp.bfloat16)
    wr = params["Wr"].astype(jnp.bfloat16)
    wa = params["Wa"].astype(jnp.bfloat16)
    outs = []
    for i in range(4):
        s = (jnp.dot(parts[i].astype(jnp.bfloat16), wp,
                     preferred_element_type=jnp.float32)
             + jnp.dot(rests[i].astype(jnp.bfloat16), wr,
                       preferred_element_type=jnp.float32))
        full = jnp.dot(s.astype(jnp.bfloat16), wa,
                       preferred_element_type=jnp.float32)
        rel = parts[i] * jnp.tanh(full)
        outs.append(jnp.transpose(rel.reshape(n, w, c), (0, 2, 1)).reshape(n, c, 1, w))
    return tuple(outs)


def prm_reference_matched(params, x_nchw):
    """Same de-duplicated decomposition & precision as the Pallas path."""
    x = x_nchw.astype(jnp.float32)
    parts, n, c, w = _split_parts(x)
    w_all = _w_all(params)
    wa = params["Wa"].astype(jnp.bfloat16)
    ys = [jnp.dot(parts[j].astype(jnp.bfloat16), w_all,
                  preferred_element_type=jnp.float32).astype(jnp.bfloat16)
          for j in range(4)]
    outs = []
    for i in range(4):
        s = sum(ys[(i + k) % 4][:, k * 1024:(k + 1) * 1024].astype(jnp.float32)
                for k in range(4))
        full = jnp.dot(s.astype(jnp.bfloat16), wa,
                       preferred_element_type=jnp.float32)
        rel = parts[i] * jnp.tanh(full)
        outs.append(jnp.transpose(rel.reshape(n, w, c), (0, 2, 1)).reshape(n, c, 1, w))
    return tuple(outs)


# ------------------------------ initialization -------------------------------
def init_params(key):
    k1, k2, k3 = jax.random.split(key, 3)

    def kaiming_conv1x1(k, cout, cin):
        # nn.Conv2d(kernel_size=1, bias=False) + kaiming_normal_(a=0, fan_in)
        return jax.random.normal(k, (cout, cin, 1, 1), jnp.float32) * (2.0 / cin) ** 0.5

    wp_conv = kaiming_conv1x1(k1, 1024, 2048)        # conv_part
    wr_conv = kaiming_conv1x1(k2, 1024, 2048 * 3)    # conv_rest
    wa_conv = kaiming_conv1x1(k3, 2048, 1024)        # addconv
    # Stored as (Cin, Cout) matmul matrices matching the row-major pixel layout.
    return {
        "Wp": wp_conv[:, :, 0, 0].T,   # (2048, 1024)
        "Wr": wr_conv[:, :, 0, 0].T,   # (6144, 1024)
        "Wa": wa_conv[:, :, 0, 0].T,   # (1024, 2048)
    }


if __name__ == "__main__":
    key = jax.random.PRNGKey(0)
    pkey, xkey = jax.random.split(key)
    params = init_params(pkey)

    # Channels (2048) and H (>=4) are fixed by the module; keep the rest small.
    x = jax.random.normal(xkey, (2, 2048, 4, 1), jnp.float32)   # NCHW like PyTorch

    fwd = jax.jit(prm_forward)
    outs = jax.block_until_ready(fwd(params, x))

    assert len(outs) == 4
    for o in outs:
        assert o.shape == (2, 2048, 1, 1)
        assert bool(jnp.all(jnp.isfinite(o)))

    # Tight check vs the precision/decomposition-matched reference
    # (catches BlockSpec / index_map / grid bugs).
    refs_m = jax.block_until_ready(jax.jit(prm_reference_matched)(params, x))
    for o, r in zip(outs, refs_m):
        err = float(jnp.max(jnp.abs(o - r)))
        assert err < 1e-2, f"Pallas vs matched reference mismatch: {err}"

    # Looser check vs the PyTorch-structure reference
    # (catches any error in the rest-permutation algebra).
    refs_f = jax.block_until_ready(jax.jit(prm_reference_faithful)(params, x))
    for o, r in zip(outs, refs_f):
        err = float(jnp.max(jnp.abs(o - r)))
        assert err < 2e-1, f"Pallas vs faithful reference mismatch: {err}"

    print("KERNEL_OK")
</pallas_src>

<mosaic_0001>
module attributes {stable_mosaic.version = 11 : i64} {
  func.func @_fused_pr_matmul_kernel(%arg0: i32, %arg1: i32, %arg2: memref<8x2048xbf16, #tpu.memory_space<vmem>>, %arg3: memref<2048x512xbf16, #tpu.memory_space<vmem>>, %arg4: memref<8x512xbf16, #tpu.memory_space<vmem>>) attributes {dimension_semantics = [#tpu.dimension_semantics<parallel>, #tpu.dimension_semantics<parallel>], iteration_bounds = array<i64: 1, 8>, scalar_prefetch = 0 : i64, scratch_operands = 0 : i64, tpu.core_type = #tpu.core_type<tc>, window_params = [{transform_indices = @transform_0, window_bounds = array<i64: 8, 2048>}, {transform_indices = @transform_1, window_bounds = array<i64: 2048, 512>}, {transform_indices = @transform_2, window_bounds = array<i64: 8, 512>}]} {
    %c0 = arith.constant 0 : index
    %c0_0 = arith.constant 0 : index
    %0 = vector.load %arg2[%c0, %c0_0] : memref<8x2048xbf16, #tpu.memory_space<vmem>>, vector<8x2048xbf16>
    %c0_1 = arith.constant 0 : index
    %c0_2 = arith.constant 0 : index
    %1 = vector.load %arg3[%c0_1, %c0_2] : memref<2048x512xbf16, #tpu.memory_space<vmem>>, vector<2048x512xbf16>
    %cst = arith.constant dense<0.000000e+00> : vector<8x512xf32>
    %2 = tpu.matmul %0, %1, %cst {dimension_numbers = #tpu.dot_dimension_numbers<[1], [0], [0], [1], [0, 0, 1, 1], [], []>} : vector<8x2048xbf16>, vector<2048x512xbf16>, vector<8x512xf32> -> vector<8x512xf32>
    %3 = arith.truncf %2 : vector<8x512xf32> to vector<8x512xbf16>
    %c0_3 = arith.constant 0 : index
    %c0_4 = arith.constant 0 : index
    %4 = vector.load %arg4[%c0_3, %c0_4] : memref<8x512xbf16, #tpu.memory_space<vmem>>, vector<8x512xbf16>
    tpu.vector_store %arg4[%c0_3, %c0_4], %3 {strides = array<i32>} : memref<8x512xbf16, #tpu.memory_space<vmem>>, vector<8x512xbf16>,
    return
  }
  func.func @transform_0(%arg0: i32, %arg1: i32) -> (i32, i32) {
    %c0_i32 = arith.constant 0 : i32
    %c0_i32_0 = arith.constant 0 : i32
    return %arg0, %c0_i32 : i32, i32
  }
  func.func @transform_1(%arg0: i32, %arg1: i32) -> (i32, i32) {
    %c0_i32 = arith.constant 0 : i32
    %c0_i32_0 = arith.constant 0 : i32
    return %c0_i32, %arg1 : i32, i32
  }
  func.func @transform_2(%arg0: i32, %arg1: i32) -> (i32, i32) {
    %c0_i32 = arith.constant 0 : i32
    return %arg0, %arg1 : i32, i32
  }
}

module attributes {stable_mosaic.version = 11 : i64} {
  func.func @_relation_kernel(%arg0: i32, %arg1: i32, %arg2: i32, %arg3: memref<1x2x1024xbf16, #tpu.memory_space<vmem>>, %arg4: memref<1x2x1024xbf16, #tpu.memory_space<vmem>>, %arg5: memref<1x2x1024xbf16, #tpu.memory_space<vmem>>, %arg6: memref<1x2x1024xbf16, #tpu.memory_space<vmem>>, %arg7: memref<1024x512xbf16, #tpu.memory_space<vmem>>, %arg8: memref<1x2x512xf32, #tpu.memory_space<vmem>>, %arg9: memref<1x2x512xf32, #tpu.memory_space<vmem>>) attributes {dimension_semantics = [#tpu.dimension_semantics<parallel>, #tpu.dimension_semantics<parallel>, #tpu.dimension_semantics<parallel>], iteration_bounds = array<i64: 4, 1, 4>, scalar_prefetch = 0 : i64, scratch_operands = 0 : i64, tpu.core_type = #tpu.core_type<tc>, window_params = [{transform_indices = @transform_0, window_bounds = array<i64: 1, 2, 1024>}, {transform_indices = @transform_1, window_bounds = array<i64: 1, 2, 1024>}, {transform_indices = @transform_2, window_bounds = array<i64: 1, 2, 1024>}, {transform_indices = @transform_3, window_bounds = array<i64: 1, 2, 1024>}, {transform_indices = @transform_4, window_bounds = array<i64: 1024, 512>}, {transform_indices = @transform_5, window_bounds = array<i64: 1, 2, 512>}, {transform_indices = @transform_6, window_bounds = array<i64: 1, 2, 512>}]} {
    %c0 = arith.constant 0 : index
    %c0_0 = arith.constant 0 : index
    %c0_1 = arith.constant 0 : index
    %0 = vector.load %arg3[%c0, %c0_0, %c0_1] : memref<1x2x1024xbf16, #tpu.memory_space<vmem>>, vector<1x2x1024xbf16>
    %1 = vector.shape_cast %0 : vector<1x2x1024xbf16> to vector<2x1024xbf16>
    %2 = arith.extf %1 : vector<2x1024xbf16> to vector<2x1024xf32>
    %c0_2 = arith.constant 0 : index
    %c0_3 = arith.constant 0 : index
    %c0_4 = arith.constant 0 : index
    %3 = vector.load %arg4[%c0_2, %c0_3, %c0_4] : memref<1x2x1024xbf16, #tpu.memory_space<vmem>>, vector<1x2x1024xbf16>
    %4 = vector.shape_cast %3 : vector<1x2x1024xbf16> to vector<2x1024xbf16>
    %5 = arith.extf %4 : vector<2x1024xbf16> to vector<2x1024xf32>
    %6 = arith.addf %2, %5 : vector<2x1024xf32>
    %c0_5 = arith.constant 0 : index
    %c0_6 = arith.constant 0 : index
    %c0_7 = arith.constant 0 : index
    %7 = vector.load %arg5[%c0_5, %c0_6, %c0_7] : memref<1x2x1024xbf16, #tpu.memory_space<vmem>>, vector<1x2x1024xbf16>
    %8 = vector.shape_cast %7 : vector<1x2x1024xbf16> to vector<2x1024xbf16>
    %9 = arith.extf %8 : vector<2x1024xbf16> to vector<2x1024xf32>
    %10 = arith.addf %6, %9 : vector<2x1024xf32>
    %c0_8 = arith.constant 0 : index
    %c0_9 = arith.constant 0 : index
    %c0_10 = arith.constant 0 : index
    %11 = vector.load %arg6[%c0_8, %c0_9, %c0_10] : memref<1x2x1024xbf16, #tpu.memory_space<vmem>>, vector<1x2x1024xbf16>
    %12 = vector.shape_cast %11 : vector<1x2x1024xbf16> to vector<2x1024xbf16>
    %13 = arith.extf %12 : vector<2x1024xbf16> to vector<2x1024xf32>
    %14 = arith.addf %10, %13 : vector<2x1024xf32>
    %15 = arith.truncf %14 : vector<2x1024xf32> to vector<2x1024xbf16>
    %c0_11 = arith.constant 0 : index
    %c0_12 = arith.constant 0 : index
    %16 = vector.load %arg7[%c0_11, %c0_12] : memref<1024x512xbf16, #tpu.memory_space<vmem>>, vector<1024x512xbf16>
    %cst = arith.constant dense<0.000000e+00> : vector<2x512xf32>
    %17 = tpu.matmul %15, %16, %cst {dimension_numbers = #tpu.dot_dimension_numbers<[1], [0], [0], [1], [0, 0, 1, 1], [], []>} : vector<2x1024xbf16>, vector<1024x512xbf16>, vector<2x512xf32> -> vector<2x512xf32>
    %c0_13 = arith.constant 0 : index
    %c0_14 = arith.constant 0 : index
    %c0_15 = arith.constant 0 : index
    %18 = vector.load %arg8[%c0_13, %c0_14, %c0_15] : memref<1x2x512xf32, #tpu.memory_space<vmem>>, vector<1x2x512xf32>
    %19 = vector.shape_cast %18 : vector<1x2x512xf32> to vector<2x512xf32>
    %20 = math.tanh %17 : vector<2x512xf32>
    %21 = arith.mulf %19, %20 : vector<2x512xf32>
    %c0_16 = arith.constant 0 : index
    %c0_17 = arith.constant 0 : index
    %c0_18 = arith.constant 0 : index
    %22 = vector.load %arg9[%c0_16, %c0_17, %c0_18] : memref<1x2x512xf32, #tpu.memory_space<vmem>>, vector<1x2x512xf32>
    %23 = vector.shape_cast %22 : vector<1x2x512xf32> to vector<2x512xf32>
    %24 = vector.shape_cast %21 : vector<2x512xf32> to vector<1x2x512xf32>
    tpu.vector_store %arg9[%c0_16, %c0_17, %c0_18], %24 {strides = array<i32>} : memref<1x2x512xf32, #tpu.memory_space<vmem>>, vector<1x2x512xf32>,
    return
  }
  func.func @transform_0(%arg0: i32, %arg1: i32, %arg2: i32) -> (i32, i32, i32) {
    %c0_i32 = arith.constant 0 : i32
    %0 = arith.addi %arg0, %c0_i32 : i32
    %c4_i32 = arith.constant 4 : i32
    %c0_i32_0 = arith.constant 0 : i32
    %1 = arith.cmpi eq, %c4_i32, %c0_i32_0 : i32
    %c1_i32 = arith.constant 1 : i32
    %2 = arith.select %1, %c1_i32, %c4_i32 : i32
    %3 = arith.remsi %0, %2 : i32
    %c0_i32_1 = arith.constant 0 : i32
    %4 = arith.cmpi ne, %3, %c0_i32_1 : i32
    %c0_i32_2 = arith.constant 0 : i32
    %5 = arith.cmpi slt, %3, %c0_i32_2 : i32
    %c0_i32_3 = arith.constant 0 : i32
    %6 = arith.cmpi slt, %2, %c0_i32_3 : i32
    %7 = arith.xori %5, %6 : i1
    %8 = arith.andi %7, %4 : i1
    %9 = arith.addi %3, %2 : i32
    %10 = arith.select %8, %9, %3 : i32
    %c0_i32_4 = arith.constant 0 : i32
    %c0_i32_5 = arith.constant 0 : i32
    return %10, %arg1, %c0_i32_4 : i32, i32, i32
  }
  func.func @transform_1(%arg0: i32, %arg1: i32, %arg2: i32) -> (i32, i32, i32) {
    %c1_i32 = arith.constant 1 : i32
    %0 = arith.addi %arg0, %c1_i32 : i32
    %c4_i32 = arith.constant 4 : i32
    %c0_i32 = arith.constant 0 : i32
    %1 = arith.cmpi eq, %c4_i32, %c0_i32 : i32
    %c1_i32_0 = arith.constant 1 : i32
    %2 = arith.select %1, %c1_i32_0, %c4_i32 : i32
    %3 = arith.remsi %0, %2 : i32
    %c0_i32_1 = arith.constant 0 : i32
    %4 = arith.cmpi ne, %3, %c0_i32_1 : i32
    %c0_i32_2 = arith.constant 0 : i32
    %5 = arith.cmpi slt, %3, %c0_i32_2 : i32
    %c0_i32_3 = arith.constant 0 : i32
    %6 = arith.cmpi slt, %2, %c0_i32_3 : i32
    %7 = arith.xori %5, %6 : i1
    %8 = arith.andi %7, %4 : i1
    %9 = arith.addi %3, %2 : i32
    %10 = arith.select %8, %9, %3 : i32
    %c1_i32_4 = arith.constant 1 : i32
    %c0_i32_5 = arith.constant 0 : i32
    return %10, %arg1, %c1_i32_4 : i32, i32, i32
  }
  func.func @transform_2(%arg0: i32, %arg1: i32, %arg2: i32) -> (i32, i32, i32) {
    %c2_i32 = arith.constant 2 : i32
    %0 = arith.addi %arg0, %c2_i32 : i32
    %c4_i32 = arith.constant 4 : i32
    %c0_i32 = arith.constant 0 : i32
    %1 = arith.cmpi eq, %c4_i32, %c0_i32 : i32
    %c1_i32 = arith.constant 1 : i32
    %2 = arith.select %1, %c1_i32, %c4_i32 : i32
    %3 = arith.remsi %0, %2 : i32
    %c0_i32_0 = arith.constant 0 : i32
    %4 = arith.cmpi ne, %3, %c0_i32_0 : i32
    %c0_i32_1 = arith.constant 0 : i32
    %5 = arith.cmpi slt, %3, %c0_i32_1 : i32
    %c0_i32_2 = arith.constant 0 : i32
    %6 = arith.cmpi slt, %2, %c0_i32_2 : i32
    %7 = arith.xori %5, %6 : i1
    %8 = arith.andi %7, %4 : i1
    %9 = arith.addi %3, %2 : i32
    %10 = arith.select %8, %9, %3 : i32
    %c2_i32_3 = arith.constant 2 : i32
    %c0_i32_4 = arith.constant 0 : i32
    return %10, %arg1, %c2_i32_3 : i32, i32, i32
  }
  func.func @transform_3(%arg0: i32, %arg1: i32, %arg2: i32) -> (i32, i32, i32) {
    %c3_i32 = arith.constant 3 : i32
    %0 = arith.addi %arg0, %c3_i32 : i32
    %c4_i32 = arith.constant 4 : i32
    %c0_i32 = arith.constant 0 : i32
    %1 = arith.cmpi eq, %c4_i32, %c0_i32 : i32
    %c1_i32 = arith.constant 1 : i32
    %2 = arith.select %1, %c1_i32, %c4_i32 : i32
    %3 = arith.remsi %0, %2 : i32
    %c0_i32_0 = arith.constant 0 : i32
    %4 = arith.cmpi ne, %3, %c0_i32_0 : i32
    %c0_i32_1 = arith.constant 0 : i32
    %5 = arith.cmpi slt, %3, %c0_i32_1 : i32
    %c0_i32_2 = arith.constant 0 : i32
    %6 = arith.cmpi slt, %2, %c0_i32_2 : i32
    %7 = arith.xori %5, %6 : i1
    %8 = arith.andi %7, %4 : i1
    %9 = arith.addi %3, %2 : i32
    %10 = arith.select %8, %9, %3 : i32
    %c3_i32_3 = arith.constant 3 : i32
    %c0_i32_4 = arith.constant 0 : i32
    return %10, %arg1, %c3_i32_3 : i32, i32, i32
  }
  func.func @transform_4(%arg0: i32, %arg1: i32, %arg2: i32) -> (i32, i32) {
    %c0_i32 = arith.constant 0 : i32
    %c0_i32_0 = arith.constant 0 : i32
    return %c0_i32, %arg2 : i32, i32
  }
  func.func @transform_5(%arg0: i32, %arg1: i32, %arg2: i32) -> (i32, i32, i32) {
    %c0_i32 = arith.constant 0 : i32
    return %arg0, %arg1, %arg2 : i32, i32, i32
  }
  func.func @transform_6(%arg0: i32, %arg1: i32, %arg2: i32) -> (i32, i32, i32) {
    %c0_i32 = arith.constant 0 : i32
    return %arg0, %arg1, %arg2 : i32, i32, i32
  }
}

</mosaic_0001>

<bundles_post_ra>
// kernel: prm_forward.2
= control target key start
LH: loop header
LB: loop body
LE: loop exit
PB: predicated region body
PF: predicated region fallthrough
CT: control target
= control target key end

     0   :  { %s8606_s9 = smov 0   ;;  %s8608_s10 = smov 0   ;;  %s10442_s0 = inlined_call_operand.vmem [shape: bf16[8,2048], index: 0, kind: input, shape index: {}]   ;;  %s10443_s1 = inlined_call_operand.vmem [shape: bf16[2048,4096], index: 1, kind: input, shape index: {}]   ;;  %s10444_s2 = inlined_call_operand.vmem [shape: bf16[8,4096], index: 2, kind: output, shape index: {}]  }
   0x1   :  { %s8610_s11 = smov 0   ;;  %s8612_s12 = smov 0  }
   0x2   :  { %s8614_s13 = smov 0  }
   0x3 LB: > { %s21_s14 = sadd.s32 1, %s8569_s12  ;;  %p64_p1 = scmp.ne.s32.totalorder %s8561_s10, %s8557_s9  ;;  %s8573_s13 = sphi %s8614_s13, %s12_s13   ;;  %s8569_s12 = sphi %s8612_s12, %s10454_s12   ;;  %s8565_s11 = sphi %s8610_s11, %s10453_s11   ;;  %s8561_s10 = sphi %s8608_s10, %s10452_s10   ;;  %s8557_s9 = sphi %s8606_s9, %s10451_s9  }
   0x4   : > { %p22_p0 = scmp.ge.s32.totalorder %s21_s14, 8  ;;  %p65_p2 = scmp.eq.s32.totalorder %s8573_s13, 0 }
   0x5   : > { %s57_s16 = sadd.s32 1, %s8561_s10  ;;  %p5874_p5 = scmp.ge.s32.totalorder %s8573_s13, 8 }
   0x6   : > { %s10456_s14 = smov (%p22_p0, %s21_s14), 0  ;;  %p66_p3 = por %p65_p2, %p64_p1 }
   0x7   : > { %s54_s15 = ssub.s32 %s8569_s12, %s10456_s14  ;;  %126 = sbr.rel (%p5874_p5) target bundleno = 274 (0x112), region = 20 }
   0x8   : > { %p55_p4 = scmp.eq.s32.totalorder %s54_s15, 0 }
   0xa   : > { %s8641_s17 = scalar_select %p55_p4, %s8561_s10, %s57_s16  }
   0xc   : > { %129 = sbr.rel (!%p66_p3) target bundleno = 274 (0x112), region = 24  ;;  %s131_s18 = sand.u32 (%p66_p3), 1, %s8561_s10  }
   0xd   : > { %s7934_s19 = sshll.u32 (%p66_p3), %s8569_s12, 4  ;;  %s8646_s20 = sshll.u32 (%p66_p3), %s131_s18, 12 }
   0xe   : > { %s8651_s23 = scalar_lea.vmem (%p66_p3), %s10443_s1, %s7934_s19   ;;  %s133_s24 = scalar_lea.vmem (%p66_p3), [#allocation2], %s8646_s20  }
   0xf   : > { %s10445_s25 = smov (%p66_p3), %s133_s24  ;;  %s10446_s26 = smov (%p66_p3), %s8651_s23 }
  0x10   : > { %s8661_s27 = smov (%p66_p3), 0   ;;  %s8663_s28 = smov (%p66_p3), 0  }
  0x11 LB: >> { %v150_v0 = vld [vmem:[%s8581_s26] sm:$0xff]  ;;  %s662_s29 = sadd.s32 1, %s8585_s27  ;;  %s146_s28 = sadd.s32 1, %s8589_s28   ;;  %s8589_s28 = sphi %s8663_s28, %s146_s28   ;;  %s8585_s27 = sphi %s8661_s27, %s10449_s27   ;;  %s8581_s26 = sphi %s10446_s26, %s10448_s26   ;;  %s8577_s25 = sphi %s10445_s25, %s10447_s25  }
  0x12   : >> { %v152_v1 = vld [vmem:[%s8581_s26 + $0x80] sm:$0xff]  ;;  %151 = vst [vmem:[%s8577_s25] sm:$0xff] %v150_v0  ;;  %p663_p6 = scmp.ge.s32.totalorder %s662_s29, 2  ;;  %p143_p7 = scmp.ge.s32.totalorder %s146_s28, 2  }
  0x13   : >> { %v154_v2 = vld [vmem:[%s8581_s26 + $0x100] sm:$0xff]  ;;  %153 = vst [vmem:[%s8577_s25 + $0x10] sm:$0xff] %v152_v1 }
  0x14   : >> { %v156_v3 = vld [vmem:[%s8581_s26 + $0x180] sm:$0xff]  ;;  %155 = vst [vmem:[%s8577_s25 + $0x20] sm:$0xff] %v154_v2  ;;  %s10458_s29 = smov (%p663_p6, %s662_s29), 0 }
  0x15   : >> { %v158_v4 = vld [vmem:[%s8581_s26 + $0x200] sm:$0xff]  ;;  %157 = vst [vmem:[%s8577_s25 + $0x30] sm:$0xff] %v156_v3  ;;  %s5878_s30 = sshll.u32 %s10458_s29, 3  ;;  %s10449_s27 = smov %s10458_s29 }
  0x16   : >> { %v160_v5 = vld [vmem:[%s8581_s26 + $0x280] sm:$0xff]  ;;  %159 = vst [vmem:[%s8577_s25 + $0x40] sm:$0xff] %v158_v4  ;;  %s8941_s3 = scalar_lea.vmem %s8651_s23, %s5878_s30   ;;  %s8945_s4 = scalar_lea.vmem %s133_s24, %s5878_s30 [#allocation2]  }
  0x17   : >> { %v162_v6 = vld [vmem:[%s8581_s26 + $0x300] sm:$0xff]  ;;  %161 = vst [vmem:[%s8577_s25 + $0x50] sm:$0xff] %v160_v5 }
  0x18   : >> { %v164_v7 = vld [vmem:[%s8581_s26 + $0x380] sm:$0xff]  ;;  %163 = vst [vmem:[%s8577_s25 + $0x60] sm:$0xff] %v162_v6 }
  0x19   : >> { %v166_v8 = vld [vmem:[%s8581_s26 + $0x400] sm:$0xff]  ;;  %165 = vst [vmem:[%s8577_s25 + $0x70] sm:$0xff] %v164_v7 }
  0x1a   : >> { %v168_v9 = vld [vmem:[%s8581_s26 + $0x480] sm:$0xff]  ;;  %167 = vst [vmem:[%s8577_s25 + $0x80] sm:$0xff] %v166_v8 }
  0x1b   : >> { %v170_v10 = vld [vmem:[%s8581_s26 + $0x500] sm:$0xff]  ;;  %169 = vst [vmem:[%s8577_s25 + $0x90] sm:$0xff] %v168_v9 }
  0x1c   : >> { %v172_v11 = vld [vmem:[%s8581_s26 + $0x580] sm:$0xff]  ;;  %171 = vst [vmem:[%s8577_s25 + $0xa0] sm:$0xff] %v170_v10 }
  0x1d   : >> { %v174_v12 = vld [vmem:[%s8581_s26 + $0x600] sm:$0xff]  ;;  %173 = vst [vmem:[%s8577_s25 + $0xb0] sm:$0xff] %v172_v11 }
  0x1e   : >> { %v176_v13 = vld [vmem:[%s8581_s26 + $0x680] sm:$0xff]  ;;  %175 = vst [vmem:[%s8577_s25 + $0xc0] sm:$0xff] %v174_v12 }
  0x1f   : >> { %v178_v14 = vld [vmem:[%s8581_s26 + $0x700] sm:$0xff]  ;;  %177 = vst [vmem:[%s8577_s25 + $0xd0] sm:$0xff] %v176_v13 }
  0x20   : >> { %v180_v15 = vld [vmem:[%s8581_s26 + $0x780] sm:$0xff]  ;;  %179 = vst [vmem:[%s8577_s25 + $0xe0] sm:$0xff] %v178_v14 }
  0x21   : >> { %v182_v16 = vld [vmem:[%s8581_s26 + $0x800] sm:$0xff]  ;;  %181 = vst [vmem:[%s8577_s25 + $0xf0] sm:$0xff] %v180_v15 }
  0x22   : >> { %v184_v17 = vld [vmem:[%s8581_s26 + $0x880] sm:$0xff]  ;;  %183 = vst [vmem:[%s8577_s25 + $0x100] sm:$0xff] %v182_v16 }
  0x23   : >> { %v186_v18 = vld [vmem:[%s8581_s26 + $0x900] sm:$0xff]  ;;  %185 = vst [vmem:[%s8577_s25 + $0x110] sm:$0xff] %v184_v17 }
  0x24   : >> { %v188_v19 = vld [vmem:[%s8581_s26 + $0x980] sm:$0xff]  ;;  %187 = vst [vmem:[%s8577_s25 + $0x120] sm:$0xff] %v186_v18 }
  0x25   : >> { %v190_v20 = vld [vmem:[%s8581_s26 + $0xa00] sm:$0xff]  ;;  %189 = vst [vmem:[%s8577_s25 + $0x130] sm:$0xff] %v188_v19 }
  0x26   : >> { %v192_v21 = vld [vmem:[%s8581_s26 + $0xa80] sm:$0xff]  ;;  %191 = vst [vmem:[%s8577_s25 + $0x140] sm:$0xff] %v190_v20 }
  0x27   : >> { %v194_v22 = vld [vmem:[%s8581_s26 + $0xb00] sm:$0xff]  ;;  %193 = vst [vmem:[%s8577_s25 + $0x150] sm:$0xff] %v192_v21 }
  0x28   : >> { %v196_v23 = vld [vmem:[%s8581_s26 + $0xb80] sm:$0xff]  ;;  %195 = vst [vmem:[%s8577_s25 + $0x160] sm:$0xff] %v194_v22 }
  0x29   : >> { %v198_v24 = vld [vmem:[%s8581_s26 + $0xc00] sm:$0xff]  ;;  %197 = vst [vmem:[%s8577_s25 + $0x170] sm:$0xff] %v196_v23 }
  0x2a   : >> { %v200_v25 = vld [vmem:[%s8581_s26 + $0xc80] sm:$0xff]  ;;  %199 = vst [vmem:[%s8577_s25 + $0x180] sm:$0xff] %v198_v24 }
  0x2b   : >> { %v202_v26 = vld [vmem:[%s8581_s26 + $0xd00] sm:$0xff]  ;;  %201 = vst [vmem:[%s8577_s25 + $0x190] sm:$0xff] %v200_v25 }
  0x2c   : >> { %v204_v27 = vld [vmem:[%s8581_s26 + $0xd80] sm:$0xff]  ;;  %203 = vst [vmem:[%s8577_s25 + $0x1a0] sm:$0xff] %v202_v26 }
  0x2d   : >> { %v206_v28 = vld [vmem:[%s8581_s26 + $0xe00] sm:$0xff]  ;;  %205 = vst [vmem:[%s8577_s25 + $0x1b0] sm:$0xff] %v204_v27 }
  0x2e   : >> { %v208_v29 = vld [vmem:[%s8581_s26 + $0xe80] sm:$0xff]  ;;  %207 = vst [vmem:[%s8577_s25 + $0x1c0] sm:$0xff] %v206_v28 }
  0x2f   : >> { %v210_v30 = vld [vmem:[%s8581_s26 + $0xf00] sm:$0xff]  ;;  %209 = vst [vmem:[%s8577_s25 + $0x1d0] sm:$0xff] %v208_v29 }
  0x30   : >> { %v212_v31 = vld [vmem:[%s8581_s26 + $0xf80] sm:$0xff]  ;;  %211 = vst [vmem:[%s8577_s25 + $0x1e0] sm:$0xff] %v210_v30 }
  0x31   : >> { %v214_v32 = vld [vmem:[%s8581_s26 + $0x1000] sm:$0xff]  ;;  %213 = vst [vmem:[%s8577_s25 + $0x1f0] sm:$0xff] %v212_v31 }
  0x32   : >> { %v216_v33 = vld [vmem:[%s8581_s26 + $0x1080] sm:$0xff]  ;;  %215 = vst [vmem:[%s8577_s25 + $0x200] sm:$0xff] %v214_v32 }
  0x33   : >> { %v218_v34 = vld [vmem:[%s8581_s26 + $0x1100] sm:$0xff]  ;;  %217 = vst [vmem:[%s8577_s25 + $0x210] sm:$0xff] %v216_v33 }
  0x34   : >> { %v220_v35 = vld [vmem:[%s8581_s26 + $0x1180] sm:$0xff]  ;;  %219 = vst [vmem:[%s8577_s25 + $0x220] sm:$0xff] %v218_v34 }
  0x35   : >> { %v222_v36 = vld [vmem:[%s8581_s26 + $0x1200] sm:$0xff]  ;;  %221 = vst [vmem:[%s8577_s25 + $0x230] sm:$0xff] %v220_v35 }
  0x36   : >> { %v224_v37 = vld [vmem:[%s8581_s26 + $0x1280] sm:$0xff]  ;;  %223 = vst [vmem:[%s8577_s25 + $0x240] sm:$0xff] %v222_v36 }
  0x37   : >> { %v226_v38 = vld [vmem:[%s8581_s26 + $0x1300] sm:$0xff]  ;;  %225 = vst [vmem:[%s8577_s25 + $0x250] sm:$0xff] %v224_v37 }
  0x38   : >> { %v228_v39 = vld [vmem:[%s8581_s26 + $0x1380] sm:$0xff]  ;;  %227 = vst [vmem:[%s8577_s25 + $0x260] sm:$0xff] %v226_v38 }
  0x39   : >> { %v230_v40 = vld [vmem:[%s8581_s26 + $0x1400] sm:$0xff]  ;;  %229 = vst [vmem:[%s8577_s25 + $0x270] sm:$0xff] %v228_v39 }
  0x3a   : >> { %v232_v41 = vld [vmem:[%s8581_s26 + $0x1480] sm:$0xff]  ;;  %231 = vst [vmem:[%s8577_s25 + $0x280] sm:$0xff] %v230_v40 }
  0x3b   : >> { %v234_v42 = vld [vmem:[%s8581_s26 + $0x1500] sm:$0xff]  ;;  %233 = vst [vmem:[%s8577_s25 + $0x290] sm:$0xff] %v232_v41 }
  0x3c   : >> { %v236_v43 = vld [vmem:[%s8581_s26 + $0x1580] sm:$0xff]  ;;  %235 = vst [vmem:[%s8577_s25 + $0x2a0] sm:$0xff] %v234_v42 }
  0x3d   : >> { %v238_v44 = vld [vmem:[%s8581_s26 + $0x1600] sm:$0xff]  ;;  %237 = vst [vmem:[%s8577_s25 + $0x2b0] sm:$0xff] %v236_v43 }
  0x3e   : >> { %v240_v45 = vld [vmem:[%s8581_s26 + $0x1680] sm:$0xff]  ;;  %239 = vst [vmem:[%s8577_s25 + $0x2c0] sm:$0xff] %v238_v44 }
  0x3f   : >> { %v242_v46 = vld [vmem:[%s8581_s26 + $0x1700] sm:$0xff]  ;;  %241 = vst [vmem:[%s8577_s25 + $0x2d0] sm:$0xff] %v240_v45 }
  0x40   : >> { %v244_v47 = vld [vmem:[%s8581_s26 + $0x1780] sm:$0xff]  ;;  %243 = vst [vmem:[%s8577_s25 + $0x2e0] sm:$0xff] %v242_v46 }
  0x41   : >> { %v246_v48 = vld [vmem:[%s8581_s26 + $0x1800] sm:$0xff]  ;;  %245 = vst [vmem:[%s8577_s25 + $0x2f0] sm:$0xff] %v244_v47 }
  0x42   : >> { %v248_v49 = vld [vmem:[%s8581_s26 + $0x1880] sm:$0xff]  ;;  %247 = vst [vmem:[%s8577_s25 + $0x300] sm:$0xff] %v246_v48 }
  0x43   : >> { %v250_v50 = vld [vmem:[%s8581_s26 + $0x1900] sm:$0xff]  ;;  %249 = vst [vmem:[%s8577_s25 + $0x310] sm:$0xff] %v248_v49 }
  0x44   : >> { %v252_v51 = vld [vmem:[%s8581_s26 + $0x1980] sm:$0xff]  ;;  %251 = vst [vmem:[%s8577_s25 + $0x320] sm:$0xff] %v250_v50 }
  0x45   : >> { %v254_v52 = vld [vmem:[%s8581_s26 + $0x1a00] sm:$0xff]  ;;  %253 = vst [vmem:[%s8577_s25 + $0x330] sm:$0xff] %v252_v51 }
  0x46   : >> { %v256_v53 = vld [vmem:[%s8581_s26 + $0x1a80] sm:$0xff]  ;;  %255 = vst [vmem:[%s8577_s25 + $0x340] sm:$0xff] %v254_v52 }
  0x47   : >> { %v258_v54 = vld [vmem:[%s8581_s26 + $0x1b00] sm:$0xff]  ;;  %257 = vst [vmem:[%s8577_s25 + $0x350] sm:$0xff] %v256_v53 }
  0x48   : >> { %v260_v55 = vld [vmem:[%s8581_s26 + $0x1b80] sm:$0xff]  ;;  %259 = vst [vmem:[%s8577_s25 + $0x360] sm:$0xff] %v258_v54 }
  0x49   : >> { %v262_v56 = vld [vmem:[%s8581_s26 + $0x1c00] sm:$0xff]  ;;  %261 = vst [vmem:[%s8577_s25 + $0x370] sm:$0xff] %v260_v55 }
  0x4a   : >> { %v264_v57 = vld [vmem:[%s8581_s26 + $0x1c80] sm:$0xff]  ;;  %263 = vst [vmem:[%s8577_s25 + $0x380] sm:$0xff] %v262_v56 }
  0x4b   : >> { %v266_v58 = vld [vmem:[%s8581_s26 + $0x1d00] sm:$0xff]  ;;  %265 = vst [vmem:[%s8577_s25 + $0x390] sm:$0xff] %v264_v57 }
  0x4c   : >> { %v268_v59 = vld [vmem:[%s8581_s26 + $0x1d80] sm:$0xff]  ;;  %267 = vst [vmem:[%s8577_s25 + $0x3a0] sm:$0xff] %v266_v58 }
  0x4d   : >> { %v270_v60 = vld [vmem:[%s8581_s26 + $0x1e00] sm:$0xff]  ;;  %269 = vst [vmem:[%s8577_s25 + $0x3b0] sm:$0xff] %v268_v59 }
  0x4e   : >> { %v272_v61 = vld [vmem:[%s8581_s26 + $0x1e80] sm:$0xff]  ;;  %271 = vst [vmem:[%s8577_s25 + $0x3c0] sm:$0xff] %v270_v60 }
  0x4f   : >> { %v274_v62 = vld [vmem:[%s8581_s26 + $0x1f00] sm:$0xff]  ;;  %273 = vst [vmem:[%s8577_s25 + $0x3d0] sm:$0xff] %v272_v61 }
  0x50   : >> { %v276_v63 = vld [vmem:[%s8581_s26 + $0x1f80] sm:$0xff]  ;;  %275 = vst [vmem:[%s8577_s25 + $0x3e0] sm:$0xff] %v274_v62 }
  0x51   : >> { %v278_v0 = vld [vmem:[%s8581_s26 + $0x2000] sm:$0xff]  ;;  %277 = vst [vmem:[%s8577_s25 + $0x3f0] sm:$0xff] %v276_v63 }
  0x52   : >> { %v280_v1 = vld [vmem:[%s8581_s26 + $0x2080] sm:$0xff]  ;;  %279 = vst [vmem:[%s8577_s25 + $0x400] sm:$0xff] %v278_v0 }
  0x53   : >> { %v282_v2 = vld [vmem:[%s8581_s26 + $0x2100] sm:$0xff]  ;;  %281 = vst [vmem:[%s8577_s25 + $0x410] sm:$0xff] %v280_v1 }
  0x54   : >> { %v284_v3 = vld [vmem:[%s8581_s26 + $0x2180] sm:$0xff]  ;;  %283 = vst [vmem:[%s8577_s25 + $0x420] sm:$0xff] %v282_v2 }
  0x55   : >> { %v286_v4 = vld [vmem:[%s8581_s26 + $0x2200] sm:$0xff]  ;;  %285 = vst [vmem:[%s8577_s25 + $0x430] sm:$0xff] %v284_v3 }
  0x56   : >> { %v288_v5 = vld [vmem:[%s8581_s26 + $0x2280] sm:$0xff]  ;;  %287 = vst [vmem:[%s8577_s25 + $0x440] sm:$0xff] %v286_v4 }
  0x57   : >> { %v290_v6 = vld [vmem:[%s8581_s26 + $0x2300] sm:$0xff]  ;;  %289 = vst [vmem:[%s8577_s25 + $0x450] sm:$0xff] %v288_v5 }
  0x58   : >> { %v292_v7 = vld [vmem:[%s8581_s26 + $0x2380] sm:$0xff]  ;;  %291 = vst [vmem:[%s8577_s25 + $0x460] sm:$0xff] %v290_v6 }
  0x59   : >> { %v294_v8 = vld [vmem:[%s8581_s26 + $0x2400] sm:$0xff]  ;;  %293 = vst [vmem:[%s8577_s25 + $0x470] sm:$0xff] %v292_v7 }
  0x5a   : >> { %v296_v9 = vld [vmem:[%s8581_s26 + $0x2480] sm:$0xff]  ;;  %295 = vst [vmem:[%s8577_s25 + $0x480] sm:$0xff] %v294_v8 }
  0x5b   : >> { %v298_v10 = vld [vmem:[%s8581_s26 + $0x2500] sm:$0xff]  ;;  %297 = vst [vmem:[%s8577_s25 + $0x490] sm:$0xff] %v296_v9 }
  0x5c   : >> { %v300_v11 = vld [vmem:[%s8581_s26 + $0x2580] sm:$0xff]  ;;  %299 = vst [vmem:[%s8577_s25 + $0x4a0] sm:$0xff] %v298_v10 }
  0x5d   : >> { %v302_v12 = vld [vmem:[%s8581_s26 + $0x2600] sm:$0xff]  ;;  %301 = vst [vmem:[%s8577_s25 + $0x4b0] sm:$0xff] %v300_v11 }
  0x5e   : >> { %v304_v13 = vld [vmem:[%s8581_s26 + $0x2680] sm:$0xff]  ;;  %303 = vst [vmem:[%s8577_s25 + $0x4c0] sm:$0xff] %v302_v12 }
  0x5f   : >> { %v306_v14 = vld [vmem:[%s8581_s26 + $0x2700] sm:$0xff]  ;;  %305 = vst [vmem:[%s8577_s25 + $0x4d0] sm:$0xff] %v304_v13 }
  0x60   : >> { %v308_v15 = vld [vmem:[%s8581_s26 + $0x2780] sm:$0xff]  ;;  %307 = vst [vmem:[%s8577_s25 + $0x4e0] sm:$0xff] %v306_v14 }
  0x61   : >> { %v310_v16 = vld [vmem:[%s8581_s26 + $0x2800] sm:$0xff]  ;;  %309 = vst [vmem:[%s8577_s25 + $0x4f0] sm:$0xff] %v308_v15 }
  0x62   : >> { %v312_v17 = vld [vmem:[%s8581_s26 + $0x2880] sm:$0xff]  ;;  %311 = vst [vmem:[%s8577_s25 + $0x500] sm:$0xff] %v310_v16 }
  0x63   : >> { %v314_v18 = vld [vmem:[%s8581_s26 + $0x2900] sm:$0xff]  ;;  %313 = vst [vmem:[%s8577_s25 + $0x510] sm:$0xff] %v312_v17 }
  0x64   : >> { %v316_v19 = vld [vmem:[%s8581_s26 + $0x2980] sm:$0xff]  ;;  %315 = vst [vmem:[%s8577_s25 + $0x520] sm:$0xff] %v314_v18 }
  0x65   : >> { %v318_v20 = vld [vmem:[%s8581_s26 + $0x2a00] sm:$0xff]  ;;  %317 = vst [vmem:[%s8577_s25 + $0x530] sm:$0xff] %v316_v19 }
  0x66   : >> { %v320_v21 = vld [vmem:[%s8581_s26 + $0x2a80] sm:$0xff]  ;;  %319 = vst [vmem:[%s8577_s25 + $0x540] sm:$0xff] %v318_v20 }
  0x67   : >> { %v322_v22 = vld [vmem:[%s8581_s26 + $0x2b00] sm:$0xff]  ;;  %321 = vst [vmem:[%s8577_s25 + $0x550] sm:$0xff] %v320_v21 }
  0x68   : >> { %v324_v23 = vld [vmem:[%s8581_s26 + $0x2b80] sm:$0xff]  ;;  %323 = vst [vmem:[%s8577_s25 + $0x560] sm:$0xff] %v322_v22 }
  0x69   : >> { %v326_v24 = vld [vmem:[%s8581_s26 + $0x2c00] sm:$0xff]  ;;  %325 = vst [vmem:[%s8577_s25 + $0x570] sm:$0xff] %v324_v23 }
  0x6a   : >> { %v328_v25 = vld [vmem:[%s8581_s26 + $0x2c80] sm:$0xff]  ;;  %327 = vst [vmem:[%s8577_s25 + $0x580] sm:$0xff] %v326_v24 }
  0x6b   : >> { %v330_v26 = vld [vmem:[%s8581_s26 + $0x2d00] sm:$0xff]  ;;  %329 = vst [vmem:[%s8577_s25 + $0x590] sm:$0xff] %v328_v25 }
  0x6c   : >> { %v332_v27 = vld [vmem:[%s8581_s26 + $0x2d80] sm:$0xff]  ;;  %331 = vst [vmem:[%s8577_s25 + $0x5a0] sm:$0xff] %v330_v26 }
  0x6d   : >> { %v334_v28 = vld [vmem:[%s8581_s26 + $0x2e00] sm:$0xff]  ;;  %333 = vst [vmem:[%s8577_s25 + $0x5b0] sm:$0xff] %v332_v27 }
  0x6e   : >> { %v336_v29 = vld [vmem:[%s8581_s26 + $0x2e80] sm:$0xff]  ;;  %335 = vst [vmem:[%s8577_s25 + $0x5c0] sm:$0xff] %v334_v28 }
  0x6f   : >> { %v338_v30 = vld [vmem:[%s8581_s26 + $0x2f00] sm:$0xff]  ;;  %337 = vst [vmem:[%s8577_s25 + $0x5d0] sm:$0xff] %v336_v29 }
  0x70   : >> { %v340_v31 = vld [vmem:[%s8581_s26 + $0x2f80] sm:$0xff]  ;;  %339 = vst [vmem:[%s8577_s25 + $0x5e0] sm:$0xff] %v338_v30 }
  0x71   : >> { %v342_v32 = vld [vmem:[%s8581_s26 + $0x3000] sm:$0xff]  ;;  %341 = vst [vmem:[%s8577_s25 + $0x5f0] sm:$0xff] %v340_v31 }
  0x72   : >> { %v344_v33 = vld [vmem:[%s8581_s26 + $0x3080] sm:$0xff]  ;;  %343 = vst [vmem:[%s8577_s25 + $0x600] sm:$0xff] %v342_v32 }
  0x73   : >> { %v346_v34 = vld [vmem:[%s8581_s26 + $0x3100] sm:$0xff]  ;;  %345 = vst [vmem:[%s8577_s25 + $0x610] sm:$0xff] %v344_v33 }
  0x74   : >> { %v348_v35 = vld [vmem:[%s8581_s26 + $0x3180] sm:$0xff]  ;;  %347 = vst [vmem:[%s8577_s25 + $0x620] sm:$0xff] %v346_v34 }
  0x75   : >> { %v350_v36 = vld [vmem:[%s8581_s26 + $0x3200] sm:$0xff]  ;;  %349 = vst [vmem:[%s8577_s25 + $0x630] sm:$0xff] %v348_v35 }
  0x76   : >> { %v352_v37 = vld [vmem:[%s8581_s26 + $0x3280] sm:$0xff]  ;;  %351 = vst [vmem:[%s8577_s25 + $0x640] sm:$0xff] %v350_v36 }
  0x77   : >> { %v354_v38 = vld [vmem:[%s8581_s26 + $0x3300] sm:$0xff]  ;;  %353 = vst [vmem:[%s8577_s25 + $0x650] sm:$0xff] %v352_v37 }
  0x78   : >> { %v356_v39 = vld [vmem:[%s8581_s26 + $0x3380] sm:$0xff]  ;;  %355 = vst [vmem:[%s8577_s25 + $0x660] sm:$0xff] %v354_v38 }
  0x79   : >> { %v358_v40 = vld [vmem:[%s8581_s26 + $0x3400] sm:$0xff]  ;;  %357 = vst [vmem:[%s8577_s25 + $0x670] sm:$0xff] %v356_v39 }
  0x7a   : >> { %v360_v41 = vld [vmem:[%s8581_s26 + $0x3480] sm:$0xff]  ;;  %359 = vst [vmem:[%s8577_s25 + $0x680] sm:$0xff] %v358_v40 }
  0x7b   : >> { %v362_v42 = vld [vmem:[%s8581_s26 + $0x3500] sm:$0xff]  ;;  %361 = vst [vmem:[%s8577_s25 + $0x690] sm:$0xff] %v360_v41 }
  0x7c   : >> { %v364_v43 = vld [vmem:[%s8581_s26 + $0x3580] sm:$0xff]  ;;  %363 = vst [vmem:[%s8577_s25 + $0x6a0] sm:$0xff] %v362_v42 }
  0x7d   : >> { %v366_v44 = vld [vmem:[%s8581_s26 + $0x3600] sm:$0xff]  ;;  %365 = vst [vmem:[%s8577_s25 + $0x6b0] sm:$0xff] %v364_v43 }
  0x7e   : >> { %v368_v45 = vld [vmem:[%s8581_s26 + $0x3680] sm:$0xff]  ;;  %367 = vst [vmem:[%s8577_s25 + $0x6c0] sm:$0xff] %v366_v44 }
  0x7f   : >> { %v370_v46 = vld [vmem:[%s8581_s26 + $0x3700] sm:$0xff]  ;;  %369 = vst [vmem:[%s8577_s25 + $0x6d0] sm:$0xff] %v368_v45 }
  0x80   : >> { %v372_v47 = vld [vmem:[%s8581_s26 + $0x3780] sm:$0xff]  ;;  %371 = vst [vmem:[%s8577_s25 + $0x6e0] sm:$0xff] %v370_v46 }
  0x81   : >> { %v374_v48 = vld [vmem:[%s8581_s26 + $0x3800] sm:$0xff]  ;;  %373 = vst [vmem:[%s8577_s25 + $0x6f0] sm:$0xff] %v372_v47 }
  0x82   : >> { %v376_v49 = vld [vmem:[%s8581_s26 + $0x3880] sm:$0xff]  ;;  %375 = vst [vmem:[%s8577_s25 + $0x700] sm:$0xff] %v374_v48 }
  0x83   : >> { %v378_v50 = vld [vmem:[%s8581_s26 + $0x3900] sm:$0xff]  ;;  %377 = vst [vmem:[%s8577_s25 + $0x710] sm:$0xff] %v376_v49 }
  0x84   : >> { %v380_v51 = vld [vmem:[%s8581_s26 + $0x3980] sm:$0xff]  ;;  %379 = vst [vmem:[%s8577_s25 + $0x720] sm:$0xff] %v378_v50 }
  0x85   : >> { %v382_v52 = vld [vmem:[%s8581_s26 + $0x3a00] sm:$0xff]  ;;  %381 = vst [vmem:[%s8577_s25 + $0x730] sm:$0xff] %v380_v51 }
  0x86   : >> { %v384_v53 = vld [vmem:[%s8581_s26 + $0x3a80] sm:$0xff]  ;;  %383 = vst [vmem:[%s8577_s25 + $0x740] sm:$0xff] %v382_v52 }
  0x87   : >> { %v386_v54 = vld [vmem:[%s8581_s26 + $0x3b00] sm:$0xff]  ;;  %385 = vst [vmem:[%s8577_s25 + $0x750] sm:$0xff] %v384_v53 }
  0x88   : >> { %v388_v55 = vld [vmem:[%s8581_s26 + $0x3b80] sm:$0xff]  ;;  %387 = vst [vmem:[%s8577_s25 + $0x760] sm:$0xff] %v386_v54 }
  0x89   : >> { %v390_v56 = vld [vmem:[%s8581_s26 + $0x3c00] sm:$0xff]  ;;  %389 = vst [vmem:[%s8577_s25 + $0x770] sm:$0xff] %v388_v55 }
  0x8a   : >> { %v392_v57 = vld [vmem:[%s8581_s26 + $0x3c80] sm:$0xff]  ;;  %391 = vst [vmem:[%s8577_s25 + $0x780] sm:$0xff] %v390_v56 }
  0x8b   : >> { %v394_v58 = vld [vmem:[%s8581_s26 + $0x3d00] sm:$0xff]  ;;  %393 = vst [vmem:[%s8577_s25 + $0x790] sm:$0xff] %v392_v57 }
  0x8c   : >> { %v396_v59 = vld [vmem:[%s8581_s26 + $0x3d80] sm:$0xff]  ;;  %395 = vst [vmem:[%s8577_s25 + $0x7a0] sm:$0xff] %v394_v58 }
  0x8d   : >> { %v398_v60 = vld [vmem:[%s8581_s26 + $0x3e00] sm:$0xff]  ;;  %397 = vst [vmem:[%s8577_s25 + $0x7b0] sm:$0xff] %v396_v59 }
  0x8e   : >> { %v400_v61 = vld [vmem:[%s8581_s26 + $0x3e80] sm:$0xff]  ;;  %399 = vst [vmem:[%s8577_s25 + $0x7c0] sm:$0xff] %v398_v60 }
  0x8f   : >> { %v402_v62 = vld [vmem:[%s8581_s26 + $0x3f00] sm:$0xff]  ;;  %401 = vst [vmem:[%s8577_s25 + $0x7d0] sm:$0xff] %v400_v61 }
  0x90   : >> { %v404_v63 = vld [vmem:[%s8581_s26 + $0x3f80] sm:$0xff]  ;;  %403 = vst [vmem:[%s8577_s25 + $0x7e0] sm:$0xff] %v402_v62 }
  0x91   : >> { %v406_v0 = vld [vmem:[%s8581_s26 + $0x4000] sm:$0xff]  ;;  %405 = vst [vmem:[%s8577_s25 + $0x7f0] sm:$0xff] %v404_v63 }
  0x92   : >> { %v408_v1 = vld [vmem:[%s8581_s26 + $0x4080] sm:$0xff]  ;;  %407 = vst [vmem:[%s8577_s25 + $0x800] sm:$0xff] %v406_v0 }
  0x93   : >> { %v410_v2 = vld [vmem:[%s8581_s26 + $0x4100] sm:$0xff]  ;;  %409 = vst [vmem:[%s8577_s25 + $0x810] sm:$0xff] %v408_v1 }
  0x94   : >> { %v412_v3 = vld [vmem:[%s8581_s26 + $0x4180] sm:$0xff]  ;;  %411 = vst [vmem:[%s8577_s25 + $0x820] sm:$0xff] %v410_v2 }
  0x95   : >> { %v414_v4 = vld [vmem:[%s8581_s26 + $0x4200] sm:$0xff]  ;;  %413 = vst [vmem:[%s8577_s25 + $0x830] sm:$0xff] %v412_v3 }
  0x96   : >> { %v416_v5 = vld [vmem:[%s8581_s26 + $0x4280] sm:$0xff]  ;;  %415 = vst [vmem:[%s8577_s25 + $0x840] sm:$0xff] %v414_v4 }
  0x97   : >> { %v418_v6 = vld [vmem:[%s8581_s26 + $0x4300] sm:$0xff]  ;;  %417 = vst [vmem:[%s8577_s25 + $0x850] sm:$0xff] %v416_v5 }
  0x98   : >> { %v420_v7 = vld [vmem:[%s8581_s26 + $0x4380] sm:$0xff]  ;;  %419 = vst [vmem:[%s8577_s25 + $0x860] sm:$0xff] %v418_v6 }
  0x99   : >> { %v422_v8 = vld [vmem:[%s8581_s26 + $0x4400] sm:$0xff]  ;;  %421 = vst [vmem:[%s8577_s25 + $0x870] sm:$0xff] %v420_v7 }
  0x9a   : >> { %v424_v9 = vld [vmem:[%s8581_s26 + $0x4480] sm:$0xff]  ;;  %423 = vst [vmem:[%s8577_s25 + $0x880] sm:$0xff] %v422_v8 }
  0x9b   : >> { %v426_v10 = vld [vmem:[%s8581_s26 + $0x4500] sm:$0xff]  ;;  %425 = vst [vmem:[%s8577_s25 + $0x890] sm:$0xff] %v424_v9 }
  0x9c   : >> { %v428_v11 = vld [vmem:[%s8581_s26 + $0x4580] sm:$0xff]  ;;  %427 = vst [vmem:[%s8577_s25 + $0x8a0] sm:$0xff] %v426_v10 }
  0x9d   : >> { %v430_v12 = vld [vmem:[%s8581_s26 + $0x4600] sm:$0xff]  ;;  %429 = vst [vmem:[%s8577_s25 + $0x8b0] sm:$0xff] %v428_v11 }
  0x9e   : >> { %v432_v13 = vld [vmem:[%s8581_s26 + $0x4680] sm:$0xff]  ;;  %431 = vst [vmem:[%s8577_s25 + $0x8c0] sm:$0xff] %v430_v12 }
  0x9f   : >> { %v434_v14 = vld [vmem:[%s8581_s26 + $0x4700] sm:$0xff]  ;;  %433 = vst [vmem:[%s8577_s25 + $0x8d0] sm:$0xff] %v432_v13 }
  0xa0   : >> { %v436_v15 = vld [vmem:[%s8581_s26 + $0x4780] sm:$0xff]  ;;  %435 = vst [vmem:[%s8577_s25 + $0x8e0] sm:$0xff] %v434_v14 }
  0xa1   : >> { %v438_v16 = vld [vmem:[%s8581_s26 + $0x4800] sm:$0xff]  ;;  %437 = vst [vmem:[%s8577_s25 + $0x8f0] sm:$0xff] %v436_v15 }
  0xa2   : >> { %v440_v17 = vld [vmem:[%s8581_s26 + $0x4880] sm:$0xff]  ;;  %439 = vst [vmem:[%s8577_s25 + $0x900] sm:$0xff] %v438_v16 }
  0xa3   : >> { %v442_v18 = vld [vmem:[%s8581_s26 + $0x4900] sm:$0xff]  ;;  %441 = vst [vmem:[%s8577_s25 + $0x910] sm:$0xff] %v440_v17 }
  0xa4   : >> { %v444_v19 = vld [vmem:[%s8581_s26 + $0x4980] sm:$0xff]  ;;  %443 = vst [vmem:[%s8577_s25 + $0x920] sm:$0xff] %v442_v18 }
  0xa5   : >> { %v446_v20 = vld [vmem:[%s8581_s26 + $0x4a00] sm:$0xff]  ;;  %445 = vst [vmem:[%s8577_s25 + $0x930] sm:$0xff] %v444_v19 }
  0xa6   : >> { %v448_v21 = vld [vmem:[%s8581_s26 + $0x4a80] sm:$0xff]  ;;  %447 = vst [vmem:[%s8577_s25 + $0x940] sm:$0xff] %v446_v20 }
  0xa7   : >> { %v450_v22 = vld [vmem:[%s8581_s26 + $0x4b00] sm:$0xff]  ;;  %449 = vst [vmem:[%s8577_s25 + $0x950] sm:$0xff] %v448_v21 }
  0xa8   : >> { %v452_v23 = vld [vmem:[%s8581_s26 + $0x4b80] sm:$0xff]  ;;  %451 = vst [vmem:[%s8577_s25 + $0x960] sm:$0xff] %v450_v22 }
  0xa9   : >> { %v454_v24 = vld [vmem:[%s8581_s26 + $0x4c00] sm:$0xff]  ;;  %453 = vst [vmem:[%s8577_s25 + $0x970] sm:$0xff] %v452_v23 }
  0xaa   : >> { %v456_v25 = vld [vmem:[%s8581_s26 + $0x4c80] sm:$0xff]  ;;  %455 = vst [vmem:[%s8577_s25 + $0x980] sm:$0xff] %v454_v24 }
  0xab   : >> { %v458_v26 = vld [vmem:[%s8581_s26 + $0x4d00] sm:$0xff]  ;;  %457 = vst [vmem:[%s8577_s25 + $0x990] sm:$0xff] %v456_v25 }
  0xac   : >> { %v460_v27 = vld [vmem:[%s8581_s26 + $0x4d80] sm:$0xff]  ;;  %459 = vst [vmem:[%s8577_s25 + $0x9a0] sm:$0xff] %v458_v26 }
  0xad   : >> { %v462_v28 = vld [vmem:[%s8581_s26 + $0x4e00] sm:$0xff]  ;;  %461 = vst [vmem:[%s8577_s25 + $0x9b0] sm:$0xff] %v460_v27 }
  0xae   : >> { %v464_v29 = vld [vmem:[%s8581_s26 + $0x4e80] sm:$0xff]  ;;  %463 = vst [vmem:[%s8577_s25 + $0x9c0] sm:$0xff] %v462_v28 }
  0xaf   : >> { %v466_v30 = vld [vmem:[%s8581_s26 + $0x4f00] sm:$0xff]  ;;  %465 = vst [vmem:[%s8577_s25 + $0x9d0] sm:$0xff] %v464_v29 }
  0xb0   : >> { %v468_v31 = vld [vmem:[%s8581_s26 + $0x4f80] sm:$0xff]  ;;  %467 = vst [vmem:[%s8577_s25 + $0x9e0] sm:$0xff] %v466_v30 }
  0xb1   : >> { %v470_v32 = vld [vmem:[%s8581_s26 + $0x5000] sm:$0xff]  ;;  %469 = vst [vmem:[%s8577_s25 + $0x9f0] sm:$0xff] %v468_v31 }
  0xb2   : >> { %v472_v33 = vld [vmem:[%s8581_s26 + $0x5080] sm:$0xff]  ;;  %471 = vst [vmem:[%s8577_s25 + $0xa00] sm:$0xff] %v470_v32 }
  0xb3   : >> { %v474_v34 = vld [vmem:[%s8581_s26 + $0x5100] sm:$0xff]  ;;  %473 = vst [vmem:[%s8577_s25 + $0xa10] sm:$0xff] %v472_v33 }
  0xb4   : >> { %v476_v35 = vld [vmem:[%s8581_s26 + $0x5180] sm:$0xff]  ;;  %475 = vst [vmem:[%s8577_s25 + $0xa20] sm:$0xff] %v474_v34 }
  0xb5   : >> { %v478_v36 = vld [vmem:[%s8581_s26 + $0x5200] sm:$0xff]  ;;  %477 = vst [vmem:[%s8577_s25 + $0xa30] sm:$0xff] %v476_v35 }
  0xb6   : >> { %v480_v37 = vld [vmem:[%s8581_s26 + $0x5280] sm:$0xff]  ;;  %479 = vst [vmem:[%s8577_s25 + $0xa40] sm:$0xff] %v478_v36 }
  0xb7   : >> { %v482_v38 = vld [vmem:[%s8581_s26 + $0x5300] sm:$0xff]  ;;  %481 = vst [vmem:[%s8577_s25 + $0xa50] sm:$0xff] %v480_v37 }
  0xb8   : >> { %v484_v39 = vld [vmem:[%s8581_s26 + $0x5380] sm:$0xff]  ;;  %483 = vst [vmem:[%s8577_s25 + $0xa60] sm:$0xff] %v482_v38 }
  0xb9   : >> { %v486_v40 = vld [vmem:[%s8581_s26 + $0x5400] sm:$0xff]  ;;  %485 = vst [vmem:[%s8577_s25 + $0xa70] sm:$0xff] %v484_v39 }
  0xba   : >> { %v488_v41 = vld [vmem:[%s8581_s26 + $0x5480] sm:$0xff]  ;;  %487 = vst [vmem:[%s8577_s25 + $0xa80] sm:$0xff] %v486_v40 }
  0xbb   : >> { %v490_v42 = vld [vmem:[%s8581_s26 + $0x5500] sm:$0xff]  ;;  %489 = vst [vmem:[%s8577_s25 + $0xa90] sm:$0xff] %v488_v41 }
  0xbc   : >> { %v492_v43 = vld [vmem:[%s8581_s26 + $0x5580] sm:$0xff]  ;;  %491 = vst [vmem:[%s8577_s25 + $0xaa0] sm:$0xff] %v490_v42 }
  0xbd   : >> { %v494_v44 = vld [vmem:[%s8581_s26 + $0x5600] sm:$0xff]  ;;  %493 = vst [vmem:[%s8577_s25 + $0xab0] sm:$0xff] %v492_v43 }
  0xbe   : >> { %v496_v45 = vld [vmem:[%s8581_s26 + $0x5680] sm:$0xff]  ;;  %495 = vst [vmem:[%s8577_s25 + $0xac0] sm:$0xff] %v494_v44 }
  0xbf   : >> { %v498_v46 = vld [vmem:[%s8581_s26 + $0x5700] sm:$0xff]  ;;  %497 = vst [vmem:[%s8577_s25 + $0xad0] sm:$0xff] %v496_v45 }
  0xc0   : >> { %v500_v47 = vld [vmem:[%s8581_s26 + $0x5780] sm:$0xff]  ;;  %499 = vst [vmem:[%s8577_s25 + $0xae0] sm:$0xff] %v498_v46 }
  0xc1   : >> { %v502_v48 = vld [vmem:[%s8581_s26 + $0x5800] sm:$0xff]  ;;  %501 = vst [vmem:[%s8577_s25 + $0xaf0] sm:$0xff] %v500_v47 }
  0xc2   : >> { %v504_v49 = vld [vmem:[%s8581_s26 + $0x5880] sm:$0xff]  ;;  %503 = vst [vmem:[%s8577_s25 + $0xb00] sm:$0xff] %v502_v48 }
  0xc3   : >> { %v506_v50 = vld [vmem:[%s8581_s26 + $0x5900] sm:$0xff]  ;;  %505 = vst [vmem:[%s8577_s25 + $0xb10] sm:$0xff] %v504_v49 }
  0xc4   : >> { %v508_v51 = vld [vmem:[%s8581_s26 + $0x5980] sm:$0xff]  ;;  %507 = vst [vmem:[%s8577_s25 + $0xb20] sm:$0xff] %v506_v50 }
  0xc5   : >> { %v510_v52 = vld [vmem:[%s8581_s26 + $0x5a00] sm:$0xff]  ;;  %509 = vst [vmem:[%s8577_s25 + $0xb30] sm:$0xff] %v508_v51 }
  0xc6   : >> { %v512_v53 = vld [vmem:[%s8581_s26 + $0x5a80] sm:$0xff]  ;;  %511 = vst [vmem:[%s8577_s25 + $0xb40] sm:$0xff] %v510_v52 }
  0xc7   : >> { %v514_v54 = vld [vmem:[%s8581_s26 + $0x5b00] sm:$0xff]  ;;  %513 = vst [vmem:[%s8577_s25 + $0xb50] sm:$0xff] %v512_v53 }
  0xc8   : >> { %v516_v55 = vld [vmem:[%s8581_s26 + $0x5b80] sm:$0xff]  ;;  %515 = vst [vmem:[%s8577_s25 + $0xb60] sm:$0xff] %v514_v54 }
  0xc9   : >> { %v518_v56 = vld [vmem:[%s8581_s26 + $0x5c00] sm:$0xff]  ;;  %517 = vst [vmem:[%s8577_s25 + $0xb70] sm:$0xff] %v516_v55 }
  0xca   : >> { %v520_v57 = vld [vmem:[%s8581_s26 + $0x5c80] sm:$0xff]  ;;  %519 = vst [vmem:[%s8577_s25 + $0xb80] sm:$0xff] %v518_v56 }
  0xcb   : >> { %v522_v58 = vld [vmem:[%s8581_s26 + $0x5d00] sm:$0xff]  ;;  %521 = vst [vmem:[%s8577_s25 + $0xb90] sm:$0xff] %v520_v57 }
  0xcc   : >> { %v524_v59 = vld [vmem:[%s8581_s26 + $0x5d80] sm:$0xff]  ;;  %523 = vst [vmem:[%s8577_s25 + $0xba0] sm:$0xff] %v522_v58 }
  0xcd   : >> { %v526_v60 = vld [vmem:[%s8581_s26 + $0x5e00] sm:$0xff]  ;;  %525 = vst [vmem:[%s8577_s25 + $0xbb0] sm:$0xff] %v524_v59 }
  0xce   : >> { %v528_v61 = vld [vmem:[%s8581_s26 + $0x5e80] sm:$0xff]  ;;  %527 = vst [vmem:[%s8577_s25 + $0xbc0] sm:$0xff] %v526_v60 }
  0xcf   : >> { %v530_v62 = vld [vmem:[%s8581_s26 + $0x5f00] sm:$0xff]  ;;  %529 = vst [vmem:[%s8577_s25 + $0xbd0] sm:$0xff] %v528_v61 }
  0xd0   : >> { %v532_v63 = vld [vmem:[%s8581_s26 + $0x5f80] sm:$0xff]  ;;  %531 = vst [vmem:[%s8577_s25 + $0xbe0] sm:$0xff] %v530_v62 }
  0xd1   : >> { %v534_v0 = vld [vmem:[%s8581_s26 + $0x6000] sm:$0xff]  ;;  %533 = vst [vmem:[%s8577_s25 + $0xbf0] sm:$0xff] %v532_v63 }
  0xd2   : >> { %v536_v1 = vld [vmem:[%s8581_s26 + $0x6080] sm:$0xff]  ;;  %535 = vst [vmem:[%s8577_s25 + $0xc00] sm:$0xff] %v534_v0 }
  0xd3   : >> { %v538_v2 = vld [vmem:[%s8581_s26 + $0x6100] sm:$0xff]  ;;  %537 = vst [vmem:[%s8577_s25 + $0xc10] sm:$0xff] %v536_v1 }
  0xd4   : >> { %v540_v3 = vld [vmem:[%s8581_s26 + $0x6180] sm:$0xff]  ;;  %539 = vst [vmem:[%s8577_s25 + $0xc20] sm:$0xff] %v538_v2 }
  0xd5   : >> { %v542_v4 = vld [vmem:[%s8581_s26 + $0x6200] sm:$0xff]  ;;  %541 = vst [vmem:[%s8577_s25 + $0xc30] sm:$0xff] %v540_v3 }
  0xd6   : >> { %v544_v5 = vld [vmem:[%s8581_s26 + $0x6280] sm:$0xff]  ;;  %543 = vst [vmem:[%s8577_s25 + $0xc40] sm:$0xff] %v542_v4 }
  0xd7   : >> { %v546_v6 = vld [vmem:[%s8581_s26 + $0x6300] sm:$0xff]  ;;  %545 = vst [vmem:[%s8577_s25 + $0xc50] sm:$0xff] %v544_v5 }
  0xd8   : >> { %v548_v7 = vld [vmem:[%s8581_s26 + $0x6380] sm:$0xff]  ;;  %547 = vst [vmem:[%s8577_s25 + $0xc60] sm:$0xff] %v546_v6 }
  0xd9   : >> { %v550_v8 = vld [vmem:[%s8581_s26 + $0x6400] sm:$0xff]  ;;  %549 = vst [vmem:[%s8577_s25 + $0xc70] sm:$0xff] %v548_v7 }
  0xda   : >> { %v552_v9 = vld [vmem:[%s8581_s26 + $0x6480] sm:$0xff]  ;;  %551 = vst [vmem:[%s8577_s25 + $0xc80] sm:$0xff] %v550_v8 }
  0xdb   : >> { %v554_v10 = vld [vmem:[%s8581_s26 + $0x6500] sm:$0xff]  ;;  %553 = vst [vmem:[%s8577_s25 + $0xc90] sm:$0xff] %v552_v9 }
  0xdc   : >> { %v556_v11 = vld [vmem:[%s8581_s26 + $0x6580] sm:$0xff]  ;;  %555 = vst [vmem:[%s8577_s25 + $0xca0] sm:$0xff] %v554_v10 }
  0xdd   : >> { %v558_v12 = vld [vmem:[%s8581_s26 + $0x6600] sm:$0xff]  ;;  %557 = vst [vmem:[%s8577_s25 + $0xcb0] sm:$0xff] %v556_v11 }
  0xde   : >> { %v560_v13 = vld [vmem:[%s8581_s26 + $0x6680] sm:$0xff]  ;;  %559 = vst [vmem:[%s8577_s25 + $0xcc0] sm:$0xff] %v558_v12 }
  0xdf   : >> { %v562_v14 = vld [vmem:[%s8581_s26 + $0x6700] sm:$0xff]  ;;  %561 = vst [vmem:[%s8577_s25 + $0xcd0] sm:$0xff] %v560_v13 }
  0xe0   : >> { %v564_v15 = vld [vmem:[%s8581_s26 + $0x6780] sm:$0xff]  ;;  %563 = vst [vmem:[%s8577_s25 + $0xce0] sm:$0xff] %v562_v14 }
  0xe1   : >> { %v566_v16 = vld [vmem:[%s8581_s26 + $0x6800] sm:$0xff]  ;;  %565 = vst [vmem:[%s8577_s25 + $0xcf0] sm:$0xff] %v564_v15 }
  0xe2   : >> { %v568_v17 = vld [vmem:[%s8581_s26 + $0x6880] sm:$0xff]  ;;  %567 = vst [vmem:[%s8577_s25 + $0xd00] sm:$0xff] %v566_v16 }
  0xe3   : >> { %v570_v18 = vld [vmem:[%s8581_s26 + $0x6900] sm:$0xff]  ;;  %569 = vst [vmem:[%s8577_s25 + $0xd10] sm:$0xff] %v568_v17 }
  0xe4   : >> { %v572_v19 = vld [vmem:[%s8581_s26 + $0x6980] sm:$0xff]  ;;  %571 = vst [vmem:[%s8577_s25 + $0xd20] sm:$0xff] %v570_v18 }
  0xe5   : >> { %v574_v20 = vld [vmem:[%s8581_s26 + $0x6a00] sm:$0xff]  ;;  %573 = vst [vmem:[%s8577_s25 + $0xd30] sm:$0xff] %v572_v19 }
  0xe6   : >> { %v576_v21 = vld [vmem:[%s8581_s26 + $0x6a80] sm:$0xff]  ;;  %575 = vst [vmem:[%s8577_s25 + $0xd40] sm:$0xff] %v574_v20 }
  0xe7   : >> { %v578_v22 = vld [vmem:[%s8581_s26 + $0x6b00] sm:$0xff]  ;;  %577 = vst [vmem:[%s8577_s25 + $0xd50] sm:$0xff] %v576_v21 }
  0xe8   : >> { %v580_v23 = vld [vmem:[%s8581_s26 + $0x6b80] sm:$0xff]  ;;  %579 = vst [vmem:[%s8577_s25 + $0xd60] sm:$0xff] %v578_v22 }
  0xe9   : >> { %v582_v24 = vld [vmem:[%s8581_s26 + $0x6c00] sm:$0xff]  ;;  %581 = vst [vmem:[%s8577_s25 + $0xd70] sm:$0xff] %v580_v23 }
  0xea   : >> { %v584_v25 = vld [vmem:[%s8581_s26 + $0x6c80] sm:$0xff]  ;;  %583 = vst [vmem:[%s8577_s25 + $0xd80] sm:$0xff] %v582_v24 }
  0xeb   : >> { %v586_v26 = vld [vmem:[%s8581_s26 + $0x6d00] sm:$0xff]  ;;  %585 = vst [vmem:[%s8577_s25 + $0xd90] sm:$0xff] %v584_v25 }
  0xec   : >> { %v588_v27 = vld [vmem:[%s8581_s26 + $0x6d80] sm:$0xff]  ;;  %587 = vst [vmem:[%s8577_s25 + $0xda0] sm:$0xff] %v586_v26 }
  0xed   : >> { %v590_v28 = vld [vmem:[%s8581_s26 + $0x6e00] sm:$0xff]  ;;  %589 = vst [vmem:[%s8577_s25 + $0xdb0] sm:$0xff] %v588_v27 }
  0xee   : >> { %v592_v29 = vld [vmem:[%s8581_s26 + $0x6e80] sm:$0xff]  ;;  %591 = vst [vmem:[%s8577_s25 + $0xdc0] sm:$0xff] %v590_v28 }
  0xef   : >> { %v594_v30 = vld [vmem:[%s8581_s26 + $0x6f00] sm:$0xff]  ;;  %593 = vst [vmem:[%s8577_s25 + $0xdd0] sm:$0xff] %v592_v29 }
  0xf0   : >> { %v596_v31 = vld [vmem:[%s8581_s26 + $0x6f80] sm:$0xff]  ;;  %595 = vst [vmem:[%s8577_s25 + $0xde0] sm:$0xff] %v594_v30 }
  0xf1   : >> { %v598_v32 = vld [vmem:[%s8581_s26 + $0x7000] sm:$0xff]  ;;  %597 = vst [vmem:[%s8577_s25 + $0xdf0] sm:$0xff] %v596_v31 }
  0xf2   : >> { %v600_v33 = vld [vmem:[%s8581_s26 + $0x7080] sm:$0xff]  ;;  %599 = vst [vmem:[%s8577_s25 + $0xe00] sm:$0xff] %v598_v32 }
  0xf3   : >> { %v602_v34 = vld [vmem:[%s8581_s26 + $0x7100] sm:$0xff]  ;;  %601 = vst [vmem:[%s8577_s25 + $0xe10] sm:$0xff] %v600_v33 }
  0xf4   : >> { %v604_v35 = vld [vmem:[%s8581_s26 + $0x7180] sm:$0xff]  ;;  %603 = vst [vmem:[%s8577_s25 + $0xe20] sm:$0xff] %v602_v34 }
  0xf5   : >> { %v606_v36 = vld [vmem:[%s8581_s26 + $0x7200] sm:$0xff]  ;;  %605 = vst [vmem:[%s8577_s25 + $0xe30] sm:$0xff] %v604_v35 }
  0xf6   : >> { %v608_v37 = vld [vmem:[%s8581_s26 + $0x7280] sm:$0xff]  ;;  %607 = vst [vmem:[%s8577_s25 + $0xe40] sm:$0xff] %v606_v36 }
  0xf7   : >> { %v610_v38 = vld [vmem:[%s8581_s26 + $0x7300] sm:$0xff]  ;;  %609 = vst [vmem:[%s8577_s25 + $0xe50] sm:$0xff] %v608_v37 }
  0xf8   : >> { %v612_v39 = vld [vmem:[%s8581_s26 + $0x7380] sm:$0xff]  ;;  %611 = vst [vmem:[%s8577_s25 + $0xe60] sm:$0xff] %v610_v38 }
  0xf9   : >> { %v614_v40 = vld [vmem:[%s8581_s26 + $0x7400] sm:$0xff]  ;;  %613 = vst [vmem:[%s8577_s25 + $0xe70] sm:$0xff] %v612_v39 }
  0xfa   : >> { %v616_v41 = vld [vmem:[%s8581_s26 + $0x7480] sm:$0xff]  ;;  %615 = vst [vmem:[%s8577_s25 + $0xe80] sm:$0xff] %v614_v40 }
  0xfb   : >> { %v618_v42 = vld [vmem:[%s8581_s26 + $0x7500] sm:$0xff]  ;;  %617 = vst [vmem:[%s8577_s25 + $0xe90] sm:$0xff] %v616_v41 }
  0xfc   : >> { %v620_v43 = vld [vmem:[%s8581_s26 + $0x7580] sm:$0xff]  ;;  %619 = vst [vmem:[%s8577_s25 + $0xea0] sm:$0xff] %v618_v42 }
  0xfd   : >> { %v622_v44 = vld [vmem:[%s8581_s26 + $0x7600] sm:$0xff]  ;;  %621 = vst [vmem:[%s8577_s25 + $0xeb0] sm:$0xff] %v620_v43 }
  0xfe   : >> { %v624_v45 = vld [vmem:[%s8581_s26 + $0x7680] sm:$0xff]  ;;  %623 = vst [vmem:[%s8577_s25 + $0xec0] sm:$0xff] %v622_v44 }
  0xff   : >> { %v626_v46 = vld [vmem:[%s8581_s26 + $0x7700] sm:$0xff]  ;;  %625 = vst [vmem:[%s8577_s25 + $0xed0] sm:$0xff] %v624_v45 }
 0x100   : >> { %v628_v47 = vld [vmem:[%s8581_s26 + $0x7780] sm:$0xff]  ;;  %627 = vst [vmem:[%s8577_s25 + $0xee0] sm:$0xff] %v626_v46 }
 0x101   : >> { %v630_v48 = vld [vmem:[%s8581_s26 + $0x7800] sm:$0xff]  ;;  %629 = vst [vmem:[%s8577_s25 + $0xef0] sm:$0xff] %v628_v47 }
 0x102   : >> { %v632_v49 = vld [vmem:[%s8581_s26 + $0x7880] sm:$0xff]  ;;  %631 = vst [vmem:[%s8577_s25 + $0xf00] sm:$0xff] %v630_v48 }
 0x103   : >> { %v634_v50 = vld [vmem:[%s8581_s26 + $0x7900] sm:$0xff]  ;;  %633 = vst [vmem:[%s8577_s25 + $0xf10] sm:$0xff] %v632_v49 }
 0x104   : >> { %v636_v51 = vld [vmem:[%s8581_s26 + $0x7980] sm:$0xff]  ;;  %635 = vst [vmem:[%s8577_s25 + $0xf20] sm:$0xff] %v634_v50 }
 0x105   : >> { %v638_v52 = vld [vmem:[%s8581_s26 + $0x7a00] sm:$0xff]  ;;  %637 = vst [vmem:[%s8577_s25 + $0xf30] sm:$0xff] %v636_v51 }
 0x106   : >> { %v640_v53 = vld [vmem:[%s8581_s26 + $0x7a80] sm:$0xff]  ;;  %639 = vst [vmem:[%s8577_s25 + $0xf40] sm:$0xff] %v638_v52 }
 0x107   : >> { %v642_v54 = vld [vmem:[%s8581_s26 + $0x7b00] sm:$0xff]  ;;  %641 = vst [vmem:[%s8577_s25 + $0xf50] sm:$0xff] %v640_v53 }
 0x108   : >> { %v644_v55 = vld [vmem:[%s8581_s26 + $0x7b80] sm:$0xff]  ;;  %643 = vst [vmem:[%s8577_s25 + $0xf60] sm:$0xff] %v642_v54 }
 0x109   : >> { %v646_v56 = vld [vmem:[%s8581_s26 + $0x7c00] sm:$0xff]  ;;  %645 = vst [vmem:[%s8577_s25 + $0xf70] sm:$0xff] %v644_v55 }
 0x10a   : >> { %v648_v57 = vld [vmem:[%s8581_s26 + $0x7c80] sm:$0xff]  ;;  %647 = vst [vmem:[%s8577_s25 + $0xf80] sm:$0xff] %v646_v56 }
 0x10b   : >> { %v650_v58 = vld [vmem:[%s8581_s26 + $0x7d00] sm:$0xff]  ;;  %649 = vst [vmem:[%s8577_s25 + $0xf90] sm:$0xff] %v648_v57 }
 0x10c   : >> { %v652_v59 = vld [vmem:[%s8581_s26 + $0x7d80] sm:$0xff]  ;;  %651 = vst [vmem:[%s8577_s25 + $0xfa0] sm:$0xff] %v650_v58 }
 0x10d   : >> { %v654_v60 = vld [vmem:[%s8581_s26 + $0x7e00] sm:$0xff]  ;;  %653 = vst [vmem:[%s8577_s25 + $0xfb0] sm:$0xff] %v652_v59  ;;  %145 = sbr.rel (!%p143_p7) target bundleno = 17 (0x11), region = 105 }
 0x10e   : >> { %v656_v61 = vld [vmem:[%s8581_s26 + $0x7e80] sm:$0xff]  ;;  %655 = vst [vmem:[%s8577_s25 + $0xfc0] sm:$0xff] %v654_v60 }
 0x10f   : >> { %v658_v62 = vld [vmem:[%s8581_s26 + $0x7f00] sm:$0xff]  ;;  %657 = vst [vmem:[%s8577_s25 + $0xfd0] sm:$0xff] %v656_v61 }
 0x110   : >> { %v660_v63 = vld [vmem:[%s8581_s26 + $0x7f80] sm:$0xff]  ;;  %659 = vst [vmem:[%s8577_s25 + $0xfe0] sm:$0xff] %v658_v62  ;;  %s10448_s26 = smov %s8941_s3 }
 0x111   : >> { %661 = vst [vmem:[%s8577_s25 + $0xff0] sm:$0xff] %v660_v63  ;;  %s10447_s25 = smov %s8945_s4 }
 0x112 PF: > { %p5880_p8 = scmp.ge.s32.totalorder %s8573_s13, 1  ;;  %p1725_p9 = scmp.lt.s32.totalorder %s8573_s13, 9 }
 0x114   : > { %p1726_p10 = pnand %p5880_p8, %p1725_p9 }
 0x115   : > { %s1732_s5 = sand.u32 (!%p1726_p10), 1, %s8557_s9   ;;  %s5882_s30 = sshll.u32 (!%p1726_p10), %s8565_s11, 2 }
 0x116   : > { %1729 = sbr.rel (%p1726_p10) target bundleno = 942 (0x3ae), region = 61  ;;  %s5881_s6 = sshll.u32 (!%p1726_p10), %s1732_s5, 12 }
 0x117   : > { %s9215_s7 = scalar_lea.vmem (!%p1726_p10), [#allocation2], %s5881_s6  ;;  %p10162_p11 = scmp.lt.s32.totalorder (!%p1726_p10), %s5882_s30, 31 }
 0x11b   : > { %v5998_v0 = vld [vmem:[%s9215_s7 + $0xe0] sm:$0xf]  ;;  %v7965_v1 = vld [vmem:[%s9215_s7 + $0xec] sm:$0xf0]  ;;  %s10460_s30 = smov (!%p10162_p11, %s5882_s30), 31 }
 0x11c   : > { %v6126_v2 = vld [vmem:[%s9215_s7 + $0x1e0] sm:$0xf]  ;;  %v5999_v3 = vor.u32 %v7965_v1, %v5998_v0  ;;  %v7997_v4 = vld [vmem:[%s9215_s7 + $0x1ec] sm:$0xf0]  ;;  %s5883_s11 = sshll.u32 %s10460_s30, 2 }
 0x11d   : > { %v6254_v5 = vld [vmem:[%s9215_s7 + $0x2e0] sm:$0xf]  ;;  %v8029_v6 = vld [vmem:[%s9215_s7 + $0x2ec] sm:$0xf0]  ;;  %v6127_v7 = vor.u32 %v7997_v4, %v6126_v2  ;;  %s10195_s6 = scalar_lea.vmem %s10444_s2, %s5883_s11 }
 0x11e   : > { %v6255_v8 = vor.u32 %v8029_v6, %v6254_v5  ;;  %v6382_v9 = vld [vmem:[%s9215_s7 + $0x3e0] sm:$0xf]  ;;  %v8061_v10 = vld [vmem:[%s9215_s7 + $0x3ec] sm:$0xf0]  ;;  %4914 = vmatpush.bf16.msra.mxu0 %v5999_v3 }
 0x11f   : > { %v5982_v11 = vld [vmem:[%s9215_s7 + $0xc0] sm:$0xf]  ;;  %v6383_v12 = vor.u32 %v8061_v10, %v6382_v9  ;;  %v7961_v13 = vld [vmem:[%s9215_s7 + $0xcc] sm:$0xf0]  ;;  %4927 = vmatpush.bf16.msra.mxu1 %v6127_v7 }
 0x120   : > { %v6110_v14 = vld [vmem:[%s9215_s7 + $0x1c0] sm:$0xf]  ;;  %v7993_v15 = vld [vmem:[%s9215_s7 + $0x1cc] sm:$0xf0]  ;;  %4940 = vmatpush.bf16.msra.mxu2 %v6255_v8  ;;  %v5983_v16 = vor.u32 %v7961_v13, %v5982_v11 }
 0x121   : > { %v6111_v17 = vor.u32 %v7993_v15, %v6110_v14  ;;  %v6238_v18 = vld [vmem:[%s9215_s7 + $0x2c0] sm:$0xf]  ;;  %v8025_v19 = vld [vmem:[%s9215_s7 + $0x2cc] sm:$0xf0]  ;;  %4953 = vmatpush.bf16.msra.mxu3 %v6383_v12 }
 0x122   : > { %v6366_v20 = vld [vmem:[%s9215_s7 + $0x3c0] sm:$0xf]  ;;  %v6239_v21 = vor.u32 %v8025_v19, %v6238_v18  ;;  %v8057_v22 = vld [vmem:[%s9215_s7 + $0x3cc] sm:$0xf0]  ;;  %4915 = vmatpush.bf16.msra.mxu0 %v5983_v16 }
 0x123   : > { %v5966_v23 = vld [vmem:[%s9215_s7 + $0xa0] sm:$0xf]  ;;  %v7957_v24 = vld [vmem:[%s9215_s7 + $0xac] sm:$0xf0]  ;;  %v6367_v25 = vor.u32 %v8057_v22, %v6366_v20  ;;  %4928 = vmatpush.bf16.msra.mxu1 %v6111_v17 }
 0x124   : > { %v6094_v26 = vld [vmem:[%s9215_s7 + $0x1a0] sm:$0xf]  ;;  %v7989_v27 = vld [vmem:[%s9215_s7 + $0x1ac] sm:$0xf0]  ;;  %v5967_v29 = vor.u32 %v7957_v24, %v5966_v23  ;;  %4941 = vmatpush.bf16.msra.mxu2 %v6239_v21 }
 0x125   : > { %v6222_v28 = vld [vmem:[%s9215_s7 + $0x2a0] sm:$0xf]  ;;  %v8021_v30 = vld [vmem:[%s9215_s7 + $0x2ac] sm:$0xf0]  ;;  %v6095_v33 = vor.u32 %v7989_v27, %v6094_v26  ;;  %4954 = vmatpush.bf16.msra.mxu3 %v6367_v25 }
 0x126   : > { %v6350_v31 = vld [vmem:[%s9215_s7 + $0x3a0] sm:$0xf]  ;;  %v8053_v32 = vld [vmem:[%s9215_s7 + $0x3ac] sm:$0xf0]  ;;  %v6223_v34 = vor.u32 %v8021_v30, %v6222_v28  ;;  %4916 = vmatpush.bf16.msra.mxu0 %v5967_v29 }
 0x127   : > { %v5950_v35 = vld [vmem:[%s9215_s7 + $0x80] sm:$0xf]  ;;  %v7953_v36 = vld [vmem:[%s9215_s7 + $0x8c] sm:$0xf0]  ;;  %v6351_v38 = vor.u32 %v8053_v32, %v6350_v31  ;;  %4929 = vmatpush.bf16.msra.mxu1 %v6095_v33 }
 0x128   : > { %v6078_v37 = vld [vmem:[%s9215_s7 + $0x180] sm:$0xf]  ;;  %v7985_v39 = vld [vmem:[%s9215_s7 + $0x18c] sm:$0xf0]  ;;  %v5951_v44 = vor.u32 %v7953_v36, %v5950_v35  ;;  %4942 = vmatpush.bf16.msra.mxu2 %v6223_v34 }
 0x129   : > { %v6206_v40 = vld [vmem:[%s9215_s7 + $0x280] sm:$0xf]  ;;  %v8017_v41 = vld [vmem:[%s9215_s7 + $0x28c] sm:$0xf0]  ;;  %v6079_v45 = vor.u32 %v7985_v39, %v6078_v37  ;;  %4955 = vmatpush.bf16.msra.mxu3 %v6351_v38 }
 0x12a   : > { %v6334_v42 = vld [vmem:[%s9215_s7 + $0x380] sm:$0xf]  ;;  %v8049_v43 = vld [vmem:[%s9215_s7 + $0x38c] sm:$0xf0]  ;;  %v6207_v46 = vor.u32 %v8017_v41, %v6206_v40  ;;  %4917 = vmatpush.bf16.msra.mxu0 %v5951_v44 }
 0x12b   : > { %v5934_v47 = vld [vmem:[%s9215_s7 + $0x60] sm:$0xf]  ;;  %v7949_v48 = vld [vmem:[%s9215_s7 + $0x6c] sm:$0xf0]  ;;  %v6335_v50 = vor.u32 %v8049_v43, %v6334_v42  ;;  %4930 = vmatpush.bf16.msra.mxu1 %v6079_v45 }
 0x12c   : > { %v6062_v49 = vld [vmem:[%s9215_s7 + $0x160] sm:$0xf]  ;;  %v7981_v51 = vld [vmem:[%s9215_s7 + $0x16c] sm:$0xf0]  ;;  %v5935_v56 = vor.u32 %v7949_v48, %v5934_v47  ;;  %4943 = vmatpush.bf16.msra.mxu2 %v6207_v46 }
 0x12d   : > { %v6190_v52 = vld [vmem:[%s9215_s7 + $0x260] sm:$0xf]  ;;  %v8013_v53 = vld [vmem:[%s9215_s7 + $0x26c] sm:$0xf0]  ;;  %v6063_v57 = vor.u32 %v7981_v51, %v6062_v49  ;;  %4956 = vmatpush.bf16.msra.mxu3 %v6335_v50 }
 0x12e   : > { %v6318_v54 = vld [vmem:[%s9215_s7 + $0x360] sm:$0xf]  ;;  %v8045_v55 = vld [vmem:[%s9215_s7 + $0x36c] sm:$0xf0]  ;;  %v6191_v58 = vor.u32 %v8013_v53, %v6190_v52  ;;  %4918 = vmatpush.bf16.msra.mxu0 %v5935_v56 }
 0x12f   : > { %v5918_v59 = vld [vmem:[%s9215_s7 + $0x40] sm:$0xf]  ;;  %v7945_v60 = vld [vmem:[%s9215_s7 + $0x4c] sm:$0xf0]  ;;  %v6319_v62 = vor.u32 %v8045_v55, %v6318_v54  ;;  %4931 = vmatpush.bf16.msra.mxu1 %v6063_v57 }
 0x130   : > { %v6046_v61 = vld [vmem:[%s9215_s7 + $0x140] sm:$0xf]  ;;  %v7977_v63 = vld [vmem:[%s9215_s7 + $0x14c] sm:$0xf0]  ;;  %v5919_v4 = vor.u32 %v7945_v60, %v5918_v59  ;;  %4944 = vmatpush.bf16.msra.mxu2 %v6191_v58  ;;  %v1779_v58 = vld [vmem:[%s10442_s0 + $0x8] sm:$0xff] }
 0x131   : > { %v6174_v0 = vld [vmem:[%s9215_s7 + $0x240] sm:$0xf]  ;;  %v8009_v1 = vld [vmem:[%s9215_s7 + $0x24c] sm:$0xf0]  ;;  %v6047_v5 = vor.u32 %v7977_v63, %v6046_v61  ;;  %4957 = vmatpush.bf16.msra.mxu3 %v6319_v62  ;;  %v2308_v63 = vunpack.c.l.b16 %v1779_v58 }
 0x132   : > { %v6302_v2 = vld [vmem:[%s9215_s7 + $0x340] sm:$0xf]  ;;  %v8041_v3 = vld [vmem:[%s9215_s7 + $0x34c] sm:$0xf0]  ;;  %v6175_v6 = vor.u32 %v8009_v1, %v6174_v0  ;;  %4919 = vmatpush.bf16.msra.mxu0 %v5919_v4  ;;  %v2309_v0 = vunpack.c.h.b16 %v1779_v58 }
 0x133   : > { %v5902_v7 = vld [vmem:[%s9215_s7 + $0x20] sm:$0xf]  ;;  %v7941_v8 = vld [vmem:[%s9215_s7 + $0x2c] sm:$0xf0]  ;;  %v6303_v10 = vor.u32 %v8041_v3, %v6302_v2  ;;  %4932 = vmatpush.bf16.msra.mxu1 %v6047_v5  ;;  %v9308_v4 = vpack.c.b16 %v2308_v63, %v2308_v63 }
 0x134   : > { %v6030_v9 = vld [vmem:[%s9215_s7 + $0x120] sm:$0xf]  ;;  %v7973_v11 = vld [vmem:[%s9215_s7 + $0x12c] sm:$0xf0]  ;;  %v5903_v16 = vor.u32 %v7941_v8, %v5902_v7  ;;  %4945 = vmatpush.bf16.msra.mxu2 %v6175_v6  ;;  %v9313_v6 = vpack.c.b16 %v2309_v0, %v2309_v0 }
 0x135   : > { %v6158_v12 = vld [vmem:[%s9215_s7 + $0x220] sm:$0xf]  ;;  %v8005_v13 = vld [vmem:[%s9215_s7 + $0x22c] sm:$0xf0]  ;;  %v6031_v19 = vor.u32 %v7973_v11, %v6030_v9  ;;  %4958 = vmatpush.bf16.msra.mxu3 %v6303_v10 }
 0x136   : > { %v6286_v14 = vld [vmem:[%s9215_s7 + $0x320] sm:$0xf]  ;;  %v8037_v15 = vld [vmem:[%s9215_s7 + $0x32c] sm:$0xf0]  ;;  %v6159_v20 = vor.u32 %v8005_v13, %v6158_v12  ;;  %4920 = vmatpush.bf16.msra.mxu0 %v5903_v16 }
 0x137   : > { %v5886_v17 = vld [vmem:[%s9215_s7] sm:$0xf]  ;;  %v7937_v18 = vld [vmem:[%s9215_s7 + $0xc] sm:$0xf0]  ;;  %v6287_v24 = vor.u32 %v8037_v15, %v6286_v14  ;;  %4933 = vmatpush.bf16.msra.mxu1 %v6031_v19 }
 0x138   : > { %v6014_v21 = vld [vmem:[%s9215_s7 + $0x100] sm:$0xf]  ;;  %v7969_v22 = vld [vmem:[%s9215_s7 + $0x10c] sm:$0xf0]  ;;  %v5887_v31 = vor.u32 %v7937_v18, %v5886_v17  ;;  %4946 = vmatpush.bf16.msra.mxu2 %v6159_v20 }
 0x139   : > { %v6142_v23 = vld [vmem:[%s9215_s7 + $0x200] sm:$0xf]  ;;  %v8001_v25 = vld [vmem:[%s9215_s7 + $0x20c] sm:$0xf0]  ;;  %v6015_v35 = vor.u32 %v7969_v22, %v6014_v21  ;;  %4959 = vmatpush.bf16.msra.mxu3 %v6287_v24 }
 0x13a   : > { %v6270_v26 = vld [vmem:[%s9215_s7 + $0x300] sm:$0xf]  ;;  %v8033_v27 = vld [vmem:[%s9215_s7 + $0x30c] sm:$0xf0]  ;;  %v6143_v36 = vor.u32 %v8001_v25, %v6142_v23  ;;  %4921 = vmatpush.bf16.msra.mxu0 %v5887_v31 }
 0x13b   : > { %v6510_v28 = vld [vmem:[%s9215_s7 + $0x4e0] sm:$0xf]  ;;  %v8093_v29 = vld [vmem:[%s9215_s7 + $0x4ec] sm:$0xf0]  ;;  %v6271_v39 = vor.u32 %v8033_v27, %v6270_v26  ;;  %4934 = vmatpush.bf16.msra.mxu1 %v6015_v35 }
 0x13c   : > { %v6638_v30 = vld [vmem:[%s9215_s7 + $0x5e0] sm:$0xf]  ;;  %v8125_v32 = vld [vmem:[%s9215_s7 + $0x5ec] sm:$0xf0]  ;;  %v6511_v40 = vor.u32 %v8093_v29, %v6510_v28  ;;  %4947 = vmatpush.bf16.msra.mxu2 %v6143_v36 }
 0x13d   : > { %v6766_v33 = vld [vmem:[%s9215_s7 + $0x6e0] sm:$0xf]  ;;  %v8157_v34 = vld [vmem:[%s9215_s7 + $0x6ec] sm:$0xf0]  ;;  %v6639_v41 = vor.u32 %v8125_v32, %v6638_v30  ;;  %4960 = vmatpush.bf16.msra.mxu3 %v6271_v39 }
 0x13e   : > { %v6894_v37 = vld [vmem:[%s9215_s7 + $0x7e0] sm:$0xf]  ;;  %v8189_v38 = vld [vmem:[%s9215_s7 + $0x7ec] sm:$0xf0]  ;;  %v6767_v42 = vor.u32 %v8157_v34, %v6766_v33  ;;  %4966 = vmatpush.bf16.msrb.mxu0 %v6511_v40 }
 0x13f   : > { %v6494_v43 = vld [vmem:[%s9215_s7 + $0x4c0] sm:$0xf]  ;;  %v8089_v44 = vld [vmem:[%s9215_s7 + $0x4cc] sm:$0xf0]  ;;  %v6895_v46 = vor.u32 %v8189_v38, %v6894_v37  ;;  %4979 = vmatpush.bf16.msrb.mxu1 %v6639_v41  ;;  %4948 = vmatmul.bf16.vlgmr.msra.gmra.mxu2 %v9308_v4 }
 0x140   : > { %v6622_v45 = vld [vmem:[%s9215_s7 + $0x5c0] sm:$0xf]  ;;  %v8121_v47 = vld [vmem:[%s9215_s7 + $0x5cc] sm:$0xf0]  ;;  %v6495_v52 = vor.u32 %v8089_v44, %v6494_v43  ;;  %4992 = vmatpush.bf16.msrb.mxu2 %v6767_v42  ;;  %4961 = vmatmul.bf16.vlgmr.msra.gmra.mxu3 %v9313_v6 }
 0x141   : > { %v6750_v48 = vld [vmem:[%s9215_s7 + $0x6c0] sm:$0xf]  ;;  %v8153_v49 = vld [vmem:[%s9215_s7 + $0x6cc] sm:$0xf0]  ;;  %v6623_v54 = vor.u32 %v8121_v47, %v6622_v45  ;;  %5005 = vmatpush.bf16.msrb.mxu3 %v6895_v46 }
 0x142   : > { %v6878_v50 = vld [vmem:[%s9215_s7 + $0x7c0] sm:$0xf]  ;;  %v8185_v51 = vld [vmem:[%s9215_s7 + $0x7cc] sm:$0xf0]  ;;  %v6751_v55 = vor.u32 %v8153_v49, %v6750_v48  ;;  %4967 = vmatpush.bf16.msrb.mxu0 %v6495_v52 }
 0x143   : > { %v6478_v53 = vld [vmem:[%s9215_s7 + $0x4a0] sm:$0xf]  ;;  %v8085_v56 = vld [vmem:[%s9215_s7 + $0x4ac] sm:$0xf0]  ;;  %v6879_v59 = vor.u32 %v8185_v51, %v6878_v50  ;;  %4980 = vmatpush.bf16.msrb.mxu1 %v6623_v54 }
 0x144   : > { %v6606_v57 = vld [vmem:[%s9215_s7 + $0x5a0] sm:$0xf]  ;;  %v8117_v60 = vld [vmem:[%s9215_s7 + $0x5ac] sm:$0xf0]  ;;  %v6479_v3 = vor.u32 %v8085_v56, %v6478_v53  ;;  %4993 = vmatpush.bf16.msrb.mxu2 %v6751_v55 }
 0x145   : > { %v6734_v61 = vld [vmem:[%s9215_s7 + $0x6a0] sm:$0xf]  ;;  %v8149_v62 = vld [vmem:[%s9215_s7 + $0x6ac] sm:$0xf0]  ;;  %v6607_v7 = vor.u32 %v8117_v60, %v6606_v57  ;;  %5006 = vmatpush.bf16.msrb.mxu3 %v6879_v59 }
 0x146   : > { %v6862_v1 = vld [vmem:[%s9215_s7 + $0x7a0] sm:$0xf]  ;;  %v8181_v2 = vld [vmem:[%s9215_s7 + $0x7ac] sm:$0xf0]  ;;  %v6735_v8 = vor.u32 %v8149_v62, %v6734_v61  ;;  %4968 = vmatpush.bf16.msrb.mxu0 %v6479_v3  ;;  %v1781_v3 = vld [vmem:[%s10442_s0 + $0x18] sm:$0xff] }
 0x147   : > { %v1778_v5 = vld [vmem:[%s10442_s0] sm:$0xff]  ;;  %v8081_v10 = vld [vmem:[%s9215_s7 + $0x48c] sm:$0xf0]  ;;  %v6863_v14 = vor.u32 %v8181_v2, %v6862_v1  ;;  %4981 = vmatpush.bf16.msrb.mxu1 %v6607_v7 }
 0x148   : > { %v6462_v9 = vld [vmem:[%s9215_s7 + $0x480] sm:$0xf]  ;;  %v2306_v12 = vunpack.c.l.b16 %v1778_v5  ;;  %v2307_v13 = vunpack.c.h.b16 %v1778_v5  ;;  %v8113_v15 = vld [vmem:[%s9215_s7 + $0x58c] sm:$0xf0]  ;;  %4994 = vmatpush.bf16.msrb.mxu2 %v6735_v8 }
 0x149   : > { %v6590_v11 = vld [vmem:[%s9215_s7 + $0x580] sm:$0xf]  ;;  %v8145_v17 = vld [vmem:[%s9215_s7 + $0x68c] sm:$0xf0]  ;;  %v6463_v22 = vor.u32 %v8081_v10, %v6462_v9  ;;  %5007 = vmatpush.bf16.msrb.mxu3 %v6863_v14 }
 0x14a   : > { %v6718_v16 = vld [vmem:[%s9215_s7 + $0x680] sm:$0xf]  ;;  %v8177_v19 = vld [vmem:[%s9215_s7 + $0x78c] sm:$0xf0]  ;;  %v9324_v20 = vpack.c.b16 %v2306_v12, %v2306_v12  ;;  %v9327_v21 = vpack.c.b16 %v2307_v13, %v2307_v13  ;;  %v6591_v23 = vor.u32 %v8113_v15, %v6590_v11 }
 0x14b   : > { %v6846_v18 = vld [vmem:[%s9215_s7 + $0x780] sm:$0xf]  ;;  %v6719_v24 = vor.u32 %v8145_v17, %v6718_v16  ;;  %v8077_v26 = vld [vmem:[%s9215_s7 + $0x46c] sm:$0xf0]  ;;  %4969 = vmatpush.bf16.msrb.mxu0 %v6463_v22  ;;  %v2312_v17 = vunpack.c.l.b16 %v1781_v3 }
 0x14c   : > { %v6446_v25 = vld [vmem:[%s9215_s7 + $0x460] sm:$0xf]  ;;  %v6847_v28 = vor.u32 %v8177_v19, %v6846_v18  ;;  %v8109_v29 = vld [vmem:[%s9215_s7 + $0x56c] sm:$0xf0]  ;;  %4922 = vmatmul.bf16.vlgmr.msra.gmra.mxu0 %v9324_v20  ;;  %4935 = vmatmul.bf16.vlgmr.msra.gmra.mxu1 %v9327_v21 }
 0x14d   : > { %v6574_v27 = vld [vmem:[%s9215_s7 + $0x560] sm:$0xf]  ;;  %v8141_v31 = vld [vmem:[%s9215_s7 + $0x66c] sm:$0xf0]  ;;  %v6447_v34 = vor.u32 %v8077_v26, %v6446_v25  ;;  %4982 = vmatpush.bf16.msrb.mxu1 %v6591_v23  ;;  %4995 = vmatpush.bf16.msrb.mxu2 %v6719_v24  ;;  %v2313_v25 = vunpack.c.h.b16 %v1781_v3 }
 0x14e   : > { %v6702_v30 = vld [vmem:[%s9215_s7 + $0x660] sm:$0xf]  ;;  %v8173_v33 = vld [vmem:[%s9215_s7 + $0x76c] sm:$0xf0]  ;;  %v6575_v35 = vor.u32 %v8109_v29, %v6574_v27  ;;  %5008 = vmatpush.bf16.msrb.mxu3 %v6847_v28 }
 0x14f   : > { %v6830_v32 = vld [vmem:[%s9215_s7 + $0x760] sm:$0xf]  ;;  %v6703_v36 = vor.u32 %v8141_v31, %v6702_v30  ;;  %v8073_v38 = vld [vmem:[%s9215_s7 + $0x44c] sm:$0xf0]  ;;  %4970 = vmatpush.bf16.msrb.mxu0 %v6447_v34 }
 0x150   : > { %v6430_v37 = vld [vmem:[%s9215_s7 + $0x440] sm:$0xf]  ;;  %v6831_v40 = vor.u32 %v8173_v33, %v6830_v32  ;;  %v8105_v41 = vld [vmem:[%s9215_s7 + $0x54c] sm:$0xf0] }
 0x151   : > { %v6558_v39 = vld [vmem:[%s9215_s7 + $0x540] sm:$0xf]  ;;  %v8137_v43 = vld [vmem:[%s9215_s7 + $0x64c] sm:$0xf0]  ;;  %v6431_v46 = vor.u32 %v8073_v38, %v6430_v37  ;;  %4983 = vmatpush.bf16.msrb.mxu1 %v6575_v35  ;;  %4996 = vmatpush.bf16.msrb.mxu2 %v6703_v36  ;;  %v9383_v38 = vpack.c.b16 %v2312_v17, %v2312_v17 }
 0x152   : > { %v6686_v42 = vld [vmem:[%s9215_s7 + $0x640] sm:$0xf]  ;;  %v8169_v45 = vld [vmem:[%s9215_s7 + $0x74c] sm:$0xf0]  ;;  %v6559_v47 = vor.u32 %v8105_v41, %v6558_v39  ;;  %5009 = vmatpush.bf16.msrb.mxu3 %v6831_v40 }
 0x153   : > { %v6814_v44 = vld [vmem:[%s9215_s7 + $0x740] sm:$0xf]  ;;  %v6687_v48 = vor.u32 %v8137_v43, %v6686_v42  ;;  %v8069_v50 = vld [vmem:[%s9215_s7 + $0x42c] sm:$0xf0]  ;;  %4971 = vmatpush.bf16.msrb.mxu0 %v6431_v46  ;;  %v9389_v42 = vpack.c.b16 %v2313_v25, %v2313_v25 }
 0x154   : > { %v6414_v49 = vld [vmem:[%s9215_s7 + $0x420] sm:$0xf]  ;;  %v6815_v52 = vor.u32 %v8169_v45, %v6814_v44  ;;  %v8101_v53 = vld [vmem:[%s9215_s7 + $0x52c] sm:$0xf0] }
 0x155   : > { %v6542_v51 = vld [vmem:[%s9215_s7 + $0x520] sm:$0xf]  ;;  %v8133_v55 = vld [vmem:[%s9215_s7 + $0x62c] sm:$0xf0]  ;;  %v6415_v59 = vor.u32 %v8069_v50, %v6414_v49  ;;  %4984 = vmatpush.bf16.msrb.mxu1 %v6559_v47  ;;  %4997 = vmatpush.bf16.msrb.mxu2 %v6687_v48 }
 0x156   : > { %v6670_v54 = vld [vmem:[%s9215_s7 + $0x620] sm:$0xf]  ;;  %v8165_v57 = vld [vmem:[%s9215_s7 + $0x72c] sm:$0xf0]  ;;  %v6543_v63 = vor.u32 %v8101_v53, %v6542_v51  ;;  %5010 = vmatpush.bf16.msrb.mxu3 %v6815_v52 }
 0x157   : > { %v6798_v56 = vld [vmem:[%s9215_s7 + $0x720] sm:$0xf]  ;;  %v8065_v60 = vld [vmem:[%s9215_s7 + $0x40c] sm:$0xf0]  ;;  %v6671_v0 = vor.u32 %v8133_v55, %v6670_v54  ;;  %4972 = vmatpush.bf16.msrb.mxu0 %v6415_v59 }
 0x158   : > { %v6398_v58 = vld [vmem:[%s9215_s7 + $0x400] sm:$0xf]  ;;  %v8097_v62 = vld [vmem:[%s9215_s7 + $0x50c] sm:$0xf0]  ;;  %v6799_v5 = vor.u32 %v8165_v57, %v6798_v56 }
 0x159   : > { %v6526_v61 = vld [vmem:[%s9215_s7 + $0x500] sm:$0xf]  ;;  %v8129_v2 = vld [vmem:[%s9215_s7 + $0x60c] sm:$0xf0]  ;;  %v6399_v13 = vor.u32 %v8065_v60, %v6398_v58  ;;  %4985 = vmatpush.bf16.msrb.mxu1 %v6543_v63  ;;  %4998 = vmatpush.bf16.msrb.mxu2 %v6671_v0 }
 0x15a   : > { %v6654_v1 = vld [vmem:[%s9215_s7 + $0x600] sm:$0xf]  ;;  %v8161_v8 = vld [vmem:[%s9215_s7 + $0x70c] sm:$0xf0]  ;;  %v6527_v18 = vor.u32 %v8097_v62, %v6526_v61  ;;  %5011 = vmatpush.bf16.msrb.mxu3 %v6799_v5 }
 0x15b   : > { %v6782_v7 = vld [vmem:[%s9215_s7 + $0x700] sm:$0xf]  ;;  %v1780_v9 = vld [vmem:[%s10442_s0 + $0x10] sm:$0xff]  ;;  %v6655_v19 = vor.u32 %v8129_v2, %v6654_v1  ;;  %4973 = vmatpush.bf16.msrb.mxu0 %v6399_v13 }
 0x15c   : > { %v7022_v10 = vld [vmem:[%s9215_s7 + $0x8e0] sm:$0xf]  ;;  %v8221_v11 = vld [vmem:[%s9215_s7 + $0x8ec] sm:$0xf0]  ;;  %v2310_v24 = vunpack.c.l.b16 %v1780_v9  ;;  %v6783_v26 = vor.u32 %v8161_v8, %v6782_v7  ;;  %v2311_v28 = vunpack.c.h.b16 %v1780_v9 }
 0x15d   : > { %v7150_v12 = vld [vmem:[%s9215_s7 + $0x9e0] sm:$0xf]  ;;  %v8253_v14 = vld [vmem:[%s9215_s7 + $0x9ec] sm:$0xf0]  ;;  %v7023_v27 = vor.u32 %v8221_v11, %v7022_v10  ;;  %4986 = vmatpush.bf16.msrb.mxu1 %v6527_v18  ;;  %4999 = vmatpush.bf16.msrb.mxu2 %v6655_v19 }
 0x15e   : > { %v7278_v15 = vld [vmem:[%s9215_s7 + $0xae0] sm:$0xf]  ;;  %v8285_v16 = vld [vmem:[%s9215_s7 + $0xaec] sm:$0xf0]  ;;  %v7151_v29 = vor.u32 %v8253_v14, %v7150_v12  ;;  %v9387_v41 = vpack.c.b16 %v2310_v24, %v2310_v24  ;;  %5012 = vmatpush.bf16.msrb.mxu3 %v6783_v26  ;;  %v9391_v44 = vpack.c.b16 %v2311_v28, %v2311_v28 }
 0x15f   : > { %v7406_v22 = vld [vmem:[%s9215_s7 + $0xbe0] sm:$0xf]  ;;  %v8317_v23 = vld [vmem:[%s9215_s7 + $0xbec] sm:$0xf0]  ;;  %v7279_v30 = vor.u32 %v8285_v16, %v7278_v15  ;;  %5018 = vmatpush.bf16.msra.mxu0 %v7023_v27 }
 0x160   : > { %v7006_v31 = vld [vmem:[%s9215_s7 + $0x8c0] sm:$0xf]  ;;  %v8217_v32 = vld [vmem:[%s9215_s7 + $0x8cc] sm:$0xf0]  ;;  %v7407_v34 = vor.u32 %v8317_v23, %v7406_v22  ;;  %5000 = vmatmul.bf16.vlgmr.msrb.gmra.mxu2 %v9383_v38  ;;  %4974 = vmatmul.bf16.vlgmr.msrb.gmra.mxu0 %v9387_v41 }
 0x161   : > { %v7134_v33 = vld [vmem:[%s9215_s7 + $0x9c0] sm:$0xf]  ;;  %v8249_v35 = vld [vmem:[%s9215_s7 + $0x9cc] sm:$0xf0]  ;;  %v7007_v43 = vor.u32 %v8217_v32, %v7006_v31  ;;  %5031 = vmatpush.bf16.msra.mxu1 %v7151_v29  ;;  %5044 = vmatpush.bf16.msra.mxu2 %v7279_v30 }
 0x162   : > { %v7262_v36 = vld [vmem:[%s9215_s7 + $0xac0] sm:$0xf]  ;;  %v8281_v37 = vld [vmem:[%s9215_s7 + $0xacc] sm:$0xf0]  ;;  %v7135_v45 = vor.u32 %v8249_v35, %v7134_v33  ;;  %5057 = vmatpush.bf16.msra.mxu3 %v7407_v34  ;;  %4987 = vmatmul.bf16.vlgmr.msrb.gmra.mxu1 %v9391_v44 }
 0x163   : > { %v7390_v39 = vld [vmem:[%s9215_s7 + $0xbc0] sm:$0xf]  ;;  %v8313_v40 = vld [vmem:[%s9215_s7 + $0xbcc] sm:$0xf0]  ;;  %v7263_v46 = vor.u32 %v8281_v37, %v7262_v36  ;;  %5013 = vmatmul.bf16.vlgmr.msrb.gmra.mxu3 %v9389_v42  ;;  %5019 = vmatpush.bf16.msra.mxu0 %v7007_v43 }
 0x164   : > { %v6990_v47 = vld [vmem:[%s9215_s7 + $0x8a0] sm:$0xf]  ;;  %v8213_v48 = vld [vmem:[%s9215_s7 + $0x8ac] sm:$0xf0]  ;;  %v7391_v50 = vor.u32 %v8313_v40, %v7390_v39 }
 0x165   : > { %v7118_v49 = vld [vmem:[%s9215_s7 + $0x9a0] sm:$0xf]  ;;  %v8245_v51 = vld [vmem:[%s9215_s7 + $0x9ac] sm:$0xf0]  ;;  %v6991_v56 = vor.u32 %v8213_v48, %v6990_v47  ;;  %5032 = vmatpush.bf16.msra.mxu1 %v7135_v45  ;;  %5045 = vmatpush.bf16.msra.mxu2 %v7263_v46 }
 0x166   : > { %v7246_v52 = vld [vmem:[%s9215_s7 + $0xaa0] sm:$0xf]  ;;  %v8277_v53 = vld [vmem:[%s9215_s7 + $0xaac] sm:$0xf0]  ;;  %v7119_v57 = vor.u32 %v8245_v51, %v7118_v49  ;;  %5058 = vmatpush.bf16.msra.mxu3 %v7391_v50 }
 0x167   : > { %v7374_v54 = vld [vmem:[%s9215_s7 + $0xba0] sm:$0xf]  ;;  %v8309_v55 = vld [vmem:[%s9215_s7 + $0xbac] sm:$0xf0]  ;;  %v7247_v58 = vor.u32 %v8277_v53, %v7246_v52  ;;  %5020 = vmatpush.bf16.msra.mxu0 %v6991_v56 }
 0x168   : > { %v6974_v59 = vld [vmem:[%s9215_s7 + $0x880] sm:$0xf]  ;;  %v8209_v60 = vld [vmem:[%s9215_s7 + $0x88c] sm:$0xf0]  ;;  %v7375_v62 = vor.u32 %v8309_v55, %v7374_v54 }
 0x169   : > { %v7102_v61 = vld [vmem:[%s9215_s7 + $0x980] sm:$0xf]  ;;  %v8241_v63 = vld [vmem:[%s9215_s7 + $0x98c] sm:$0xf0]  ;;  %v6975_v5 = vor.u32 %v8209_v60, %v6974_v59  ;;  %5033 = vmatpush.bf16.msra.mxu1 %v7119_v57  ;;  %5046 = vmatpush.bf16.msra.mxu2 %v7247_v58 }
 0x16a   : > { %v7230_v0 = vld [vmem:[%s9215_s7 + $0xa80] sm:$0xf]  ;;  %v8273_v1 = vld [vmem:[%s9215_s7 + $0xa8c] sm:$0xf0]  ;;  %v7103_v7 = vor.u32 %v8241_v63, %v7102_v61  ;;  %5059 = vmatpush.bf16.msra.mxu3 %v7375_v62  ;;  %v1783_v61 = vld [vmem:[%s10442_s0 + $0x28] sm:$0xff] }
 0x16b   : > { %v7358_v2 = vld [vmem:[%s9215_s7 + $0xb80] sm:$0xf]  ;;  %v8305_v3 = vld [vmem:[%s9215_s7 + $0xb8c] sm:$0xf0]  ;;  %v7231_v8 = vor.u32 %v8273_v1, %v7230_v0  ;;  %5021 = vmatpush.bf16.msra.mxu0 %v6975_v5 }
 0x16c   : > { %v6958_v9 = vld [vmem:[%s9215_s7 + $0x860] sm:$0xf]  ;;  %v8205_v10 = vld [vmem:[%s9215_s7 + $0x86c] sm:$0xf0]  ;;  %v7359_v12 = vor.u32 %v8305_v3, %v7358_v2 }
 0x16d   : > { %v7086_v11 = vld [vmem:[%s9215_s7 + $0x960] sm:$0xf]  ;;  %v8237_v13 = vld [vmem:[%s9215_s7 + $0x96c] sm:$0xf0]  ;;  %v6959_v18 = vor.u32 %v8205_v10, %v6958_v9  ;;  %5034 = vmatpush.bf16.msra.mxu1 %v7103_v7  ;;  %5047 = vmatpush.bf16.msra.mxu2 %v7231_v8 }
 0x16e   : > { %v7214_v14 = vld [vmem:[%s9215_s7 + $0xa60] sm:$0xf]  ;;  %v8269_v15 = vld [vmem:[%s9215_s7 + $0xa6c] sm:$0xf0]  ;;  %v7087_v19 = vor.u32 %v8237_v13, %v7086_v11  ;;  %5060 = vmatpush.bf16.msra.mxu3 %v7359_v12  ;;  %v2316_v12 = vunpack.c.l.b16 %v1783_v61 }
 0x16f   : > { %v7342_v16 = vld [vmem:[%s9215_s7 + $0xb60] sm:$0xf]  ;;  %v8301_v17 = vld [vmem:[%s9215_s7 + $0xb6c] sm:$0xf0]  ;;  %v7215_v22 = vor.u32 %v8269_v15, %v7214_v14  ;;  %5022 = vmatpush.bf16.msra.mxu0 %v6959_v18 }
 0x170   : > { %v6942_v23 = vld [vmem:[%s9215_s7 + $0x840] sm:$0xf]  ;;  %v8201_v24 = vld [vmem:[%s9215_s7 + $0x84c] sm:$0xf0]  ;;  %v7343_v26 = vor.u32 %v8301_v17, %v7342_v16  ;;  %v2317_v16 = vunpack.c.h.b16 %v1783_v61 }
 0x171   : > { %v7070_v25 = vld [vmem:[%s9215_s7 + $0x940] sm:$0xf]  ;;  %v8233_v27 = vld [vmem:[%s9215_s7 + $0x94c] sm:$0xf0]  ;;  %v6943_v32 = vor.u32 %v8201_v24, %v6942_v23  ;;  %5035 = vmatpush.bf16.msra.mxu1 %v7087_v19  ;;  %5048 = vmatpush.bf16.msra.mxu2 %v7215_v22 }
 0x172   : > { %v7198_v28 = vld [vmem:[%s9215_s7 + $0xa40] sm:$0xf]  ;;  %v8265_v29 = vld [vmem:[%s9215_s7 + $0xa4c] sm:$0xf0]  ;;  %v7071_v33 = vor.u32 %v8233_v27, %v7070_v25  ;;  %5061 = vmatpush.bf16.msra.mxu3 %v7343_v26 }
 0x173   : > { %v7326_v30 = vld [vmem:[%s9215_s7 + $0xb40] sm:$0xf]  ;;  %v8297_v31 = vld [vmem:[%s9215_s7 + $0xb4c] sm:$0xf0]  ;;  %v7199_v34 = vor.u32 %v8265_v29, %v7198_v28  ;;  %5023 = vmatpush.bf16.msra.mxu0 %v6943_v32  ;;  %v9467_v29 = vpack.c.b16 %v2316_v12, %v2316_v12 }
 0x174   : > { %v6926_v35 = vld [vmem:[%s9215_s7 + $0x820] sm:$0xf]  ;;  %v8197_v36 = vld [vmem:[%s9215_s7 + $0x82c] sm:$0xf0]  ;;  %v7327_v39 = vor.u32 %v8297_v31, %v7326_v30 }
 0x175   : > { %v7054_v37 = vld [vmem:[%s9215_s7 + $0x920] sm:$0xf]  ;;  %v8229_v40 = vld [vmem:[%s9215_s7 + $0x92c] sm:$0xf0]  ;;  %v6927_v49 = vor.u32 %v8197_v36, %v6926_v35  ;;  %5036 = vmatpush.bf16.msra.mxu1 %v7071_v33  ;;  %5049 = vmatpush.bf16.msra.mxu2 %v7199_v34  ;;  %v9473_v33 = vpack.c.b16 %v2317_v16, %v2317_v16 }
 0x176   : > { %v7182_v43 = vld [vmem:[%s9215_s7 + $0xa20] sm:$0xf]  ;;  %v8261_v45 = vld [vmem:[%s9215_s7 + $0xa2c] sm:$0xf0]  ;;  %v7055_v53 = vor.u32 %v8229_v40, %v7054_v37  ;;  %5062 = vmatpush.bf16.msra.mxu3 %v7327_v39 }
 0x177   : > { %v7310_v46 = vld [vmem:[%s9215_s7 + $0xb20] sm:$0xf]  ;;  %v8293_v47 = vld [vmem:[%s9215_s7 + $0xb2c] sm:$0xf0]  ;;  %v7183_v54 = vor.u32 %v8261_v45, %v7182_v43  ;;  %5024 = vmatpush.bf16.msra.mxu0 %v6927_v49 }
 0x178   : > { %v6910_v48 = vld [vmem:[%s9215_s7 + $0x800] sm:$0xf]  ;;  %v8193_v50 = vld [vmem:[%s9215_s7 + $0x80c] sm:$0xf0]  ;;  %v7311_v58 = vor.u32 %v8293_v47, %v7310_v46 }
 0x179   : > { %v7038_v51 = vld [vmem:[%s9215_s7 + $0x900] sm:$0xf]  ;;  %v8225_v52 = vld [vmem:[%s9215_s7 + $0x90c] sm:$0xf0]  ;;  %v6911_v1 = vor.u32 %v8193_v50, %v6910_v48  ;;  %5037 = vmatpush.bf16.msra.mxu1 %v7055_v53  ;;  %5050 = vmatpush.bf16.msra.mxu2 %v7183_v54 }
 0x17a   : > { %v7166_v55 = vld [vmem:[%s9215_s7 + $0xa00] sm:$0xf]  ;;  %v8257_v56 = vld [vmem:[%s9215_s7 + $0xa0c] sm:$0xf0]  ;;  %v7039_v8 = vor.u32 %v8225_v52, %v7038_v51  ;;  %5063 = vmatpush.bf16.msra.mxu3 %v7311_v58 }
 0x17b   : > { %v1782_v57 = vld [vmem:[%s10442_s0 + $0x20] sm:$0xff]  ;;  %v8289_v60 = vld [vmem:[%s9215_s7 + $0xb0c] sm:$0xf0]  ;;  %v7167_v9 = vor.u32 %v8257_v56, %v7166_v55  ;;  %5025 = vmatpush.bf16.msra.mxu0 %v6911_v1 }
 0x17c   : > { %v7294_v59 = vld [vmem:[%s9215_s7 + $0xb00] sm:$0xf]  ;;  %v8349_v63 = vld [vmem:[%s9215_s7 + $0xcec] sm:$0xf0]  ;;  %v2314_v7 = vunpack.c.l.b16 %v1782_v57  ;;  %v2315_v13 = vunpack.c.h.b16 %v1782_v57 }
 0x17d   : > { %v7534_v62 = vld [vmem:[%s9215_s7 + $0xce0] sm:$0xf]  ;;  %v8381_v2 = vld [vmem:[%s9215_s7 + $0xdec] sm:$0xf0]  ;;  %v7295_v14 = vor.u32 %v8289_v60, %v7294_v59  ;;  %5038 = vmatpush.bf16.msra.mxu1 %v7039_v8  ;;  %5051 = vmatpush.bf16.msra.mxu2 %v7167_v9 }
 0x17e   : > { %v7662_v0 = vld [vmem:[%s9215_s7 + $0xde0] sm:$0xf]  ;;  %v8413_v5 = vld [vmem:[%s9215_s7 + $0xeec] sm:$0xf0]  ;;  %v7535_v15 = vor.u32 %v8349_v63, %v7534_v62  ;;  %v9462_v25 = vpack.c.b16 %v2314_v7, %v2314_v7  ;;  %v9469_v30 = vpack.c.b16 %v2315_v13, %v2315_v13 }
 0x17f   : > { %v7790_v3 = vld [vmem:[%s9215_s7 + $0xee0] sm:$0xf]  ;;  %v8445_v11 = vld [vmem:[%s9215_s7 + $0xfec] sm:$0xf0]  ;;  %v7663_v17 = vor.u32 %v8381_v2, %v7662_v0  ;;  %5064 = vmatpush.bf16.msra.mxu3 %v7295_v14 }
 0x180   : > { %v7918_v10 = vld [vmem:[%s9215_s7 + $0xfe0] sm:$0xf]  ;;  %v7791_v18 = vor.u32 %v8413_v5, %v7790_v3  ;;  %v8345_v22 = vld [vmem:[%s9215_s7 + $0xccc] sm:$0xf0]  ;;  %5070 = vmatpush.bf16.msrb.mxu0 %v7535_v15  ;;  %5052 = vmatmul.bf16.vlgmr.msra.gmra.mxu2 %v9467_v29 }
 0x181   : > { %v7518_v19 = vld [vmem:[%s9215_s7 + $0xcc0] sm:$0xf]  ;;  %v7919_v24 = vor.u32 %v8445_v11, %v7918_v10  ;;  %v8377_v26 = vld [vmem:[%s9215_s7 + $0xdcc] sm:$0xf0]  ;;  %5083 = vmatpush.bf16.msrb.mxu1 %v7663_v17  ;;  %5026 = vmatmul.bf16.vlgmr.msra.gmra.mxu0 %v9462_v25 }
 0x182   : > { %v7646_v23 = vld [vmem:[%s9215_s7 + $0xdc0] sm:$0xf]  ;;  %v8409_v28 = vld [vmem:[%s9215_s7 + $0xecc] sm:$0xf0]  ;;  %v7519_v34 = vor.u32 %v8345_v22, %v7518_v19  ;;  %5096 = vmatpush.bf16.msrb.mxu2 %v7791_v18  ;;  %5039 = vmatmul.bf16.vlgmr.msra.gmra.mxu1 %v9469_v30 }
 0x183   : > { %v7774_v27 = vld [vmem:[%s9215_s7 + $0xec0] sm:$0xf]  ;;  %v8441_v32 = vld [vmem:[%s9215_s7 + $0xfcc] sm:$0xf0]  ;;  %v7647_v35 = vor.u32 %v8377_v26, %v7646_v23  ;;  %5109 = vmatpush.bf16.msrb.mxu3 %v7919_v24 }
 0x184   : > { %v7902_v31 = vld [vmem:[%s9215_s7 + $0xfc0] sm:$0xf]  ;;  %v7775_v36 = vor.u32 %v8409_v28, %v7774_v27  ;;  %v8341_v39 = vld [vmem:[%s9215_s7 + $0xcac] sm:$0xf0]  ;;  %5065 = vmatmul.bf16.vlgmr.msra.gmra.mxu3 %v9473_v33  ;;  %5071 = vmatpush.bf16.msrb.mxu0 %v7519_v34 }
 0x185   : > { %v7502_v37 = vld [vmem:[%s9215_s7 + $0xca0] sm:$0xf]  ;;  %v7903_v43 = vor.u32 %v8441_v32, %v7902_v31  ;;  %v8373_v45 = vld [vmem:[%s9215_s7 + $0xdac] sm:$0xf0]  ;;  %5084 = vmatpush.bf16.msrb.mxu1 %v7647_v35 }
 0x186   : > { %v7630_v40 = vld [vmem:[%s9215_s7 + $0xda0] sm:$0xf]  ;;  %v8405_v47 = vld [vmem:[%s9215_s7 + $0xeac] sm:$0xf0]  ;;  %v7503_v50 = vor.u32 %v8341_v39, %v7502_v37  ;;  %5097 = vmatpush.bf16.msrb.mxu2 %v7775_v36 }
 0x187   : > { %v7758_v46 = vld [vmem:[%s9215_s7 + $0xea0] sm:$0xf]  ;;  %v8437_v49 = vld [vmem:[%s9215_s7 + $0xfac] sm:$0xf0]  ;;  %v7631_v51 = vor.u32 %v8373_v45, %v7630_v40  ;;  %5110 = vmatpush.bf16.msrb.mxu3 %v7903_v43 }
 0x188   : > { %v7886_v48 = vld [vmem:[%s9215_s7 + $0xfa0] sm:$0xf]  ;;  %v7759_v52 = vor.u32 %v8405_v47, %v7758_v46  ;;  %v8337_v54 = vld [vmem:[%s9215_s7 + $0xc8c] sm:$0xf0]  ;;  %5072 = vmatpush.bf16.msrb.mxu0 %v7503_v50 }
 0x189   : > { %v7486_v53 = vld [vmem:[%s9215_s7 + $0xc80] sm:$0xf]  ;;  %v7887_v56 = vor.u32 %v8437_v49, %v7886_v48  ;;  %v8369_v57 = vld [vmem:[%s9215_s7 + $0xd8c] sm:$0xf0]  ;;  %5085 = vmatpush.bf16.msrb.mxu1 %v7631_v51 }
 0x18a   : > { %v7614_v55 = vld [vmem:[%s9215_s7 + $0xd80] sm:$0xf]  ;;  %v8401_v59 = vld [vmem:[%s9215_s7 + $0xe8c] sm:$0xf0]  ;;  %v7487_v62 = vor.u32 %v8337_v54, %v7486_v53  ;;  %5098 = vmatpush.bf16.msrb.mxu2 %v7759_v52 }
 0x18b   : > { %v7742_v58 = vld [vmem:[%s9215_s7 + $0xe80] sm:$0xf]  ;;  %v8433_v61 = vld [vmem:[%s9215_s7 + $0xf8c] sm:$0xf0]  ;;  %v7615_v63 = vor.u32 %v8369_v57, %v7614_v55  ;;  %5111 = vmatpush.bf16.msrb.mxu3 %v7887_v56 }
 0x18c   : > { %v7870_v60 = vld [vmem:[%s9215_s7 + $0xf80] sm:$0xf]  ;;  %v7743_v0 = vor.u32 %v8401_v59, %v7742_v58  ;;  %v8333_v2 = vld [vmem:[%s9215_s7 + $0xc6c] sm:$0xf0]  ;;  %5073 = vmatpush.bf16.msrb.mxu0 %v7487_v62  ;;  %v1785_v59 = vld [vmem:[%s10442_s0 + $0x38] sm:$0xff] }
 0x18d   : > { %v7470_v1 = vld [vmem:[%s9215_s7 + $0xc60] sm:$0xf]  ;;  %v7871_v5 = vor.u32 %v8433_v61, %v7870_v60  ;;  %v8365_v7 = vld [vmem:[%s9215_s7 + $0xd6c] sm:$0xf0]  ;;  %5086 = vmatpush.bf16.msrb.mxu1 %v7615_v63  ;;  %v7963_v60 = vld [vmem:[%s9215_s7 + $0xe4] sm:$0xf] }
 0x18e   : > { %v7598_v3 = vld [vmem:[%s9215_s7 + $0xd60] sm:$0xf]  ;;  %v8397_v9 = vld [vmem:[%s9215_s7 + $0xe6c] sm:$0xf0]  ;;  %v7471_v12 = vor.u32 %v8333_v2, %v7470_v1  ;;  %5099 = vmatpush.bf16.msrb.mxu2 %v7743_v0  ;;  %v6000_v61 = vld [vmem:[%s9215_s7 + $0xf0] sm:$0xf0] }
 0x18f   : > { %v7726_v8 = vld [vmem:[%s9215_s7 + $0xe60] sm:$0xf]  ;;  %v8429_v11 = vld [vmem:[%s9215_s7 + $0xf6c] sm:$0xf0]  ;;  %v7599_v13 = vor.u32 %v8365_v7, %v7598_v3  ;;  %5112 = vmatpush.bf16.msrb.mxu3 %v7871_v5  ;;  %v7995_v62 = vld [vmem:[%s9215_s7 + $0x1e4] sm:$0xf] }
 0x190   : > { %v7854_v10 = vld [vmem:[%s9215_s7 + $0xf60] sm:$0xf]  ;;  %v7727_v14 = vor.u32 %v8397_v9, %v7726_v8  ;;  %v8329_v16 = vld [vmem:[%s9215_s7 + $0xc4c] sm:$0xf0]  ;;  %5074 = vmatpush.bf16.msrb.mxu0 %v7471_v12  ;;  %v6128_v0 = vld [vmem:[%s9215_s7 + $0x1f0] sm:$0xf0] }
 0x191   : > { %v7454_v15 = vld [vmem:[%s9215_s7 + $0xc40] sm:$0xf]  ;;  %v7855_v18 = vor.u32 %v8429_v11, %v7854_v10  ;;  %v8361_v19 = vld [vmem:[%s9215_s7 + $0xd4c] sm:$0xf0]  ;;  %5087 = vmatpush.bf16.msrb.mxu1 %v7599_v13  ;;  %v8027_v1 = vld [vmem:[%s9215_s7 + $0x2e4] sm:$0xf]  ;;  %v2320_v10 = vunpack.c.l.b16 %v1785_v59  ;;  %v6003_v13 = vor.u32 %v7963_v60, %v6000_v61 }
 0x192   : > { %v7582_v17 = vld [vmem:[%s9215_s7 + $0xd40] sm:$0xf]  ;;  %v8393_v23 = vld [vmem:[%s9215_s7 + $0xe4c] sm:$0xf0]  ;;  %v7455_v27 = vor.u32 %v8329_v16, %v7454_v15  ;;  %5100 = vmatpush.bf16.msrb.mxu2 %v7727_v14  ;;  %v6256_v2 = vld [vmem:[%s9215_s7 + $0x2f0] sm:$0xf0]  ;;  %v2321_v14 = vunpack.c.h.b16 %v1785_v59  ;;  %v6131_v15 = vor.u32 %v7995_v62, %v6128_v0 }
 0x193   : > { %v7710_v22 = vld [vmem:[%s9215_s7 + $0xe40] sm:$0xf]  ;;  %v8425_v26 = vld [vmem:[%s9215_s7 + $0xf4c] sm:$0xf0]  ;;  %v7583_v28 = vor.u32 %v8361_v19, %v7582_v17  ;;  %5113 = vmatpush.bf16.msrb.mxu3 %v7855_v18  ;;  %v8059_v8 = vld [vmem:[%s9215_s7 + $0x3e4] sm:$0xf]  ;;  %v6259_v16 = vor.u32 %v8027_v1, %v6256_v2 }
 0x194   : > { %v7838_v24 = vld [vmem:[%s9215_s7 + $0xf40] sm:$0xf]  ;;  %v7711_v31 = vor.u32 %v8393_v23, %v7710_v22  ;;  %v8325_v34 = vld [vmem:[%s9215_s7 + $0xc2c] sm:$0xf0]  ;;  %5075 = vmatpush.bf16.msrb.mxu0 %v7455_v27  ;;  %v6384_v9 = vld [vmem:[%s9215_s7 + $0x3f0] sm:$0xf0] }
 0x195   : > { %v7438_v32 = vld [vmem:[%s9215_s7 + $0xc20] sm:$0xf]  ;;  %v7839_v36 = vor.u32 %v8425_v26, %v7838_v24  ;;  %v8357_v37 = vld [vmem:[%s9215_s7 + $0xd2c] sm:$0xf0]  ;;  %5088 = vmatpush.bf16.msrb.mxu1 %v7583_v28  ;;  %v7959_v17 = vld [vmem:[%s9215_s7 + $0xc4] sm:$0xf]  ;;  %v6387_v22 = vor.u32 %v8059_v8, %v6384_v9  ;;  %v9549_v28 = vpack.c.b16 %v2320_v10, %v2320_v10 }
 0x196   : > { %v7566_v35 = vld [vmem:[%s9215_s7 + $0xd20] sm:$0xf]  ;;  %v8389_v40 = vld [vmem:[%s9215_s7 + $0xe2c] sm:$0xf0]  ;;  %v7439_v47 = vor.u32 %v8325_v34, %v7438_v32  ;;  %5101 = vmatpush.bf16.msrb.mxu2 %v7711_v31  ;;  %v5984_v18 = vld [vmem:[%s9215_s7 + $0xd0] sm:$0xf0] }
 0x197   : > { %v7694_v39 = vld [vmem:[%s9215_s7 + $0xe20] sm:$0xf]  ;;  %v8421_v45 = vld [vmem:[%s9215_s7 + $0xf2c] sm:$0xf0]  ;;  %v7567_v51 = vor.u32 %v8357_v37, %v7566_v35  ;;  %5114 = vmatpush.bf16.msrb.mxu3 %v7839_v36  ;;  %v7991_v19 = vld [vmem:[%s9215_s7 + $0x1c4] sm:$0xf]  ;;  %v9555_v35 = vpack.c.b16 %v2321_v14, %v2321_v14  ;;  %v5987_v36 = vor.u32 %v7959_v17, %v5984_v18 }
 0x198   : > { %v7822_v43 = vld [vmem:[%s9215_s7 + $0xf20] sm:$0xf]  ;;  %v8321_v48 = vld [vmem:[%s9215_s7 + $0xc0c] sm:$0xf0]  ;;  %v7695_v52 = vor.u32 %v8389_v40, %v7694_v39  ;;  %5076 = vmatpush.bf16.msrb.mxu0 %v7439_v47  ;;  %v6112_v24 = vld [vmem:[%s9215_s7 + $0x1d0] sm:$0xf0] }
 0x199   : > { %v7422_v46 = vld [vmem:[%s9215_s7 + $0xc00] sm:$0xf]  ;;  %v8353_v50 = vld [vmem:[%s9215_s7 + $0xd0c] sm:$0xf0]  ;;  %v7823_v56 = vor.u32 %v8421_v45, %v7822_v43  ;;  %5089 = vmatpush.bf16.msrb.mxu1 %v7567_v51  ;;  %v8023_v26 = vld [vmem:[%s9215_s7 + $0x2c4] sm:$0xf]  ;;  %v6115_v37 = vor.u32 %v7991_v19, %v6112_v24 }
 0x19a   : > { %v7550_v49 = vld [vmem:[%s9215_s7 + $0xd00] sm:$0xf]  ;;  %v8385_v54 = vld [vmem:[%s9215_s7 + $0xe0c] sm:$0xf0]  ;;  %v7423_v63 = vor.u32 %v8321_v48, %v7422_v46  ;;  %5102 = vmatpush.bf16.msrb.mxu2 %v7695_v52  ;;  %v6240_v27 = vld [vmem:[%s9215_s7 + $0x2d0] sm:$0xf0] }
 0x19b   : > { %v7678_v53 = vld [vmem:[%s9215_s7 + $0xe00] sm:$0xf]  ;;  %v1784_v55 = vld [vmem:[%s10442_s0 + $0x30] sm:$0xff]  ;;  %v7551_v5 = vor.u32 %v8353_v50, %v7550_v49  ;;  %5115 = vmatpush.bf16.msrb.mxu3 %v7823_v56  ;;  %v8055_v32 = vld [vmem:[%s9215_s7 + $0x3c4] sm:$0xf]  ;;  %v6243_v39 = vor.u32 %v8023_v26, %v6240_v27 }
 0x19c   : > { %v7806_v57 = vld [vmem:[%s9215_s7 + $0xf00] sm:$0xf]  ;;  %v8417_v58 = vld [vmem:[%s9215_s7 + $0xf0c] sm:$0xf0]  ;;  %v2318_v3 = vunpack.c.l.b16 %v1784_v55  ;;  %v7679_v7 = vor.u32 %v8385_v54, %v7678_v53  ;;  %v2319_v11 = vunpack.c.h.b16 %v1784_v55  ;;  %5077 = vmatpush.bf16.msrb.mxu0 %v7423_v63  ;;  %v6368_v34 = vld [vmem:[%s9215_s7 + $0x3d0] sm:$0xf0] }
 0x19d   : > { %v7807_v12 = vor.u32 %v8417_v58, %v7806_v57  ;;  %5090 = vmatpush.bf16.msrb.mxu1 %v7551_v5  ;;  %v7955_v40 = vld [vmem:[%s9215_s7 + $0xa4] sm:$0xf]  ;;  %v5968_v43 = vld [vmem:[%s9215_s7 + $0xb0] sm:$0xf0]  ;;  %v6371_v46 = vor.u32 %v8055_v32, %v6368_v34 }
 0x19e   : > { %v9544_v23 = vpack.c.b16 %v2318_v3, %v2318_v3  ;;  %5103 = vmatpush.bf16.msrb.mxu2 %v7679_v7  ;;  %v9551_v31 = vpack.c.b16 %v2319_v11, %v2319_v11  ;;  %v7987_v45 = vld [vmem:[%s9215_s7 + $0x1a4] sm:$0xf]  ;;  %v6096_v47 = vld [vmem:[%s9215_s7 + $0x1b0] sm:$0xf0]  ;;  %v5971_v52 = vor.u32 %v7955_v40, %v5968_v43 }
 0x19f   : > { %5116 = vmatpush.bf16.msrb.mxu3 %v7807_v12  ;;  %v8019_v48 = vld [vmem:[%s9215_s7 + $0x2a4] sm:$0xf]  ;;  %v6224_v49 = vld [vmem:[%s9215_s7 + $0x2b0] sm:$0xf0]  ;;  %v6099_v53 = vor.u32 %v7987_v45, %v6096_v47 }
 0x1a0   : > { %5122 = vmatpush.bf16.msra.mxu0 %v6003_v13  ;;  %5091 = vmatmul.bf16.vlgmr.msrb.gmra.mxu1 %v9551_v31  ;;  %v8051_v50 = vld [vmem:[%s9215_s7 + $0x3a4] sm:$0xf]  ;;  %v6352_v51 = vld [vmem:[%s9215_s7 + $0x3b0] sm:$0xf0]  ;;  %v6227_v54 = vor.u32 %v8019_v48, %v6224_v49 }
 0x1a1   : > { %5135 = vmatpush.bf16.msra.mxu1 %v6131_v15  ;;  %5078 = vmatmul.bf16.vlgmr.msrb.gmra.mxu0 %v9544_v23  ;;  %v7951_v55 = vld [vmem:[%s9215_s7 + $0x84] sm:$0xf]  ;;  %v5952_v56 = vld [vmem:[%s9215_s7 + $0x90] sm:$0xf0]  ;;  %v6355_v58 = vor.u32 %v8051_v50, %v6352_v51 }
 0x1a2   : > { %5148 = vmatpush.bf16.msra.mxu2 %v6259_v16  ;;  %5117 = vmatmul.bf16.vlgmr.msrb.gmra.mxu3 %v9555_v35  ;;  %v7983_v57 = vld [vmem:[%s9215_s7 + $0x184] sm:$0xf]  ;;  %v6080_v59 = vld [vmem:[%s9215_s7 + $0x190] sm:$0xf0]  ;;  %v5955_v0 = vor.u32 %v7951_v55, %v5952_v56 }
 0x1a3   : > { %5161 = vmatpush.bf16.msra.mxu3 %v6387_v22  ;;  %5104 = vmatmul.bf16.vlgmr.msrb.gmra.mxu2 %v9549_v28  ;;  %v8015_v60 = vld [vmem:[%s9215_s7 + $0x284] sm:$0xf]  ;;  %v6208_v61 = vld [vmem:[%s9215_s7 + $0x290] sm:$0xf0]  ;;  %v6083_v1 = vor.u32 %v7983_v57, %v6080_v59 }
 0x1a4   : > { %5123 = vmatpush.bf16.msra.mxu0 %v5987_v36  ;;  %v8047_v62 = vld [vmem:[%s9215_s7 + $0x384] sm:$0xf]  ;;  %v6336_v63 = vld [vmem:[%s9215_s7 + $0x390] sm:$0xf0]  ;;  %v6211_v2 = vor.u32 %v8015_v60, %v6208_v61 }
 0x1a5   : > { %5136 = vmatpush.bf16.msra.mxu1 %v6115_v37  ;;  %v7947_v3 = vld [vmem:[%s9215_s7 + $0x64] sm:$0xf]  ;;  %v5936_v5 = vld [vmem:[%s9215_s7 + $0x70] sm:$0xf0]  ;;  %v6339_v8 = vor.u32 %v8047_v62, %v6336_v63 }
 0x1a6   : > { %5149 = vmatpush.bf16.msra.mxu2 %v6243_v39  ;;  %v7979_v7 = vld [vmem:[%s9215_s7 + $0x164] sm:$0xf]  ;;  %v6064_v9 = vld [vmem:[%s9215_s7 + $0x170] sm:$0xf0]  ;;  %v5939_v14 = vor.u32 %v7947_v3, %v5936_v5 }
 0x1a7   : > { %5162 = vmatpush.bf16.msra.mxu3 %v6371_v46  ;;  %v8011_v10 = vld [vmem:[%s9215_s7 + $0x264] sm:$0xf]  ;;  %v6192_v11 = vld [vmem:[%s9215_s7 + $0x270] sm:$0xf0]  ;;  %v6067_v15 = vor.u32 %v7979_v7, %v6064_v9 }
 0x1a8   : > { %5124 = vmatpush.bf16.msra.mxu0 %v5971_v52  ;;  %v8043_v12 = vld [vmem:[%s9215_s7 + $0x364] sm:$0xf]  ;;  %v6320_v13 = vld [vmem:[%s9215_s7 + $0x370] sm:$0xf0]  ;;  %v6195_v16 = vor.u32 %v8011_v10, %v6192_v11 }
 0x1a9   : > { %5137 = vmatpush.bf16.msra.mxu1 %v6099_v53  ;;  %v7943_v17 = vld [vmem:[%s9215_s7 + $0x44] sm:$0xf]  ;;  %v5920_v18 = vld [vmem:[%s9215_s7 + $0x50] sm:$0xf0]  ;;  %v6323_v22 = vor.u32 %v8043_v12, %v6320_v13 }
 0x1aa   : > { %5150 = vmatpush.bf16.msra.mxu2 %v6227_v54  ;;  %v7975_v19 = vld [vmem:[%s9215_s7 + $0x144] sm:$0xf]  ;;  %v6048_v24 = vld [vmem:[%s9215_s7 + $0x150] sm:$0xf0]  ;;  %v5923_v36 = vor.u32 %v7943_v17, %v5920_v18 }
 0x1ab   : > { %5163 = vmatpush.bf16.msra.mxu3 %v6355_v58  ;;  %v8007_v26 = vld [vmem:[%s9215_s7 + $0x244] sm:$0xf]  ;;  %v6176_v27 = vld [vmem:[%s9215_s7 + $0x250] sm:$0xf0]  ;;  %v6051_v37 = vor.u32 %v7975_v19, %v6048_v24 }
 0x1ac   : > { %5125 = vmatpush.bf16.msra.mxu0 %v5955_v0  ;;  %v8039_v32 = vld [vmem:[%s9215_s7 + $0x344] sm:$0xf]  ;;  %v6304_v34 = vld [vmem:[%s9215_s7 + $0x350] sm:$0xf0]  ;;  %v6179_v39 = vor.u32 %v8007_v26, %v6176_v27 }
 0x1ad   : > { %5138 = vmatpush.bf16.msra.mxu1 %v6083_v1  ;;  %v7939_v40 = vld [vmem:[%s9215_s7 + $0x24] sm:$0xf]  ;;  %v5904_v43 = vld [vmem:[%s9215_s7 + $0x30] sm:$0xf0]  ;;  %v6307_v46 = vor.u32 %v8039_v32, %v6304_v34 }
 0x1ae   : > { %5151 = vmatpush.bf16.msra.mxu2 %v6211_v2  ;;  %v7971_v45 = vld [vmem:[%s9215_s7 + $0x124] sm:$0xf]  ;;  %v6032_v47 = vld [vmem:[%s9215_s7 + $0x130] sm:$0xf0]  ;;  %v5907_v52 = vor.u32 %v7939_v40, %v5904_v43 }
 0x1af   : > { %5164 = vmatpush.bf16.msra.mxu3 %v6339_v8  ;;  %v8003_v48 = vld [vmem:[%s9215_s7 + $0x224] sm:$0xf]  ;;  %v6160_v49 = vld [vmem:[%s9215_s7 + $0x230] sm:$0xf0]  ;;  %v6035_v55 = vor.u32 %v7971_v45, %v6032_v47 }
 0x1b0   : > { %5126 = vmatpush.bf16.msra.mxu0 %v5939_v14  ;;  %v8035_v50 = vld [vmem:[%s9215_s7 + $0x324] sm:$0xf]  ;;  %v6288_v51 = vld [vmem:[%s9215_s7 + $0x330] sm:$0xf0]  ;;  %v6163_v56 = vor.u32 %v8003_v48, %v6160_v49 }
 0x1b1   : > { %5139 = vmatpush.bf16.msra.mxu1 %v6067_v15  ;;  %v7935_v53 = vld [vmem:[%s9215_s7 + $0x4] sm:$0xf]  ;;  %v5888_v54 = vld [vmem:[%s9215_s7 + $0x10] sm:$0xf0]  ;;  %v6291_v60 = vor.u32 %v8035_v50, %v6288_v51 }
 0x1b2   : > { %5152 = vmatpush.bf16.msra.mxu2 %v6195_v16  ;;  %v7967_v57 = vld [vmem:[%s9215_s7 + $0x104] sm:$0xf]  ;;  %v6016_v58 = vld [vmem:[%s9215_s7 + $0x110] sm:$0xf0]  ;;  %v5891_v3 = vor.u32 %v7935_v53, %v5888_v54 }
 0x1b3   : > { %5165 = vmatpush.bf16.msra.mxu3 %v6323_v22  ;;  %v7999_v59 = vld [vmem:[%s9215_s7 + $0x204] sm:$0xf]  ;;  %v6144_v61 = vld [vmem:[%s9215_s7 + $0x210] sm:$0xf0]  ;;  %v6019_v9 = vor.u32 %v7967_v57, %v6016_v58 }
 0x1b4   : > { %5127 = vmatpush.bf16.msra.mxu0 %v5923_v36  ;;  %v8031_v62 = vld [vmem:[%s9215_s7 + $0x304] sm:$0xf]  ;;  %v6272_v63 = vld [vmem:[%s9215_s7 + $0x310] sm:$0xf0]  ;;  %v6147_v10 = vor.u32 %v7999_v59, %v6144_v61 }
 0x1b5   : > { %5140 = vmatpush.bf16.msra.mxu1 %v6051_v37  ;;  %v8091_v0 = vld [vmem:[%s9215_s7 + $0x4e4] sm:$0xf]  ;;  %v6512_v1 = vld [vmem:[%s9215_s7 + $0x4f0] sm:$0xf0]  ;;  %v6275_v13 = vor.u32 %v8031_v62, %v6272_v63 }
 0x1b6   : > { %5153 = vmatpush.bf16.msra.mxu2 %v6179_v39  ;;  %v8123_v2 = vld [vmem:[%s9215_s7 + $0x5e4] sm:$0xf]  ;;  %v6640_v5 = vld [vmem:[%s9215_s7 + $0x5f0] sm:$0xf0]  ;;  %v6515_v14 = vor.u32 %v8091_v0, %v6512_v1 }
 0x1b7   : > { %5166 = vmatpush.bf16.msra.mxu3 %v6307_v46  ;;  %v8155_v7 = vld [vmem:[%s9215_s7 + $0x6e4] sm:$0xf]  ;;  %v6768_v8 = vld [vmem:[%s9215_s7 + $0x6f0] sm:$0xf0]  ;;  %v6643_v15 = vor.u32 %v8123_v2, %v6640_v5 }
 0x1b8   : > { %5128 = vmatpush.bf16.msra.mxu0 %v5907_v52  ;;  %v8187_v11 = vld [vmem:[%s9215_s7 + $0x7e4] sm:$0xf]  ;;  %v6896_v12 = vld [vmem:[%s9215_s7 + $0x7f0] sm:$0xf0]  ;;  %v6771_v16 = vor.u32 %v8155_v7, %v6768_v8 }
 0x1b9   : > { %5141 = vmatpush.bf16.msra.mxu1 %v6035_v55  ;;  %v8087_v17 = vld [vmem:[%s9215_s7 + $0x4c4] sm:$0xf]  ;;  %v6496_v18 = vld [vmem:[%s9215_s7 + $0x4d0] sm:$0xf0]  ;;  %v6899_v22 = vor.u32 %v8187_v11, %v6896_v12 }
 0x1ba   : > { %5154 = vmatpush.bf16.msra.mxu2 %v6163_v56  ;;  %v8119_v19 = vld [vmem:[%s9215_s7 + $0x5c4] sm:$0xf]  ;;  %v6624_v24 = vld [vmem:[%s9215_s7 + $0x5d0] sm:$0xf0]  ;;  %v6499_v36 = vor.u32 %v8087_v17, %v6496_v18 }
 0x1bb   : > { %5167 = vmatpush.bf16.msra.mxu3 %v6291_v60  ;;  %v8151_v26 = vld [vmem:[%s9215_s7 + $0x6c4] sm:$0xf]  ;;  %v6752_v27 = vld [vmem:[%s9215_s7 + $0x6d0] sm:$0xf0]  ;;  %v6627_v37 = vor.u32 %v8119_v19, %v6624_v24 }
 0x1bc   : > { %5129 = vmatpush.bf16.msra.mxu0 %v5891_v3  ;;  %v8183_v32 = vld [vmem:[%s9215_s7 + $0x7c4] sm:$0xf]  ;;  %v6880_v34 = vld [vmem:[%s9215_s7 + $0x7d0] sm:$0xf0]  ;;  %v6755_v39 = vor.u32 %v8151_v26, %v6752_v27 }
 0x1bd   : > { %5142 = vmatpush.bf16.msra.mxu1 %v6019_v9  ;;  %v8083_v40 = vld [vmem:[%s9215_s7 + $0x4a4] sm:$0xf]  ;;  %v6480_v43 = vld [vmem:[%s9215_s7 + $0x4b0] sm:$0xf0]  ;;  %v6883_v46 = vor.u32 %v8183_v32, %v6880_v34 }
 0x1be   : > { %5155 = vmatpush.bf16.msra.mxu2 %v6147_v10  ;;  %v8115_v45 = vld [vmem:[%s9215_s7 + $0x5a4] sm:$0xf]  ;;  %v6608_v47 = vld [vmem:[%s9215_s7 + $0x5b0] sm:$0xf0]  ;;  %v6483_v52 = vor.u32 %v8083_v40, %v6480_v43 }
 0x1bf   : > { %5168 = vmatpush.bf16.msra.mxu3 %v6275_v13  ;;  %v8147_v48 = vld [vmem:[%s9215_s7 + $0x6a4] sm:$0xf]  ;;  %v6736_v49 = vld [vmem:[%s9215_s7 + $0x6b0] sm:$0xf0]  ;;  %5130 = vmatmul.bf16.vlgmr.msra.gmra.mxu0 %v9324_v20  ;;  %v6611_v53 = vor.u32 %v8115_v45, %v6608_v47 }
 0x1c0   : > { %5174 = vmatpush.bf16.msrb.mxu0 %v6515_v14  ;;  %v8179_v50 = vld [vmem:[%s9215_s7 + $0x7a4] sm:$0xf]  ;;  %v6864_v51 = vld [vmem:[%s9215_s7 + $0x7b0] sm:$0xf0]  ;;  %5143 = vmatmul.bf16.vlgmr.msra.gmra.mxu1 %v9327_v21  ;;  %v6739_v54 = vor.u32 %v8147_v48, %v6736_v49 }
 0x1c1   : > { %5187 = vmatpush.bf16.msrb.mxu1 %v6643_v15  ;;  %5156 = vmatmul.bf16.vlgmr.msra.gmra.mxu2 %v9308_v4  ;;  %v8079_v55 = vld [vmem:[%s9215_s7 + $0x484] sm:$0xf]  ;;  %v6464_v56 = vld [vmem:[%s9215_s7 + $0x490] sm:$0xf0]  ;;  %v6867_v58 = vor.u32 %v8179_v50, %v6864_v51 }
 0x1c2   : > { %5200 = vmatpush.bf16.msrb.mxu2 %v6771_v16  ;;  %5169 = vmatmul.bf16.vlgmr.msra.gmra.mxu3 %v9313_v6  ;;  %v8111_v57 = vld [vmem:[%s9215_s7 + $0x584] sm:$0xf]  ;;  %v6592_v59 = vld [vmem:[%s9215_s7 + $0x590] sm:$0xf0]  ;;  %v6467_v0 = vor.u32 %v8079_v55, %v6464_v56  ;;  %v4949_v49 = vpop.f32.mrf.mxu2 }
 0x1c3   : > { %5213 = vmatpush.bf16.msrb.mxu3 %v6899_v22  ;;  %v8143_v60 = vld [vmem:[%s9215_s7 + $0x684] sm:$0xf]  ;;  %v6720_v61 = vld [vmem:[%s9215_s7 + $0x690] sm:$0xf0]  ;;  %v6595_v1 = vor.u32 %v8111_v57, %v6592_v59 }
 0x1c4   : > { %5175 = vmatpush.bf16.msrb.mxu0 %v6499_v36  ;;  %v8175_v62 = vld [vmem:[%s9215_s7 + $0x784] sm:$0xf]  ;;  %v6848_v63 = vld [vmem:[%s9215_s7 + $0x790] sm:$0xf0]  ;;  %v6723_v2 = vor.u32 %v8143_v60, %v6720_v61 }
 0x1c5   : > { %5188 = vmatpush.bf16.msrb.mxu1 %v6627_v37  ;;  %v8075_v3 = vld [vmem:[%s9215_s7 + $0x464] sm:$0xf]  ;;  %v6448_v5 = vld [vmem:[%s9215_s7 + $0x470] sm:$0xf0]  ;;  %v6851_v8 = vor.u32 %v8175_v62, %v6848_v63 }
 0x1c6   : > { %5201 = vmatpush.bf16.msrb.mxu2 %v6755_v39  ;;  %v8107_v7 = vld [vmem:[%s9215_s7 + $0x564] sm:$0xf]  ;;  %v6576_v9 = vld [vmem:[%s9215_s7 + $0x570] sm:$0xf0]  ;;  %v6451_v14 = vor.u32 %v8075_v3, %v6448_v5 }
 0x1c7   : > { %5214 = vmatpush.bf16.msrb.mxu3 %v6883_v46  ;;  %v8139_v10 = vld [vmem:[%s9215_s7 + $0x664] sm:$0xf]  ;;  %v6704_v11 = vld [vmem:[%s9215_s7 + $0x670] sm:$0xf0]  ;;  %v6579_v15 = vor.u32 %v8107_v7, %v6576_v9 }
 0x1c8   : > { %5176 = vmatpush.bf16.msrb.mxu0 %v6483_v52  ;;  %v8171_v12 = vld [vmem:[%s9215_s7 + $0x764] sm:$0xf]  ;;  %v6832_v13 = vld [vmem:[%s9215_s7 + $0x770] sm:$0xf0]  ;;  %v6707_v16 = vor.u32 %v8139_v10, %v6704_v11 }
 0x1c9   : > { %5189 = vmatpush.bf16.msrb.mxu1 %v6611_v53  ;;  %v8071_v17 = vld [vmem:[%s9215_s7 + $0x444] sm:$0xf]  ;;  %v6432_v18 = vld [vmem:[%s9215_s7 + $0x450] sm:$0xf0]  ;;  %v6835_v22 = vor.u32 %v8171_v12, %v6832_v13  ;;  %v4923_v36 = vpop.f32.mrf.mxu0  ;;  %v4936_v39 = vpop.f32.mrf.mxu1 }
 0x1ca   : > { %5202 = vmatpush.bf16.msrb.mxu2 %v6739_v54  ;;  %v8103_v19 = vld [vmem:[%s9215_s7 + $0x544] sm:$0xf]  ;;  %v6560_v24 = vld [vmem:[%s9215_s7 + $0x550] sm:$0xf0]  ;;  %v6435_v37 = vor.u32 %v8071_v17, %v6432_v18  ;;  %v4937_v48 = vadd.f32 %v4936_v39, %v4923_v36  ;;  %v4962_v54 = vpop.f32.mrf.mxu3 }
 0x1cb   : > { %5215 = vmatpush.bf16.msrb.mxu3 %v6867_v58  ;;  %v8135_v26 = vld [vmem:[%s9215_s7 + $0x644] sm:$0xf]  ;;  %v6688_v27 = vld [vmem:[%s9215_s7 + $0x650] sm:$0xf0]  ;;  %v6563_v40 = vor.u32 %v8103_v19, %v6560_v24 }
 0x1cc   : > { %5177 = vmatpush.bf16.msrb.mxu0 %v6467_v0  ;;  %v8167_v32 = vld [vmem:[%s9215_s7 + $0x744] sm:$0xf]  ;;  %v6816_v34 = vld [vmem:[%s9215_s7 + $0x750] sm:$0xf0]  ;;  %v6691_v43 = vor.u32 %v8135_v26, %v6688_v27  ;;  %v4950_v57 = vadd.f32 %v4949_v49, %v4937_v48  ;;  %v4951_v26 = vpop.f32.mrf.mxu2 }
 0x1cd   : > { %5190 = vmatpush.bf16.msrb.mxu1 %v6595_v1  ;;  %v8067_v45 = vld [vmem:[%s9215_s7 + $0x424] sm:$0xf]  ;;  %v6416_v46 = vld [vmem:[%s9215_s7 + $0x430] sm:$0xf0]  ;;  %v6819_v50 = vor.u32 %v8167_v32, %v6816_v34 }
 0x1ce   : > { %5203 = vmatpush.bf16.msrb.mxu2 %v6723_v2  ;;  %v8099_v47 = vld [vmem:[%s9215_s7 + $0x524] sm:$0xf]  ;;  %v6544_v51 = vld [vmem:[%s9215_s7 + $0x530] sm:$0xf0]  ;;  %v6419_v58 = vor.u32 %v8067_v45, %v6416_v46  ;;  %v9674_v2 = vadd.f32 %v4962_v54, %v4950_v57 }
 0x1cf   : > { %5216 = vmatpush.bf16.msrb.mxu3 %v6851_v8  ;;  %v8131_v52 = vld [vmem:[%s9215_s7 + $0x624] sm:$0xf]  ;;  %v6672_v53 = vld [vmem:[%s9215_s7 + $0x630] sm:$0xf0]  ;;  %v6547_v61 = vor.u32 %v8099_v47, %v6544_v51 }
 0x1d0   : > { %5178 = vmatpush.bf16.msrb.mxu0 %v6451_v14  ;;  %v8163_v55 = vld [vmem:[%s9215_s7 + $0x724] sm:$0xf]  ;;  %v6800_v56 = vld [vmem:[%s9215_s7 + $0x730] sm:$0xf0]  ;;  %v6675_v62 = vor.u32 %v8131_v52, %v6672_v53 }
 0x1d1   : > { %5191 = vmatpush.bf16.msrb.mxu1 %v6579_v15  ;;  %v8063_v59 = vld [vmem:[%s9215_s7 + $0x404] sm:$0xf]  ;;  %v6400_v60 = vld [vmem:[%s9215_s7 + $0x410] sm:$0xf0]  ;;  %v6803_v3 = vor.u32 %v8163_v55, %v6800_v56  ;;  %v4925_v12 = vpop.f32.mrf.mxu0  ;;  %v4938_v17 = vpop.f32.mrf.mxu1 }
 0x1d2   : > { %5204 = vmatpush.bf16.msrb.mxu2 %v6707_v16  ;;  %v8095_v63 = vld [vmem:[%s9215_s7 + $0x504] sm:$0xf]  ;;  %v6528_v0 = vld [vmem:[%s9215_s7 + $0x510] sm:$0xf0]  ;;  %v6403_v13 = vor.u32 %v8063_v59, %v6400_v60  ;;  %v4964_v34 = vpop.f32.mrf.mxu3 }
 0x1d3   : > { %5217 = vmatpush.bf16.msrb.mxu3 %v6835_v22  ;;  %v8127_v1 = vld [vmem:[%s9215_s7 + $0x604] sm:$0xf]  ;;  %v6656_v5 = vld [vmem:[%s9215_s7 + $0x610] sm:$0xf0]  ;;  %v6531_v18 = vor.u32 %v8095_v63, %v6528_v0 }
 0x1d4   : > { %5179 = vmatpush.bf16.msrb.mxu0 %v6435_v37  ;;  %v8159_v7 = vld [vmem:[%s9215_s7 + $0x704] sm:$0xf]  ;;  %v6784_v8 = vld [vmem:[%s9215_s7 + $0x710] sm:$0xf0]  ;;  %v6659_v19 = vor.u32 %v8127_v1, %v6656_v5 }
 0x1d5   : > { %5192 = vmatpush.bf16.msrb.mxu1 %v6563_v40  ;;  %v8219_v9 = vld [vmem:[%s9215_s7 + $0x8e4] sm:$0xf]  ;;  %v7024_v10 = vld [vmem:[%s9215_s7 + $0x8f0] sm:$0xf0]  ;;  %v6787_v27 = vor.u32 %v8159_v7, %v6784_v8 }
 0x1d6   : > { %5205 = vmatpush.bf16.msrb.mxu2 %v6691_v43  ;;  %v8251_v11 = vld [vmem:[%s9215_s7 + $0x9e4] sm:$0xf]  ;;  %v7152_v14 = vld [vmem:[%s9215_s7 + $0x9f0] sm:$0xf0]  ;;  %v7027_v32 = vor.u32 %v8219_v9, %v7024_v10 }
 0x1d7   : > { %5218 = vmatpush.bf16.msrb.mxu3 %v6819_v50  ;;  %v8283_v15 = vld [vmem:[%s9215_s7 + $0xae4] sm:$0xf]  ;;  %v7280_v16 = vld [vmem:[%s9215_s7 + $0xaf0] sm:$0xf0]  ;;  %v7155_v36 = vor.u32 %v8251_v11, %v7152_v14 }
 0x1d8   : > { %5180 = vmatpush.bf16.msrb.mxu0 %v6419_v58  ;;  %v8315_v22 = vld [vmem:[%s9215_s7 + $0xbe4] sm:$0xf]  ;;  %v7408_v24 = vld [vmem:[%s9215_s7 + $0xbf0] sm:$0xf0]  ;;  %v7283_v37 = vor.u32 %v8283_v15, %v7280_v16 }
 0x1d9   : > { %5193 = vmatpush.bf16.msrb.mxu1 %v6547_v61  ;;  %v8215_v39 = vld [vmem:[%s9215_s7 + $0x8c4] sm:$0xf]  ;;  %v7008_v40 = vld [vmem:[%s9215_s7 + $0x8d0] sm:$0xf0]  ;;  %v7411_v45 = vor.u32 %v8315_v22, %v7408_v24 }
 0x1da   : > { %5206 = vmatpush.bf16.msrb.mxu2 %v6675_v62  ;;  %v8247_v43 = vld [vmem:[%s9215_s7 + $0x9c4] sm:$0xf]  ;;  %v7136_v46 = vld [vmem:[%s9215_s7 + $0x9d0] sm:$0xf0]  ;;  %v7011_v51 = vor.u32 %v8215_v39, %v7008_v40 }
 0x1db   : > { %5219 = vmatpush.bf16.msrb.mxu3 %v6803_v3  ;;  %v8279_v47 = vld [vmem:[%s9215_s7 + $0xac4] sm:$0xf]  ;;  %v7264_v48 = vld [vmem:[%s9215_s7 + $0xad0] sm:$0xf0]  ;;  %v7139_v52 = vor.u32 %v8247_v43, %v7136_v46 }
 0x1dc   : > { %5181 = vmatpush.bf16.msrb.mxu0 %v6403_v13  ;;  %v8311_v49 = vld [vmem:[%s9215_s7 + $0xbc4] sm:$0xf]  ;;  %v7392_v50 = vld [vmem:[%s9215_s7 + $0xbd0] sm:$0xf0]  ;;  %v7267_v53 = vor.u32 %v8279_v47, %v7264_v48 }
 0x1dd   : > { %5194 = vmatpush.bf16.msrb.mxu1 %v6531_v18  ;;  %v8211_v54 = vld [vmem:[%s9215_s7 + $0x8a4] sm:$0xf]  ;;  %v6992_v55 = vld [vmem:[%s9215_s7 + $0x8b0] sm:$0xf0]  ;;  %v7395_v57 = vor.u32 %v8311_v49, %v7392_v50  ;;  %v4975_v15 = vpop.f32.mrf.mxu0 }
 0x1de   : > { %5207 = vmatpush.bf16.msrb.mxu2 %v6659_v19  ;;  %v8243_v56 = vld [vmem:[%s9215_s7 + $0x9a4] sm:$0xf]  ;;  %v7120_v58 = vld [vmem:[%s9215_s7 + $0x9b0] sm:$0xf0]  ;;  %v6995_v63 = vor.u32 %v8211_v54, %v6992_v55  ;;  %v4976_v24 = vadd.f32 %v4975_v15, %v9674_v2 }
 0x1df   : > { %5220 = vmatpush.bf16.msrb.mxu3 %v6787_v27  ;;  %v8275_v59 = vld [vmem:[%s9215_s7 + $0xaa4] sm:$0xf]  ;;  %v7248_v60 = vld [vmem:[%s9215_s7 + $0xab0] sm:$0xf0]  ;;  %5182 = vmatmul.bf16.vlgmr.msrb.gmra.mxu0 %v9387_v41  ;;  %v7123_v0 = vor.u32 %v8243_v56, %v7120_v58  ;;  %v4988_v26 = vpop.f32.mrf.mxu1 }
 0x1e0   : > { %5226 = vmatpush.bf16.msra.mxu0 %v7027_v32  ;;  %v8307_v61 = vld [vmem:[%s9215_s7 + $0xba4] sm:$0xf]  ;;  %v7376_v62 = vld [vmem:[%s9215_s7 + $0xbb0] sm:$0xf0]  ;;  %5195 = vmatmul.bf16.vlgmr.msrb.gmra.mxu1 %v9391_v44  ;;  %v7251_v1 = vor.u32 %v8275_v59, %v7248_v60  ;;  %v4989_v40 = vadd.f32 %v4988_v26, %v4976_v24 }
 0x1e1   : > { %5239 = vmatpush.bf16.msra.mxu1 %v7155_v36  ;;  %5208 = vmatmul.bf16.vlgmr.msrb.gmra.mxu2 %v9383_v38  ;;  %v8207_v3 = vld [vmem:[%s9215_s7 + $0x884] sm:$0xf]  ;;  %v6976_v5 = vld [vmem:[%s9215_s7 + $0x890] sm:$0xf0]  ;;  %v7379_v8 = vor.u32 %v8307_v61, %v7376_v62 }
 0x1e2   : > { %5252 = vmatpush.bf16.msra.mxu2 %v7283_v37  ;;  %5221 = vmatmul.bf16.vlgmr.msrb.gmra.mxu3 %v9389_v42  ;;  %v8239_v7 = vld [vmem:[%s9215_s7 + $0x984] sm:$0xf]  ;;  %v7104_v9 = vld [vmem:[%s9215_s7 + $0x990] sm:$0xf0]  ;;  %v6979_v14 = vor.u32 %v8207_v3, %v6976_v5 }
 0x1e3   : > { %5265 = vmatpush.bf16.msra.mxu3 %v7411_v45  ;;  %v8271_v10 = vld [vmem:[%s9215_s7 + $0xa84] sm:$0xf]  ;;  %v7232_v11 = vld [vmem:[%s9215_s7 + $0xa90] sm:$0xf0]  ;;  %v7107_v16 = vor.u32 %v8239_v7, %v7104_v9  ;;  %v5001_v49 = vpop.f32.mrf.mxu2 }
 0x1e4   : > { %5227 = vmatpush.bf16.msra.mxu0 %v7011_v51  ;;  %v8303_v12 = vld [vmem:[%s9215_s7 + $0xb84] sm:$0xf]  ;;  %v7360_v13 = vld [vmem:[%s9215_s7 + $0xb90] sm:$0xf0]  ;;  %v7235_v17 = vor.u32 %v8271_v10, %v7232_v11  ;;  %v5002_v54 = vadd.f32 %v5001_v49, %v4989_v40 }
 0x1e5   : > { %5240 = vmatpush.bf16.msra.mxu1 %v7139_v52  ;;  %v8203_v18 = vld [vmem:[%s9215_s7 + $0x864] sm:$0xf]  ;;  %v6960_v19 = vld [vmem:[%s9215_s7 + $0x870] sm:$0xf0]  ;;  %v7363_v27 = vor.u32 %v8303_v12, %v7360_v13  ;;  %v4977_v60 = vpop.f32.mrf.mxu0 }
 0x1e6   : > { %5253 = vmatpush.bf16.msra.mxu2 %v7267_v53  ;;  %v8235_v22 = vld [vmem:[%s9215_s7 + $0x964] sm:$0xf]  ;;  %v7088_v32 = vld [vmem:[%s9215_s7 + $0x970] sm:$0xf0]  ;;  %v6963_v43 = vor.u32 %v8203_v18, %v6960_v19  ;;  %v5014_v55 = vpop.f32.mrf.mxu3 }
 0x1e7   : > { %5266 = vmatpush.bf16.msra.mxu3 %v7395_v57  ;;  %v8267_v34 = vld [vmem:[%s9215_s7 + $0xa64] sm:$0xf]  ;;  %v7216_v36 = vld [vmem:[%s9215_s7 + $0xa70] sm:$0xf0]  ;;  %v7091_v2 = vor.u32 %v8235_v22, %v7088_v32  ;;  %v9732_v59 = vadd.f32 %v5014_v55, %v5002_v54  ;;  %v4990_v3 = vpop.f32.mrf.mxu1 }
 0x1e8   : > { %5228 = vmatpush.bf16.msra.mxu0 %v6995_v63  ;;  %v8299_v37 = vld [vmem:[%s9215_s7 + $0xb64] sm:$0xf]  ;;  %v7344_v39 = vld [vmem:[%s9215_s7 + $0xb70] sm:$0xf0]  ;;  %v7219_v45 = vor.u32 %v8267_v34, %v7216_v36 }
 0x1e9   : > { %5241 = vmatpush.bf16.msra.mxu1 %v7123_v0  ;;  %v8199_v46 = vld [vmem:[%s9215_s7 + $0x844] sm:$0xf]  ;;  %v6944_v47 = vld [vmem:[%s9215_s7 + $0x850] sm:$0xf0]  ;;  %v7347_v50 = vor.u32 %v8299_v37, %v7344_v39 }
 0x1ea   : > { %5254 = vmatpush.bf16.msra.mxu2 %v7251_v1  ;;  %v8231_v48 = vld [vmem:[%s9215_s7 + $0x944] sm:$0xf]  ;;  %v7072_v51 = vld [vmem:[%s9215_s7 + $0x950] sm:$0xf0]  ;;  %v6947_v58 = vor.u32 %v8199_v46, %v6944_v47 }
 0x1eb   : > { %5267 = vmatpush.bf16.msra.mxu3 %v7379_v8  ;;  %v8263_v52 = vld [vmem:[%s9215_s7 + $0xa44] sm:$0xf]  ;;  %v7200_v53 = vld [vmem:[%s9215_s7 + $0xa50] sm:$0xf0]  ;;  %v7075_v61 = vor.u32 %v8231_v48, %v7072_v51  ;;  %v5003_v22 = vpop.f32.mrf.mxu2 }
 0x1ec   : > { %5229 = vmatpush.bf16.msra.mxu0 %v6979_v14  ;;  %v8295_v56 = vld [vmem:[%s9215_s7 + $0xb44] sm:$0xf]  ;;  %v7328_v57 = vld [vmem:[%s9215_s7 + $0xb50] sm:$0xf0]  ;;  %v7203_v62 = vor.u32 %v8263_v52, %v7200_v53 }
 0x1ed   : > { %5242 = vmatpush.bf16.msra.mxu1 %v7107_v16  ;;  %v8195_v63 = vld [vmem:[%s9215_s7 + $0x824] sm:$0xf]  ;;  %v6928_v0 = vld [vmem:[%s9215_s7 + $0x830] sm:$0xf0]  ;;  %v7331_v5 = vor.u32 %v8295_v56, %v7328_v57 }
 0x1ee   : > { %5255 = vmatpush.bf16.msra.mxu2 %v7235_v17  ;;  %v8227_v1 = vld [vmem:[%s9215_s7 + $0x924] sm:$0xf]  ;;  %v7056_v7 = vld [vmem:[%s9215_s7 + $0x930] sm:$0xf0]  ;;  %v6931_v12 = vor.u32 %v8195_v63, %v6928_v0  ;;  %v5016_v34 = vpop.f32.mrf.mxu3 }
 0x1ef   : > { %5268 = vmatpush.bf16.msra.mxu3 %v7363_v27  ;;  %v8259_v8 = vld [vmem:[%s9215_s7 + $0xa24] sm:$0xf]  ;;  %v7184_v9 = vld [vmem:[%s9215_s7 + $0xa30] sm:$0xf0]  ;;  %v7059_v15 = vor.u32 %v8227_v1, %v7056_v7 }
 0x1f0   : > { %5230 = vmatpush.bf16.msra.mxu0 %v6963_v43  ;;  %v8291_v10 = vld [vmem:[%s9215_s7 + $0xb24] sm:$0xf]  ;;  %v7312_v11 = vld [vmem:[%s9215_s7 + $0xb30] sm:$0xf0]  ;;  %v7187_v16 = vor.u32 %v8259_v8, %v7184_v9 }
 0x1f1   : > { %5243 = vmatpush.bf16.msra.mxu1 %v7091_v2  ;;  %v8191_v13 = vld [vmem:[%s9215_s7 + $0x804] sm:$0xf]  ;;  %v6912_v14 = vld [vmem:[%s9215_s7 + $0x810] sm:$0xf0]  ;;  %v7315_v24 = vor.u32 %v8291_v10, %v7312_v11 }
 0x1f2   : > { %5256 = vmatpush.bf16.msra.mxu2 %v7219_v45  ;;  %v8223_v17 = vld [vmem:[%s9215_s7 + $0x904] sm:$0xf]  ;;  %v7040_v18 = vld [vmem:[%s9215_s7 + $0x910] sm:$0xf0]  ;;  %v6915_v40 = vor.u32 %v8191_v13, %v6912_v14 }
 0x1f3   : > { %5269 = vmatpush.bf16.msra.mxu3 %v7347_v50  ;;  %v8255_v19 = vld [vmem:[%s9215_s7 + $0xa04] sm:$0xf]  ;;  %v7168_v26 = vld [vmem:[%s9215_s7 + $0xa10] sm:$0xf0]  ;;  %v7043_v46 = vor.u32 %v8223_v17, %v7040_v18 }
 0x1f4   : > { %5231 = vmatpush.bf16.msra.mxu0 %v6947_v58  ;;  %v8287_v27 = vld [vmem:[%s9215_s7 + $0xb04] sm:$0xf]  ;;  %v7296_v32 = vld [vmem:[%s9215_s7 + $0xb10] sm:$0xf0]  ;;  %v7171_v47 = vor.u32 %v8255_v19, %v7168_v26 }
 0x1f5   : > { %5244 = vmatpush.bf16.msra.mxu1 %v7075_v61  ;;  %v8347_v36 = vld [vmem:[%s9215_s7 + $0xce4] sm:$0xf]  ;;  %v7536_v37 = vld [vmem:[%s9215_s7 + $0xcf0] sm:$0xf0]  ;;  %v7299_v50 = vor.u32 %v8287_v27, %v7296_v32 }
 0x1f6   : > { %5257 = vmatpush.bf16.msra.mxu2 %v7203_v62  ;;  %v8379_v39 = vld [vmem:[%s9215_s7 + $0xde4] sm:$0xf]  ;;  %v7664_v43 = vld [vmem:[%s9215_s7 + $0xdf0] sm:$0xf0]  ;;  %v7539_v51 = vor.u32 %v8347_v36, %v7536_v37 }
 0x1f7   : > { %5270 = vmatpush.bf16.msra.mxu3 %v7331_v5  ;;  %v8411_v2 = vld [vmem:[%s9215_s7 + $0xee4] sm:$0xf]  ;;  %v7792_v45 = vld [vmem:[%s9215_s7 + $0xef0] sm:$0xf0]  ;;  %v7667_v52 = vor.u32 %v8379_v39, %v7664_v43 }
 0x1f8   : > { %5232 = vmatpush.bf16.msra.mxu0 %v6931_v12  ;;  %v8443_v48 = vld [vmem:[%s9215_s7 + $0xfe4] sm:$0xf]  ;;  %v7920_v49 = vld [vmem:[%s9215_s7 + $0xff0] sm:$0xf0]  ;;  %v7795_v53 = vor.u32 %v8411_v2, %v7792_v45 }
 0x1f9   : > { %5245 = vmatpush.bf16.msra.mxu1 %v7059_v15  ;;  %v8343_v54 = vld [vmem:[%s9215_s7 + $0xcc4] sm:$0xf]  ;;  %v7520_v55 = vld [vmem:[%s9215_s7 + $0xcd0] sm:$0xf0]  ;;  %v7923_v57 = vor.u32 %v8443_v48, %v7920_v49 }
 0x1fa   : > { %5258 = vmatpush.bf16.msra.mxu2 %v7187_v16  ;;  %v8375_v56 = vld [vmem:[%s9215_s7 + $0xdc4] sm:$0xf]  ;;  %v7648_v58 = vld [vmem:[%s9215_s7 + $0xdd0] sm:$0xf0]  ;;  %v7523_v0 = vor.u32 %v8343_v54, %v7520_v55 }
 0x1fb   : > { %5271 = vmatpush.bf16.msra.mxu3 %v7315_v24  ;;  %v8407_v60 = vld [vmem:[%s9215_s7 + $0xec4] sm:$0xf]  ;;  %v7776_v61 = vld [vmem:[%s9215_s7 + $0xed0] sm:$0xf0]  ;;  %v7651_v1 = vor.u32 %v8375_v56, %v7648_v58 }
 0x1fc   : > { %5233 = vmatpush.bf16.msra.mxu0 %v6915_v40  ;;  %v8439_v62 = vld [vmem:[%s9215_s7 + $0xfc4] sm:$0xf]  ;;  %v7904_v63 = vld [vmem:[%s9215_s7 + $0xfd0] sm:$0xf0]  ;;  %v7779_v3 = vor.u32 %v8407_v60, %v7776_v61 }
 0x1fd   : > { %5246 = vmatpush.bf16.msra.mxu1 %v7043_v46  ;;  %v8339_v5 = vld [vmem:[%s9215_s7 + $0xca4] sm:$0xf]  ;;  %v7504_v7 = vld [vmem:[%s9215_s7 + $0xcb0] sm:$0xf0]  ;;  %v7907_v9 = vor.u32 %v8439_v62, %v7904_v63 }
 0x1fe   : > { %5259 = vmatpush.bf16.msra.mxu2 %v7171_v47  ;;  %v8371_v8 = vld [vmem:[%s9215_s7 + $0xda4] sm:$0xf]  ;;  %v7632_v10 = vld [vmem:[%s9215_s7 + $0xdb0] sm:$0xf0]  ;;  %v7507_v15 = vor.u32 %v8339_v5, %v7504_v7  ;;  %v5027_v34 = vpop.f32.mrf.mxu0 }
 0x1ff   : > { %5272 = vmatpush.bf16.msra.mxu3 %v7299_v50  ;;  %5234 = vmatmul.bf16.vlgmr.msra.gmra.mxu0 %v9462_v25  ;;  %v8403_v11 = vld [vmem:[%s9215_s7 + $0xea4] sm:$0xf]  ;;  %v7760_v12 = vld [vmem:[%s9215_s7 + $0xeb0] sm:$0xf0]  ;;  %v7635_v16 = vor.u32 %v8371_v8, %v7632_v10  ;;  %v5028_v39 = vadd.f32 %v5027_v34, %v9732_v59  ;;  %v5040_v43 = vpop.f32.mrf.mxu1 }
 0x200   : > { %5278 = vmatpush.bf16.msrb.mxu0 %v7539_v51  ;;  %5247 = vmatmul.bf16.vlgmr.msra.gmra.mxu1 %v9469_v30  ;;  %v8435_v13 = vld [vmem:[%s9215_s7 + $0xfa4] sm:$0xf]  ;;  %v7888_v14 = vld [vmem:[%s9215_s7 + $0xfb0] sm:$0xf0]  ;;  %v7763_v17 = vor.u32 %v8403_v11, %v7760_v12 }
 0x201   : > { %5291 = vmatpush.bf16.msrb.mxu1 %v7667_v52  ;;  %5260 = vmatmul.bf16.vlgmr.msra.gmra.mxu2 %v9467_v29  ;;  %v8335_v18 = vld [vmem:[%s9215_s7 + $0xc84] sm:$0xf]  ;;  %v7488_v19 = vld [vmem:[%s9215_s7 + $0xc90] sm:$0xf0]  ;;  %v7891_v24 = vor.u32 %v8435_v13, %v7888_v14  ;;  %v5041_v50 = vadd.f32 %v5040_v43, %v5028_v39 }
 0x202   : > { %5304 = vmatpush.bf16.msrb.mxu2 %v7795_v53  ;;  %5273 = vmatmul.bf16.vlgmr.msra.gmra.mxu3 %v9473_v33  ;;  %v8367_v22 = vld [vmem:[%s9215_s7 + $0xd84] sm:$0xf]  ;;  %v7616_v26 = vld [vmem:[%s9215_s7 + $0xd90] sm:$0xf0]  ;;  %v7491_v40 = vor.u32 %v8335_v18, %v7488_v19 }
 0x203   : > { %5317 = vmatpush.bf16.msrb.mxu3 %v7923_v57  ;;  %v8399_v27 = vld [vmem:[%s9215_s7 + $0xe84] sm:$0xf]  ;;  %v7744_v32 = vld [vmem:[%s9215_s7 + $0xe90] sm:$0xf0]  ;;  %v7619_v2 = vor.u32 %v8367_v22, %v7616_v26  ;;  %v5053_v63 = vpop.f32.mrf.mxu2 }
 0x204   : > { %5279 = vmatpush.bf16.msrb.mxu0 %v7523_v0  ;;  %v8431_v36 = vld [vmem:[%s9215_s7 + $0xf84] sm:$0xf]  ;;  %v7872_v37 = vld [vmem:[%s9215_s7 + $0xf90] sm:$0xf0]  ;;  %v7747_v45 = vor.u32 %v8399_v27, %v7744_v32  ;;  %v5054_v5 = vadd.f32 %v5053_v63, %v5041_v50 }
 0x205   : > { %5292 = vmatpush.bf16.msrb.mxu1 %v7651_v1  ;;  %v8331_v46 = vld [vmem:[%s9215_s7 + $0xc64] sm:$0xf]  ;;  %v7472_v47 = vld [vmem:[%s9215_s7 + $0xc70] sm:$0xf0]  ;;  %v7875_v49 = vor.u32 %v8431_v36, %v7872_v37 }
 0x206   : > { %5305 = vmatpush.bf16.msrb.mxu2 %v7779_v3  ;;  %v8363_v48 = vld [vmem:[%s9215_s7 + $0xd64] sm:$0xf]  ;;  %v7600_v51 = vld [vmem:[%s9215_s7 + $0xd70] sm:$0xf0]  ;;  %v7475_v55 = vor.u32 %v8331_v46, %v7472_v47  ;;  %v5029_v10 = vpop.f32.mrf.mxu0 }
 0x207   : > { %5318 = vmatpush.bf16.msrb.mxu3 %v7907_v9  ;;  %v8395_v52 = vld [vmem:[%s9215_s7 + $0xe64] sm:$0xf]  ;;  %v7728_v59 = vld [vmem:[%s9215_s7 + $0xe70] sm:$0xf0]  ;;  %v7603_v56 = vor.u32 %v8363_v48, %v7600_v51  ;;  %v5066_v7 = vpop.f32.mrf.mxu3  ;;  %v5042_v12 = vpop.f32.mrf.mxu1  ;;  %v6006_v51 = vld [vmem:[%s9215_s7 + $0xe8] sm:$0xf] }
 0x208   : > { %5280 = vmatpush.bf16.msrb.mxu0 %v7507_v15  ;;  %v8427_v53 = vld [vmem:[%s9215_s7 + $0xf64] sm:$0xf]  ;;  %v7856_v54 = vld [vmem:[%s9215_s7 + $0xf70] sm:$0xf0]  ;;  %v7731_v57 = vor.u32 %v8395_v52, %v7728_v59  ;;  %v9803_v13 = vadd.f32 %v5066_v7, %v5054_v5  ;;  %v7966_v52 = vld [vmem:[%s9215_s7 + $0xf4] sm:$0xf0] }
 0x209   : > { %5293 = vmatpush.bf16.msrb.mxu1 %v7635_v16  ;;  %v8327_v58 = vld [vmem:[%s9215_s7 + $0xc44] sm:$0xf]  ;;  %v7456_v60 = vld [vmem:[%s9215_s7 + $0xc50] sm:$0xf0]  ;;  %v7859_v62 = vor.u32 %v8427_v53, %v7856_v54  ;;  %v6134_v59 = vld [vmem:[%s9215_s7 + $0x1e8] sm:$0xf] }
 0x20a   : > { %5306 = vmatpush.bf16.msrb.mxu2 %v7763_v17  ;;  %v8359_v61 = vld [vmem:[%s9215_s7 + $0xd44] sm:$0xf]  ;;  %v7584_v0 = vld [vmem:[%s9215_s7 + $0xd50] sm:$0xf0]  ;;  %v7459_v11 = vor.u32 %v8327_v58, %v7456_v60  ;;  %v5990_v5 = vld [vmem:[%s9215_s7 + $0xc8] sm:$0xf] }
 0x20b   : > { %5319 = vmatpush.bf16.msrb.mxu3 %v7891_v24  ;;  %v8391_v1 = vld [vmem:[%s9215_s7 + $0xe44] sm:$0xf]  ;;  %v7712_v3 = vld [vmem:[%s9215_s7 + $0xe50] sm:$0xf0]  ;;  %v7587_v14 = vor.u32 %v8359_v61, %v7584_v0  ;;  %v5055_v50 = vpop.f32.mrf.mxu2  ;;  %v6390_v61 = vld [vmem:[%s9215_s7 + $0x3e8] sm:$0xf]  ;;  %v6007_v0 = vor.u32 %v7966_v52, %v6006_v51 }
 0x20c   : > { %5281 = vmatpush.bf16.msrb.mxu0 %v7491_v40  ;;  %v8423_v8 = vld [vmem:[%s9215_s7 + $0xf44] sm:$0xf]  ;;  %v7840_v9 = vld [vmem:[%s9215_s7 + $0xf50] sm:$0xf0]  ;;  %v7715_v15 = vor.u32 %v8391_v1, %v7712_v3  ;;  %v7962_v7 = vld [vmem:[%s9215_s7 + $0xd4] sm:$0xf0] }
 0x20d   : > { %5294 = vmatpush.bf16.msrb.mxu1 %v7619_v2  ;;  %v8323_v16 = vld [vmem:[%s9215_s7 + $0xc24] sm:$0xf]  ;;  %v7440_v17 = vld [vmem:[%s9215_s7 + $0xc30] sm:$0xf0]  ;;  %v7843_v19 = vor.u32 %v8423_v8, %v7840_v9  ;;  %v6118_v8 = vld [vmem:[%s9215_s7 + $0x1c8] sm:$0xf] }
 0x20e   : > { %5307 = vmatpush.bf16.msrb.mxu2 %v7747_v45  ;;  %v8355_v18 = vld [vmem:[%s9215_s7 + $0xd24] sm:$0xf]  ;;  %v7568_v22 = vld [vmem:[%s9215_s7 + $0xd30] sm:$0xf0]  ;;  %v7443_v34 = vor.u32 %v8323_v16, %v7440_v17  ;;  %v7994_v10 = vld [vmem:[%s9215_s7 + $0x1d4] sm:$0xf0]  ;;  %v5991_v16 = vor.u32 %v7962_v7, %v5990_v5 }
 0x20f   : > { %5320 = vmatpush.bf16.msrb.mxu3 %v7875_v49  ;;  %v8387_v24 = vld [vmem:[%s9215_s7 + $0xe24] sm:$0xf]  ;;  %v7696_v26 = vld [vmem:[%s9215_s7 + $0xe30] sm:$0xf0]  ;;  %v7571_v39 = vor.u32 %v8355_v18, %v7568_v22  ;;  %v5068_v53 = vpop.f32.mrf.mxu3  ;;  %v8026_v12 = vld [vmem:[%s9215_s7 + $0x2d4] sm:$0xf0]  ;;  %v6119_v17 = vor.u32 %v7994_v10, %v6118_v8 }
 0x210   : > { %5282 = vmatpush.bf16.msrb.mxu0 %v7475_v55  ;;  %v8419_v27 = vld [vmem:[%s9215_s7 + $0xf24] sm:$0xf]  ;;  %v7824_v32 = vld [vmem:[%s9215_s7 + $0xf30] sm:$0xf0]  ;;  %v7699_v40 = vor.u32 %v8387_v24, %v7696_v26  ;;  %v7998_v55 = vld [vmem:[%s9215_s7 + $0x1f4] sm:$0xf0] }
 0x211   : > { %5295 = vmatpush.bf16.msrb.mxu1 %v7603_v56  ;;  %v8319_v36 = vld [vmem:[%s9215_s7 + $0xc04] sm:$0xf]  ;;  %v7424_v37 = vld [vmem:[%s9215_s7 + $0xc10] sm:$0xf0]  ;;  %v7827_v46 = vor.u32 %v8419_v27, %v7824_v32  ;;  %v6262_v56 = vld [vmem:[%s9215_s7 + $0x2e8] sm:$0xf]  ;;  %v6135_v1 = vor.u32 %v7998_v55, %v6134_v59 }
 0x212   : > { %5308 = vmatpush.bf16.msrb.mxu2 %v7731_v57  ;;  %v8351_v43 = vld [vmem:[%s9215_s7 + $0xd04] sm:$0xf]  ;;  %v7552_v2 = vld [vmem:[%s9215_s7 + $0xd10] sm:$0xf0]  ;;  %v7427_v54 = vor.u32 %v8319_v36, %v7424_v37  ;;  %v8030_v57 = vld [vmem:[%s9215_s7 + $0x2f4] sm:$0xf0] }
 0x213   : > { %5321 = vmatpush.bf16.msrb.mxu3 %v7859_v62  ;;  %v8383_v45 = vld [vmem:[%s9215_s7 + $0xe04] sm:$0xf]  ;;  %v7680_v47 = vld [vmem:[%s9215_s7 + $0xe10] sm:$0xf0]  ;;  %v7555_v58 = vor.u32 %v8351_v43, %v7552_v2  ;;  %v8062_v62 = vld [vmem:[%s9215_s7 + $0x3f4] sm:$0xf0]  ;;  %v6263_v3 = vor.u32 %v8030_v57, %v6262_v56 }
 0x214   : > { %5283 = vmatpush.bf16.msrb.mxu0 %v7459_v11  ;;  %v8415_v48 = vld [vmem:[%s9215_s7 + $0xf04] sm:$0xf]  ;;  %v7808_v49 = vld [vmem:[%s9215_s7 + $0xf10] sm:$0xf0]  ;;  %v7683_v60 = vor.u32 %v8383_v45, %v7680_v47  ;;  %v6391_v9 = vor.u32 %v8062_v62, %v6390_v61  ;;  %v6246_v11 = vld [vmem:[%s9215_s7 + $0x2c8] sm:$0xf] }
 0x215   : > { %5296 = vmatpush.bf16.msrb.mxu1 %v7587_v14  ;;  %v7811_v63 = vor.u32 %v8415_v48, %v7808_v49  ;;  %v6374_v14 = vld [vmem:[%s9215_s7 + $0x3c8] sm:$0xf]  ;;  %v6247_v18 = vor.u32 %v8026_v12, %v6246_v11  ;;  %v7958_v22 = vld [vmem:[%s9215_s7 + $0xb4] sm:$0xf0] }
 0x216   : > { %5309 = vmatpush.bf16.msrb.mxu2 %v7715_v15  ;;  %v8058_v15 = vld [vmem:[%s9215_s7 + $0x3d4] sm:$0xf0]  ;;  %v6102_v24 = vld [vmem:[%s9215_s7 + $0x1a8] sm:$0xf] }
 0x217   : > { %5322 = vmatpush.bf16.msrb.mxu3 %v7843_v19  ;;  %v5974_v19 = vld [vmem:[%s9215_s7 + $0xa8] sm:$0xf]  ;;  %v6375_v26 = vor.u32 %v8058_v15, %v6374_v14  ;;  %v7990_v27 = vld [vmem:[%s9215_s7 + $0x1b4] sm:$0xf0] }
 0x218   : > { %5284 = vmatpush.bf16.msrb.mxu0 %v7443_v34  ;;  %v6230_v32 = vld [vmem:[%s9215_s7 + $0x2a8] sm:$0xf]  ;;  %v8022_v34 = vld [vmem:[%s9215_s7 + $0x2b4] sm:$0xf0] }
 0x219   : > { %5297 = vmatpush.bf16.msrb.mxu1 %v7571_v39  ;;  %v6358_v36 = vld [vmem:[%s9215_s7 + $0x3a8] sm:$0xf]  ;;  %v8054_v37 = vld [vmem:[%s9215_s7 + $0x3b4] sm:$0xf0]  ;;  %v5975_v39 = vor.u32 %v7958_v22, %v5974_v19  ;;  %v6231_v43 = vor.u32 %v8022_v34, %v6230_v32 }
 0x21a   : > { %5310 = vmatpush.bf16.msrb.mxu2 %v7699_v40  ;;  %v6103_v40 = vor.u32 %v7990_v27, %v6102_v24  ;;  %v5958_v2 = vld [vmem:[%s9215_s7 + $0x88] sm:$0xf]  ;;  %v7954_v45 = vld [vmem:[%s9215_s7 + $0x94] sm:$0xf0]  ;;  %v6359_v47 = vor.u32 %v8054_v37, %v6358_v36 }
 0x21b   : > { %5323 = vmatpush.bf16.msrb.mxu3 %v7827_v46  ;;  %v6086_v46 = vld [vmem:[%s9215_s7 + $0x188] sm:$0xf]  ;;  %v7986_v48 = vld [vmem:[%s9215_s7 + $0x194] sm:$0xf0] }
 0x21c   : > { %5285 = vmatpush.bf16.msrb.mxu0 %v7427_v54  ;;  %v6214_v49 = vld [vmem:[%s9215_s7 + $0x288] sm:$0xf]  ;;  %v8018_v50 = vld [vmem:[%s9215_s7 + $0x294] sm:$0xf0]  ;;  %v5959_v54 = vor.u32 %v7954_v45, %v5958_v2  ;;  %v6087_v56 = vor.u32 %v7986_v48, %v6086_v46 }
 0x21d   : > { %5298 = vmatpush.bf16.msrb.mxu1 %v7555_v58  ;;  %v6342_v52 = vld [vmem:[%s9215_s7 + $0x388] sm:$0xf]  ;;  %v8050_v59 = vld [vmem:[%s9215_s7 + $0x394] sm:$0xf0]  ;;  %v5092_v55 = vpop.f32.mrf.mxu1  ;;  %v6215_v57 = vor.u32 %v8018_v50, %v6214_v49 }
 0x21e   : > { %5311 = vmatpush.bf16.msrb.mxu2 %v7683_v60  ;;  %v5079_v51 = vpop.f32.mrf.mxu0  ;;  %v5942_v58 = vld [vmem:[%s9215_s7 + $0x68] sm:$0xf]  ;;  %v7950_v60 = vld [vmem:[%s9215_s7 + $0x74] sm:$0xf0]  ;;  %v6343_v62 = vor.u32 %v8050_v59, %v6342_v52 }
 0x21f   : > { %5324 = vmatpush.bf16.msrb.mxu3 %v7811_v63  ;;  %5286 = vmatmul.bf16.vlgmr.msrb.gmra.mxu0 %v9544_v23  ;;  %v5080_v53 = vadd.f32 %v5079_v51, %v9803_v13  ;;  %v6070_v61 = vld [vmem:[%s9215_s7 + $0x168] sm:$0xf]  ;;  %v8014_v13 = vld [vmem:[%s9215_s7 + $0x274] sm:$0xf0]  ;;  %v5943_v7 = vor.u32 %v7950_v60, %v5942_v58 }
 0x220   : > { %5330 = vmatpush.bf16.msra.mxu0 %v6007_v0  ;;  %5299 = vmatmul.bf16.vlgmr.msrb.gmra.mxu1 %v9551_v31  ;;  %v7982_v0 = vld [vmem:[%s9215_s7 + $0x174] sm:$0xf0]  ;;  %v5926_v10 = vld [vmem:[%s9215_s7 + $0x48] sm:$0xf] }
 0x221   : > { %5343 = vmatpush.bf16.msra.mxu1 %v6135_v1  ;;  %5312 = vmatmul.bf16.vlgmr.msrb.gmra.mxu2 %v9549_v28  ;;  %v5093_v63 = vadd.f32 %v5092_v55, %v5080_v53  ;;  %v6198_v1 = vld [vmem:[%s9215_s7 + $0x268] sm:$0xf]  ;;  %v8046_v5 = vld [vmem:[%s9215_s7 + $0x374] sm:$0xf0]  ;;  %v6071_v8 = vor.u32 %v7982_v0, %v6070_v61 }
 0x222   : > { %5356 = vmatpush.bf16.msra.mxu2 %v6263_v3  ;;  %5325 = vmatmul.bf16.vlgmr.msrb.gmra.mxu3 %v9555_v35  ;;  %v6326_v3 = vld [vmem:[%s9215_s7 + $0x368] sm:$0xf]  ;;  %v7946_v11 = vld [vmem:[%s9215_s7 + $0x54] sm:$0xf0] }
 0x223   : > { %5369 = vmatpush.bf16.msra.mxu3 %v6391_v9  ;;  %v6199_v9 = vor.u32 %v8014_v13, %v6198_v1  ;;  %v6054_v12 = vld [vmem:[%s9215_s7 + $0x148] sm:$0xf]  ;;  %v6327_v14 = vor.u32 %v8046_v5, %v6326_v3  ;;  %v5927_v32 = vor.u32 %v7946_v11, %v5926_v10  ;;  %v7974_v46 = vld [vmem:[%s9215_s7 + $0x134] sm:$0xf0] }
 0x224   : > { %5331 = vmatpush.bf16.msra.mxu0 %v5991_v16  ;;  %v7978_v16 = vld [vmem:[%s9215_s7 + $0x154] sm:$0xf0]  ;;  %v6310_v24 = vld [vmem:[%s9215_s7 + $0x348] sm:$0xf] }
 0x225   : > { %5344 = vmatpush.bf16.msra.mxu1 %v6119_v17  ;;  %v6182_v17 = vld [vmem:[%s9215_s7 + $0x248] sm:$0xf]  ;;  %v5118_v22 = vpop.f32.mrf.mxu3  ;;  %v5094_v34 = vpop.f32.mrf.mxu1  ;;  %v6055_v37 = vor.u32 %v7978_v16, %v6054_v12  ;;  %v8006_v48 = vld [vmem:[%s9215_s7 + $0x234] sm:$0xf0] }
 0x226   : > { %5357 = vmatpush.bf16.msra.mxu2 %v6247_v18  ;;  %v5105_v15 = vpop.f32.mrf.mxu2  ;;  %v8010_v18 = vld [vmem:[%s9215_s7 + $0x254] sm:$0xf0]  ;;  %v5081_v27 = vpop.f32.mrf.mxu0  ;;  %v6038_v2 = vld [vmem:[%s9215_s7 + $0x128] sm:$0xf] }
 0x227   : > { %5370 = vmatpush.bf16.msra.mxu3 %v6375_v26  ;;  %v5106_v19 = vadd.f32 %v5105_v15, %v5093_v63  ;;  %v8042_v26 = vld [vmem:[%s9215_s7 + $0x354] sm:$0xf0]  ;;  %v6294_v49 = vld [vmem:[%s9215_s7 + $0x328] sm:$0xf]  ;;  %v6039_v53 = vor.u32 %v7974_v46, %v6038_v2 }
 0x228   : > { %5332 = vmatpush.bf16.msra.mxu0 %v5975_v39  ;;  %v6183_v39 = vor.u32 %v8010_v18, %v6182_v17  ;;  %v6311_v45 = vor.u32 %v8042_v26, %v6310_v24  ;;  %v8038_v50 = vld [vmem:[%s9215_s7 + $0x334] sm:$0xf0]  ;;  %v5894_v52 = vld [vmem:[%s9215_s7 + $0x8] sm:$0xf] }
 0x229   : > { %5345 = vmatpush.bf16.msra.mxu1 %v6103_v40  ;;  %v9874_v36 = vadd.f32 %v5118_v22, %v5106_v19  ;;  %v5910_v40 = vld [vmem:[%s9215_s7 + $0x28] sm:$0xf]  ;;  %v7938_v59 = vld [vmem:[%s9215_s7 + $0x14] sm:$0xf0]  ;;  %v6295_v58 = vor.u32 %v8038_v50, %v6294_v49 }
 0x22a   : > { %5358 = vmatpush.bf16.msra.mxu2 %v6231_v43  ;;  %v7942_v43 = vld [vmem:[%s9215_s7 + $0x34] sm:$0xf0]  ;;  %v6022_v55 = vld [vmem:[%s9215_s7 + $0x108] sm:$0xf]  ;;  %v5895_v5 = vor.u32 %v7938_v59, %v5894_v52 }
 0x22b   : > { %5371 = vmatpush.bf16.msra.mxu3 %v6359_v47  ;;  %v6166_v47 = vld [vmem:[%s9215_s7 + $0x228] sm:$0xf]  ;;  %v5911_v51 = vor.u32 %v7942_v43, %v5910_v40  ;;  %v8002_v60 = vld [vmem:[%s9215_s7 + $0x214] sm:$0xf0] }
 0x22c   : > { %5333 = vmatpush.bf16.msra.mxu0 %v5959_v54  ;;  %v6167_v54 = vor.u32 %v8006_v48, %v6166_v47  ;;  %v6278_v61 = vld [vmem:[%s9215_s7 + $0x308] sm:$0xf]  ;;  %v8094_v1 = vld [vmem:[%s9215_s7 + $0x4f4] sm:$0xf0] }
 0x22d   : > { %5346 = vmatpush.bf16.msra.mxu1 %v6087_v56  ;;  %v7970_v56 = vld [vmem:[%s9215_s7 + $0x114] sm:$0xf0]  ;;  %v6518_v0 = vld [vmem:[%s9215_s7 + $0x4e8] sm:$0xf]  ;;  %v5120_v3 = vpop.f32.mrf.mxu3 }
 0x22e   : > { %5359 = vmatpush.bf16.msra.mxu2 %v6215_v57  ;;  %v6150_v57 = vld [vmem:[%s9215_s7 + $0x208] sm:$0xf]  ;;  %v5107_v63 = vpop.f32.mrf.mxu2  ;;  %v6023_v10 = vor.u32 %v7970_v56, %v6022_v55  ;;  %v6519_v16 = vor.u32 %v8094_v1, %v6518_v0  ;;  %v8090_v22 = vld [vmem:[%s9215_s7 + $0x4d4] sm:$0xf0] }
 0x22f   : > { %5372 = vmatpush.bf16.msra.mxu3 %v6343_v62  ;;  %v8034_v62 = vld [vmem:[%s9215_s7 + $0x314] sm:$0xf0]  ;;  %v6646_v13 = vld [vmem:[%s9215_s7 + $0x5e8] sm:$0xf]  ;;  %v6151_v11 = vor.u32 %v8002_v60, %v6150_v57 }
 0x230   : > { %5334 = vmatpush.bf16.msra.mxu0 %v5943_v7  ;;  %v8126_v7 = vld [vmem:[%s9215_s7 + $0x5f4] sm:$0xf0]  ;;  %v6902_v12 = vld [vmem:[%s9215_s7 + $0x7e8] sm:$0xf]  ;;  %v6279_v15 = vor.u32 %v8034_v62, %v6278_v61 }
 0x231   : > { %5347 = vmatpush.bf16.msra.mxu1 %v6071_v8  ;;  %v6774_v8 = vld [vmem:[%s9215_s7 + $0x6e8] sm:$0xf]  ;;  %v6647_v17 = vor.u32 %v8126_v7, %v6646_v13  ;;  %v8122_v27 = vld [vmem:[%s9215_s7 + $0x5d4] sm:$0xf0] }
 0x232   : > { %5360 = vmatpush.bf16.msra.mxu2 %v6199_v9  ;;  %v8158_v9 = vld [vmem:[%s9215_s7 + $0x6f4] sm:$0xf0]  ;;  %v6502_v19 = vld [vmem:[%s9215_s7 + $0x4c8] sm:$0xf] }
 0x233   : > { %5373 = vmatpush.bf16.msra.mxu3 %v6327_v14  ;;  %v8190_v14 = vld [vmem:[%s9215_s7 + $0x7f4] sm:$0xf0]  ;;  %v6775_v18 = vor.u32 %v8158_v9, %v6774_v8  ;;  %v6630_v24 = vld [vmem:[%s9215_s7 + $0x5c8] sm:$0xf]  ;;  %v6503_v40 = vor.u32 %v8090_v22, %v6502_v19 }
 0x234   : > { %5335 = vmatpush.bf16.msra.mxu0 %v5927_v32  ;;  %v6903_v26 = vor.u32 %v8190_v14, %v6902_v12  ;;  %v6758_v32 = vld [vmem:[%s9215_s7 + $0x6c8] sm:$0xf]  ;;  %v8154_v34 = vld [vmem:[%s9215_s7 + $0x6d4] sm:$0xf0]  ;;  %v6631_v43 = vor.u32 %v8122_v27, %v6630_v24 }
 0x235   : > { %5348 = vmatpush.bf16.msra.mxu1 %v6055_v37  ;;  %v6886_v37 = vld [vmem:[%s9215_s7 + $0x7c8] sm:$0xf]  ;;  %v6759_v2 = vor.u32 %v8154_v34, %v6758_v32  ;;  %v8086_v46 = vld [vmem:[%s9215_s7 + $0x4b4] sm:$0xf0] }
 0x236   : > { %5361 = vmatpush.bf16.msra.mxu2 %v6183_v39  ;;  %v8186_v39 = vld [vmem:[%s9215_s7 + $0x7d4] sm:$0xf0]  ;;  %v6614_v47 = vld [vmem:[%s9215_s7 + $0x5a8] sm:$0xf] }
 0x237   : > { %5374 = vmatpush.bf16.msra.mxu3 %v6311_v45  ;;  %v6486_v45 = vld [vmem:[%s9215_s7 + $0x4a8] sm:$0xf]  ;;  %v6887_v48 = vor.u32 %v8186_v39, %v6886_v37  ;;  %v8118_v49 = vld [vmem:[%s9215_s7 + $0x5b4] sm:$0xf0] }
 0x238   : > { %5336 = vmatpush.bf16.msra.mxu0 %v5911_v51  ;;  %v6742_v50 = vld [vmem:[%s9215_s7 + $0x6a8] sm:$0xf]  ;;  %v8150_v51 = vld [vmem:[%s9215_s7 + $0x6b4] sm:$0xf0] }
 0x239   : > { %5349 = vmatpush.bf16.msra.mxu1 %v6039_v53  ;;  %v6870_v52 = vld [vmem:[%s9215_s7 + $0x7a8] sm:$0xf]  ;;  %v8182_v59 = vld [vmem:[%s9215_s7 + $0x7b4] sm:$0xf0]  ;;  %v6487_v53 = vor.u32 %v8086_v46, %v6486_v45  ;;  %v6743_v55 = vor.u32 %v8150_v51, %v6742_v50 }
 0x23a   : > { %5362 = vmatpush.bf16.msra.mxu2 %v6167_v54  ;;  %v6615_v54 = vor.u32 %v8118_v49, %v6614_v47  ;;  %v6470_v56 = vld [vmem:[%s9215_s7 + $0x488] sm:$0xf]  ;;  %v8082_v57 = vld [vmem:[%s9215_s7 + $0x494] sm:$0xf0]  ;;  %v6871_v60 = vor.u32 %v8182_v59, %v6870_v52 }
 0x23b   : > { %5375 = vmatpush.bf16.msra.mxu3 %v6295_v58  ;;  %v6598_v58 = vld [vmem:[%s9215_s7 + $0x588] sm:$0xf]  ;;  %v8114_v61 = vld [vmem:[%s9215_s7 + $0x594] sm:$0xf0]  ;;  %v6471_v13 = vor.u32 %v8082_v57, %v6470_v56 }
 0x23c   : > { %5337 = vmatpush.bf16.msra.mxu0 %v5895_v5  ;;  %v6726_v62 = vld [vmem:[%s9215_s7 + $0x688] sm:$0xf]  ;;  %v8146_v63 = vld [vmem:[%s9215_s7 + $0x694] sm:$0xf0]  ;;  %v5131_v3 = vpop.f32.mrf.mxu0  ;;  %v6599_v5 = vor.u32 %v8114_v61, %v6598_v58 }
 0x23d   : > { %5350 = vmatpush.bf16.msra.mxu1 %v6023_v10  ;;  %v6854_v0 = vld [vmem:[%s9215_s7 + $0x788] sm:$0xf]  ;;  %v8178_v1 = vld [vmem:[%s9215_s7 + $0x794] sm:$0xf0]  ;;  %v6727_v7 = vor.u32 %v8146_v63, %v6726_v62 }
 0x23e   : > { %5363 = vmatpush.bf16.msra.mxu2 %v6151_v11  ;;  %v6454_v8 = vld [vmem:[%s9215_s7 + $0x468] sm:$0xf]  ;;  %v8078_v9 = vld [vmem:[%s9215_s7 + $0x474] sm:$0xf0]  ;;  %v5144_v11 = vpop.f32.mrf.mxu1  ;;  %v6855_v12 = vor.u32 %v8178_v1, %v6854_v0 }
 0x23f   : > { %5376 = vmatpush.bf16.msra.mxu3 %v6279_v15  ;;  %5338 = vmatmul.bf16.vlgmr.msra.gmra.mxu0 %v9324_v20  ;;  %v6582_v10 = vld [vmem:[%s9215_s7 + $0x568] sm:$0xf]  ;;  %v8110_v14 = vld [vmem:[%s9215_s7 + $0x574] sm:$0xf0]  ;;  %v6455_v22 = vor.u32 %v8078_v9, %v6454_v8 }
 0x240   : > { %5382 = vmatpush.bf16.msrb.mxu0 %v6519_v16  ;;  %5351 = vmatmul.bf16.vlgmr.msra.gmra.mxu1 %v9327_v21  ;;  %v6710_v15 = vld [vmem:[%s9215_s7 + $0x668] sm:$0xf]  ;;  %v8142_v16 = vld [vmem:[%s9215_s7 + $0x674] sm:$0xf0]  ;;  %v6583_v24 = vor.u32 %v8110_v14, %v6582_v10 }
 0x241   : > { %5395 = vmatpush.bf16.msrb.mxu1 %v6647_v17  ;;  %5364 = vmatmul.bf16.vlgmr.msra.gmra.mxu2 %v9308_v4  ;;  %v5145_v17 = vadd.f32 %v5144_v11, %v5131_v3  ;;  %v8174_v19 = vld [vmem:[%s9215_s7 + $0x774] sm:$0xf0]  ;;  %v6438_v27 = vld [vmem:[%s9215_s7 + $0x448] sm:$0xf] }
 0x242   : > { %5408 = vmatpush.bf16.msrb.mxu2 %v6775_v18  ;;  %5377 = vmatmul.bf16.vlgmr.msra.gmra.mxu3 %v9313_v6  ;;  %v6838_v18 = vld [vmem:[%s9215_s7 + $0x768] sm:$0xf]  ;;  %v8074_v32 = vld [vmem:[%s9215_s7 + $0x454] sm:$0xf0] }
 0x243   : > { %5421 = vmatpush.bf16.msrb.mxu3 %v6903_v26  ;;  %v6711_v26 = vor.u32 %v8142_v16, %v6710_v15  ;;  %v6566_v34 = vld [vmem:[%s9215_s7 + $0x548] sm:$0xf]  ;;  %v6839_v39 = vor.u32 %v8174_v19, %v6838_v18  ;;  %v6439_v49 = vor.u32 %v8074_v32, %v6438_v27  ;;  %v8102_v58 = vld [vmem:[%s9215_s7 + $0x534] sm:$0xf0] }
 0x244   : > { %5383 = vmatpush.bf16.msrb.mxu0 %v6503_v40  ;;  %v5157_v37 = vpop.f32.mrf.mxu2  ;;  %v8106_v40 = vld [vmem:[%s9215_s7 + $0x554] sm:$0xf0]  ;;  %v6822_v47 = vld [vmem:[%s9215_s7 + $0x748] sm:$0xf]  ;;  %v5133_v51 = vpop.f32.mrf.mxu0 }
 0x245   : > { %5396 = vmatpush.bf16.msrb.mxu1 %v6631_v43  ;;  %v6694_v43 = vld [vmem:[%s9215_s7 + $0x648] sm:$0xf]  ;;  %v5158_v45 = vadd.f32 %v5157_v37, %v5145_v17  ;;  %v5170_v46 = vpop.f32.mrf.mxu3  ;;  %v6567_v52 = vor.u32 %v8106_v40, %v6566_v34  ;;  %v8134_v61 = vld [vmem:[%s9215_s7 + $0x634] sm:$0xf0] }
 0x246   : > { %5409 = vmatpush.bf16.msrb.mxu2 %v6759_v2  ;;  %v8138_v2 = vld [vmem:[%s9215_s7 + $0x654] sm:$0xf0]  ;;  %v5146_v56 = vpop.f32.mrf.mxu1  ;;  %v6806_v62 = vld [vmem:[%s9215_s7 + $0x728] sm:$0xf] }
 0x247   : > { %5422 = vmatpush.bf16.msrb.mxu3 %v6887_v48  ;;  %v8170_v48 = vld [vmem:[%s9215_s7 + $0x754] sm:$0xf0]  ;;  %v9944_v50 = vadd.f32 %v5170_v46, %v5158_v45  ;;  %v6695_v59 = vor.u32 %v8138_v2, %v6694_v43  ;;  %v6406_v1 = vld [vmem:[%s9215_s7 + $0x408] sm:$0xf] }
 0x248   : > { %5384 = vmatpush.bf16.msrb.mxu0 %v6487_v53  ;;  %v6422_v53 = vld [vmem:[%s9215_s7 + $0x428] sm:$0xf]  ;;  %v6823_v57 = vor.u32 %v8170_v48, %v6822_v47  ;;  %v8166_v63 = vld [vmem:[%s9215_s7 + $0x734] sm:$0xf0] }
 0x249   : > { %5397 = vmatpush.bf16.msrb.mxu1 %v6615_v54  ;;  %v8070_v54 = vld [vmem:[%s9215_s7 + $0x434] sm:$0xf0]  ;;  %v6662_v9 = vld [vmem:[%s9215_s7 + $0x608] sm:$0xf]  ;;  %v6807_v11 = vor.u32 %v8166_v63, %v6806_v62 }
 0x24a   : > { %5410 = vmatpush.bf16.msrb.mxu2 %v6743_v55  ;;  %v6550_v55 = vld [vmem:[%s9215_s7 + $0x528] sm:$0xf]  ;;  %v6423_v0 = vor.u32 %v8070_v54, %v6422_v53  ;;  %v8098_v8 = vld [vmem:[%s9215_s7 + $0x514] sm:$0xf0] }
 0x24b   : > { %5423 = vmatpush.bf16.msrb.mxu3 %v6871_v60  ;;  %v6678_v60 = vld [vmem:[%s9215_s7 + $0x628] sm:$0xf]  ;;  %v6551_v3 = vor.u32 %v8102_v58, %v6550_v55  ;;  %v8162_v15 = vld [vmem:[%s9215_s7 + $0x714] sm:$0xf0] }
 0x24c   : > { %5385 = vmatpush.bf16.msrb.mxu0 %v6471_v13  ;;  %v8066_v13 = vld [vmem:[%s9215_s7 + $0x414] sm:$0xf0]  ;;  %v5159_v10 = vpop.f32.mrf.mxu2  ;;  %v6790_v14 = vld [vmem:[%s9215_s7 + $0x708] sm:$0xf] }
 0x24d   : > { %5398 = vmatpush.bf16.msrb.mxu1 %v6599_v5  ;;  %v6679_v5 = vor.u32 %v8134_v61, %v6678_v60  ;;  %v5172_v16 = vpop.f32.mrf.mxu3  ;;  %v7030_v17 = vld [vmem:[%s9215_s7 + $0x8e8] sm:$0xf]  ;;  %v8222_v18 = vld [vmem:[%s9215_s7 + $0x8f4] sm:$0xf0]  ;;  %v6791_v40 = vor.u32 %v8162_v15, %v6790_v14 }
 0x24e   : > { %5411 = vmatpush.bf16.msrb.mxu2 %v6727_v7  ;;  %v6534_v7 = vld [vmem:[%s9215_s7 + $0x508] sm:$0xf]  ;;  %v8286_v27 = vld [vmem:[%s9215_s7 + $0xaf4] sm:$0xf0]  ;;  %v7031_v43 = vor.u32 %v8222_v18, %v7030_v17 }
 0x24f   : > { %5424 = vmatpush.bf16.msrb.mxu3 %v6855_v12  ;;  %v8130_v12 = vld [vmem:[%s9215_s7 + $0x614] sm:$0xf0]  ;;  %v7158_v19 = vld [vmem:[%s9215_s7 + $0x9e8] sm:$0xf]  ;;  %v6535_v32 = vor.u32 %v8098_v8, %v6534_v7 }
 0x250   : > { %5386 = vmatpush.bf16.msrb.mxu0 %v6455_v22  ;;  %v6407_v22 = vor.u32 %v8066_v13, %v6406_v1  ;;  %v6663_v34 = vor.u32 %v8130_v12, %v6662_v9  ;;  %v7414_v37 = vld [vmem:[%s9215_s7 + $0xbe8] sm:$0xf]  ;;  %v8218_v47 = vld [vmem:[%s9215_s7 + $0x8d4] sm:$0xf0] }
 0x251   : > { %5399 = vmatpush.bf16.msrb.mxu1 %v6583_v24  ;;  %v8254_v24 = vld [vmem:[%s9215_s7 + $0x9f4] sm:$0xf0]  ;;  %v7014_v46 = vld [vmem:[%s9215_s7 + $0x8c8] sm:$0xf] }
 0x252   : > { %5412 = vmatpush.bf16.msrb.mxu2 %v6711_v26  ;;  %v7286_v26 = vld [vmem:[%s9215_s7 + $0xae8] sm:$0xf]  ;;  %v7159_v2 = vor.u32 %v8254_v24, %v7158_v19  ;;  %v8250_v51 = vld [vmem:[%s9215_s7 + $0x9d4] sm:$0xf0]  ;;  %v7015_v55 = vor.u32 %v8218_v47, %v7014_v46 }
 0x253   : > { %5425 = vmatpush.bf16.msrb.mxu3 %v6839_v39  ;;  %v8318_v39 = vld [vmem:[%s9215_s7 + $0xbf4] sm:$0xf0]  ;;  %v7287_v45 = vor.u32 %v8286_v27, %v7286_v26  ;;  %v7142_v48 = vld [vmem:[%s9215_s7 + $0x9c8] sm:$0xf] }
 0x254   : > { %5387 = vmatpush.bf16.msrb.mxu0 %v6439_v49  ;;  %v7415_v49 = vor.u32 %v8318_v39, %v7414_v37  ;;  %v7398_v53 = vld [vmem:[%s9215_s7 + $0xbc8] sm:$0xf]  ;;  %v8314_v54 = vld [vmem:[%s9215_s7 + $0xbd4] sm:$0xf0]  ;;  %v7143_v56 = vor.u32 %v8250_v51, %v7142_v48 }
 0x255   : > { %5400 = vmatpush.bf16.msrb.mxu1 %v6567_v52  ;;  %v7270_v52 = vld [vmem:[%s9215_s7 + $0xac8] sm:$0xf]  ;;  %v8214_v60 = vld [vmem:[%s9215_s7 + $0x8b4] sm:$0xf0]  ;;  %v7399_v62 = vor.u32 %v8314_v54, %v7398_v53 }
 0x256   : > { %5413 = vmatpush.bf16.msrb.mxu2 %v6695_v59  ;;  %v8282_v59 = vld [vmem:[%s9215_s7 + $0xad4] sm:$0xf0]  ;;  %v6998_v58 = vld [vmem:[%s9215_s7 + $0x8a8] sm:$0xf] }
 0x257   : > { %5426 = vmatpush.bf16.msrb.mxu3 %v6823_v57  ;;  %v7271_v57 = vor.u32 %v8282_v59, %v7270_v52  ;;  %v7126_v61 = vld [vmem:[%s9215_s7 + $0x9a8] sm:$0xf]  ;;  %v8246_v63 = vld [vmem:[%s9215_s7 + $0x9b4] sm:$0xf0] }
 0x258   : > { %5388 = vmatpush.bf16.msrb.mxu0 %v6423_v0  ;;  %v7254_v0 = vld [vmem:[%s9215_s7 + $0xaa8] sm:$0xf]  ;;  %v8278_v1 = vld [vmem:[%s9215_s7 + $0xab4] sm:$0xf0]  ;;  %v7127_v7 = vor.u32 %v8246_v63, %v7126_v61 }
 0x259   : > { %5401 = vmatpush.bf16.msrb.mxu1 %v6551_v3  ;;  %v7382_v13 = vld [vmem:[%s9215_s7 + $0xba8] sm:$0xf]  ;;  %v8310_v3 = vld [vmem:[%s9215_s7 + $0xbb4] sm:$0xf0]  ;;  %v7255_v8 = vor.u32 %v8278_v1, %v7254_v0 }
 0x25a   : > { %5414 = vmatpush.bf16.msrb.mxu2 %v6679_v5  ;;  %v6999_v5 = vor.u32 %v8214_v60, %v6998_v58  ;;  %v6982_v9 = vld [vmem:[%s9215_s7 + $0x888] sm:$0xf]  ;;  %v8210_v10 = vld [vmem:[%s9215_s7 + $0x894] sm:$0xf0]  ;;  %v7383_v12 = vor.u32 %v8310_v3, %v7382_v13 }
 0x25b   : > { %5427 = vmatpush.bf16.msrb.mxu3 %v6807_v11  ;;  %v7110_v11 = vld [vmem:[%s9215_s7 + $0x988] sm:$0xf]  ;;  %v8242_v14 = vld [vmem:[%s9215_s7 + $0x994] sm:$0xf0]  ;;  %v6983_v19 = vor.u32 %v8210_v10, %v6982_v9 }
 0x25c   : > { %5389 = vmatpush.bf16.msrb.mxu0 %v6407_v22  ;;  %v7238_v15 = vld [vmem:[%s9215_s7 + $0xa88] sm:$0xf]  ;;  %v8274_v16 = vld [vmem:[%s9215_s7 + $0xa94] sm:$0xf0]  ;;  %v9998_v22 = vpop.f32.mrf.mxu0  ;;  %v7111_v24 = vor.u32 %v8242_v14, %v7110_v11 }
 0x25d   : > { %5402 = vmatpush.bf16.msrb.mxu1 %v6535_v32  ;;  %v7366_v17 = vld [vmem:[%s9215_s7 + $0xb88] sm:$0xf]  ;;  %v8306_v18 = vld [vmem:[%s9215_s7 + $0xb94] sm:$0xf0]  ;;  %v7239_v26 = vor.u32 %v8274_v16, %v7238_v15  ;;  %v10003_v37 = vpop.f32.mrf.mxu1 }
 0x25e   : > { %5415 = vmatpush.bf16.msrb.mxu2 %v6663_v34  ;;  %v6966_v27 = vld [vmem:[%s9215_s7 + $0x868] sm:$0xf]  ;;  %v8206_v32 = vld [vmem:[%s9215_s7 + $0x874] sm:$0xf0]  ;;  %v7367_v39 = vor.u32 %v8306_v18, %v7366_v17 }
 0x25f   : > { %5428 = vmatpush.bf16.msrb.mxu3 %v6791_v40  ;;  %5390 = vmatmul.bf16.vlgmr.msrb.gmra.mxu0 %v9387_v41  ;;  %v7094_v34 = vld [vmem:[%s9215_s7 + $0x968] sm:$0xf]  ;;  %v8238_v40 = vld [vmem:[%s9215_s7 + $0x974] sm:$0xf0]  ;;  %v6967_v47 = vor.u32 %v8206_v32, %v6966_v27 }
 0x260   : > { %5434 = vmatpush.bf16.msra.mxu0 %v7031_v43  ;;  %5403 = vmatmul.bf16.vlgmr.msrb.gmra.mxu1 %v9391_v44  ;;  %v7222_v43 = vld [vmem:[%s9215_s7 + $0xa68] sm:$0xf]  ;;  %v8302_v46 = vld [vmem:[%s9215_s7 + $0xb74] sm:$0xf0]  ;;  %v7095_v48 = vor.u32 %v8238_v40, %v7094_v34 }
 0x261   : > { %5447 = vmatpush.bf16.msra.mxu1 %v7159_v2  ;;  %5416 = vmatmul.bf16.vlgmr.msrb.gmra.mxu2 %v9383_v38  ;;  %v8270_v2 = vld [vmem:[%s9215_s7 + $0xa74] sm:$0xf0]  ;;  %v6950_v51 = vld [vmem:[%s9215_s7 + $0x848] sm:$0xf] }
 0x262   : > { %5460 = vmatpush.bf16.msra.mxu2 %v7287_v45  ;;  %5429 = vmatmul.bf16.vlgmr.msrb.gmra.mxu3 %v9389_v42  ;;  %v7350_v45 = vld [vmem:[%s9215_s7 + $0xb68] sm:$0xf]  ;;  %v8202_v52 = vld [vmem:[%s9215_s7 + $0x854] sm:$0xf0] }
 0x263   : > { %5473 = vmatpush.bf16.msra.mxu3 %v7415_v49  ;;  %v7223_v49 = vor.u32 %v8270_v2, %v7222_v43  ;;  %v7078_v59 = vld [vmem:[%s9215_s7 + $0x948] sm:$0xf]  ;;  %v7351_v54 = vor.u32 %v8302_v46, %v7350_v45  ;;  %v8298_v61 = vld [vmem:[%s9215_s7 + $0xb54] sm:$0xf0] }
 0x264   : > { %5435 = vmatpush.bf16.msra.mxu0 %v7015_v55  ;;  %v10013_v53 = vpop.f32.mrf.mxu2  ;;  %v8234_v55 = vld [vmem:[%s9215_s7 + $0x954] sm:$0xf0]  ;;  %v7334_v60 = vld [vmem:[%s9215_s7 + $0xb48] sm:$0xf]  ;;  %v5185_v63 = vpop.f32.mrf.mxu0 }
 0x265   : > { %5448 = vmatpush.bf16.msra.mxu1 %v7143_v56  ;;  %v7206_v56 = vld [vmem:[%s9215_s7 + $0xa48] sm:$0xf]  ;;  %v10018_v58 = vpop.f32.mrf.mxu3  ;;  %v7079_v0 = vor.u32 %v8234_v55, %v7078_v59  ;;  %v8198_v3 = vld [vmem:[%s9215_s7 + $0x834] sm:$0xf0] }
 0x266   : > { %5461 = vmatpush.bf16.msra.mxu2 %v7271_v57  ;;  %v8266_v57 = vld [vmem:[%s9215_s7 + $0xa54] sm:$0xf0]  ;;  %v6934_v13 = vld [vmem:[%s9215_s7 + $0x828] sm:$0xf] }
 0x267   : > { %5474 = vmatpush.bf16.msra.mxu3 %v7399_v62  ;;  %v6951_v62 = vor.u32 %v8202_v52, %v6950_v51  ;;  %v7207_v1 = vor.u32 %v8266_v57, %v7206_v56  ;;  %v8230_v9 = vld [vmem:[%s9215_s7 + $0x934] sm:$0xf0]  ;;  %v7190_v10 = vld [vmem:[%s9215_s7 + $0xa28] sm:$0xf]  ;;  %v6935_v15 = vor.u32 %v8198_v3, %v6934_v13 }
 0x268   : > { %5436 = vmatpush.bf16.msra.mxu0 %v6999_v5  ;;  %v7062_v5 = vld [vmem:[%s9215_s7 + $0x928] sm:$0xf]  ;;  %v8262_v11 = vld [vmem:[%s9215_s7 + $0xa34] sm:$0xf0] }
 0x269   : > { %5449 = vmatpush.bf16.msra.mxu1 %v7127_v7  ;;  %v5198_v7 = vpop.f32.mrf.mxu1  ;;  %v8294_v14 = vld [vmem:[%s9215_s7 + $0xb34] sm:$0xf0]  ;;  %v6918_v16 = vld [vmem:[%s9215_s7 + $0x808] sm:$0xf]  ;;  %v7063_v18 = vor.u32 %v8230_v9, %v7062_v5 }
 0x26a   : > { %5462 = vmatpush.bf16.msra.mxu2 %v7255_v8  ;;  %v7335_v8 = vor.u32 %v8298_v61, %v7334_v60  ;;  %v8194_v17 = vld [vmem:[%s9215_s7 + $0x814] sm:$0xf0]  ;;  %v7174_v27 = vld [vmem:[%s9215_s7 + $0xa08] sm:$0xf] }
 0x26b   : > { %5475 = vmatpush.bf16.msra.mxu3 %v7383_v12  ;;  %v7318_v12 = vld [vmem:[%s9215_s7 + $0xb28] sm:$0xf]  ;;  %v8290_v43 = vld [vmem:[%s9215_s7 + $0xb14] sm:$0xf0] }
 0x26c   : > { %5437 = vmatpush.bf16.msra.mxu0 %v6983_v19  ;;  %v7191_v19 = vor.u32 %v8262_v11, %v7190_v10  ;;  %v5211_v32 = vpop.f32.mrf.mxu2  ;;  %v7319_v34 = vor.u32 %v8294_v14, %v7318_v12  ;;  %v7302_v40 = vld [vmem:[%s9215_s7 + $0xb08] sm:$0xf]  ;;  %v8350_v46 = vld [vmem:[%s9215_s7 + $0xcf4] sm:$0xf0] }
 0x26d   : > { %5450 = vmatpush.bf16.msra.mxu1 %v7111_v24  ;;  %v7046_v24 = vld [vmem:[%s9215_s7 + $0x908] sm:$0xf]  ;;  %v5224_v2 = vpop.f32.mrf.mxu3  ;;  %v8414_v52 = vld [vmem:[%s9215_s7 + $0xef4] sm:$0xf0]  ;;  %v7303_v57 = vor.u32 %v8290_v43, %v7302_v40 }
 0x26e   : > { %5463 = vmatpush.bf16.msra.mxu2 %v7239_v26  ;;  %v8226_v26 = vld [vmem:[%s9215_s7 + $0x914] sm:$0xf0]  ;;  %v7542_v45 = vld [vmem:[%s9215_s7 + $0xce8] sm:$0xf] }
 0x26f   : > { %5476 = vmatpush.bf16.msra.mxu3 %v7367_v39  ;;  %v8258_v39 = vld [vmem:[%s9215_s7 + $0xa14] sm:$0xf0]  ;;  %v7798_v51 = vld [vmem:[%s9215_s7 + $0xee8] sm:$0xf]  ;;  %v7047_v59 = vor.u32 %v8226_v26, %v7046_v24  ;;  %v7543_v60 = vor.u32 %v8350_v46, %v7542_v45 }
 0x270   : > { %5438 = vmatpush.bf16.msra.mxu0 %v6967_v47  ;;  %v7670_v47 = vld [vmem:[%s9215_s7 + $0xde8] sm:$0xf]  ;;  %v8446_v56 = vld [vmem:[%s9215_s7 + $0xff4] sm:$0xf0] }
 0x271   : > { %5451 = vmatpush.bf16.msra.mxu1 %v7095_v48  ;;  %v6919_v48 = vor.u32 %v8194_v17, %v6918_v16  ;;  %v7926_v55 = vld [vmem:[%s9215_s7 + $0xfe8] sm:$0xf]  ;;  %v8378_v3 = vld [vmem:[%s9215_s7 + $0xdd4] sm:$0xf0] }
 0x272   : > { %5464 = vmatpush.bf16.msra.mxu2 %v7223_v49  ;;  %v8382_v49 = vld [vmem:[%s9215_s7 + $0xdf4] sm:$0xf0]  ;;  %v7526_v63 = vld [vmem:[%s9215_s7 + $0xcc8] sm:$0xf]  ;;  %v7927_v13 = vor.u32 %v8446_v56, %v7926_v55 }
 0x273   : > { %5477 = vmatpush.bf16.msra.mxu3 %v7351_v54  ;;  %v7175_v54 = vor.u32 %v8258_v39, %v7174_v27  ;;  %v7671_v61 = vor.u32 %v8382_v49, %v7670_v47  ;;  %v7782_v5 = vld [vmem:[%s9215_s7 + $0xec8] sm:$0xf]  ;;  %v8410_v7 = vld [vmem:[%s9215_s7 + $0xed4] sm:$0xf0] }
 0x274   : > { %5439 = vmatpush.bf16.msra.mxu0 %v6951_v62  ;;  %v7799_v62 = vor.u32 %v8414_v52, %v7798_v51  ;;  %v8442_v9 = vld [vmem:[%s9215_s7 + $0xfd4] sm:$0xf0]  ;;  %v7783_v12 = vor.u32 %v8410_v7, %v7782_v5  ;;  %v7510_v14 = vld [vmem:[%s9215_s7 + $0xca8] sm:$0xf]  ;;  %v5184_v7 = vadd.f32 %v9998_v22, %v9944_v50 }
 0x275   : > { %5452 = vmatpush.bf16.msra.mxu1 %v7079_v0  ;;  %v8346_v0 = vld [vmem:[%s9215_s7 + $0xcd4] sm:$0xf0]  ;;  %v7638_v16 = vld [vmem:[%s9215_s7 + $0xda8] sm:$0xf] }
 0x276   : > { %5465 = vmatpush.bf16.msra.mxu2 %v7207_v1  ;;  %v7654_v1 = vld [vmem:[%s9215_s7 + $0xdc8] sm:$0xf]  ;;  %v7527_v10 = vor.u32 %v8346_v0, %v7526_v63  ;;  %v8406_v24 = vld [vmem:[%s9215_s7 + $0xeb4] sm:$0xf0] }
 0x277   : > { %5478 = vmatpush.bf16.msra.mxu3 %v7335_v8  ;;  %v7910_v8 = vld [vmem:[%s9215_s7 + $0xfc8] sm:$0xf]  ;;  %v7655_v11 = vor.u32 %v8378_v3, %v7654_v1  ;;  %v8438_v27 = vld [vmem:[%s9215_s7 + $0xfb4] sm:$0xf0] }
 0x278   : > { %5440 = vmatpush.bf16.msra.mxu0 %v6935_v15  ;;  %v8342_v15 = vld [vmem:[%s9215_s7 + $0xcb4] sm:$0xf0]  ;;  %v7911_v17 = vor.u32 %v8442_v9, %v7910_v8  ;;  %v7894_v26 = vld [vmem:[%s9215_s7 + $0xfa8] sm:$0xf] }
 0x279   : > { %5453 = vmatpush.bf16.msra.mxu1 %v7063_v18  ;;  %v8374_v18 = vld [vmem:[%s9215_s7 + $0xdb4] sm:$0xf0]  ;;  %v7511_v32 = vor.u32 %v8342_v15, %v7510_v14  ;;  %v7494_v40 = vld [vmem:[%s9215_s7 + $0xc88] sm:$0xf]  ;;  %v7895_v45 = vor.u32 %v8438_v27, %v7894_v26 }
 0x27a   : > { %5466 = vmatpush.bf16.msra.mxu2 %v7191_v19  ;;  %v7766_v19 = vld [vmem:[%s9215_s7 + $0xea8] sm:$0xf]  ;;  %v8338_v43 = vld [vmem:[%s9215_s7 + $0xc94] sm:$0xf0] }
 0x27b   : > { %5479 = vmatpush.bf16.msra.mxu3 %v7319_v34  ;;  %v7639_v34 = vor.u32 %v8374_v18, %v7638_v16  ;;  %v7767_v39 = vor.u32 %v8406_v24, %v7766_v19  ;;  %v7622_v2 = vld [vmem:[%s9215_s7 + $0xd88] sm:$0xf]  ;;  %v8370_v46 = vld [vmem:[%s9215_s7 + $0xd94] sm:$0xf0] }
 0x27c   : > { %5441 = vmatpush.bf16.msra.mxu0 %v6919_v48  ;;  %v7750_v47 = vld [vmem:[%s9215_s7 + $0xe88] sm:$0xf]  ;;  %v8402_v48 = vld [vmem:[%s9215_s7 + $0xe94] sm:$0xf0]  ;;  %v10072_v49 = vpop.f32.mrf.mxu0  ;;  %v7623_v55 = vor.u32 %v8370_v46, %v7622_v2 }
 0x27d   : > { %5454 = vmatpush.bf16.msra.mxu1 %v7047_v59  ;;  %v7878_v51 = vld [vmem:[%s9215_s7 + $0xf88] sm:$0xf]  ;;  %v8434_v52 = vld [vmem:[%s9215_s7 + $0xf94] sm:$0xf0]  ;;  %v7495_v59 = vor.u32 %v8338_v43, %v7494_v40  ;;  %v7751_v56 = vor.u32 %v8402_v48, %v7750_v47 }
 0x27e   : > { %5467 = vmatpush.bf16.msra.mxu2 %v7175_v54  ;;  %v10076_v54 = vpop.f32.mrf.mxu1  ;;  %v8366_v63 = vld [vmem:[%s9215_s7 + $0xd74] sm:$0xf0]  ;;  %v7734_v0 = vld [vmem:[%s9215_s7 + $0xe68] sm:$0xf] }
 0x27f   : > { %5480 = vmatpush.bf16.msra.mxu3 %v7303_v57  ;;  %5442 = vmatmul.bf16.vlgmr.msra.gmra.mxu0 %v9462_v25  ;;  %v7478_v57 = vld [vmem:[%s9215_s7 + $0xc68] sm:$0xf]  ;;  %v8398_v1 = vld [vmem:[%s9215_s7 + $0xe74] sm:$0xf0] }
 0x280   : > { %5486 = vmatpush.bf16.msrb.mxu0 %v7543_v60  ;;  %5455 = vmatmul.bf16.vlgmr.msra.gmra.mxu1 %v9469_v30  ;;  %v8334_v60 = vld [vmem:[%s9215_s7 + $0xc74] sm:$0xf0]  ;;  %v7735_v9 = vor.u32 %v8398_v1, %v7734_v0  ;;  %v7846_v50 = vld [vmem:[%s9215_s7 + $0xf48] sm:$0xf] }
 0x281   : > { %5499 = vmatpush.bf16.msrb.mxu1 %v7671_v61  ;;  %5468 = vmatmul.bf16.vlgmr.msra.gmra.mxu2 %v9467_v29  ;;  %v7606_v61 = vld [vmem:[%s9215_s7 + $0xd68] sm:$0xf]  ;;  %v8430_v3 = vld [vmem:[%s9215_s7 + $0xf74] sm:$0xf0]  ;;  %v7479_v5 = vor.u32 %v8334_v60, %v7478_v57 }
 0x282   : > { %5512 = vmatpush.bf16.msrb.mxu2 %v7799_v62  ;;  %5481 = vmatmul.bf16.vlgmr.msra.gmra.mxu3 %v9473_v33  ;;  %v7879_v62 = vor.u32 %v8434_v52, %v7878_v51  ;;  %v7607_v8 = vor.u32 %v8366_v63, %v7606_v61  ;;  %v8362_v16 = vld [vmem:[%s9215_s7 + $0xd54] sm:$0xf0]  ;;  %v7446_v40 = vld [vmem:[%s9215_s7 + $0xc28] sm:$0xf] }
 0x283   : > { %5525 = vmatpush.bf16.msrb.mxu3 %v7927_v13  ;;  %v7862_v13 = vld [vmem:[%s9215_s7 + $0xf68] sm:$0xf]  ;;  %v8394_v18 = vld [vmem:[%s9215_s7 + $0xe54] sm:$0xf0] }
 0x284   : > { %5487 = vmatpush.bf16.msrb.mxu0 %v7527_v10  ;;  %v7462_v10 = vld [vmem:[%s9215_s7 + $0xc48] sm:$0xf]  ;;  %v7863_v14 = vor.u32 %v8430_v3, %v7862_v13  ;;  %v10091_v15 = vpop.f32.mrf.mxu2  ;;  %v8426_v22 = vld [vmem:[%s9215_s7 + $0xf54] sm:$0xf0]  ;;  %v5237_v24 = vpop.f32.mrf.mxu0 }
 0x285   : > { %5500 = vmatpush.bf16.msrb.mxu1 %v7655_v11  ;;  %v8330_v11 = vld [vmem:[%s9215_s7 + $0xc54] sm:$0xf0]  ;;  %v10096_v19 = vpop.f32.mrf.mxu3  ;;  %v7574_v2 = vld [vmem:[%s9215_s7 + $0xd28] sm:$0xf] }
 0x286   : > { %5513 = vmatpush.bf16.msrb.mxu2 %v7783_v12  ;;  %v7590_v12 = vld [vmem:[%s9215_s7 + $0xd48] sm:$0xf]  ;;  %v7463_v26 = vor.u32 %v8330_v11, %v7462_v10  ;;  %v5250_v27 = vpop.f32.mrf.mxu1  ;;  %v8326_v43 = vld [vmem:[%s9215_s7 + $0xc34] sm:$0xf0]  ;;  %v6136_v11 = vld [vmem:[%s9215_s7 + $0x1f8] sm:$0xf0] }
 0x287   : > { %5526 = vmatpush.bf16.msrb.mxu3 %v7911_v17  ;;  %v7718_v17 = vld [vmem:[%s9215_s7 + $0xe48] sm:$0xf]  ;;  %v8358_v46 = vld [vmem:[%s9215_s7 + $0xd34] sm:$0xf0]  ;;  %v7447_v52 = vor.u32 %v8326_v43, %v7446_v40  ;;  %v7992_v40 = vld [vmem:[%s9215_s7 + $0x1cc] sm:$0xf] }
 0x288   : > { %5488 = vmatpush.bf16.msrb.mxu0 %v7511_v32  ;;  %v5197_v32 = vadd.f32 %v10003_v37, %v5184_v7  ;;  %v7702_v47 = vld [vmem:[%s9215_s7 + $0xe28] sm:$0xf]  ;;  %v8390_v48 = vld [vmem:[%s9215_s7 + $0xe34] sm:$0xf0]  ;;  %v7575_v57 = vor.u32 %v8358_v46, %v7574_v2  ;;  %v6008_v7 = vld [vmem:[%s9215_s7 + $0xf8] sm:$0xf0] }
 0x289   : > { %5501 = vmatpush.bf16.msrb.mxu1 %v7639_v34  ;;  %v7591_v34 = vor.u32 %v8362_v16, %v7590_v12  ;;  %v7830_v51 = vld [vmem:[%s9215_s7 + $0xf28] sm:$0xf]  ;;  %v8422_v37 = vld [vmem:[%s9215_s7 + $0xf34] sm:$0xf0]  ;;  %v7703_v60 = vor.u32 %v8390_v48, %v7702_v47  ;;  %v8028_v12 = vld [vmem:[%s9215_s7 + $0x2ec] sm:$0xf] }
 0x28a   : > { %5514 = vmatpush.bf16.msrb.mxu2 %v7767_v39  ;;  %v7719_v39 = vor.u32 %v8394_v18, %v7718_v17  ;;  %v7558_v61 = vld [vmem:[%s9215_s7 + $0xd08] sm:$0xf]  ;;  %v7831_v0 = vor.u32 %v8422_v37, %v7830_v51  ;;  %v8386_v1 = vld [vmem:[%s9215_s7 + $0xe14] sm:$0xf0]  ;;  %v6120_v2 = vld [vmem:[%s9215_s7 + $0x1d8] sm:$0xf0] }
 0x28b   : > { %5527 = vmatpush.bf16.msrb.mxu3 %v7895_v45  ;;  %v7847_v45 = vor.u32 %v8426_v22, %v7846_v50  ;;  %v7686_v63 = vld [vmem:[%s9215_s7 + $0xe08] sm:$0xf]  ;;  %v8418_v3 = vld [vmem:[%s9215_s7 + $0xf14] sm:$0xf0]  ;;  %v8060_v50 = vld [vmem:[%s9215_s7 + $0x3ec] sm:$0xf]  ;;  %v6123_v37 = vor.u32 %v7992_v40, %v6120_v2 }
 0x28c   : > { %5489 = vmatpush.bf16.msrb.mxu0 %v7495_v59  ;;  %v7430_v59 = vld [vmem:[%s9215_s7 + $0xc08] sm:$0xf]  ;;  %v7687_v18 = vor.u32 %v8386_v1, %v7686_v63  ;;  %v6392_v22 = vld [vmem:[%s9215_s7 + $0x3f8] sm:$0xf0]  ;;  %v8056_v47 = vld [vmem:[%s9215_s7 + $0x3cc] sm:$0xf] }
 0x28d   : > { %5502 = vmatpush.bf16.msrb.mxu1 %v7623_v55  ;;  %v8322_v55 = vld [vmem:[%s9215_s7 + $0xc14] sm:$0xf0]  ;;  %v7814_v13 = vld [vmem:[%s9215_s7 + $0xf08] sm:$0xf]  ;;  %v6395_v43 = vor.u32 %v8060_v50, %v6392_v22  ;;  %v6248_v46 = vld [vmem:[%s9215_s7 + $0x2d8] sm:$0xf0] }
 0x28e   : > { %5515 = vmatpush.bf16.msrb.mxu2 %v7751_v56  ;;  %v5210_v56 = vadd.f32 %v10013_v53, %v5197_v32  ;;  %v7964_v53 = vld [vmem:[%s9215_s7 + $0xec] sm:$0xf]  ;;  %v7431_v10 = vor.u32 %v8322_v55, %v7430_v59  ;;  %v7815_v24 = vor.u32 %v8418_v3, %v7814_v13  ;;  %v6376_v48 = vld [vmem:[%s9215_s7 + $0x3d8] sm:$0xf0] }
 0x28f   : > { %5528 = vmatpush.bf16.msrb.mxu3 %v7879_v62  ;;  %v8354_v62 = vld [vmem:[%s9215_s7 + $0xd14] sm:$0xf0]  ;;  %v7956_v59 = vld [vmem:[%s9215_s7 + $0xac] sm:$0xf]  ;;  %v5976_v55 = vld [vmem:[%s9215_s7 + $0xb8] sm:$0xf0] }
 0x290   : > { %5490 = vmatpush.bf16.msrb.mxu0 %v7479_v5  ;;  %v5263_v5 = vpop.f32.mrf.mxu2  ;;  %v5223_v16 = vadd.f32 %v10018_v58, %v5210_v56  ;;  %v7559_v17 = vor.u32 %v8354_v62, %v7558_v61  ;;  %v5992_v58 = vld [vmem:[%s9215_s7 + $0xd8] sm:$0xf0]  ;;  %v7988_v56 = vld [vmem:[%s9215_s7 + $0x1ac] sm:$0xf]  ;;  %v5979_v1 = vor.u32 %v7956_v59, %v5976_v55 }
 0x291   : > { %5503 = vmatpush.bf16.msrb.mxu1 %v7607_v8  ;;  %v7996_v8 = vld [vmem:[%s9215_s7 + $0x1ec] sm:$0xf]  ;;  %v6232_v62 = vld [vmem:[%s9215_s7 + $0x2b8] sm:$0xf0] }
 0x292   : > { %5516 = vmatpush.bf16.msrb.mxu2 %v7735_v9  ;;  %v5276_v9 = vpop.f32.mrf.mxu3  ;;  %v5236_v27 = vadd.f32 %v10072_v49, %v5223_v16  ;;  %v6139_v32 = vor.u32 %v7996_v8, %v6136_v11  ;;  %v8020_v61 = vld [vmem:[%s9215_s7 + $0x2ac] sm:$0xf]  ;;  %v5960_v5 = vld [vmem:[%s9215_s7 + $0x98] sm:$0xf0] }
 0x293   : > { %5529 = vmatpush.bf16.msrb.mxu3 %v7863_v14  ;;  %v6264_v14 = vld [vmem:[%s9215_s7 + $0x2f8] sm:$0xf0]  ;;  %v8052_v63 = vld [vmem:[%s9215_s7 + $0x3ac] sm:$0xf]  ;;  %v6235_v13 = vor.u32 %v8020_v61, %v6232_v62 }
 0x294   : > { %5491 = vmatpush.bf16.msrb.mxu0 %v7463_v26  ;;  %v6011_v26 = vor.u32 %v7964_v53, %v6008_v7  ;;  %v5249_v51 = vadd.f32 %v10076_v54, %v5236_v27  ;;  %v7952_v3 = vld [vmem:[%s9215_s7 + $0x8c] sm:$0xf]  ;;  %v6088_v8 = vld [vmem:[%s9215_s7 + $0x198] sm:$0xf0] }
 0x295   : > { %5504 = vmatpush.bf16.msrb.mxu1 %v7591_v34  ;;  %v6267_v34 = vor.u32 %v8028_v12, %v6264_v14  ;;  %v7984_v53 = vld [vmem:[%s9215_s7 + $0x18c] sm:$0xf]  ;;  %v6344_v16 = vld [vmem:[%s9215_s7 + $0x398] sm:$0xf0] }
 0x296   : > { %5517 = vmatpush.bf16.msrb.mxu2 %v7719_v39  ;;  %v7960_v39 = vld [vmem:[%s9215_s7 + $0xcc] sm:$0xf]  ;;  %v5262_v54 = vadd.f32 %v10091_v15, %v5249_v51  ;;  %v6091_v50 = vor.u32 %v7984_v53, %v6088_v8  ;;  %v6056_v59 = vld [vmem:[%s9215_s7 + $0x158] sm:$0xf0] }
 0x297   : > { %5530 = vmatpush.bf16.msrb.mxu3 %v7847_v45  ;;  %v8024_v45 = vld [vmem:[%s9215_s7 + $0x2cc] sm:$0xf]  ;;  %v5995_v49 = vor.u32 %v7960_v39, %v5992_v58  ;;  %v6200_v58 = vld [vmem:[%s9215_s7 + $0x278] sm:$0xf0] }
 0x298   : > { %5492 = vmatpush.bf16.msrb.mxu0 %v7447_v52  ;;  %v6251_v52 = vor.u32 %v8024_v45, %v6248_v46  ;;  %v8016_v9 = vld [vmem:[%s9215_s7 + $0x28c] sm:$0xf]  ;;  %v5275_v11 = vadd.f32 %v10096_v19, %v5262_v54  ;;  %v6312_v62 = vld [vmem:[%s9215_s7 + $0x358] sm:$0xf0] }
 0x299   : > { %5505 = vmatpush.bf16.msrb.mxu1 %v7575_v57  ;;  %v6379_v57 = vor.u32 %v8056_v47, %v6376_v48  ;;  %v8048_v14 = vld [vmem:[%s9215_s7 + $0x38c] sm:$0xf]  ;;  %v6040_v8 = vld [vmem:[%s9215_s7 + $0x138] sm:$0xf0] }
 0x29a   : > { %5518 = vmatpush.bf16.msrb.mxu2 %v7703_v60  ;;  %v6104_v60 = vld [vmem:[%s9215_s7 + $0x1b8] sm:$0xf0]  ;;  %v7980_v27 = vld [vmem:[%s9215_s7 + $0x16c] sm:$0xf] }
 0x29b   : > { %5531 = vmatpush.bf16.msrb.mxu3 %v7831_v0  ;;  %v6360_v0 = vld [vmem:[%s9215_s7 + $0x3b8] sm:$0xf0]  ;;  %v6107_v15 = vor.u32 %v7988_v56, %v6104_v60  ;;  %v8012_v39 = vld [vmem:[%s9215_s7 + $0x26c] sm:$0xf] }
 0x29c   : > { %5493 = vmatpush.bf16.msrb.mxu0 %v7431_v10  ;;  %v6363_v7 = vor.u32 %v8052_v63, %v6360_v0  ;;  %v6216_v10 = vld [vmem:[%s9215_s7 + $0x298] sm:$0xf0]  ;;  %v5287_v12 = vpop.f32.mrf.mxu0  ;;  %v8044_v40 = vld [vmem:[%s9215_s7 + $0x36c] sm:$0xf]  ;;  %v6203_v47 = vor.u32 %v8012_v39, %v6200_v58 }
 0x29d   : > { %5506 = vmatpush.bf16.msrb.mxu1 %v7559_v17  ;;  %v5963_v17 = vor.u32 %v7952_v3, %v5960_v5  ;;  %v5288_v19 = vadd.f32 %v5287_v12, %v5275_v11  ;;  %v6219_v22 = vor.u32 %v8016_v9, %v6216_v10  ;;  %v7944_v48 = vld [vmem:[%s9215_s7 + $0x4c] sm:$0xf]  ;;  %v6184_v56 = vld [vmem:[%s9215_s7 + $0x258] sm:$0xf0] }
 0x29e   : > { %5519 = vmatpush.bf16.msrb.mxu2 %v7687_v18  ;;  %v5300_v18 = vpop.f32.mrf.mxu1  ;;  %v7976_v51 = vld [vmem:[%s9215_s7 + $0x14c] sm:$0xf]  ;;  %v5912_v5 = vld [vmem:[%s9215_s7 + $0x38] sm:$0xf0] }
 0x29f   : > { %5532 = vmatpush.bf16.msrb.mxu3 %v7815_v24  ;;  %5494 = vmatmul.bf16.vlgmr.msrb.gmra.mxu0 %v9544_v23  ;;  %v7948_v24 = vld [vmem:[%s9215_s7 + $0x6c] sm:$0xf]  ;;  %v5301_v45 = vadd.f32 %v5300_v18, %v5288_v19  ;;  %v6168_v10 = vld [vmem:[%s9215_s7 + $0x238] sm:$0xf0] }
 0x2a0   : > { %5538 = vmatpush.bf16.msra.mxu0 %v6011_v26  ;;  %5507 = vmatmul.bf16.vlgmr.msrb.gmra.mxu1 %v9551_v31  ;;  %v5944_v26 = vld [vmem:[%s9215_s7 + $0x78] sm:$0xf0]  ;;  %v8008_v55 = vld [vmem:[%s9215_s7 + $0x24c] sm:$0xf] }
 0x2a1   : > { %5551 = vmatpush.bf16.msra.mxu1 %v6139_v32  ;;  %5520 = vmatmul.bf16.vlgmr.msrb.gmra.mxu2 %v9549_v28  ;;  %v6347_v32 = vor.u32 %v8048_v14, %v6344_v16  ;;  %v5947_v2 = vor.u32 %v7948_v24, %v5944_v26  ;;  %v8040_v61 = vld [vmem:[%s9215_s7 + $0x34c] sm:$0xf]  ;;  %v6296_v14 = vld [vmem:[%s9215_s7 + $0x338] sm:$0xf0] }
 0x2a2   : > { %5564 = vmatpush.bf16.msra.mxu2 %v6267_v34  ;;  %5533 = vmatmul.bf16.vlgmr.msrb.gmra.mxu3 %v9555_v35  ;;  %v6072_v34 = vld [vmem:[%s9215_s7 + $0x178] sm:$0xf0]  ;;  %v7940_v3 = vld [vmem:[%s9215_s7 + $0x2c] sm:$0xf] }
 0x2a3   : > { %5577 = vmatpush.bf16.msra.mxu3 %v6395_v43  ;;  %v6328_v43 = vld [vmem:[%s9215_s7 + $0x378] sm:$0xf0]  ;;  %v6075_v46 = vor.u32 %v7980_v27, %v6072_v34  ;;  %v7972_v53 = vld [vmem:[%s9215_s7 + $0x12c] sm:$0xf]  ;;  %v5915_v16 = vor.u32 %v7940_v3, %v5912_v5 }
 0x2a4   : > { %5539 = vmatpush.bf16.msra.mxu0 %v5995_v49  ;;  %v5928_v49 = vld [vmem:[%s9215_s7 + $0x58] sm:$0xf0]  ;;  %v5289_v54 = vpop.f32.mrf.mxu0  ;;  %v8004_v9 = vld [vmem:[%s9215_s7 + $0x22c] sm:$0xf]  ;;  %v6043_v19 = vor.u32 %v7972_v53, %v6040_v8 }
 0x2a5   : > { %5552 = vmatpush.bf16.msra.mxu1 %v6123_v37  ;;  %v6331_v37 = vor.u32 %v8044_v40, %v6328_v43  ;;  %v5326_v60 = vpop.f32.mrf.mxu3  ;;  %v5931_v63 = vor.u32 %v7944_v48, %v5928_v49  ;;  %v8036_v12 = vld [vmem:[%s9215_s7 + $0x32c] sm:$0xf]  ;;  %v5896_v18 = vld [vmem:[%s9215_s7 + $0x18] sm:$0xf0] }
 0x2a6   : > { %5565 = vmatpush.bf16.msra.mxu2 %v6251_v52  ;;  %v5313_v52 = vpop.f32.mrf.mxu2  ;;  %v5302_v0 = vpop.f32.mrf.mxu1  ;;  %v8000_v24 = vld [vmem:[%s9215_s7 + $0x20c] sm:$0xf]  ;;  %v6299_v26 = vor.u32 %v8036_v12, %v6296_v14  ;;  %v6152_v27 = vld [vmem:[%s9215_s7 + $0x218] sm:$0xf0] }
 0x2a7   : > { %5578 = vmatpush.bf16.msra.mxu3 %v6379_v57  ;;  %v5314_v57 = vadd.f32 %v5313_v52, %v5301_v45  ;;  %v6280_v34 = vld [vmem:[%s9215_s7 + $0x318] sm:$0xf0]  ;;  %v8092_v58 = vld [vmem:[%s9215_s7 + $0x4ec] sm:$0xf] }
 0x2a8   : > { %5540 = vmatpush.bf16.msra.mxu0 %v5979_v1  ;;  %v6520_v40 = vld [vmem:[%s9215_s7 + $0x4f8] sm:$0xf0]  ;;  %v8124_v43 = vld [vmem:[%s9215_s7 + $0x5ec] sm:$0xf] }
 0x2a9   : > { %5553 = vmatpush.bf16.msra.mxu1 %v6107_v15  ;;  %v5327_v1 = vadd.f32 %v5326_v60, %v5314_v57  ;;  %v6059_v15 = vor.u32 %v7976_v51, %v6056_v59  ;;  %v6776_v48 = vld [vmem:[%s9215_s7 + $0x6f8] sm:$0xf0]  ;;  %v6155_v51 = vor.u32 %v8000_v24, %v6152_v27  ;;  %v8088_v60 = vld [vmem:[%s9215_s7 + $0x4cc] sm:$0xf] }
 0x2aa   : > { %5566 = vmatpush.bf16.msra.mxu2 %v6235_v13  ;;  %v6187_v13 = vor.u32 %v8008_v55, %v6184_v56  ;;  %v6904_v52 = vld [vmem:[%s9215_s7 + $0x7f8] sm:$0xf0]  ;;  %v6523_v55 = vor.u32 %v8092_v58, %v6520_v40  ;;  %v8152_v0 = vld [vmem:[%s9215_s7 + $0x6cc] sm:$0xf] }
 0x2ab   : > { %5579 = vmatpush.bf16.msra.mxu3 %v6363_v7  ;;  %v6315_v7 = vor.u32 %v8040_v61, %v6312_v62  ;;  %v5746_v11 = vpack.c.bf16 %v5327_v1, %v9874_v36  ;;  %v6024_v36 = vld [vmem:[%s9215_s7 + $0x118] sm:$0xf0]  ;;  %v8120_v62 = vld [vmem:[%s9215_s7 + $0x5cc] sm:$0xf] }
 0x2ac   : > { %5541 = vmatpush.bf16.msra.mxu0 %v5963_v17  ;;  %v7936_v17 = vld [vmem:[%s9215_s7 + $0xc] sm:$0xf]  ;;  %v6504_v61 = vld [vmem:[%s9215_s7 + $0x4d8] sm:$0xf0] }
 0x2ad   : > { %5554 = vmatpush.bf16.msra.mxu1 %v6091_v50  ;;  %5748 = vst [vmem:[%s10195_s6] sm:$0xff] %v5746_v11  ;;  %v6171_v50 = vor.u32 %v8004_v9, %v6168_v10  ;;  %v5899_v45 = vor.u32 %v7936_v17, %v5896_v18  ;;  %v6760_v1 = vld [vmem:[%s9215_s7 + $0x6d8] sm:$0xf0]  ;;  %v6507_v3 = vor.u32 %v8088_v60, %v6504_v61  ;;  %v8116_v9 = vld [vmem:[%s9215_s7 + $0x5ac] sm:$0xf] }
 0x2ae   : > { %5567 = vmatpush.bf16.msra.mxu2 %v6219_v22  ;;  %v7968_v22 = vld [vmem:[%s9215_s7 + $0x10c] sm:$0xf]  ;;  %v5315_v39 = vpop.f32.mrf.mxu2  ;;  %v6763_v53 = vor.u32 %v8152_v0, %v6760_v1  ;;  %v6488_v8 = vld [vmem:[%s9215_s7 + $0x4b8] sm:$0xf0] }
 0x2af   : > { %5580 = vmatpush.bf16.msra.mxu3 %v6347_v32  ;;  %v8032_v32 = vld [vmem:[%s9215_s7 + $0x30c] sm:$0xf]  ;;  %v6027_v49 = vor.u32 %v7968_v22, %v6024_v36  ;;  %v6616_v11 = vld [vmem:[%s9215_s7 + $0x5b8] sm:$0xf0] }
 0x2b0   : > { %5542 = vmatpush.bf16.msra.mxu0 %v5947_v2  ;;  %v5328_v2 = vpop.f32.mrf.mxu3  ;;  %v6283_v59 = vor.u32 %v8032_v32, %v6280_v34  ;;  %v8148_v12 = vld [vmem:[%s9215_s7 + $0x6ac] sm:$0xf]  ;;  %v6744_v14 = vld [vmem:[%s9215_s7 + $0x6b8] sm:$0xf0] }
 0x2b1   : > { %5555 = vmatpush.bf16.msra.mxu1 %v6075_v46  ;;  %v6648_v46 = vld [vmem:[%s9215_s7 + $0x5f8] sm:$0xf0]  ;;  %v8112_v36 = vld [vmem:[%s9215_s7 + $0x58c] sm:$0xf] }
 0x2b2   : > { %5568 = vmatpush.bf16.msra.mxu2 %v6203_v47  ;;  %v8156_v47 = vld [vmem:[%s9215_s7 + $0x6ec] sm:$0xf]  ;;  %v6651_v56 = vor.u32 %v8124_v43, %v6648_v46  ;;  %v6872_v17 = vld [vmem:[%s9215_s7 + $0x7b8] sm:$0xf0] }
 0x2b3   : > { %5581 = vmatpush.bf16.msra.mxu3 %v6331_v37  ;;  %v8188_v37 = vld [vmem:[%s9215_s7 + $0x7ec] sm:$0xf]  ;;  %v6779_v57 = vor.u32 %v8156_v47, %v6776_v48  ;;  %v6472_v22 = vld [vmem:[%s9215_s7 + $0x498] sm:$0xf0] }
 0x2b4   : > { %5543 = vmatpush.bf16.msra.mxu0 %v5931_v63  ;;  %v6907_v54 = vor.u32 %v8188_v37, %v6904_v52  ;;  %v6632_v63 = vld [vmem:[%s9215_s7 + $0x5d8] sm:$0xf0]  ;;  %v8176_v27 = vld [vmem:[%s9215_s7 + $0x78c] sm:$0xf] }
 0x2b5   : > { %5556 = vmatpush.bf16.msra.mxu1 %v6059_v15  ;;  %v8184_v15 = vld [vmem:[%s9215_s7 + $0x7cc] sm:$0xf]  ;;  %v6635_v5 = vor.u32 %v8120_v62, %v6632_v63  ;;  %v6600_v24 = vld [vmem:[%s9215_s7 + $0x598] sm:$0xf0] }
 0x2b6   : > { %5569 = vmatpush.bf16.msra.mxu2 %v6187_v13  ;;  %v6888_v13 = vld [vmem:[%s9215_s7 + $0x7d8] sm:$0xf0]  ;;  %v6603_v39 = vor.u32 %v8112_v36, %v6600_v24  ;;  %v8076_v40 = vld [vmem:[%s9215_s7 + $0x46c] sm:$0xf] }
 0x2b7   : > { %5582 = vmatpush.bf16.msra.mxu3 %v6315_v7  ;;  %v8084_v7 = vld [vmem:[%s9215_s7 + $0x4ac] sm:$0xf]  ;;  %v6891_v10 = vor.u32 %v8184_v15, %v6888_v13  ;;  %v6856_v32 = vld [vmem:[%s9215_s7 + $0x798] sm:$0xf0] }
 0x2b8   : > { %5544 = vmatpush.bf16.msra.mxu0 %v5915_v16  ;;  %v8180_v16 = vld [vmem:[%s9215_s7 + $0x7ac] sm:$0xf]  ;;  %v6491_v18 = vor.u32 %v8084_v7, %v6488_v8  ;;  %v6456_v43 = vld [vmem:[%s9215_s7 + $0x478] sm:$0xf0]  ;;  %v6859_v46 = vor.u32 %v8176_v27, %v6856_v32 }
 0x2b9   : > { %5557 = vmatpush.bf16.msra.mxu1 %v6043_v19  ;;  %v6619_v19 = vor.u32 %v8116_v9, %v6616_v11  ;;  %v8108_v2 = vld [vmem:[%s9215_s7 + $0x56c] sm:$0xf]  ;;  %v6584_v47 = vld [vmem:[%s9215_s7 + $0x578] sm:$0xf0] }
 0x2ba   : > { %5570 = vmatpush.bf16.msra.mxu2 %v6171_v50  ;;  %v6747_v50 = vor.u32 %v8148_v12, %v6744_v14  ;;  %v8140_v48 = vld [vmem:[%s9215_s7 + $0x66c] sm:$0xf]  ;;  %v6840_v52 = vld [vmem:[%s9215_s7 + $0x778] sm:$0xf0] }
 0x2bb   : > { %5583 = vmatpush.bf16.msra.mxu3 %v6299_v26  ;;  %v6728_v26 = vld [vmem:[%s9215_s7 + $0x698] sm:$0xf0]  ;;  %v8172_v37 = vld [vmem:[%s9215_s7 + $0x76c] sm:$0xf] }
 0x2bc   : > { %5545 = vmatpush.bf16.msra.mxu0 %v5899_v45  ;;  %v5339_v34 = vpop.f32.mrf.mxu0  ;;  %v6440_v60 = vld [vmem:[%s9215_s7 + $0x458] sm:$0xf0]  ;;  %v8104_v61 = vld [vmem:[%s9215_s7 + $0x54c] sm:$0xf] }
 0x2bd   : > { %5558 = vmatpush.bf16.msra.mxu1 %v6027_v49  ;;  %v5352_v45 = vpop.f32.mrf.mxu1  ;;  %v6712_v49 = vld [vmem:[%s9215_s7 + $0x678] sm:$0xf0]  ;;  %v8136_v0 = vld [vmem:[%s9215_s7 + $0x64c] sm:$0xf] }
 0x2be   : > { %5571 = vmatpush.bf16.msra.mxu2 %v6155_v51  ;;  %v5353_v51 = vadd.f32 %v5352_v45, %v5339_v34  ;;  %v6568_v63 = vld [vmem:[%s9215_s7 + $0x558] sm:$0xf0]  ;;  %v8068_v11 = vld [vmem:[%s9215_s7 + $0x42c] sm:$0xf] }
 0x2bf   : > { %5584 = vmatpush.bf16.msra.mxu3 %v6283_v59  ;;  %5546 = vmatmul.bf16.vlgmr.msra.gmra.mxu0 %v9324_v20  ;;  %v6875_v20 = vor.u32 %v8180_v16, %v6872_v17  ;;  %v6459_v59 = vor.u32 %v8076_v40, %v6456_v43  ;;  %v6696_v1 = vld [vmem:[%s9215_s7 + $0x658] sm:$0xf0]  ;;  %v6571_v9 = vor.u32 %v8104_v61, %v6568_v63  ;;  %v8100_v14 = vld [vmem:[%s9215_s7 + $0x52c] sm:$0xf] }
 0x2c0   : > { %5590 = vmatpush.bf16.msrb.mxu0 %v6523_v55  ;;  %5559 = vmatmul.bf16.vlgmr.msra.gmra.mxu1 %v9327_v21  ;;  %v6587_v55 = vor.u32 %v8108_v2, %v6584_v47  ;;  %v6424_v12 = vld [vmem:[%s9215_s7 + $0x438] sm:$0xf0]  ;;  %v8096_v27 = vld [vmem:[%s9215_s7 + $0x50c] sm:$0xf] }
 0x2c1   : > { %5603 = vmatpush.bf16.msrb.mxu1 %v6651_v56  ;;  %5572 = vmatmul.bf16.vlgmr.msra.gmra.mxu2 %v9308_v4  ;;  %v8080_v4 = vld [vmem:[%s9215_s7 + $0x48c] sm:$0xf]  ;;  %v6715_v56 = vor.u32 %v8140_v48, %v6712_v49  ;;  %v6427_v36 = vor.u32 %v8068_v11, %v6424_v12  ;;  %v6408_v24 = vld [vmem:[%s9215_s7 + $0x418] sm:$0xf0] }
 0x2c2   : > { %5616 = vmatpush.bf16.msrb.mxu2 %v6779_v57  ;;  %5585 = vmatmul.bf16.vlgmr.msra.gmra.mxu3 %v9313_v6  ;;  %v8144_v6 = vld [vmem:[%s9215_s7 + $0x68c] sm:$0xf]  ;;  %v6475_v21 = vor.u32 %v8080_v4, %v6472_v22  ;;  %v6808_v22 = vld [vmem:[%s9215_s7 + $0x738] sm:$0xf0] }
 0x2c3   : > { %5629 = vmatpush.bf16.msrb.mxu3 %v6907_v54  ;;  %v6731_v58 = vor.u32 %v8144_v6, %v6728_v26  ;;  %v8072_v57 = vld [vmem:[%s9215_s7 + $0x44c] sm:$0xf]  ;;  %v6843_v54 = vor.u32 %v8172_v37, %v6840_v52  ;;  %v6536_v32 = vld [vmem:[%s9215_s7 + $0x518] sm:$0xf0] }
 0x2c4   : > { %5591 = vmatpush.bf16.msrb.mxu0 %v6507_v3  ;;  %v5365_v62 = vpop.f32.mrf.mxu2  ;;  %v8168_v3 = vld [vmem:[%s9215_s7 + $0x74c] sm:$0xf]  ;;  %v5341_v8 = vpop.f32.mrf.mxu0  ;;  %v6792_v43 = vld [vmem:[%s9215_s7 + $0x718] sm:$0xf0]  ;;  %v6539_v52 = vor.u32 %v8096_v27, %v6536_v32 }
 0x2c5   : > { %5604 = vmatpush.bf16.msrb.mxu1 %v6635_v5  ;;  %v5366_v15 = vadd.f32 %v5365_v62, %v5353_v51  ;;  %v5378_v13 = vpop.f32.mrf.mxu3  ;;  %v6824_v5 = vld [vmem:[%s9215_s7 + $0x758] sm:$0xf0]  ;;  %v5354_v16 = vpop.f32.mrf.mxu1  ;;  %v8164_v4 = vld [vmem:[%s9215_s7 + $0x72c] sm:$0xf] }
 0x2c6   : > { %5617 = vmatpush.bf16.msrb.mxu2 %v6763_v53  ;;  %v6443_v53 = vor.u32 %v8072_v57, %v6440_v60  ;;  %v6827_v17 = vor.u32 %v8168_v3, %v6824_v5  ;;  %v8160_v40 = vld [vmem:[%s9215_s7 + $0x70c] sm:$0xf]  ;;  %v7160_v49 = vld [vmem:[%s9215_s7 + $0x9f8] sm:$0xf0] }
 0x2c7   : > { %5630 = vmatpush.bf16.msrb.mxu3 %v6891_v10  ;;  %v10264_v7 = vadd.f32 %v5378_v13, %v5366_v15  ;;  %v6699_v10 = vor.u32 %v8136_v0, %v6696_v1  ;;  %v8220_v45 = vld [vmem:[%s9215_s7 + $0x8ec] sm:$0xf]  ;;  %v7288_v37 = vld [vmem:[%s9215_s7 + $0xaf8] sm:$0xf0]  ;;  %v6795_v57 = vor.u32 %v8160_v40, %v6792_v43 }
 0x2c8   : > { %5592 = vmatpush.bf16.msrb.mxu0 %v6491_v18  ;;  %v6552_v18 = vld [vmem:[%s9215_s7 + $0x538] sm:$0xf0]  ;;  %v8252_v47 = vld [vmem:[%s9215_s7 + $0x9ec] sm:$0xf] }
 0x2c9   : > { %5605 = vmatpush.bf16.msrb.mxu1 %v6619_v19  ;;  %v8132_v19 = vld [vmem:[%s9215_s7 + $0x62c] sm:$0xf]  ;;  %v6555_v6 = vor.u32 %v8100_v14, %v6552_v18  ;;  %v7163_v61 = vor.u32 %v8252_v47, %v7160_v49  ;;  %v7016_v63 = vld [vmem:[%s9215_s7 + $0x8d8] sm:$0xf0] }
 0x2ca   : > { %5618 = vmatpush.bf16.msrb.mxu2 %v6747_v50  ;;  %v6680_v50 = vld [vmem:[%s9215_s7 + $0x638] sm:$0xf0]  ;;  %v8284_v51 = vld [vmem:[%s9215_s7 + $0xaec] sm:$0xf] }
 0x2cb   : > { %5631 = vmatpush.bf16.msrb.mxu3 %v6875_v20  ;;  %v8064_v20 = vld [vmem:[%s9215_s7 + $0x40c] sm:$0xf]  ;;  %v6683_v26 = vor.u32 %v8132_v19, %v6680_v50  ;;  %v7291_v62 = vor.u32 %v8284_v51, %v7288_v37  ;;  %v7144_v15 = vld [vmem:[%s9215_s7 + $0x9d8] sm:$0xf0] }
 0x2cc   : > { %5593 = vmatpush.bf16.msrb.mxu0 %v6475_v21  ;;  %v8128_v21 = vld [vmem:[%s9215_s7 + $0x60c] sm:$0xf]  ;;  %v5367_v34 = vpop.f32.mrf.mxu2  ;;  %v6411_v48 = vor.u32 %v8064_v20, %v6408_v24  ;;  %v7272_v3 = vld [vmem:[%s9215_s7 + $0xad8] sm:$0xf0] }
 0x2cd   : > { %5606 = vmatpush.bf16.msrb.mxu1 %v6603_v39  ;;  %v6811_v39 = vor.u32 %v8164_v4, %v6808_v22  ;;  %v5380_v2 = vpop.f32.mrf.mxu3  ;;  %v8248_v0 = vld [vmem:[%s9215_s7 + $0x9cc] sm:$0xf]  ;;  %v7000_v12 = vld [vmem:[%s9215_s7 + $0x8b8] sm:$0xf0] }
 0x2ce   : > { %5619 = vmatpush.bf16.msrb.mxu2 %v6731_v58  ;;  %v6664_v58 = vld [vmem:[%s9215_s7 + $0x618] sm:$0xf0]  ;;  %v8280_v13 = vld [vmem:[%s9215_s7 + $0xacc] sm:$0xf] }
 0x2cf   : > { %5632 = vmatpush.bf16.msrb.mxu3 %v6859_v46  ;;  %v7032_v46 = vld [vmem:[%s9215_s7 + $0x8f8] sm:$0xf0]  ;;  %v8312_v5 = vld [vmem:[%s9215_s7 + $0xbcc] sm:$0xf] }
 0x2d0   : > { %5594 = vmatpush.bf16.msrb.mxu0 %v6459_v59  ;;  %v6667_v59 = vor.u32 %v8128_v21, %v6664_v58  ;;  %v7035_v60 = vor.u32 %v8220_v45, %v7032_v46  ;;  %v8212_v11 = vld [vmem:[%s9215_s7 + $0x8ac] sm:$0xf]  ;;  %v7256_v19 = vld [vmem:[%s9215_s7 + $0xab8] sm:$0xf0] }
 0x2d1   : > { %5607 = vmatpush.bf16.msrb.mxu1 %v6587_v55  ;;  %v8316_v55 = vld [vmem:[%s9215_s7 + $0xbec] sm:$0xf]  ;;  %v7384_v4 = vld [vmem:[%s9215_s7 + $0xbb8] sm:$0xf0]  ;;  %v7003_v22 = vor.u32 %v8212_v11, %v7000_v12 }
 0x2d2   : > { %5620 = vmatpush.bf16.msrb.mxu2 %v6715_v56  ;;  %v7416_v56 = vld [vmem:[%s9215_s7 + $0xbf8] sm:$0xf0]  ;;  %v8244_v14 = vld [vmem:[%s9215_s7 + $0x9ac] sm:$0xf] }
 0x2d3   : > { %5633 = vmatpush.bf16.msrb.mxu3 %v6843_v54  ;;  %v8216_v54 = vld [vmem:[%s9215_s7 + $0x8cc] sm:$0xf]  ;;  %v7419_v1 = vor.u32 %v8316_v55, %v7416_v56  ;;  %v6984_v24 = vld [vmem:[%s9215_s7 + $0x898] sm:$0xf0] }
 0x2d4   : > { %5595 = vmatpush.bf16.msrb.mxu0 %v6443_v53  ;;  %v7400_v53 = vld [vmem:[%s9215_s7 + $0xbd8] sm:$0xf0]  ;;  %v7019_v8 = vor.u32 %v8216_v54, %v7016_v63  ;;  %v8276_v18 = vld [vmem:[%s9215_s7 + $0xaac] sm:$0xf] }
 0x2d5   : > { %5608 = vmatpush.bf16.msrb.mxu1 %v6571_v9  ;;  %v7147_v9 = vor.u32 %v8248_v0, %v7144_v15  ;;  %v7403_v16 = vor.u32 %v8312_v5, %v7400_v53  ;;  %v8308_v50 = vld [vmem:[%s9215_s7 + $0xbac] sm:$0xf]  ;;  %v7240_v27 = vld [vmem:[%s9215_s7 + $0xa98] sm:$0xf0] }
 0x2d6   : > { %5621 = vmatpush.bf16.msrb.mxu2 %v6699_v10  ;;  %v7275_v10 = vor.u32 %v8280_v13, %v7272_v3  ;;  %v8208_v20 = vld [vmem:[%s9215_s7 + $0x88c] sm:$0xf]  ;;  %v7368_v21 = vld [vmem:[%s9215_s7 + $0xb98] sm:$0xf0] }
 0x2d7   : > { %5634 = vmatpush.bf16.msrb.mxu3 %v6827_v17  ;;  %v7128_v17 = vld [vmem:[%s9215_s7 + $0x9b8] sm:$0xf0]  ;;  %v8304_v32 = vld [vmem:[%s9215_s7 + $0xb8c] sm:$0xf] }
 0x2d8   : > { %5596 = vmatpush.bf16.msrb.mxu0 %v6427_v36  ;;  %v7259_v36 = vor.u32 %v8276_v18, %v7256_v19  ;;  %v8204_v40 = vld [vmem:[%s9215_s7 + $0x86c] sm:$0xf]  ;;  %v6968_v43 = vld [vmem:[%s9215_s7 + $0x878] sm:$0xf0]  ;;  %v7371_v47 = vor.u32 %v8304_v32, %v7368_v21 }
 0x2d9   : > { %5609 = vmatpush.bf16.msrb.mxu1 %v6555_v6  ;;  %v7112_v6 = vld [vmem:[%s9215_s7 + $0x998] sm:$0xf0]  ;;  %v8236_v2 = vld [vmem:[%s9215_s7 + $0x96c] sm:$0xf]  ;;  %v6971_v55 = vor.u32 %v8204_v40, %v6968_v43 }
 0x2da   : > { %5622 = vmatpush.bf16.msrb.mxu2 %v6683_v26  ;;  %v8272_v26 = vld [vmem:[%s9215_s7 + $0xa8c] sm:$0xf]  ;;  %v7224_v51 = vld [vmem:[%s9215_s7 + $0xa78] sm:$0xf0] }
 0x2db   : > { %5635 = vmatpush.bf16.msrb.mxu3 %v6811_v39  ;;  %v7243_v58 = vor.u32 %v8272_v26, %v7240_v27  ;;  %v8268_v49 = vld [vmem:[%s9215_s7 + $0xa6c] sm:$0xf]  ;;  %v7080_v63 = vld [vmem:[%s9215_s7 + $0x958] sm:$0xf0] }
 0x2dc   : > { %5597 = vmatpush.bf16.msrb.mxu0 %v6411_v48  ;;  %v5391_v34 = vpop.f32.mrf.mxu0  ;;  %v7096_v48 = vld [vmem:[%s9215_s7 + $0x978] sm:$0xf0]  ;;  %v8300_v37 = vld [vmem:[%s9215_s7 + $0xb6c] sm:$0xf]  ;;  %v7227_v56 = vor.u32 %v8268_v49, %v7224_v51 }
 0x2dd   : > { %5610 = vmatpush.bf16.msrb.mxu1 %v6539_v52  ;;  %v5392_v45 = vadd.f32 %v5391_v34, %v10264_v7  ;;  %v5404_v46 = vpop.f32.mrf.mxu1  ;;  %v7352_v52 = vld [vmem:[%s9215_s7 + $0xb78] sm:$0xf0]  ;;  %v7099_v7 = vor.u32 %v8236_v2, %v7096_v48  ;;  %v8264_v0 = vld [vmem:[%s9215_s7 + $0xa4c] sm:$0xf] }
 0x2de   : > { %5623 = vmatpush.bf16.msrb.mxu2 %v6667_v59  ;;  %v7355_v54 = vor.u32 %v8300_v37, %v7352_v52  ;;  %v8296_v3 = vld [vmem:[%s9215_s7 + $0xb4c] sm:$0xf]  ;;  %v7336_v5 = vld [vmem:[%s9215_s7 + $0xb58] sm:$0xf0] }
 0x2df   : > { %5636 = vmatpush.bf16.msrb.mxu3 %v6795_v57  ;;  %5598 = vmatmul.bf16.vlgmr.msrb.gmra.mxu0 %v9387_v41  ;;  %v8240_v41 = vld [vmem:[%s9215_s7 + $0x98c] sm:$0xf]  ;;  %v5405_v59 = vadd.f32 %v5404_v46, %v5392_v45  ;;  %v7339_v18 = vor.u32 %v8296_v3, %v7336_v5  ;;  %v7064_v19 = vld [vmem:[%s9215_s7 + $0x938] sm:$0xf0] }
 0x2e0   : > { %5642 = vmatpush.bf16.msra.mxu0 %v7035_v60  ;;  %5611 = vmatmul.bf16.vlgmr.msrb.gmra.mxu1 %v9391_v44  ;;  %v6987_v44 = vor.u32 %v8208_v20, %v6984_v24  ;;  %v7115_v39 = vor.u32 %v8240_v41, %v7112_v6  ;;  %v8200_v57 = vld [vmem:[%s9215_s7 + $0x84c] sm:$0xf]  ;;  %v6952_v60 = vld [vmem:[%s9215_s7 + $0x858] sm:$0xf0] }
 0x2e1   : > { %5655 = vmatpush.bf16.msra.mxu1 %v7163_v61  ;;  %5624 = vmatmul.bf16.vlgmr.msrb.gmra.mxu2 %v9383_v38  ;;  %v7131_v38 = vor.u32 %v8244_v14, %v7128_v17  ;;  %v8232_v61 = vld [vmem:[%s9215_s7 + $0x94c] sm:$0xf]  ;;  %v6955_v53 = vor.u32 %v8200_v57, %v6952_v60  ;;  %v6936_v14 = vld [vmem:[%s9215_s7 + $0x838] sm:$0xf0] }
 0x2e2   : > { %5668 = vmatpush.bf16.msra.mxu2 %v7291_v62  ;;  %5637 = vmatmul.bf16.vlgmr.msrb.gmra.mxu3 %v9389_v42  ;;  %v7387_v42 = vor.u32 %v8308_v50, %v7384_v4  ;;  %v8196_v12 = vld [vmem:[%s9215_s7 + $0x82c] sm:$0xf]  ;;  %v7192_v4 = vld [vmem:[%s9215_s7 + $0xa38] sm:$0xf0] }
 0x2e3   : > { %5681 = vmatpush.bf16.msra.mxu3 %v7419_v1  ;;  %v7208_v1 = vld [vmem:[%s9215_s7 + $0xa58] sm:$0xf0]  ;;  %v8260_v50 = vld [vmem:[%s9215_s7 + $0xa2c] sm:$0xf] }
 0x2e4   : > { %5643 = vmatpush.bf16.msra.mxu0 %v7019_v8  ;;  %v5417_v62 = vpop.f32.mrf.mxu2  ;;  %v7211_v11 = vor.u32 %v8264_v0, %v7208_v1  ;;  %v8192_v20 = vld [vmem:[%s9215_s7 + $0x80c] sm:$0xf]  ;;  %v6920_v24 = vld [vmem:[%s9215_s7 + $0x818] sm:$0xf0] }
 0x2e5   : > { %5656 = vmatpush.bf16.msra.mxu1 %v7147_v9  ;;  %v5418_v15 = vadd.f32 %v5417_v62, %v5405_v59  ;;  %v5430_v13 = vpop.f32.mrf.mxu3  ;;  %v5393_v9 = vpop.f32.mrf.mxu0  ;;  %v8224_v6 = vld [vmem:[%s9215_s7 + $0x90c] sm:$0xf]  ;;  %v7048_v26 = vld [vmem:[%s9215_s7 + $0x918] sm:$0xf0]  ;;  %v6923_v45 = vor.u32 %v8192_v20, %v6920_v24 }
 0x2e6   : > { %5669 = vmatpush.bf16.msra.mxu2 %v7275_v10  ;;  %v7083_v10 = vor.u32 %v8232_v61, %v7080_v63  ;;  %v5406_v17 = vpop.f32.mrf.mxu1  ;;  %v8256_v27 = vld [vmem:[%s9215_s7 + $0xa0c] sm:$0xf]  ;;  %v7544_v43 = vld [vmem:[%s9215_s7 + $0xcf8] sm:$0xf0]  ;;  %v7051_v49 = vor.u32 %v8224_v6, %v7048_v26 }
 0x2e7   : > { %5682 = vmatpush.bf16.msra.mxu3 %v7403_v16  ;;  %v10335_v8 = vadd.f32 %v5430_v13, %v5418_v15  ;;  %v8228_v16 = vld [vmem:[%s9215_s7 + $0x92c] sm:$0xf]  ;;  %v7672_v46 = vld [vmem:[%s9215_s7 + $0xdf8] sm:$0xf0] }
 0x2e8   : > { %5644 = vmatpush.bf16.msra.mxu0 %v7003_v22  ;;  %v8292_v22 = vld [vmem:[%s9215_s7 + $0xb2c] sm:$0xf]  ;;  %v7067_v41 = vor.u32 %v8228_v16, %v7064_v19  ;;  %v7800_v48 = vld [vmem:[%s9215_s7 + $0xef8] sm:$0xf0] }
 0x2e9   : > { %5657 = vmatpush.bf16.msra.mxu1 %v7131_v38  ;;  %v7320_v38 = vld [vmem:[%s9215_s7 + $0xb38] sm:$0xf0]  ;;  %v8288_v34 = vld [vmem:[%s9215_s7 + $0xb0c] sm:$0xf] }
 0x2ea   : > { %5670 = vmatpush.bf16.msra.mxu2 %v7259_v36  ;;  %v6939_v36 = vor.u32 %v8196_v12, %v6936_v14  ;;  %v7323_v21 = vor.u32 %v8292_v22, %v7320_v38  ;;  %v8348_v40 = vld [vmem:[%s9215_s7 + $0xcec] sm:$0xf]  ;;  %v7928_v52 = vld [vmem:[%s9215_s7 + $0xff8] sm:$0xf0] }
 0x2eb   : > { %5683 = vmatpush.bf16.msra.mxu3 %v7387_v42  ;;  %v7195_v42 = vor.u32 %v8260_v50, %v7192_v4  ;;  %v8380_v2 = vld [vmem:[%s9215_s7 + $0xdec] sm:$0xf]  ;;  %v7528_v60 = vld [vmem:[%s9215_s7 + $0xcd8] sm:$0xf0] }
 0x2ec   : > { %5645 = vmatpush.bf16.msra.mxu0 %v6987_v44  ;;  %v5419_v32 = vpop.f32.mrf.mxu2  ;;  %v7176_v44 = vld [vmem:[%s9215_s7 + $0xa18] sm:$0xf0]  ;;  %v8444_v37 = vld [vmem:[%s9215_s7 + $0xfec] sm:$0xf] }
 0x2ed   : > { %5658 = vmatpush.bf16.msra.mxu1 %v7115_v39  ;;  %v7304_v39 = vld [vmem:[%s9215_s7 + $0xb18] sm:$0xf0]  ;;  %v7179_v51 = vor.u32 %v8256_v27, %v7176_v44  ;;  %v8344_v57 = vld [vmem:[%s9215_s7 + $0xccc] sm:$0xf]  ;;  %v7931_v62 = vor.u32 %v8444_v37, %v7928_v52 }
 0x2ee   : > { %5671 = vmatpush.bf16.msra.mxu2 %v7243_v58  ;;  %v5432_v58 = vpop.f32.mrf.mxu3  ;;  %v7307_v59 = vor.u32 %v8288_v34, %v7304_v39  ;;  %v8376_v61 = vld [vmem:[%s9215_s7 + $0xdcc] sm:$0xf]  ;;  %v7784_v0 = vld [vmem:[%s9215_s7 + $0xed8] sm:$0xf0]  ;;  %v7531_v13 = vor.u32 %v8344_v57, %v7528_v60 }
 0x2ef   : > { %5684 = vmatpush.bf16.msra.mxu3 %v7371_v47  ;;  %v8412_v47 = vld [vmem:[%s9215_s7 + $0xeec] sm:$0xf]  ;;  %v7912_v15 = vld [vmem:[%s9215_s7 + $0xfd8] sm:$0xf0] }
 0x2f0   : > { %5646 = vmatpush.bf16.msra.mxu0 %v6971_v55  ;;  %v7547_v55 = vor.u32 %v8348_v40, %v7544_v43  ;;  %v8408_v63 = vld [vmem:[%s9215_s7 + $0xecc] sm:$0xf]  ;;  %v7512_v9 = vld [vmem:[%s9215_s7 + $0xcb8] sm:$0xf0] }
 0x2f1   : > { %5659 = vmatpush.bf16.msra.mxu1 %v7099_v7  ;;  %v7675_v7 = vor.u32 %v8380_v2, %v7672_v46  ;;  %v8440_v1 = vld [vmem:[%s9215_s7 + $0xfcc] sm:$0xf]  ;;  %v7787_v5 = vor.u32 %v8408_v63, %v7784_v0  ;;  %v7640_v12 = vld [vmem:[%s9215_s7 + $0xdb8] sm:$0xf0] }
 0x2f2   : > { %5672 = vmatpush.bf16.msra.mxu2 %v7227_v56  ;;  %v7803_v56 = vor.u32 %v8412_v47, %v7800_v48  ;;  %v8404_v14 = vld [vmem:[%s9215_s7 + $0xeac] sm:$0xf]  ;;  %v7768_v16 = vld [vmem:[%s9215_s7 + $0xeb8] sm:$0xf0] }
 0x2f3   : > { %5685 = vmatpush.bf16.msra.mxu3 %v7355_v54  ;;  %v7656_v54 = vld [vmem:[%s9215_s7 + $0xdd8] sm:$0xf0]  ;;  %v8436_v17 = vld [vmem:[%s9215_s7 + $0xfac] sm:$0xf]  ;;  %v7771_v50 = vor.u32 %v8404_v14, %v7768_v16 }
 0x2f4   : > { %5647 = vmatpush.bf16.msra.mxu0 %v6955_v53  ;;  %v7659_v3 = vor.u32 %v8376_v61, %v7656_v54  ;;  %v8340_v53 = vld [vmem:[%s9215_s7 + $0xcac] sm:$0xf]  ;;  %v7496_v22 = vld [vmem:[%s9215_s7 + $0xc98] sm:$0xf0] }
 0x2f5   : > { %5660 = vmatpush.bf16.msra.mxu1 %v7083_v10  ;;  %v8372_v10 = vld [vmem:[%s9215_s7 + $0xdac] sm:$0xf]  ;;  %v7624_v38 = vld [vmem:[%s9215_s7 + $0xd98] sm:$0xf0] }
 0x2f6   : > { %5673 = vmatpush.bf16.msra.mxu2 %v7211_v11  ;;  %v7915_v11 = vor.u32 %v8440_v1, %v7912_v15  ;;  %v7643_v19 = vor.u32 %v8372_v10, %v7640_v12  ;;  %v8336_v4 = vld [vmem:[%s9215_s7 + $0xc8c] sm:$0xf]  ;;  %v7752_v20 = vld [vmem:[%s9215_s7 + $0xe98] sm:$0xf0] }
 0x2f7   : > { %5686 = vmatpush.bf16.msra.mxu3 %v7339_v18  ;;  %v7896_v18 = vld [vmem:[%s9215_s7 + $0xfb8] sm:$0xf0]  ;;  %v8432_v24 = vld [vmem:[%s9215_s7 + $0xf8c] sm:$0xf]  ;;  %v7499_v6 = vor.u32 %v8336_v4, %v7496_v22 }
 0x2f8   : > { %5648 = vmatpush.bf16.msra.mxu0 %v6939_v36  ;;  %v8400_v36 = vld [vmem:[%s9215_s7 + $0xe8c] sm:$0xf]  ;;  %v7480_v44 = vld [vmem:[%s9215_s7 + $0xc78] sm:$0xf0] }
 0x2f9   : > { %5661 = vmatpush.bf16.msra.mxu1 %v7067_v41  ;;  %v7880_v41 = vld [vmem:[%s9215_s7 + $0xf98] sm:$0xf0]  ;;  %v7755_v32 = vor.u32 %v8400_v36, %v7752_v20  ;;  %v8364_v34 = vld [vmem:[%s9215_s7 + $0xd6c] sm:$0xf] }
 0x2fa   : > { %5674 = vmatpush.bf16.msra.mxu2 %v7195_v42  ;;  %v7883_v39 = vor.u32 %v8432_v24, %v7880_v41  ;;  %v7608_v40 = vld [vmem:[%s9215_s7 + $0xd78] sm:$0xf0]  ;;  %v8396_v43 = vld [vmem:[%s9215_s7 + $0xe6c] sm:$0xf] }
 0x2fb   : > { %5687 = vmatpush.bf16.msra.mxu3 %v7323_v21  ;;  %v8332_v21 = vld [vmem:[%s9215_s7 + $0xc6c] sm:$0xf]  ;;  %v7611_v47 = vor.u32 %v8364_v34, %v7608_v40  ;;  %v7576_v10 = vld [vmem:[%s9215_s7 + $0xd38] sm:$0xf0] }
 0x2fc   : > { %5649 = vmatpush.bf16.msra.mxu0 %v6923_v45  ;;  %v8428_v2 = vld [vmem:[%s9215_s7 + $0xf6c] sm:$0xf]  ;;  %v7864_v45 = vld [vmem:[%s9215_s7 + $0xf78] sm:$0xf0]  ;;  %v7483_v46 = vor.u32 %v8332_v21, %v7480_v44 }
 0x2fd   : > { %5662 = vmatpush.bf16.msra.mxu1 %v7051_v49  ;;  %v5456_v26 = vpop.f32.mrf.mxu1  ;;  %v8328_v49 = vld [vmem:[%s9215_s7 + $0xc4c] sm:$0xf]  ;;  %v7867_v52 = vor.u32 %v8428_v2, %v7864_v45  ;;  %v7704_v12 = vld [vmem:[%s9215_s7 + $0xe38] sm:$0xf0] }
 0x2fe   : > { %5675 = vmatpush.bf16.msra.mxu2 %v7179_v51  ;;  %v7464_v51 = vld [vmem:[%s9215_s7 + $0xc58] sm:$0xf0]  ;;  %v8360_v37 = vld [vmem:[%s9215_s7 + $0xd4c] sm:$0xf] }
 0x2ff   : > { %5688 = vmatpush.bf16.msra.mxu3 %v7307_v59  ;;  %5650 = vmatmul.bf16.vlgmr.msra.gmra.mxu0 %v9462_v25  ;;  %v7515_v25 = vor.u32 %v8340_v53, %v7512_v9  ;;  %v8424_v61 = vld [vmem:[%s9215_s7 + $0xf4c] sm:$0xf]  ;;  %v7467_v63 = vor.u32 %v8328_v49, %v7464_v51  ;;  %v7832_v16 = vld [vmem:[%s9215_s7 + $0xf38] sm:$0xf0] }
 0x300   : > { %5694 = vmatpush.bf16.msrb.mxu0 %v7547_v55  ;;  %5663 = vmatmul.bf16.vlgmr.msra.gmra.mxu1 %v9469_v30  ;;  %v7899_v30 = vor.u32 %v8436_v17, %v7896_v18  ;;  %v7592_v55 = vld [vmem:[%s9215_s7 + $0xd58] sm:$0xf0]  ;;  %v8356_v53 = vld [vmem:[%s9215_s7 + $0xd2c] sm:$0xf] }
 0x301   : > { %5707 = vmatpush.bf16.msrb.mxu1 %v7675_v7  ;;  %5676 = vmatmul.bf16.vlgmr.msra.gmra.mxu2 %v9467_v29  ;;  %v8368_v29 = vld [vmem:[%s9215_s7 + $0xd8c] sm:$0xf]  ;;  %v7595_v15 = vor.u32 %v8360_v37, %v7592_v55  ;;  %v7579_v18 = vor.u32 %v8356_v53, %v7576_v10 }
 0x302   : > { %5720 = vmatpush.bf16.msrb.mxu2 %v7803_v56  ;;  %5689 = vmatmul.bf16.vlgmr.msra.gmra.mxu3 %v9473_v33  ;;  %v5443_v33 = vpop.f32.mrf.mxu0  ;;  %v7627_v27 = vor.u32 %v8368_v29, %v7624_v38  ;;  %v8392_v7 = vld [vmem:[%s9215_s7 + $0xe4c] sm:$0xf]  ;;  %v7720_v56 = vld [vmem:[%s9215_s7 + $0xe58] sm:$0xf0] }
 0x303   : > { %5733 = vmatpush.bf16.msrb.mxu3 %v7931_v62  ;;  %v5444_v42 = vadd.f32 %v5443_v33, %v10335_v8  ;;  %v7736_v8 = vld [vmem:[%s9215_s7 + $0xe78] sm:$0xf0]  ;;  %v8420_v14 = vld [vmem:[%s9215_s7 + $0xf2c] sm:$0xf] }
 0x304   : > { %5695 = vmatpush.bf16.msrb.mxu0 %v7531_v13  ;;  %v7739_v48 = vor.u32 %v8396_v43, %v7736_v8  ;;  %v5469_v59 = vpop.f32.mrf.mxu2  ;;  %v7848_v62 = vld [vmem:[%s9215_s7 + $0xf58] sm:$0xf0]  ;;  %v7723_v13 = vor.u32 %v8392_v7, %v7720_v56  ;;  %v8352_v4 = vld [vmem:[%s9215_s7 + $0xd0c] sm:$0xf]  ;;  %v7835_v22 = vor.u32 %v8420_v14, %v7832_v16 }
 0x305   : > { %5708 = vmatpush.bf16.msrb.mxu1 %v7659_v3  ;;  %v5457_v58 = vadd.f32 %v5456_v26, %v5444_v42  ;;  %v5482_v60 = vpop.f32.mrf.mxu3  ;;  %v5458_v0 = vpop.f32.mrf.mxu1  ;;  %v8324_v3 = vld [vmem:[%s9215_s7 + $0xc2c] sm:$0xf]  ;;  %v7851_v9 = vor.u32 %v8424_v61, %v7848_v62  ;;  %v7560_v29 = vld [vmem:[%s9215_s7 + $0xd18] sm:$0xf0] }
 0x306   : > { %5721 = vmatpush.bf16.msrb.mxu2 %v7787_v5  ;;  %v7448_v5 = vld [vmem:[%s9215_s7 + $0xc38] sm:$0xf0]  ;;  %v8416_v20 = vld [vmem:[%s9215_s7 + $0xf0c] sm:$0xf]  ;;  %v7563_v42 = vor.u32 %v8352_v4, %v7560_v29 }
 0x307   : > { %5734 = vmatpush.bf16.msrb.mxu3 %v7915_v11  ;;  %v5470_v57 = vadd.f32 %v5469_v59, %v5457_v58  ;;  %v8388_v11 = vld [vmem:[%s9215_s7 + $0xe2c] sm:$0xf]  ;;  %v7451_v17 = vor.u32 %v8324_v3, %v7448_v5  ;;  %v7688_v38 = vld [vmem:[%s9215_s7 + $0xe18] sm:$0xf0] }
 0x308   : > { %5696 = vmatpush.bf16.msrb.mxu0 %v7515_v25  ;;  %v7707_v25 = vor.u32 %v8388_v11, %v7704_v12  ;;  %v7816_v33 = vld [vmem:[%s9215_s7 + $0xf18] sm:$0xf0] }
 0x309   : > { %5709 = vmatpush.bf16.msrb.mxu1 %v7643_v19  ;;  %v5483_v1 = vadd.f32 %v5482_v60, %v5470_v57  ;;  %v8320_v19 = vld [vmem:[%s9215_s7 + $0xc0c] sm:$0xf]  ;;  %v7819_v26 = vor.u32 %v8416_v20, %v7816_v33 }
 0x30a   : > { %5722 = vmatpush.bf16.msrb.mxu2 %v7771_v50  ;;  %v5445_v54 = vpop.f32.mrf.mxu0  ;;  %v7432_v50 = vld [vmem:[%s9215_s7 + $0xc18] sm:$0xf0] }
 0x30b   : > { %5735 = vmatpush.bf16.msrb.mxu3 %v7899_v30  ;;  %v8384_v30 = vld [vmem:[%s9215_s7 + $0xe0c] sm:$0xf]  ;;  %v7435_v41 = vor.u32 %v8320_v19, %v7432_v50 }
 0x30c   : > { %5697 = vmatpush.bf16.msrb.mxu0 %v7499_v6  ;;  %v5471_v36 = vpop.f32.mrf.mxu2  ;;  %v7691_v6 = vor.u32 %v8384_v30, %v7688_v38 }
 0x30d   : > { %5710 = vmatpush.bf16.msrb.mxu1 %v7627_v27  ;;  %v5484_v24 = vpop.f32.mrf.mxu3 }
 0x30e   : > { %5723 = vmatpush.bf16.msrb.mxu2 %v7755_v32 }
 0x30f   : > { %5736 = vmatpush.bf16.msrb.mxu3 %v7883_v39 }
 0x310   : > { %5698 = vmatpush.bf16.msrb.mxu0 %v7483_v46 }
 0x311   : > { %5711 = vmatpush.bf16.msrb.mxu1 %v7611_v47 }
 0x312   : > { %5724 = vmatpush.bf16.msrb.mxu2 %v7739_v48 }
 0x313   : > { %5737 = vmatpush.bf16.msrb.mxu3 %v7867_v52 }
 0x314   : > { %5699 = vmatpush.bf16.msrb.mxu0 %v7467_v63 }
 0x315   : > { %5712 = vmatpush.bf16.msrb.mxu1 %v7595_v15 }
 0x316   : > { %5725 = vmatpush.bf16.msrb.mxu2 %v7723_v13 }
 0x317   : > { %5738 = vmatpush.bf16.msrb.mxu3 %v7851_v9 }
 0x318   : > { %5700 = vmatpush.bf16.msrb.mxu0 %v7451_v17 }
 0x319   : > { %5713 = vmatpush.bf16.msrb.mxu1 %v7579_v18 }
 0x31a   : > { %5726 = vmatpush.bf16.msrb.mxu2 %v7707_v25 }
 0x31b   : > { %5739 = vmatpush.bf16.msrb.mxu3 %v7835_v22 }
 0x31c   : > { %5701 = vmatpush.bf16.msrb.mxu0 %v7435_v41  ;;  %v5495_v27 = vpop.f32.mrf.mxu0 }
 0x31d   : > { %5714 = vmatpush.bf16.msrb.mxu1 %v7563_v42  ;;  %v5496_v32 = vadd.f32 %v5495_v27, %v5483_v1  ;;  %v5508_v21 = vpop.f32.mrf.mxu1 }
 0x31e   : > { %5727 = vmatpush.bf16.msrb.mxu2 %v7691_v6 }
 0x31f   : > { %5740 = vmatpush.bf16.msrb.mxu3 %v7819_v26  ;;  %5702 = vmatmul.bf16.vlgmr.msrb.gmra.mxu0 %v9544_v23  ;;  %v5509_v44 = vadd.f32 %v5508_v21, %v5496_v32 }
 0x320   : > { %5715 = vmatmul.bf16.vlgmr.msrb.gmra.mxu1 %v9551_v31 }
 0x321   : > { %5728 = vmatmul.bf16.vlgmr.msrb.gmra.mxu2 %v9549_v28 }
 0x322   : > { %5741 = vmatmul.bf16.vlgmr.msrb.gmra.mxu3 %v9555_v35 }
 0x324   : > { %v5521_v34 = vpop.f32.mrf.mxu2  ;;  %v5497_v40 = vpop.f32.mrf.mxu0 }
 0x325   : > { %v5522_v39 = vadd.f32 %v5521_v34, %v5509_v44  ;;  %v5534_v58 = vpop.f32.mrf.mxu3  ;;  %v5510_v43 = vpop.f32.mrf.mxu1 }
 0x327   : > { %v5535_v8 = vadd.f32 %v5534_v58, %v5522_v39 }
 0x32c   : > { %v5523_v2 = vpop.f32.mrf.mxu2 }
 0x32d   : > { %v5536_v45 = vpop.f32.mrf.mxu3 }
 0x33c   : > { %v5547_v46 = vpop.f32.mrf.mxu0 }
 0x33d   : > { %v5560_v23 = vpop.f32.mrf.mxu1 }
 0x33e   : > { %v5561_v47 = vadd.f32 %v5560_v23, %v5547_v46 }
 0x344   : > { %v5573_v31 = vpop.f32.mrf.mxu2  ;;  %v5549_v35 = vpop.f32.mrf.mxu0 }
 0x345   : > { %v5574_v48 = vadd.f32 %v5573_v31, %v5561_v47  ;;  %v5586_v28 = vpop.f32.mrf.mxu3  ;;  %v5562_v51 = vpop.f32.mrf.mxu1 }
 0x347   : > { %v5587_v49 = vadd.f32 %v5586_v28, %v5574_v48 }
 0x34c   : > { %v5575_v37 = vpop.f32.mrf.mxu2 }
 0x34d   : > { %v5588_v52 = vpop.f32.mrf.mxu3 }
 0x35c   : > { %v5599_v59 = vpop.f32.mrf.mxu0 }
 0x35d   : > { %v5612_v55 = vpop.f32.mrf.mxu1  ;;  %v5600_v0 = vadd.f32 %v5599_v59, %v5587_v49 }
 0x35f   : > { %v5613_v3 = vadd.f32 %v5612_v55, %v5600_v0 }
 0x364   : > { %v5625_v7 = vpop.f32.mrf.mxu2  ;;  %v5601_v57 = vpop.f32.mrf.mxu0 }
 0x365   : > { %v5638_v56 = vpop.f32.mrf.mxu3  ;;  %v5614_v60 = vpop.f32.mrf.mxu1  ;;  %v5626_v53 = vadd.f32 %v5625_v7, %v5613_v3 }
 0x367   : > { %v5639_v11 = vadd.f32 %v5638_v56, %v5626_v53 }
 0x36c   : > { %v5627_v61 = vpop.f32.mrf.mxu2 }
 0x36d   : > { %v5640_v62 = vpop.f32.mrf.mxu3 }
 0x37c   : > { %v5651_v54 = vpop.f32.mrf.mxu0 }
 0x37d   : > { %v5664_v63 = vpop.f32.mrf.mxu1  ;;  %v5652_v12 = vadd.f32 %v5651_v54, %v5639_v11 }
 0x37f   : > { %v5665_v14 = vadd.f32 %v5664_v63, %v5652_v12 }
 0x384   : > { %v5677_v1 = vpop.f32.mrf.mxu2  ;;  %v5653_v13 = vpop.f32.mrf.mxu0 }
 0x385   : > { %v5690_v15 = vpop.f32.mrf.mxu3  ;;  %v5666_v5 = vpop.f32.mrf.mxu1  ;;  %v5678_v16 = vadd.f32 %v5677_v1, %v5665_v14 }
 0x387   : > { %v5691_v17 = vadd.f32 %v5690_v15, %v5678_v16 }
 0x38c   : > { %v5679_v9 = vpop.f32.mrf.mxu2 }
 0x38d   : > { %v5692_v10 = vpop.f32.mrf.mxu3 }
 0x39c   : > { %v5703_v18 = vpop.f32.mrf.mxu0 }
 0x39d   : > { %v5716_v25 = vpop.f32.mrf.mxu1  ;;  %v5704_v19 = vadd.f32 %v5703_v18, %v5691_v17 }
 0x39f   : > { %v5717_v50 = vadd.f32 %v5716_v25, %v5704_v19 }
 0x3a4   : > { %v5729_v4 = vpop.f32.mrf.mxu2  ;;  %v5705_v30 = vpop.f32.mrf.mxu0 }
 0x3a5   : > { %v5730_v22 = vadd.f32 %v5729_v4, %v5717_v50  ;;  %v5742_v29 = vpop.f32.mrf.mxu3  ;;  %v5718_v38 = vpop.f32.mrf.mxu1 }
 0x3a7   : > { %v5743_v36 = vadd.f32 %v5742_v29, %v5730_v22 }
 0x3a9   : > { %v5747_v20 = vpack.c.bf16 %v5743_v36, %v5535_v8 }
 0x3ab   : > { %5749 = vst [vmem:[%s10195_s6 + $0x8] sm:$0xff] %v5747_v20 }
 0x3ac   : > { %v5731_v33 = vpop.f32.mrf.mxu2 }
 0x3ad   : > { %v5744_v24 = vpop.f32.mrf.mxu3 }
 0x3ae PF: > { %s12_s13 = sadd.s32 1, %s8573_s13   ;;  %s10451_s9 = smov %s8561_s10 }
 0x3af   : > { %p9_p12 = scmp.ge.s32.totalorder %s12_s13, 10   ;;  %s10452_s10 = smov %s8641_s17 }
 0x3b0   : > { %s10453_s11 = smov %s8569_s12  ;;  %s10454_s12 = smov %s10456_s14 }
 0x3b1   :  { %11 = sbr.rel (!%p9_p12) target bundleno = 3 (0x3), region = 116 }

// kernel: prm_forward.3
= control target key start
LH: loop header
LB: loop body
LE: loop exit
PB: predicated region body
PF: predicated region fallthrough
CT: control target
= control target key end

     0   :  { %s5093_s21 = smov 0   ;;  %s5095_s22 = smov 0   ;;  %s6319_s0 = inlined_call_operand.vmem [shape: bf16[4,2,4096], index: 0, kind: input, shape index: {}, may-alias: {0,1,2,3}]   ;;  %s6320_s1 = inlined_call_operand.vmem [shape: bf16[4,2,4096], index: 1, kind: input, shape index: {}, may-alias: {0,1,2,3}]   ;;  %s6321_s2 = inlined_call_operand.vmem [shape: bf16[4,2,4096], index: 2, kind: input, shape index: {}, may-alias: {0,1,2,3}]   ;;  %s6322_s3 = inlined_call_operand.vmem [shape: bf16[4,2,4096], index: 3, kind: input, shape index: {}, may-alias: {0,1,2,3}]   ;;  %s6323_s4 = inlined_call_operand.vmem [shape: bf16[1024,2048], index: 4, kind: input, shape index: {}]   ;;  %s6324_s5 = inlined_call_operand.vmem [shape: f32[4,2,2048], index: 5, kind: input, shape index: {}]   ;;  %s6325_s6 = inlined_call_operand.vmem [shape: f32[4,2,2048], index: 6, kind: output, shape index: {}]  }
   0x1   :  { %s5097_s23 = smov 0   ;;  %s5099_s24 = smov 0  }
   0x2   :  { %s5101_s25 = smov 0   ;;  %s5103_s26 = smov 0  }
   0x3   :  { %s5105_s27 = smov 0  }
   0x4 LB: > { %s28_s28 = sadd.s32 1, %s5048_s25  ;;  %s35_s29 = sadd.s32 1, %s5052_s26  ;;  %s5056_s27 = sphi %s5105_s27, %s16_s27   ;;  %s5052_s26 = sphi %s5103_s26, %s6331_s26   ;;  %s5048_s25 = sphi %s5101_s25, %s6330_s25   ;;  %s5044_s24 = sphi %s5099_s24, %s6329_s24   ;;  %s5040_s23 = sphi %s5097_s23, %s6328_s23   ;;  %s5036_s22 = sphi %s5095_s22, %s6327_s22   ;;  %s5032_s21 = sphi %s5093_s21, %s6326_s21  }
   0x5   : > { %p29_p0 = scmp.ge.s32.totalorder %s28_s28, 4  ;;  %s256_s30 = sadd.s32 1, %s5036_s22 }
   0x6   : > { %p263_p1 = scmp.ne.s32.totalorder %s5036_s22, %s5032_s21  ;;  %p264_p2 = scmp.eq.s32.totalorder %s5056_s27, 0 }
   0x7   : > { %s6333_s28 = smov (%p29_p0, %s28_s28), 0  ;;  %s6335_s29 = smov (!%p29_p0, %s35_s29), %s5052_s26 }
   0x8   : > { %s253_s7 = ssub.s32 %s5048_s25, %s6333_s28  ;;  %p265_p3 = por %p264_p2, %p263_p1 }
   0x9   : > { %p37_p4 = scmp.ge.s32.totalorder %s6335_s29, 4  ;;  %p254_p5 = scmp.eq.s32.totalorder %s253_s7, 0 }
   0xa   : > { %p3624_p6 = scmp.ge.s32.totalorder %s5056_s27, 16 }
   0xb   : > { %s6337_s29 = smov (%p37_p4, %s6335_s29), 0 }
   0xc   : > { %s5142_s8 = scalar_select %p254_p5, %s5036_s22, %s256_s30  }
   0xd   : > { %349 = sbr.rel (%p3624_p6) target bundleno = 278 (0x116), region = 16 }
  0x12   : > { %501 = sbr.rel (!%p265_p3) target bundleno = 278 (0x116), region = 36  ;;  %s503_s9 = sand.u32 (%p265_p3), 1, %s5036_s22  }
  0x13   : > { %s4681_s10 = sshll.u32 (%p265_p3), %s5048_s25, 4  ;;  %s3625_s11 = sshll.u32 (%p265_p3), %s503_s9, 11 }
  0x14   : > { %s5150_s14 = scalar_lea.vmem (%p265_p3), %s6323_s4, %s4681_s10  ;;  %s5155_s15 = scalar_lea.vmem (%p265_p3), [#allocation2], %s3625_s11 }
  0x15   : > { %v521_v0 = vld [vmem:[%s5150_s14] sm:$0xff] (%p265_p3)  ;;  %v523_v1 = vld [vmem:[%s5150_s14 + $0x8] sm:$0xff] (%p265_p3) }
  0x16   : > { %v525_v2 = vld [vmem:[%s5150_s14 + $0x40] sm:$0xff] (%p265_p3)  ;;  %522 = vst [vmem:[%s5155_s15] sm:$0xff] (%p265_p3), %v521_v0  ;;  %v527_v3 = vld [vmem:[%s5150_s14 + $0x48] sm:$0xff] (%p265_p3) }
  0x17   : > { %524 = vst [vmem:[%s5155_s15 + $0x8] sm:$0xff] %v523_v1  ;;  %v529_v4 = vld [vmem:[%s5150_s14 + $0x80] sm:$0xff]  ;;  %v531_v5 = vld [vmem:[%s5150_s14 + $0x88] sm:$0xff] }
  0x18   : > { %526 = vst [vmem:[%s5155_s15 + $0x10] sm:$0xff] %v525_v2  ;;  %v533_v6 = vld [vmem:[%s5150_s14 + $0xc0] sm:$0xff]  ;;  %v535_v7 = vld [vmem:[%s5150_s14 + $0xc8] sm:$0xff] }
  0x19   : > { %528 = vst [vmem:[%s5155_s15 + $0x18] sm:$0xff] %v527_v3  ;;  %v537_v8 = vld [vmem:[%s5150_s14 + $0x100] sm:$0xff]  ;;  %v539_v9 = vld [vmem:[%s5150_s14 + $0x108] sm:$0xff] }
  0x1a   : > { %530 = vst [vmem:[%s5155_s15 + $0x20] sm:$0xff] %v529_v4  ;;  %v541_v10 = vld [vmem:[%s5150_s14 + $0x140] sm:$0xff]  ;;  %v543_v11 = vld [vmem:[%s5150_s14 + $0x148] sm:$0xff] }
  0x1b   : > { %532 = vst [vmem:[%s5155_s15 + $0x28] sm:$0xff] %v531_v5  ;;  %v545_v12 = vld [vmem:[%s5150_s14 + $0x180] sm:$0xff]  ;;  %v547_v13 = vld [vmem:[%s5150_s14 + $0x188] sm:$0xff] }
  0x1c   : > { %534 = vst [vmem:[%s5155_s15 + $0x30] sm:$0xff] %v533_v6  ;;  %v549_v14 = vld [vmem:[%s5150_s14 + $0x1c0] sm:$0xff]  ;;  %v551_v15 = vld [vmem:[%s5150_s14 + $0x1c8] sm:$0xff] }
  0x1d   : > { %536 = vst [vmem:[%s5155_s15 + $0x38] sm:$0xff] %v535_v7  ;;  %v553_v16 = vld [vmem:[%s5150_s14 + $0x200] sm:$0xff]  ;;  %v555_v17 = vld [vmem:[%s5150_s14 + $0x208] sm:$0xff] }
  0x1e   : > { %538 = vst [vmem:[%s5155_s15 + $0x40] sm:$0xff] %v537_v8  ;;  %v557_v18 = vld [vmem:[%s5150_s14 + $0x240] sm:$0xff]  ;;  %v559_v19 = vld [vmem:[%s5150_s14 + $0x248] sm:$0xff] }
  0x1f   : > { %540 = vst [vmem:[%s5155_s15 + $0x48] sm:$0xff] %v539_v9  ;;  %v561_v20 = vld [vmem:[%s5150_s14 + $0x280] sm:$0xff]  ;;  %v563_v21 = vld [vmem:[%s5150_s14 + $0x288] sm:$0xff] }
  0x20   : > { %542 = vst [vmem:[%s5155_s15 + $0x50] sm:$0xff] %v541_v10  ;;  %v565_v22 = vld [vmem:[%s5150_s14 + $0x2c0] sm:$0xff]  ;;  %v567_v23 = vld [vmem:[%s5150_s14 + $0x2c8] sm:$0xff] }
  0x21   : > { %544 = vst [vmem:[%s5155_s15 + $0x58] sm:$0xff] %v543_v11  ;;  %v569_v24 = vld [vmem:[%s5150_s14 + $0x300] sm:$0xff]  ;;  %v571_v25 = vld [vmem:[%s5150_s14 + $0x308] sm:$0xff] }
  0x22   : > { %546 = vst [vmem:[%s5155_s15 + $0x60] sm:$0xff] %v545_v12  ;;  %v573_v26 = vld [vmem:[%s5150_s14 + $0x340] sm:$0xff]  ;;  %v575_v27 = vld [vmem:[%s5150_s14 + $0x348] sm:$0xff] }
  0x23   : > { %548 = vst [vmem:[%s5155_s15 + $0x68] sm:$0xff] %v547_v13  ;;  %v577_v28 = vld [vmem:[%s5150_s14 + $0x380] sm:$0xff]  ;;  %v579_v29 = vld [vmem:[%s5150_s14 + $0x388] sm:$0xff] }
  0x24   : > { %550 = vst [vmem:[%s5155_s15 + $0x70] sm:$0xff] %v549_v14  ;;  %v581_v30 = vld [vmem:[%s5150_s14 + $0x3c0] sm:$0xff]  ;;  %v583_v31 = vld [vmem:[%s5150_s14 + $0x3c8] sm:$0xff] }
  0x25   : > { %552 = vst [vmem:[%s5155_s15 + $0x78] sm:$0xff] %v551_v15  ;;  %v585_v32 = vld [vmem:[%s5150_s14 + $0x400] sm:$0xff]  ;;  %v587_v33 = vld [vmem:[%s5150_s14 + $0x408] sm:$0xff] }
  0x26   : > { %554 = vst [vmem:[%s5155_s15 + $0x80] sm:$0xff] %v553_v16  ;;  %v589_v34 = vld [vmem:[%s5150_s14 + $0x440] sm:$0xff]  ;;  %v591_v35 = vld [vmem:[%s5150_s14 + $0x448] sm:$0xff] }
  0x27   : > { %556 = vst [vmem:[%s5155_s15 + $0x88] sm:$0xff] %v555_v17  ;;  %v593_v36 = vld [vmem:[%s5150_s14 + $0x480] sm:$0xff]  ;;  %v595_v37 = vld [vmem:[%s5150_s14 + $0x488] sm:$0xff] }
  0x28   : > { %558 = vst [vmem:[%s5155_s15 + $0x90] sm:$0xff] %v557_v18  ;;  %v597_v38 = vld [vmem:[%s5150_s14 + $0x4c0] sm:$0xff]  ;;  %v599_v39 = vld [vmem:[%s5150_s14 + $0x4c8] sm:$0xff] }
  0x29   : > { %560 = vst [vmem:[%s5155_s15 + $0x98] sm:$0xff] %v559_v19  ;;  %v601_v40 = vld [vmem:[%s5150_s14 + $0x500] sm:$0xff]  ;;  %v603_v41 = vld [vmem:[%s5150_s14 + $0x508] sm:$0xff] }
  0x2a   : > { %562 = vst [vmem:[%s5155_s15 + $0xa0] sm:$0xff] %v561_v20  ;;  %v605_v42 = vld [vmem:[%s5150_s14 + $0x540] sm:$0xff]  ;;  %v607_v43 = vld [vmem:[%s5150_s14 + $0x548] sm:$0xff] }
  0x2b   : > { %564 = vst [vmem:[%s5155_s15 + $0xa8] sm:$0xff] %v563_v21  ;;  %v609_v44 = vld [vmem:[%s5150_s14 + $0x580] sm:$0xff]  ;;  %v611_v45 = vld [vmem:[%s5150_s14 + $0x588] sm:$0xff] }
  0x2c   : > { %566 = vst [vmem:[%s5155_s15 + $0xb0] sm:$0xff] %v565_v22  ;;  %v613_v46 = vld [vmem:[%s5150_s14 + $0x5c0] sm:$0xff]  ;;  %v615_v47 = vld [vmem:[%s5150_s14 + $0x5c8] sm:$0xff] }
  0x2d   : > { %568 = vst [vmem:[%s5155_s15 + $0xb8] sm:$0xff] %v567_v23  ;;  %v617_v48 = vld [vmem:[%s5150_s14 + $0x600] sm:$0xff]  ;;  %v619_v49 = vld [vmem:[%s5150_s14 + $0x608] sm:$0xff] }
  0x2e   : > { %570 = vst [vmem:[%s5155_s15 + $0xc0] sm:$0xff] %v569_v24  ;;  %v621_v50 = vld [vmem:[%s5150_s14 + $0x640] sm:$0xff]  ;;  %v623_v51 = vld [vmem:[%s5150_s14 + $0x648] sm:$0xff] }
  0x2f   : > { %572 = vst [vmem:[%s5155_s15 + $0xc8] sm:$0xff] %v571_v25  ;;  %v625_v52 = vld [vmem:[%s5150_s14 + $0x680] sm:$0xff]  ;;  %v627_v53 = vld [vmem:[%s5150_s14 + $0x688] sm:$0xff] }
  0x30   : > { %574 = vst [vmem:[%s5155_s15 + $0xd0] sm:$0xff] %v573_v26  ;;  %v629_v54 = vld [vmem:[%s5150_s14 + $0x6c0] sm:$0xff]  ;;  %v631_v55 = vld [vmem:[%s5150_s14 + $0x6c8] sm:$0xff] }
  0x31   : > { %576 = vst [vmem:[%s5155_s15 + $0xd8] sm:$0xff] %v575_v27  ;;  %v633_v56 = vld [vmem:[%s5150_s14 + $0x700] sm:$0xff]  ;;  %v635_v57 = vld [vmem:[%s5150_s14 + $0x708] sm:$0xff] }
  0x32   : > { %578 = vst [vmem:[%s5155_s15 + $0xe0] sm:$0xff] %v577_v28  ;;  %v637_v58 = vld [vmem:[%s5150_s14 + $0x740] sm:$0xff]  ;;  %v639_v59 = vld [vmem:[%s5150_s14 + $0x748] sm:$0xff] }
  0x33   : > { %580 = vst [vmem:[%s5155_s15 + $0xe8] sm:$0xff] %v579_v29  ;;  %v641_v60 = vld [vmem:[%s5150_s14 + $0x780] sm:$0xff]  ;;  %v643_v61 = vld [vmem:[%s5150_s14 + $0x788] sm:$0xff] }
  0x34   : > { %582 = vst [vmem:[%s5155_s15 + $0xf0] sm:$0xff] %v581_v30  ;;  %v645_v62 = vld [vmem:[%s5150_s14 + $0x7c0] sm:$0xff]  ;;  %v647_v63 = vld [vmem:[%s5150_s14 + $0x7c8] sm:$0xff] }
  0x35   : > { %584 = vst [vmem:[%s5155_s15 + $0xf8] sm:$0xff] %v583_v31  ;;  %v649_v0 = vld [vmem:[%s5150_s14 + $0x800] sm:$0xff]  ;;  %v651_v1 = vld [vmem:[%s5150_s14 + $0x808] sm:$0xff] }
  0x36   : > { %586 = vst [vmem:[%s5155_s15 + $0x100] sm:$0xff] %v585_v32  ;;  %v653_v2 = vld [vmem:[%s5150_s14 + $0x840] sm:$0xff]  ;;  %v655_v3 = vld [vmem:[%s5150_s14 + $0x848] sm:$0xff] }
  0x37   : > { %588 = vst [vmem:[%s5155_s15 + $0x108] sm:$0xff] %v587_v33  ;;  %v657_v4 = vld [vmem:[%s5150_s14 + $0x880] sm:$0xff]  ;;  %v659_v5 = vld [vmem:[%s5150_s14 + $0x888] sm:$0xff] }
  0x38   : > { %590 = vst [vmem:[%s5155_s15 + $0x110] sm:$0xff] %v589_v34  ;;  %v661_v6 = vld [vmem:[%s5150_s14 + $0x8c0] sm:$0xff]  ;;  %v663_v7 = vld [vmem:[%s5150_s14 + $0x8c8] sm:$0xff] }
  0x39   : > { %592 = vst [vmem:[%s5155_s15 + $0x118] sm:$0xff] %v591_v35  ;;  %v665_v8 = vld [vmem:[%s5150_s14 + $0x900] sm:$0xff]  ;;  %v667_v9 = vld [vmem:[%s5150_s14 + $0x908] sm:$0xff] }
  0x3a   : > { %594 = vst [vmem:[%s5155_s15 + $0x120] sm:$0xff] %v593_v36  ;;  %v669_v10 = vld [vmem:[%s5150_s14 + $0x940] sm:$0xff]  ;;  %v671_v11 = vld [vmem:[%s5150_s14 + $0x948] sm:$0xff] }
  0x3b   : > { %596 = vst [vmem:[%s5155_s15 + $0x128] sm:$0xff] %v595_v37  ;;  %v673_v12 = vld [vmem:[%s5150_s14 + $0x980] sm:$0xff]  ;;  %v675_v13 = vld [vmem:[%s5150_s14 + $0x988] sm:$0xff] }
  0x3c   : > { %598 = vst [vmem:[%s5155_s15 + $0x130] sm:$0xff] %v597_v38  ;;  %v677_v14 = vld [vmem:[%s5150_s14 + $0x9c0] sm:$0xff]  ;;  %v679_v15 = vld [vmem:[%s5150_s14 + $0x9c8] sm:$0xff] }
  0x3d   : > { %600 = vst [vmem:[%s5155_s15 + $0x138] sm:$0xff] %v599_v39  ;;  %v681_v16 = vld [vmem:[%s5150_s14 + $0xa00] sm:$0xff]  ;;  %v683_v17 = vld [vmem:[%s5150_s14 + $0xa08] sm:$0xff] }
  0x3e   : > { %602 = vst [vmem:[%s5155_s15 + $0x140] sm:$0xff] %v601_v40  ;;  %v685_v18 = vld [vmem:[%s5150_s14 + $0xa40] sm:$0xff]  ;;  %v687_v19 = vld [vmem:[%s5150_s14 + $0xa48] sm:$0xff] }
  0x3f   : > { %604 = vst [vmem:[%s5155_s15 + $0x148] sm:$0xff] %v603_v41  ;;  %v689_v20 = vld [vmem:[%s5150_s14 + $0xa80] sm:$0xff]  ;;  %v691_v21 = vld [vmem:[%s5150_s14 + $0xa88] sm:$0xff] }
  0x40   : > { %606 = vst [vmem:[%s5155_s15 + $0x150] sm:$0xff] %v605_v42  ;;  %v693_v22 = vld [vmem:[%s5150_s14 + $0xac0] sm:$0xff]  ;;  %v695_v23 = vld [vmem:[%s5150_s14 + $0xac8] sm:$0xff] }
  0x41   : > { %608 = vst [vmem:[%s5155_s15 + $0x158] sm:$0xff] %v607_v43  ;;  %v697_v24 = vld [vmem:[%s5150_s14 + $0xb00] sm:$0xff]  ;;  %v699_v25 = vld [vmem:[%s5150_s14 + $0xb08] sm:$0xff] }
  0x42   : > { %610 = vst [vmem:[%s5155_s15 + $0x160] sm:$0xff] %v609_v44  ;;  %v701_v26 = vld [vmem:[%s5150_s14 + $0xb40] sm:$0xff]  ;;  %v703_v27 = vld [vmem:[%s5150_s14 + $0xb48] sm:$0xff] }
  0x43   : > { %612 = vst [vmem:[%s5155_s15 + $0x168] sm:$0xff] %v611_v45  ;;  %v705_v28 = vld [vmem:[%s5150_s14 + $0xb80] sm:$0xff]  ;;  %v707_v29 = vld [vmem:[%s5150_s14 + $0xb88] sm:$0xff] }
  0x44   : > { %614 = vst [vmem:[%s5155_s15 + $0x170] sm:$0xff] %v613_v46  ;;  %v709_v30 = vld [vmem:[%s5150_s14 + $0xbc0] sm:$0xff]  ;;  %v711_v31 = vld [vmem:[%s5150_s14 + $0xbc8] sm:$0xff] }
  0x45   : > { %616 = vst [vmem:[%s5155_s15 + $0x178] sm:$0xff] %v615_v47  ;;  %v713_v32 = vld [vmem:[%s5150_s14 + $0xc00] sm:$0xff]  ;;  %v715_v33 = vld [vmem:[%s5150_s14 + $0xc08] sm:$0xff] }
  0x46   : > { %618 = vst [vmem:[%s5155_s15 + $0x180] sm:$0xff] %v617_v48  ;;  %v717_v34 = vld [vmem:[%s5150_s14 + $0xc40] sm:$0xff]  ;;  %v719_v35 = vld [vmem:[%s5150_s14 + $0xc48] sm:$0xff] }
  0x47   : > { %620 = vst [vmem:[%s5155_s15 + $0x188] sm:$0xff] %v619_v49  ;;  %v721_v36 = vld [vmem:[%s5150_s14 + $0xc80] sm:$0xff]  ;;  %v723_v37 = vld [vmem:[%s5150_s14 + $0xc88] sm:$0xff] }
  0x48   : > { %622 = vst [vmem:[%s5155_s15 + $0x190] sm:$0xff] %v621_v50  ;;  %v725_v38 = vld [vmem:[%s5150_s14 + $0xcc0] sm:$0xff]  ;;  %v727_v39 = vld [vmem:[%s5150_s14 + $0xcc8] sm:$0xff] }
  0x49   : > { %624 = vst [vmem:[%s5155_s15 + $0x198] sm:$0xff] %v623_v51  ;;  %v729_v40 = vld [vmem:[%s5150_s14 + $0xd00] sm:$0xff]  ;;  %v731_v41 = vld [vmem:[%s5150_s14 + $0xd08] sm:$0xff] }
  0x4a   : > { %626 = vst [vmem:[%s5155_s15 + $0x1a0] sm:$0xff] %v625_v52  ;;  %v733_v42 = vld [vmem:[%s5150_s14 + $0xd40] sm:$0xff]  ;;  %v735_v43 = vld [vmem:[%s5150_s14 + $0xd48] sm:$0xff] }
  0x4b   : > { %628 = vst [vmem:[%s5155_s15 + $0x1a8] sm:$0xff] %v627_v53  ;;  %v737_v44 = vld [vmem:[%s5150_s14 + $0xd80] sm:$0xff]  ;;  %v739_v45 = vld [vmem:[%s5150_s14 + $0xd88] sm:$0xff] }
  0x4c   : > { %630 = vst [vmem:[%s5155_s15 + $0x1b0] sm:$0xff] %v629_v54  ;;  %v741_v46 = vld [vmem:[%s5150_s14 + $0xdc0] sm:$0xff]  ;;  %v743_v47 = vld [vmem:[%s5150_s14 + $0xdc8] sm:$0xff] }
  0x4d   : > { %632 = vst [vmem:[%s5155_s15 + $0x1b8] sm:$0xff] %v631_v55  ;;  %v745_v48 = vld [vmem:[%s5150_s14 + $0xe00] sm:$0xff]  ;;  %v747_v49 = vld [vmem:[%s5150_s14 + $0xe08] sm:$0xff] }
  0x4e   : > { %634 = vst [vmem:[%s5155_s15 + $0x1c0] sm:$0xff] %v633_v56  ;;  %v749_v50 = vld [vmem:[%s5150_s14 + $0xe40] sm:$0xff]  ;;  %v751_v51 = vld [vmem:[%s5150_s14 + $0xe48] sm:$0xff] }
  0x4f   : > { %636 = vst [vmem:[%s5155_s15 + $0x1c8] sm:$0xff] %v635_v57  ;;  %v753_v52 = vld [vmem:[%s5150_s14 + $0xe80] sm:$0xff]  ;;  %v755_v53 = vld [vmem:[%s5150_s14 + $0xe88] sm:$0xff] }
  0x50   : > { %638 = vst [vmem:[%s5155_s15 + $0x1d0] sm:$0xff] %v637_v58  ;;  %v757_v54 = vld [vmem:[%s5150_s14 + $0xec0] sm:$0xff]  ;;  %v759_v55 = vld [vmem:[%s5150_s14 + $0xec8] sm:$0xff] }
  0x51   : > { %640 = vst [vmem:[%s5155_s15 + $0x1d8] sm:$0xff] %v639_v59  ;;  %v761_v56 = vld [vmem:[%s5150_s14 + $0xf00] sm:$0xff]  ;;  %v763_v57 = vld [vmem:[%s5150_s14 + $0xf08] sm:$0xff] }
  0x52   : > { %642 = vst [vmem:[%s5155_s15 + $0x1e0] sm:$0xff] %v641_v60  ;;  %v765_v58 = vld [vmem:[%s5150_s14 + $0xf40] sm:$0xff]  ;;  %v767_v59 = vld [vmem:[%s5150_s14 + $0xf48] sm:$0xff] }
  0x53   : > { %644 = vst [vmem:[%s5155_s15 + $0x1e8] sm:$0xff] %v643_v61  ;;  %v769_v60 = vld [vmem:[%s5150_s14 + $0xf80] sm:$0xff]  ;;  %v771_v61 = vld [vmem:[%s5150_s14 + $0xf88] sm:$0xff] }
  0x54   : > { %646 = vst [vmem:[%s5155_s15 + $0x1f0] sm:$0xff] %v645_v62  ;;  %v773_v62 = vld [vmem:[%s5150_s14 + $0xfc0] sm:$0xff] }
  0x55   : > { %648 = vst [vmem:[%s5155_s15 + $0x1f8] sm:$0xff] %v647_v63  ;;  %v775_v63 = vld [vmem:[%s5150_s14 + $0xfc8] sm:$0xff] }
  0x56   : > { %650 = vst [vmem:[%s5155_s15 + $0x200] sm:$0xff] %v649_v0  ;;  %v777_v0 = vld [vmem:[%s5150_s14 + $0x1000] sm:$0xff] }
  0x57   : > { %652 = vst [vmem:[%s5155_s15 + $0x208] sm:$0xff] %v651_v1  ;;  %v779_v1 = vld [vmem:[%s5150_s14 + $0x1008] sm:$0xff] }
  0x58   : > { %654 = vst [vmem:[%s5155_s15 + $0x210] sm:$0xff] %v653_v2  ;;  %v781_v2 = vld [vmem:[%s5150_s14 + $0x1040] sm:$0xff] }
  0x59   : > { %656 = vst [vmem:[%s5155_s15 + $0x218] sm:$0xff] %v655_v3  ;;  %v783_v3 = vld [vmem:[%s5150_s14 + $0x1048] sm:$0xff] }
  0x5a   : > { %658 = vst [vmem:[%s5155_s15 + $0x220] sm:$0xff] %v657_v4  ;;  %v785_v4 = vld [vmem:[%s5150_s14 + $0x1080] sm:$0xff] }
  0x5b   : > { %660 = vst [vmem:[%s5155_s15 + $0x228] sm:$0xff] %v659_v5  ;;  %v787_v5 = vld [vmem:[%s5150_s14 + $0x1088] sm:$0xff] }
  0x5c   : > { %662 = vst [vmem:[%s5155_s15 + $0x230] sm:$0xff] %v661_v6  ;;  %v789_v6 = vld [vmem:[%s5150_s14 + $0x10c0] sm:$0xff] }
  0x5d   : > { %664 = vst [vmem:[%s5155_s15 + $0x238] sm:$0xff] %v663_v7  ;;  %v791_v7 = vld [vmem:[%s5150_s14 + $0x10c8] sm:$0xff] }
  0x5e   : > { %666 = vst [vmem:[%s5155_s15 + $0x240] sm:$0xff] %v665_v8  ;;  %v793_v8 = vld [vmem:[%s5150_s14 + $0x1100] sm:$0xff] }
  0x5f   : > { %668 = vst [vmem:[%s5155_s15 + $0x248] sm:$0xff] %v667_v9  ;;  %v795_v9 = vld [vmem:[%s5150_s14 + $0x1108] sm:$0xff] }
  0x60   : > { %670 = vst [vmem:[%s5155_s15 + $0x250] sm:$0xff] %v669_v10  ;;  %v797_v10 = vld [vmem:[%s5150_s14 + $0x1140] sm:$0xff] }
  0x61   : > { %672 = vst [vmem:[%s5155_s15 + $0x258] sm:$0xff] %v671_v11  ;;  %v799_v11 = vld [vmem:[%s5150_s14 + $0x1148] sm:$0xff] }
  0x62   : > { %674 = vst [vmem:[%s5155_s15 + $0x260] sm:$0xff] %v673_v12  ;;  %v801_v12 = vld [vmem:[%s5150_s14 + $0x1180] sm:$0xff] }
  0x63   : > { %676 = vst [vmem:[%s5155_s15 + $0x268] sm:$0xff] %v675_v13  ;;  %v803_v13 = vld [vmem:[%s5150_s14 + $0x1188] sm:$0xff] }
  0x64   : > { %678 = vst [vmem:[%s5155_s15 + $0x270] sm:$0xff] %v677_v14  ;;  %v805_v14 = vld [vmem:[%s5150_s14 + $0x11c0] sm:$0xff] }
  0x65   : > { %680 = vst [vmem:[%s5155_s15 + $0x278] sm:$0xff] %v679_v15  ;;  %v807_v15 = vld [vmem:[%s5150_s14 + $0x11c8] sm:$0xff] }
  0x66   : > { %682 = vst [vmem:[%s5155_s15 + $0x280] sm:$0xff] %v681_v16  ;;  %v809_v16 = vld [vmem:[%s5150_s14 + $0x1200] sm:$0xff] }
  0x67   : > { %684 = vst [vmem:[%s5155_s15 + $0x288] sm:$0xff] %v683_v17  ;;  %v811_v17 = vld [vmem:[%s5150_s14 + $0x1208] sm:$0xff] }
  0x68   : > { %686 = vst [vmem:[%s5155_s15 + $0x290] sm:$0xff] %v685_v18  ;;  %v813_v18 = vld [vmem:[%s5150_s14 + $0x1240] sm:$0xff] }
  0x69   : > { %688 = vst [vmem:[%s5155_s15 + $0x298] sm:$0xff] %v687_v19  ;;  %v815_v19 = vld [vmem:[%s5150_s14 + $0x1248] sm:$0xff] }
  0x6a   : > { %690 = vst [vmem:[%s5155_s15 + $0x2a0] sm:$0xff] %v689_v20  ;;  %v817_v20 = vld [vmem:[%s5150_s14 + $0x1280] sm:$0xff] }
  0x6b   : > { %692 = vst [vmem:[%s5155_s15 + $0x2a8] sm:$0xff] %v691_v21  ;;  %v819_v21 = vld [vmem:[%s5150_s14 + $0x1288] sm:$0xff] }
  0x6c   : > { %694 = vst [vmem:[%s5155_s15 + $0x2b0] sm:$0xff] %v693_v22  ;;  %v821_v22 = vld [vmem:[%s5150_s14 + $0x12c0] sm:$0xff] }
  0x6d   : > { %696 = vst [vmem:[%s5155_s15 + $0x2b8] sm:$0xff] %v695_v23  ;;  %v823_v23 = vld [vmem:[%s5150_s14 + $0x12c8] sm:$0xff] }
  0x6e   : > { %698 = vst [vmem:[%s5155_s15 + $0x2c0] sm:$0xff] %v697_v24  ;;  %v825_v24 = vld [vmem:[%s5150_s14 + $0x1300] sm:$0xff] }
  0x6f   : > { %700 = vst [vmem:[%s5155_s15 + $0x2c8] sm:$0xff] %v699_v25  ;;  %v827_v25 = vld [vmem:[%s5150_s14 + $0x1308] sm:$0xff] }
  0x70   : > { %702 = vst [vmem:[%s5155_s15 + $0x2d0] sm:$0xff] %v701_v26  ;;  %v829_v26 = vld [vmem:[%s5150_s14 + $0x1340] sm:$0xff] }
  0x71   : > { %704 = vst [vmem:[%s5155_s15 + $0x2d8] sm:$0xff] %v703_v27  ;;  %v831_v27 = vld [vmem:[%s5150_s14 + $0x1348] sm:$0xff] }
  0x72   : > { %706 = vst [vmem:[%s5155_s15 + $0x2e0] sm:$0xff] %v705_v28  ;;  %v833_v28 = vld [vmem:[%s5150_s14 + $0x1380] sm:$0xff] }
  0x73   : > { %708 = vst [vmem:[%s5155_s15 + $0x2e8] sm:$0xff] %v707_v29  ;;  %v835_v29 = vld [vmem:[%s5150_s14 + $0x1388] sm:$0xff] }
  0x74   : > { %710 = vst [vmem:[%s5155_s15 + $0x2f0] sm:$0xff] %v709_v30  ;;  %v837_v30 = vld [vmem:[%s5150_s14 + $0x13c0] sm:$0xff] }
  0x75   : > { %712 = vst [vmem:[%s5155_s15 + $0x2f8] sm:$0xff] %v711_v31  ;;  %v839_v31 = vld [vmem:[%s5150_s14 + $0x13c8] sm:$0xff] }
  0x76   : > { %714 = vst [vmem:[%s5155_s15 + $0x300] sm:$0xff] %v713_v32  ;;  %v841_v32 = vld [vmem:[%s5150_s14 + $0x1400] sm:$0xff] }
  0x77   : > { %716 = vst [vmem:[%s5155_s15 + $0x308] sm:$0xff] %v715_v33  ;;  %v843_v33 = vld [vmem:[%s5150_s14 + $0x1408] sm:$0xff] }
  0x78   : > { %718 = vst [vmem:[%s5155_s15 + $0x310] sm:$0xff] %v717_v34  ;;  %v845_v34 = vld [vmem:[%s5150_s14 + $0x1440] sm:$0xff] }
  0x79   : > { %720 = vst [vmem:[%s5155_s15 + $0x318] sm:$0xff] %v719_v35  ;;  %v847_v35 = vld [vmem:[%s5150_s14 + $0x1448] sm:$0xff] }
  0x7a   : > { %722 = vst [vmem:[%s5155_s15 + $0x320] sm:$0xff] %v721_v36  ;;  %v849_v36 = vld [vmem:[%s5150_s14 + $0x1480] sm:$0xff] }
  0x7b   : > { %724 = vst [vmem:[%s5155_s15 + $0x328] sm:$0xff] %v723_v37  ;;  %v851_v37 = vld [vmem:[%s5150_s14 + $0x1488] sm:$0xff] }
  0x7c   : > { %726 = vst [vmem:[%s5155_s15 + $0x330] sm:$0xff] %v725_v38  ;;  %v853_v38 = vld [vmem:[%s5150_s14 + $0x14c0] sm:$0xff] }
  0x7d   : > { %728 = vst [vmem:[%s5155_s15 + $0x338] sm:$0xff] %v727_v39  ;;  %v855_v39 = vld [vmem:[%s5150_s14 + $0x14c8] sm:$0xff] }
  0x7e   : > { %730 = vst [vmem:[%s5155_s15 + $0x340] sm:$0xff] %v729_v40  ;;  %v857_v40 = vld [vmem:[%s5150_s14 + $0x1500] sm:$0xff] }
  0x7f   : > { %732 = vst [vmem:[%s5155_s15 + $0x348] sm:$0xff] %v731_v41  ;;  %v859_v41 = vld [vmem:[%s5150_s14 + $0x1508] sm:$0xff] }
  0x80   : > { %734 = vst [vmem:[%s5155_s15 + $0x350] sm:$0xff] %v733_v42  ;;  %v861_v42 = vld [vmem:[%s5150_s14 + $0x1540] sm:$0xff] }
  0x81   : > { %736 = vst [vmem:[%s5155_s15 + $0x358] sm:$0xff] %v735_v43  ;;  %v863_v43 = vld [vmem:[%s5150_s14 + $0x1548] sm:$0xff] }
  0x82   : > { %738 = vst [vmem:[%s5155_s15 + $0x360] sm:$0xff] %v737_v44  ;;  %v865_v44 = vld [vmem:[%s5150_s14 + $0x1580] sm:$0xff] }
  0x83   : > { %740 = vst [vmem:[%s5155_s15 + $0x368] sm:$0xff] %v739_v45  ;;  %v867_v45 = vld [vmem:[%s5150_s14 + $0x1588] sm:$0xff] }
  0x84   : > { %742 = vst [vmem:[%s5155_s15 + $0x370] sm:$0xff] %v741_v46  ;;  %v869_v46 = vld [vmem:[%s5150_s14 + $0x15c0] sm:$0xff] }
  0x85   : > { %744 = vst [vmem:[%s5155_s15 + $0x378] sm:$0xff] %v743_v47  ;;  %v871_v47 = vld [vmem:[%s5150_s14 + $0x15c8] sm:$0xff] }
  0x86   : > { %746 = vst [vmem:[%s5155_s15 + $0x380] sm:$0xff] %v745_v48  ;;  %v873_v48 = vld [vmem:[%s5150_s14 + $0x1600] sm:$0xff] }
  0x87   : > { %748 = vst [vmem:[%s5155_s15 + $0x388] sm:$0xff] %v747_v49  ;;  %v875_v49 = vld [vmem:[%s5150_s14 + $0x1608] sm:$0xff] }
  0x88   : > { %750 = vst [vmem:[%s5155_s15 + $0x390] sm:$0xff] %v749_v50  ;;  %v877_v50 = vld [vmem:[%s5150_s14 + $0x1640] sm:$0xff] }
  0x89   : > { %752 = vst [vmem:[%s5155_s15 + $0x398] sm:$0xff] %v751_v51  ;;  %v879_v51 = vld [vmem:[%s5150_s14 + $0x1648] sm:$0xff] }
  0x8a   : > { %754 = vst [vmem:[%s5155_s15 + $0x3a0] sm:$0xff] %v753_v52  ;;  %v881_v52 = vld [vmem:[%s5150_s14 + $0x1680] sm:$0xff] }
  0x8b   : > { %756 = vst [vmem:[%s5155_s15 + $0x3a8] sm:$0xff] %v755_v53  ;;  %v883_v53 = vld [vmem:[%s5150_s14 + $0x1688] sm:$0xff] }
  0x8c   : > { %758 = vst [vmem:[%s5155_s15 + $0x3b0] sm:$0xff] %v757_v54  ;;  %v885_v54 = vld [vmem:[%s5150_s14 + $0x16c0] sm:$0xff] }
  0x8d   : > { %760 = vst [vmem:[%s5155_s15 + $0x3b8] sm:$0xff] %v759_v55  ;;  %v887_v55 = vld [vmem:[%s5150_s14 + $0x16c8] sm:$0xff] }
  0x8e   : > { %762 = vst [vmem:[%s5155_s15 + $0x3c0] sm:$0xff] %v761_v56  ;;  %v889_v56 = vld [vmem:[%s5150_s14 + $0x1700] sm:$0xff] }
  0x8f   : > { %764 = vst [vmem:[%s5155_s15 + $0x3c8] sm:$0xff] %v763_v57  ;;  %v891_v57 = vld [vmem:[%s5150_s14 + $0x1708] sm:$0xff] }
  0x90   : > { %766 = vst [vmem:[%s5155_s15 + $0x3d0] sm:$0xff] %v765_v58  ;;  %v893_v58 = vld [vmem:[%s5150_s14 + $0x1740] sm:$0xff] }
  0x91   : > { %768 = vst [vmem:[%s5155_s15 + $0x3d8] sm:$0xff] %v767_v59  ;;  %v895_v59 = vld [vmem:[%s5150_s14 + $0x1748] sm:$0xff] }
  0x92   : > { %770 = vst [vmem:[%s5155_s15 + $0x3e0] sm:$0xff] %v769_v60  ;;  %v897_v60 = vld [vmem:[%s5150_s14 + $0x1780] sm:$0xff] }
  0x93   : > { %772 = vst [vmem:[%s5155_s15 + $0x3e8] sm:$0xff] %v771_v61  ;;  %v899_v61 = vld [vmem:[%s5150_s14 + $0x1788] sm:$0xff] }
  0x94   : > { %774 = vst [vmem:[%s5155_s15 + $0x3f0] sm:$0xff] %v773_v62  ;;  %v901_v62 = vld [vmem:[%s5150_s14 + $0x17c0] sm:$0xff] }
  0x95   : > { %776 = vst [vmem:[%s5155_s15 + $0x3f8] sm:$0xff] %v775_v63  ;;  %v903_v63 = vld [vmem:[%s5150_s14 + $0x17c8] sm:$0xff] }
  0x96   : > { %778 = vst [vmem:[%s5155_s15 + $0x400] sm:$0xff] %v777_v0  ;;  %v905_v0 = vld [vmem:[%s5150_s14 + $0x1800] sm:$0xff] }
  0x97   : > { %780 = vst [vmem:[%s5155_s15 + $0x408] sm:$0xff] %v779_v1  ;;  %v907_v1 = vld [vmem:[%s5150_s14 + $0x1808] sm:$0xff] }
  0x98   : > { %782 = vst [vmem:[%s5155_s15 + $0x410] sm:$0xff] %v781_v2  ;;  %v909_v2 = vld [vmem:[%s5150_s14 + $0x1840] sm:$0xff] }
  0x99   : > { %784 = vst [vmem:[%s5155_s15 + $0x418] sm:$0xff] %v783_v3  ;;  %v911_v3 = vld [vmem:[%s5150_s14 + $0x1848] sm:$0xff] }
  0x9a   : > { %786 = vst [vmem:[%s5155_s15 + $0x420] sm:$0xff] %v785_v4  ;;  %v913_v4 = vld [vmem:[%s5150_s14 + $0x1880] sm:$0xff] }
  0x9b   : > { %788 = vst [vmem:[%s5155_s15 + $0x428] sm:$0xff] %v787_v5  ;;  %v915_v5 = vld [vmem:[%s5150_s14 + $0x1888] sm:$0xff] }
  0x9c   : > { %790 = vst [vmem:[%s5155_s15 + $0x430] sm:$0xff] %v789_v6  ;;  %v917_v6 = vld [vmem:[%s5150_s14 + $0x18c0] sm:$0xff] }
  0x9d   : > { %792 = vst [vmem:[%s5155_s15 + $0x438] sm:$0xff] %v791_v7  ;;  %v919_v7 = vld [vmem:[%s5150_s14 + $0x18c8] sm:$0xff] }
  0x9e   : > { %794 = vst [vmem:[%s5155_s15 + $0x440] sm:$0xff] %v793_v8  ;;  %v921_v8 = vld [vmem:[%s5150_s14 + $0x1900] sm:$0xff] }
  0x9f   : > { %796 = vst [vmem:[%s5155_s15 + $0x448] sm:$0xff] %v795_v9  ;;  %v923_v9 = vld [vmem:[%s5150_s14 + $0x1908] sm:$0xff] }
  0xa0   : > { %798 = vst [vmem:[%s5155_s15 + $0x450] sm:$0xff] %v797_v10  ;;  %v925_v10 = vld [vmem:[%s5150_s14 + $0x1940] sm:$0xff] }
  0xa1   : > { %800 = vst [vmem:[%s5155_s15 + $0x458] sm:$0xff] %v799_v11  ;;  %v927_v11 = vld [vmem:[%s5150_s14 + $0x1948] sm:$0xff] }
  0xa2   : > { %802 = vst [vmem:[%s5155_s15 + $0x460] sm:$0xff] %v801_v12  ;;  %v929_v12 = vld [vmem:[%s5150_s14 + $0x1980] sm:$0xff] }
  0xa3   : > { %804 = vst [vmem:[%s5155_s15 + $0x468] sm:$0xff] %v803_v13  ;;  %v931_v13 = vld [vmem:[%s5150_s14 + $0x1988] sm:$0xff] }
  0xa4   : > { %806 = vst [vmem:[%s5155_s15 + $0x470] sm:$0xff] %v805_v14  ;;  %v933_v14 = vld [vmem:[%s5150_s14 + $0x19c0] sm:$0xff] }
  0xa5   : > { %808 = vst [vmem:[%s5155_s15 + $0x478] sm:$0xff] %v807_v15  ;;  %v935_v15 = vld [vmem:[%s5150_s14 + $0x19c8] sm:$0xff] }
  0xa6   : > { %810 = vst [vmem:[%s5155_s15 + $0x480] sm:$0xff] %v809_v16  ;;  %v937_v16 = vld [vmem:[%s5150_s14 + $0x1a00] sm:$0xff] }
  0xa7   : > { %812 = vst [vmem:[%s5155_s15 + $0x488] sm:$0xff] %v811_v17  ;;  %v939_v17 = vld [vmem:[%s5150_s14 + $0x1a08] sm:$0xff] }
  0xa8   : > { %814 = vst [vmem:[%s5155_s15 + $0x490] sm:$0xff] %v813_v18  ;;  %v941_v18 = vld [vmem:[%s5150_s14 + $0x1a40] sm:$0xff] }
  0xa9   : > { %816 = vst [vmem:[%s5155_s15 + $0x498] sm:$0xff] %v815_v19  ;;  %v943_v19 = vld [vmem:[%s5150_s14 + $0x1a48] sm:$0xff] }
  0xaa   : > { %818 = vst [vmem:[%s5155_s15 + $0x4a0] sm:$0xff] %v817_v20  ;;  %v945_v20 = vld [vmem:[%s5150_s14 + $0x1a80] sm:$0xff] }
  0xab   : > { %820 = vst [vmem:[%s5155_s15 + $0x4a8] sm:$0xff] %v819_v21  ;;  %v947_v21 = vld [vmem:[%s5150_s14 + $0x1a88] sm:$0xff] }
  0xac   : > { %822 = vst [vmem:[%s5155_s15 + $0x4b0] sm:$0xff] %v821_v22  ;;  %v949_v22 = vld [vmem:[%s5150_s14 + $0x1ac0] sm:$0xff] }
  0xad   : > { %824 = vst [vmem:[%s5155_s15 + $0x4b8] sm:$0xff] %v823_v23  ;;  %v951_v23 = vld [vmem:[%s5150_s14 + $0x1ac8] sm:$0xff] }
  0xae   : > { %826 = vst [vmem:[%s5155_s15 + $0x4c0] sm:$0xff] %v825_v24  ;;  %v953_v24 = vld [vmem:[%s5150_s14 + $0x1b00] sm:$0xff] }
  0xaf   : > { %828 = vst [vmem:[%s5155_s15 + $0x4c8] sm:$0xff] %v827_v25  ;;  %v955_v25 = vld [vmem:[%s5150_s14 + $0x1b08] sm:$0xff] }
  0xb0   : > { %830 = vst [vmem:[%s5155_s15 + $0x4d0] sm:$0xff] %v829_v26  ;;  %v957_v26 = vld [vmem:[%s5150_s14 + $0x1b40] sm:$0xff] }
  0xb1   : > { %832 = vst [vmem:[%s5155_s15 + $0x4d8] sm:$0xff] %v831_v27  ;;  %v959_v27 = vld [vmem:[%s5150_s14 + $0x1b48] sm:$0xff] }
  0xb2   : > { %834 = vst [vmem:[%s5155_s15 + $0x4e0] sm:$0xff] %v833_v28  ;;  %v961_v28 = vld [vmem:[%s5150_s14 + $0x1b80] sm:$0xff] }
  0xb3   : > { %836 = vst [vmem:[%s5155_s15 + $0x4e8] sm:$0xff] %v835_v29  ;;  %v963_v29 = vld [vmem:[%s5150_s14 + $0x1b88] sm:$0xff] }
  0xb4   : > { %838 = vst [vmem:[%s5155_s15 + $0x4f0] sm:$0xff] %v837_v30  ;;  %v965_v30 = vld [vmem:[%s5150_s14 + $0x1bc0] sm:$0xff] }
  0xb5   : > { %840 = vst [vmem:[%s5155_s15 + $0x4f8] sm:$0xff] %v839_v31  ;;  %v967_v31 = vld [vmem:[%s5150_s14 + $0x1bc8] sm:$0xff] }
  0xb6   : > { %842 = vst [vmem:[%s5155_s15 + $0x500] sm:$0xff] %v841_v32  ;;  %v969_v32 = vld [vmem:[%s5150_s14 + $0x1c00] sm:$0xff] }
  0xb7   : > { %844 = vst [vmem:[%s5155_s15 + $0x508] sm:$0xff] %v843_v33  ;;  %v971_v33 = vld [vmem:[%s5150_s14 + $0x1c08] sm:$0xff] }
  0xb8   : > { %846 = vst [vmem:[%s5155_s15 + $0x510] sm:$0xff] %v845_v34  ;;  %v973_v34 = vld [vmem:[%s5150_s14 + $0x1c40] sm:$0xff] }
  0xb9   : > { %848 = vst [vmem:[%s5155_s15 + $0x518] sm:$0xff] %v847_v35  ;;  %v975_v35 = vld [vmem:[%s5150_s14 + $0x1c48] sm:$0xff] }
  0xba   : > { %850 = vst [vmem:[%s5155_s15 + $0x520] sm:$0xff] %v849_v36  ;;  %v977_v36 = vld [vmem:[%s5150_s14 + $0x1c80] sm:$0xff] }
  0xbb   : > { %852 = vst [vmem:[%s5155_s15 + $0x528] sm:$0xff] %v851_v37  ;;  %v979_v37 = vld [vmem:[%s5150_s14 + $0x1c88] sm:$0xff] }
  0xbc   : > { %854 = vst [vmem:[%s5155_s15 + $0x530] sm:$0xff] %v853_v38  ;;  %v981_v38 = vld [vmem:[%s5150_s14 + $0x1cc0] sm:$0xff] }
  0xbd   : > { %856 = vst [vmem:[%s5155_s15 + $0x538] sm:$0xff] %v855_v39  ;;  %v983_v39 = vld [vmem:[%s5150_s14 + $0x1cc8] sm:$0xff] }
  0xbe   : > { %858 = vst [vmem:[%s5155_s15 + $0x540] sm:$0xff] %v857_v40  ;;  %v985_v40 = vld [vmem:[%s5150_s14 + $0x1d00] sm:$0xff] }
  0xbf   : > { %860 = vst [vmem:[%s5155_s15 + $0x548] sm:$0xff] %v859_v41  ;;  %v987_v41 = vld [vmem:[%s5150_s14 + $0x1d08] sm:$0xff] }
  0xc0   : > { %862 = vst [vmem:[%s5155_s15 + $0x550] sm:$0xff] %v861_v42  ;;  %v989_v42 = vld [vmem:[%s5150_s14 + $0x1d40] sm:$0xff] }
  0xc1   : > { %864 = vst [vmem:[%s5155_s15 + $0x558] sm:$0xff] %v863_v43  ;;  %v991_v43 = vld [vmem:[%s5150_s14 + $0x1d48] sm:$0xff] }
  0xc2   : > { %866 = vst [vmem:[%s5155_s15 + $0x560] sm:$0xff] %v865_v44  ;;  %v993_v44 = vld [vmem:[%s5150_s14 + $0x1d80] sm:$0xff] }
  0xc3   : > { %868 = vst [vmem:[%s5155_s15 + $0x568] sm:$0xff] %v867_v45  ;;  %v995_v45 = vld [vmem:[%s5150_s14 + $0x1d88] sm:$0xff] }
  0xc4   : > { %870 = vst [vmem:[%s5155_s15 + $0x570] sm:$0xff] %v869_v46  ;;  %v997_v46 = vld [vmem:[%s5150_s14 + $0x1dc0] sm:$0xff] }
  0xc5   : > { %872 = vst [vmem:[%s5155_s15 + $0x578] sm:$0xff] %v871_v47  ;;  %v999_v47 = vld [vmem:[%s5150_s14 + $0x1dc8] sm:$0xff] }
  0xc6   : > { %874 = vst [vmem:[%s5155_s15 + $0x580] sm:$0xff] %v873_v48  ;;  %v1001_v48 = vld [vmem:[%s5150_s14 + $0x1e00] sm:$0xff] }
  0xc7   : > { %876 = vst [vmem:[%s5155_s15 + $0x588] sm:$0xff] %v875_v49  ;;  %v1003_v49 = vld [vmem:[%s5150_s14 + $0x1e08] sm:$0xff] }
  0xc8   : > { %878 = vst [vmem:[%s5155_s15 + $0x590] sm:$0xff] %v877_v50  ;;  %v1005_v50 = vld [vmem:[%s5150_s14 + $0x1e40] sm:$0xff] }
  0xc9   : > { %880 = vst [vmem:[%s5155_s15 + $0x598] sm:$0xff] %v879_v51  ;;  %v1007_v51 = vld [vmem:[%s5150_s14 + $0x1e48] sm:$0xff] }
  0xca   : > { %882 = vst [vmem:[%s5155_s15 + $0x5a0] sm:$0xff] %v881_v52  ;;  %v1009_v52 = vld [vmem:[%s5150_s14 + $0x1e80] sm:$0xff] }
  0xcb   : > { %884 = vst [vmem:[%s5155_s15 + $0x5a8] sm:$0xff] %v883_v53  ;;  %v1011_v53 = vld [vmem:[%s5150_s14 + $0x1e88] sm:$0xff] }
  0xcc   : > { %886 = vst [vmem:[%s5155_s15 + $0x5b0] sm:$0xff] %v885_v54  ;;  %v1013_v54 = vld [vmem:[%s5150_s14 + $0x1ec0] sm:$0xff] }
  0xcd   : > { %888 = vst [vmem:[%s5155_s15 + $0x5b8] sm:$0xff] %v887_v55  ;;  %v1015_v55 = vld [vmem:[%s5150_s14 + $0x1ec8] sm:$0xff] }
  0xce   : > { %890 = vst [vmem:[%s5155_s15 + $0x5c0] sm:$0xff] %v889_v56  ;;  %v1017_v56 = vld [vmem:[%s5150_s14 + $0x1f00] sm:$0xff] }
  0xcf   : > { %892 = vst [vmem:[%s5155_s15 + $0x5c8] sm:$0xff] %v891_v57  ;;  %v1019_v57 = vld [vmem:[%s5150_s14 + $0x1f08] sm:$0xff] }
  0xd0   : > { %894 = vst [vmem:[%s5155_s15 + $0x5d0] sm:$0xff] %v893_v58  ;;  %v1021_v58 = vld [vmem:[%s5150_s14 + $0x1f40] sm:$0xff] }
  0xd1   : > { %896 = vst [vmem:[%s5155_s15 + $0x5d8] sm:$0xff] %v895_v59  ;;  %v1023_v59 = vld [vmem:[%s5150_s14 + $0x1f48] sm:$0xff] }
  0xd2   : > { %898 = vst [vmem:[%s5155_s15 + $0x5e0] sm:$0xff] %v897_v60  ;;  %v1025_v60 = vld [vmem:[%s5150_s14 + $0x1f80] sm:$0xff] }
  0xd3   : > { %900 = vst [vmem:[%s5155_s15 + $0x5e8] sm:$0xff] %v899_v61  ;;  %v1027_v61 = vld [vmem:[%s5150_s14 + $0x1f88] sm:$0xff] }
  0xd4   : > { %902 = vst [vmem:[%s5155_s15 + $0x5f0] sm:$0xff] %v901_v62  ;;  %v1029_v62 = vld [vmem:[%s5150_s14 + $0x1fc0] sm:$0xff] }
  0xd5   : > { %904 = vst [vmem:[%s5155_s15 + $0x5f8] sm:$0xff] %v903_v63  ;;  %v1031_v63 = vld [vmem:[%s5150_s14 + $0x1fc8] sm:$0xff] }
  0xd6   : > { %906 = vst [vmem:[%s5155_s15 + $0x600] sm:$0xff] %v905_v0 }
  0xd7   : > { %908 = vst [vmem:[%s5155_s15 + $0x608] sm:$0xff] %v907_v1 }
  0xd8   : > { %910 = vst [vmem:[%s5155_s15 + $0x610] sm:$0xff] %v909_v2 }
  0xd9   : > { %912 = vst [vmem:[%s5155_s15 + $0x618] sm:$0xff] %v911_v3 }
  0xda   : > { %914 = vst [vmem:[%s5155_s15 + $0x620] sm:$0xff] %v913_v4 }
  0xdb   : > { %916 = vst [vmem:[%s5155_s15 + $0x628] sm:$0xff] %v915_v5 }
  0xdc   : > { %918 = vst [vmem:[%s5155_s15 + $0x630] sm:$0xff] %v917_v6 }
  0xdd   : > { %920 = vst [vmem:[%s5155_s15 + $0x638] sm:$0xff] %v919_v7 }
  0xde   : > { %922 = vst [vmem:[%s5155_s15 + $0x640] sm:$0xff] %v921_v8 }
  0xdf   : > { %924 = vst [vmem:[%s5155_s15 + $0x648] sm:$0xff] %v923_v9 }
  0xe0   : > { %926 = vst [vmem:[%s5155_s15 + $0x650] sm:$0xff] %v925_v10 }
  0xe1   : > { %928 = vst [vmem:[%s5155_s15 + $0x658] sm:$0xff] %v927_v11 }
  0xe2   : > { %930 = vst [vmem:[%s5155_s15 + $0x660] sm:$0xff] %v929_v12 }
  0xe3   : > { %932 = vst [vmem:[%s5155_s15 + $0x668] sm:$0xff] %v931_v13 }
  0xe4   : > { %934 = vst [vmem:[%s5155_s15 + $0x670] sm:$0xff] %v933_v14 }
  0xe5   : > { %936 = vst [vmem:[%s5155_s15 + $0x678] sm:$0xff] %v935_v15 }
  0xe6   : > { %938 = vst [vmem:[%s5155_s15 + $0x680] sm:$0xff] %v937_v16 }
  0xe7   : > { %940 = vst [vmem:[%s5155_s15 + $0x688] sm:$0xff] %v939_v17 }
  0xe8   : > { %942 = vst [vmem:[%s5155_s15 + $0x690] sm:$0xff] %v941_v18 }
  0xe9   : > { %944 = vst [vmem:[%s5155_s15 + $0x698] sm:$0xff] %v943_v19 }
  0xea   : > { %946 = vst [vmem:[%s5155_s15 + $0x6a0] sm:$0xff] %v945_v20 }
  0xeb   : > { %948 = vst [vmem:[%s5155_s15 + $0x6a8] sm:$0xff] %v947_v21 }
  0xec   : > { %950 = vst [vmem:[%s5155_s15 + $0x6b0] sm:$0xff] %v949_v22 }
  0xed   : > { %952 = vst [vmem:[%s5155_s15 + $0x6b8] sm:$0xff] %v951_v23 }
  0xee   : > { %954 = vst [vmem:[%s5155_s15 + $0x6c0] sm:$0xff] %v953_v24 }
  0xef   : > { %956 = vst [vmem:[%s5155_s15 + $0x6c8] sm:$0xff] %v955_v25 }
  0xf0   : > { %958 = vst [vmem:[%s5155_s15 + $0x6d0] sm:$0xff] %v957_v26 }
  0xf1   : > { %960 = vst [vmem:[%s5155_s15 + $0x6d8] sm:$0xff] %v959_v27 }
  0xf2   : > { %962 = vst [vmem:[%s5155_s15 + $0x6e0] sm:$0xff] %v961_v28 }
  0xf3   : > { %964 = vst [vmem:[%s5155_s15 + $0x6e8] sm:$0xff] %v963_v29 }
  0xf4   : > { %966 = vst [vmem:[%s5155_s15 + $0x6f0] sm:$0xff] %v965_v30 }
  0xf5   : > { %968 = vst [vmem:[%s5155_s15 + $0x6f8] sm:$0xff] %v967_v31 }
  0xf6   : > { %970 = vst [vmem:[%s5155_s15 + $0x700] sm:$0xff] %v969_v32 }
  0xf7   : > { %972 = vst [vmem:[%s5155_s15 + $0x708] sm:$0xff] %v971_v33 }
  0xf8   : > { %974 = vst [vmem:[%s5155_s15 + $0x710] sm:$0xff] %v973_v34 }
  0xf9   : > { %976 = vst [vmem:[%s5155_s15 + $0x718] sm:$0xff] %v975_v35 }
  0xfa   : > { %978 = vst [vmem:[%s5155_s15 + $0x720] sm:$0xff] %v977_v36 }
  0xfb   : > { %980 = vst [vmem:[%s5155_s15 + $0x728] sm:$0xff] %v979_v37 }
  0xfc   : > { %982 = vst [vmem:[%s5155_s15 + $0x730] sm:$0xff] %v981_v38 }
  0xfd   : > { %984 = vst [vmem:[%s5155_s15 + $0x738] sm:$0xff] %v983_v39 }
  0xfe   : > { %986 = vst [vmem:[%s5155_s15 + $0x740] sm:$0xff] %v985_v40 }
  0xff   : > { %988 = vst [vmem:[%s5155_s15 + $0x748] sm:$0xff] %v987_v41 }
 0x100   : > { %990 = vst [vmem:[%s5155_s15 + $0x750] sm:$0xff] %v989_v42 }
 0x101   : > { %992 = vst [vmem:[%s5155_s15 + $0x758] sm:$0xff] %v991_v43 }
 0x102   : > { %994 = vst [vmem:[%s5155_s15 + $0x760] sm:$0xff] %v993_v44 }
 0x103   : > { %996 = vst [vmem:[%s5155_s15 + $0x768] sm:$0xff] %v995_v45 }
 0x104   : > { %998 = vst [vmem:[%s5155_s15 + $0x770] sm:$0xff] %v997_v46 }
 0x105   : > { %1000 = vst [vmem:[%s5155_s15 + $0x778] sm:$0xff] %v999_v47 }
 0x106   : > { %1002 = vst [vmem:[%s5155_s15 + $0x780] sm:$0xff] %v1001_v48 }
 0x107   : > { %1004 = vst [vmem:[%s5155_s15 + $0x788] sm:$0xff] %v1003_v49 }
 0x108   : > { %1006 = vst [vmem:[%s5155_s15 + $0x790] sm:$0xff] %v1005_v50 }
 0x109   : > { %1008 = vst [vmem:[%s5155_s15 + $0x798] sm:$0xff] %v1007_v51 }
 0x10a   : > { %1010 = vst [vmem:[%s5155_s15 + $0x7a0] sm:$0xff] %v1009_v52 }
 0x10b   : > { %1012 = vst [vmem:[%s5155_s15 + $0x7a8] sm:$0xff] %v1011_v53 }
 0x10c   : > { %1014 = vst [vmem:[%s5155_s15 + $0x7b0] sm:$0xff] %v1013_v54 }
 0x10d   : > { %1016 = vst [vmem:[%s5155_s15 + $0x7b8] sm:$0xff] %v1015_v55 }
 0x10e   : > { %1018 = vst [vmem:[%s5155_s15 + $0x7c0] sm:$0xff] %v1017_v56 }
 0x10f   : > { %1020 = vst [vmem:[%s5155_s15 + $0x7c8] sm:$0xff] %v1019_v57 }
 0x110   : > { %1022 = vst [vmem:[%s5155_s15 + $0x7d0] sm:$0xff] %v1021_v58 }
 0x111   : > { %1024 = vst [vmem:[%s5155_s15 + $0x7d8] sm:$0xff] %v1023_v59 }
 0x112   : > { %1026 = vst [vmem:[%s5155_s15 + $0x7e0] sm:$0xff] %v1025_v60 }
 0x113   : > { %1028 = vst [vmem:[%s5155_s15 + $0x7e8] sm:$0xff] %v1027_v61 }
 0x114   : > { %1030 = vst [vmem:[%s5155_s15 + $0x7f0] sm:$0xff] %v1029_v62 }
 0x115   : > { %1032 = vst [vmem:[%s5155_s15 + $0x7f8] sm:$0xff] %v1031_v63 }
 0x116 PF: > { %p3628_p7 = scmp.ge.s32.totalorder %s5056_s27, 1  ;;  %p1054_p8 = scmp.lt.s32.totalorder %s5056_s27, 17 }
 0x118   : > { %p1055_p9 = pnand %p3628_p7, %p1054_p8 }
 0x119   : > { %s1061_s16 = sand.u32 (!%p1055_p9), 1, %s5032_s21   ;;  %s1198_s19 = ssub.s32 (!%p1055_p9), 0, %s5044_s24 }
 0x11a   : > { %1058 = sbr.rel (%p1055_p9) target bundleno = 710 (0x2c6), region = 63  ;;  %s3629_s17 = sshll.u32 (!%p1055_p9), %s1061_s16, 11 }
 0x11b   : > { %s5669_s18 = scalar_lea.vmem (!%p1055_p9), [#allocation2], %s3629_s17  ;;  %s3630_s20 = smin.u32 (!%p1055_p9), %s5044_s24, %s1198_s19 }
 0x11c   : > { %p1197_p10 = scmp.lt.s32.totalorder (!%p1055_p9), %s5044_s24, 0  ;;  %s1200_s21 = sand.u32 (!%p1055_p9), 3, %s3630_s20  }
 0x11d   : > { %s5759_s30 = sadd.s32 (!%p1055_p9), 1, %s5044_s24  ;;  %s1201_s7 = ssub.s32 (!%p1055_p9), 0, %s1200_s21 }
 0x11e   : > { %p1230_p11 = scmp.lt.s32.totalorder (!%p1055_p9), %s5759_s30, 0  ;;  %s1231_s9 = ssub.s32 (!%p1055_p9), 0, %s5759_s30 }
 0x11f   : > { %v3769_v0 = vld [vmem:[%s5669_s18 + $0xe0] sm:$0xf]  ;;  %v4712_v1 = vld [vmem:[%s5669_s18 + $0xec] sm:$0xf0]  ;;  %s6339_s7 = smov (!%p1197_p10, %s1201_s7), %s1200_s21  ;;  %s5772_s10 = sadd.s32 2, %s5044_s24  ;;  %vm3374_vm0 = vcmask 1041408  }
 0x120   : > { %v3897_v2 = vld [vmem:[%s5669_s18 + $0x1e0] sm:$0xf]  ;;  %v3770_v3 = vor.u32 %v4712_v1, %v3769_v0  ;;  %v4744_v4 = vld [vmem:[%s5669_s18 + $0x1ec] sm:$0xf0]  ;;  %p3632_p12 = scmp.lt.s32.totalorder %s6339_s7, 0  ;;  %s1207_s11 = sadd.s32 4, %s6339_s7 }
 0x121   : > { %v4025_v5 = vld [vmem:[%s5669_s18 + $0x2e0] sm:$0xf]  ;;  %v4776_v6 = vld [vmem:[%s5669_s18 + $0x2ec] sm:$0xf0]  ;;  %v3898_v7 = vor.u32 %v4744_v4, %v3897_v2  ;;  %s3634_s12 = smin.u32 %s1231_s9, %s5759_s30  ;;  %p1265_p13 = scmp.lt.s32.totalorder %s5772_s10, 0  ;;  %vm3376_vm1 = vcmask 1045508  }
 0x122   : > { %v4026_v8 = vor.u32 %v4776_v6, %v4025_v5  ;;  %v4153_v9 = vld [vmem:[%s5669_s18 + $0x3e0] sm:$0xf]  ;;  %v4808_v10 = vld [vmem:[%s5669_s18 + $0x3ec] sm:$0xf0]  ;;  %2946 = vmatpush.bf16.msra.mxu0 %v3770_v3  ;;  %s6341_s11 = smov (!%p3632_p12, %s1207_s11), %s6339_s7  ;;  %s1233_s13 = sand.u32 3, %s3634_s12   ;;  %vm3378_vm2 = vcmask 1043456  }
 0x123   : > { %v3753_v11 = vld [vmem:[%s5669_s18 + $0xc0] sm:$0xf]  ;;  %v4154_v12 = vor.u32 %v4808_v10, %v4153_v9  ;;  %v4708_v13 = vld [vmem:[%s5669_s18 + $0xcc] sm:$0xf0]  ;;  %2959 = vmatpush.bf16.msra.mxu1 %v3898_v7  ;;  %s1266_s14 = ssub.s32 0, %s5772_s10  ;;  %p1209_p0 = scmp.lt.s32.totalorder %s6341_s11, 3 }
 0x124   : > { %v3881_v14 = vld [vmem:[%s5669_s18 + $0x1c0] sm:$0xf]  ;;  %v4740_v15 = vld [vmem:[%s5669_s18 + $0x1cc] sm:$0xf0]  ;;  %2972 = vmatpush.bf16.msra.mxu2 %v4026_v8  ;;  %v3754_v16 = vor.u32 %v4708_v13, %v3753_v11  ;;  %s1234_s15 = ssub.s32 0, %s1233_s13  ;;  %s3638_s19 = smin.u32 %s1266_s14, %s5772_s10 }
 0x125   : > { %v3882_v17 = vor.u32 %v4740_v15, %v3881_v14  ;;  %v4009_v18 = vld [vmem:[%s5669_s18 + $0x2c0] sm:$0xf]  ;;  %v4772_v19 = vld [vmem:[%s5669_s18 + $0x2cc] sm:$0xf0]  ;;  %2985 = vmatpush.bf16.msra.mxu3 %v4154_v12  ;;  %s6343_s15 = smov (!%p1230_p11, %s1234_s15), %s1233_s13  ;;  %s6345_s11 = smov (!%p1209_p0, %s6341_s11), 3 }
 0x126   : > { %v4137_v20 = vld [vmem:[%s5669_s18 + $0x3c0] sm:$0xf]  ;;  %v4010_v21 = vor.u32 %v4772_v19, %v4009_v18  ;;  %v4804_v22 = vld [vmem:[%s5669_s18 + $0x3cc] sm:$0xf0]  ;;  %2947 = vmatpush.bf16.msra.mxu0 %v3754_v16  ;;  %p3636_p1 = scmp.lt.s32.totalorder %s6343_s15, 0  ;;  %s1240_s16 = sadd.s32 4, %s6343_s15 }
 0x127   : > { %v3737_v23 = vld [vmem:[%s5669_s18 + $0xa0] sm:$0xf]  ;;  %v4704_v24 = vld [vmem:[%s5669_s18 + $0xac] sm:$0xf0]  ;;  %v4138_v25 = vor.u32 %v4804_v22, %v4137_v20  ;;  %2960 = vmatpush.bf16.msra.mxu1 %v3882_v17  ;;  %s3633_s17 = sshll.u32 %s6345_s11, 5  ;;  %s1268_s7 = sand.u32 3, %s3638_s19  }
 0x128   : > { %v3865_v26 = vld [vmem:[%s5669_s18 + $0x1a0] sm:$0xf]  ;;  %v4736_v27 = vld [vmem:[%s5669_s18 + $0x1ac] sm:$0xf0]  ;;  %v3738_v29 = vor.u32 %v4704_v24, %v3737_v23  ;;  %2973 = vmatpush.bf16.msra.mxu2 %v4010_v21  ;;  %s5797_s30 = scalar_lea.vmem %s6319_s0, %s3633_s17  ;;  %s6347_s16 = smov (!%p3636_p1, %s1240_s16), %s6343_s15 }
 0x129   : > { %v3993_v28 = vld [vmem:[%s5669_s18 + $0x2a0] sm:$0xf]  ;;  %v4768_v30 = vld [vmem:[%s5669_s18 + $0x2ac] sm:$0xf0]  ;;  %v3866_v33 = vor.u32 %v4736_v27, %v3865_v26  ;;  %2986 = vmatpush.bf16.msra.mxu3 %v4138_v25  ;;  %s1269_s9 = ssub.s32 0, %s1268_s7  ;;  %s5800_s12 = sadd.s32 3, %s5044_s24 }
 0x12a   : > { %v4121_v31 = vld [vmem:[%s5669_s18 + $0x3a0] sm:$0xf]  ;;  %v4800_v32 = vld [vmem:[%s5669_s18 + $0x3ac] sm:$0xf0]  ;;  %v3994_v34 = vor.u32 %v4768_v30, %v3993_v28  ;;  %2948 = vmatpush.bf16.msra.mxu0 %v3738_v29  ;;  %p1242_p2 = scmp.lt.s32.totalorder %s6347_s16, 3  ;;  %p1300_p3 = scmp.lt.s32.totalorder %s5800_s12, 0 }
 0x12b   : > { %v3721_v35 = vld [vmem:[%s5669_s18 + $0x80] sm:$0xf]  ;;  %v4700_v36 = vld [vmem:[%s5669_s18 + $0x8c] sm:$0xf0]  ;;  %v4122_v38 = vor.u32 %v4800_v32, %v4121_v31  ;;  %2961 = vmatpush.bf16.msra.mxu1 %v3866_v33  ;;  %s6349_s9 = smov (!%p1265_p13, %s1269_s9), %s1268_s7  ;;  %s1301_s14 = ssub.s32 0, %s5800_s12 }
 0x12c   : > { %v3849_v37 = vld [vmem:[%s5669_s18 + $0x180] sm:$0xf]  ;;  %v4732_v39 = vld [vmem:[%s5669_s18 + $0x18c] sm:$0xf0]  ;;  %v3722_v44 = vor.u32 %v4700_v36, %v3721_v35  ;;  %2974 = vmatpush.bf16.msra.mxu2 %v3994_v34  ;;  %s6351_s16 = smov (!%p1242_p2, %s6347_s16), 3  ;;  %p3640_p4 = scmp.lt.s32.totalorder %s6349_s9, 0 }
 0x12d   : > { %v3977_v40 = vld [vmem:[%s5669_s18 + $0x280] sm:$0xf]  ;;  %v4764_v41 = vld [vmem:[%s5669_s18 + $0x28c] sm:$0xf0]  ;;  %v3850_v45 = vor.u32 %v4732_v39, %v3849_v37  ;;  %2987 = vmatpush.bf16.msra.mxu3 %v4122_v38  ;;  %s1275_s11 = sadd.s32 4, %s6349_s9  ;;  %s3637_s13 = sshll.u32 %s6351_s16, 5 }
 0x12e   : > { %v4105_v42 = vld [vmem:[%s5669_s18 + $0x380] sm:$0xf]  ;;  %v4796_v43 = vld [vmem:[%s5669_s18 + $0x38c] sm:$0xf0]  ;;  %v3978_v46 = vor.u32 %v4764_v41, %v3977_v40  ;;  %2949 = vmatpush.bf16.msra.mxu0 %v3722_v44  ;;  %s3642_s15 = smin.u32 %s1301_s14, %s5800_s12  ;;  %s6353_s11 = smov (!%p3640_p4, %s1275_s11), %s6349_s9 }
 0x12f   : > { %v3705_v47 = vld [vmem:[%s5669_s18 + $0x60] sm:$0xf]  ;;  %v4696_v48 = vld [vmem:[%s5669_s18 + $0x6c] sm:$0xf0]  ;;  %v4106_v50 = vor.u32 %v4796_v43, %v4105_v42  ;;  %2962 = vmatpush.bf16.msra.mxu1 %v3850_v45  ;;  %s3492_s17 = scalar_lea.vmem %s6320_s1, %s3637_s13  ;;  %s1303_s19 = sand.u32 3, %s3642_s15  }
 0x130   : > { %v3833_v49 = vld [vmem:[%s5669_s18 + $0x160] sm:$0xf]  ;;  %v4728_v51 = vld [vmem:[%s5669_s18 + $0x16c] sm:$0xf0]  ;;  %v3706_v56 = vor.u32 %v4696_v48, %v3705_v47  ;;  %2975 = vmatpush.bf16.msra.mxu2 %v3978_v46  ;;  %p1277_p5 = scmp.lt.s32.totalorder %s6353_s11, 3  ;;  %s1304_s20 = ssub.s32 0, %s1303_s19 }
 0x131   : > { %v3961_v52 = vld [vmem:[%s5669_s18 + $0x260] sm:$0xf]  ;;  %v4760_v53 = vld [vmem:[%s5669_s18 + $0x26c] sm:$0xf0]  ;;  %v3834_v57 = vor.u32 %v4728_v51, %v3833_v49  ;;  %2988 = vmatpush.bf16.msra.mxu3 %v4106_v50  ;;  %s6355_s20 = smov (!%p1300_p3, %s1304_s20), %s1303_s19  ;;  %p1336_p8 = scmp.lt.s32.totalorder %s5044_s24, 3 }
 0x132   : > { %v4089_v54 = vld [vmem:[%s5669_s18 + $0x360] sm:$0xf]  ;;  %v4792_v55 = vld [vmem:[%s5669_s18 + $0x36c] sm:$0xf0]  ;;  %v3962_v58 = vor.u32 %v4760_v53, %v3961_v52  ;;  %2950 = vmatpush.bf16.msra.mxu0 %v3706_v56  ;;  %s6357_s11 = smov (!%p1277_p5, %s6353_s11), 3  ;;  %p3644_p6 = scmp.lt.s32.totalorder %s6355_s20, 0 }
 0x133   : > { %v3689_v59 = vld [vmem:[%s5669_s18 + $0x40] sm:$0xf]  ;;  %v4692_v60 = vld [vmem:[%s5669_s18 + $0x4c] sm:$0xf0]  ;;  %v4090_v62 = vor.u32 %v4792_v55, %v4089_v54  ;;  %2963 = vmatpush.bf16.msra.mxu1 %v3834_v57  ;;  %s1310_s21 = sadd.s32 4, %s6355_s20  ;;  %s6363_s24 = smov (!%p1336_p8, %s5044_s24), 3 }
 0x134   : > { %v3817_v61 = vld [vmem:[%s5669_s18 + $0x140] sm:$0xf]  ;;  %v4724_v63 = vld [vmem:[%s5669_s18 + $0x14c] sm:$0xf0]  ;;  %v3690_v4 = vor.u32 %v4692_v60, %v3689_v59  ;;  %2976 = vmatpush.bf16.msra.mxu2 %v3962_v58  ;;  %s6359_s21 = smov (!%p3644_p6, %s1310_s21), %s6355_s20  ;;  %s3647_s10 = sshll.u32 %s6363_s24, 4 }
 0x135   : > { %v3945_v0 = vld [vmem:[%s5669_s18 + $0x240] sm:$0xf]  ;;  %v4756_v1 = vld [vmem:[%s5669_s18 + $0x24c] sm:$0xf0]  ;;  %v3818_v5 = vor.u32 %v4724_v63, %v3817_v61  ;;  %2989 = vmatpush.bf16.msra.mxu3 %v4090_v62  ;;  %p1312_p7 = scmp.lt.s32.totalorder %s6359_s21, 3 }
 0x136   : > { %v4073_v2 = vld [vmem:[%s5669_s18 + $0x340] sm:$0xf]  ;;  %v4788_v3 = vld [vmem:[%s5669_s18 + $0x34c] sm:$0xf0]  ;;  %v3946_v6 = vor.u32 %v4756_v1, %v3945_v0  ;;  %2951 = vmatpush.bf16.msra.mxu0 %v3690_v4 }
 0x137   : > { %v3673_v7 = vld [vmem:[%s5669_s18 + $0x20] sm:$0xf]  ;;  %v4688_v8 = vld [vmem:[%s5669_s18 + $0x2c] sm:$0xf0]  ;;  %v4074_v10 = vor.u32 %v4788_v3, %v4073_v2  ;;  %2964 = vmatpush.bf16.msra.mxu1 %v3818_v5  ;;  %s6361_s21 = smov (!%p1312_p7, %s6359_s21), 3 }
 0x138   : > { %v3801_v9 = vld [vmem:[%s5669_s18 + $0x120] sm:$0xf]  ;;  %v4720_v11 = vld [vmem:[%s5669_s18 + $0x12c] sm:$0xf0]  ;;  %v3674_v16 = vor.u32 %v4688_v8, %v3673_v7  ;;  %2977 = vmatpush.bf16.msra.mxu2 %v3946_v6 }
 0x139   : > { %v3929_v12 = vld [vmem:[%s5669_s18 + $0x220] sm:$0xf]  ;;  %v4752_v13 = vld [vmem:[%s5669_s18 + $0x22c] sm:$0xf0]  ;;  %v3802_v19 = vor.u32 %v4720_v11, %v3801_v9  ;;  %2990 = vmatpush.bf16.msra.mxu3 %v4074_v10 }
 0x13a   : > { %v4057_v14 = vld [vmem:[%s5669_s18 + $0x320] sm:$0xf]  ;;  %v4784_v15 = vld [vmem:[%s5669_s18 + $0x32c] sm:$0xf0]  ;;  %v3930_v20 = vor.u32 %v4752_v13, %v3929_v12  ;;  %2952 = vmatpush.bf16.msra.mxu0 %v3674_v16 }
 0x13b   : > { %v3657_v17 = vld [vmem:[%s5669_s18] sm:$0xf]  ;;  %v4684_v18 = vld [vmem:[%s5669_s18 + $0xc] sm:$0xf0]  ;;  %v4058_v24 = vor.u32 %v4784_v15, %v4057_v14  ;;  %2965 = vmatpush.bf16.msra.mxu1 %v3802_v19 }
 0x13c   : > { %v3785_v21 = vld [vmem:[%s5669_s18 + $0x100] sm:$0xf]  ;;  %v4716_v22 = vld [vmem:[%s5669_s18 + $0x10c] sm:$0xf0]  ;;  %v3658_v31 = vor.u32 %v4684_v18, %v3657_v17  ;;  %2978 = vmatpush.bf16.msra.mxu2 %v3930_v20 }
 0x13d   : > { %v3913_v23 = vld [vmem:[%s5669_s18 + $0x200] sm:$0xf]  ;;  %v4748_v25 = vld [vmem:[%s5669_s18 + $0x20c] sm:$0xf0]  ;;  %v3786_v35 = vor.u32 %v4716_v22, %v3785_v21  ;;  %2991 = vmatpush.bf16.msra.mxu3 %v4058_v24 }
 0x13e   : > { %v4041_v26 = vld [vmem:[%s5669_s18 + $0x300] sm:$0xf]  ;;  %v4780_v27 = vld [vmem:[%s5669_s18 + $0x30c] sm:$0xf0]  ;;  %v3914_v36 = vor.u32 %v4748_v25, %v3913_v23  ;;  %2953 = vmatpush.bf16.msra.mxu0 %v3658_v31 }
 0x13f   : > { %v4281_v28 = vld [vmem:[%s5669_s18 + $0x4e0] sm:$0xf]  ;;  %v4840_v29 = vld [vmem:[%s5669_s18 + $0x4ec] sm:$0xf0]  ;;  %v4042_v39 = vor.u32 %v4780_v27, %v4041_v26  ;;  %2966 = vmatpush.bf16.msra.mxu1 %v3786_v35 }
 0x140   : > { %v4409_v30 = vld [vmem:[%s5669_s18 + $0x5e0] sm:$0xf]  ;;  %v4872_v32 = vld [vmem:[%s5669_s18 + $0x5ec] sm:$0xf0]  ;;  %v4282_v40 = vor.u32 %v4840_v29, %v4281_v28  ;;  %2979 = vmatpush.bf16.msra.mxu2 %v3914_v36 }
 0x141   : > { %v4537_v33 = vld [vmem:[%s5669_s18 + $0x6e0] sm:$0xf]  ;;  %v4904_v34 = vld [vmem:[%s5669_s18 + $0x6ec] sm:$0xf0]  ;;  %v4410_v41 = vor.u32 %v4872_v32, %v4409_v30  ;;  %2992 = vmatpush.bf16.msra.mxu3 %v4042_v39 }
 0x142   : > { %v4665_v37 = vld [vmem:[%s5669_s18 + $0x7e0] sm:$0xf]  ;;  %v4936_v38 = vld [vmem:[%s5669_s18 + $0x7ec] sm:$0xf0]  ;;  %v4538_v42 = vor.u32 %v4904_v34, %v4537_v33  ;;  %2998 = vmatpush.bf16.msrb.mxu0 %v4282_v40  ;;  %v1363_v40 = vld [vmem:[%s5797_s30] sm:$0xff]  ;;  %s3641_s30 = sshll.u32 %s6357_s11, 5 }
 0x143   : > { %v4265_v43 = vld [vmem:[%s5669_s18 + $0x4c0] sm:$0xf]  ;;  %v4836_v44 = vld [vmem:[%s5669_s18 + $0x4cc] sm:$0xf0]  ;;  %v4666_v46 = vor.u32 %v4936_v38, %v4665_v37  ;;  %3011 = vmatpush.bf16.msrb.mxu1 %v4410_v41  ;;  %s3497_s12 = scalar_lea.vmem %s6321_s2, %s3641_s30  ;;  %s3645_s11 = sshll.u32 %s6361_s21, 5 }
 0x144   : > { %v4393_v45 = vld [vmem:[%s5669_s18 + $0x5c0] sm:$0xf]  ;;  %v4868_v47 = vld [vmem:[%s5669_s18 + $0x5cc] sm:$0xf0]  ;;  %v4266_v52 = vor.u32 %v4836_v44, %v4265_v43  ;;  %3024 = vmatpush.bf16.msrb.mxu2 %v4538_v42  ;;  %s3502_s15 = scalar_lea.vmem %s6322_s3, %s3645_s11 }
 0x145   : > { %v4521_v48 = vld [vmem:[%s5669_s18 + $0x6c0] sm:$0xf]  ;;  %v4900_v49 = vld [vmem:[%s5669_s18 + $0x6cc] sm:$0xf0]  ;;  %v4394_v55 = vor.u32 %v4868_v47, %v4393_v45  ;;  %3037 = vmatpush.bf16.msrb.mxu3 %v4666_v46 }
 0x146   : > { %v4649_v50 = vld [vmem:[%s5669_s18 + $0x7c0] sm:$0xf]  ;;  %v4932_v51 = vld [vmem:[%s5669_s18 + $0x7cc] sm:$0xf0]  ;;  %v4522_v56 = vor.u32 %v4900_v49, %v4521_v48  ;;  %2999 = vmatpush.bf16.msrb.mxu0 %v4266_v52 }
 0x147   : > { %v4249_v53 = vld [vmem:[%s5669_s18 + $0x4a0] sm:$0xf]  ;;  %v4832_v54 = vld [vmem:[%s5669_s18 + $0x4ac] sm:$0xf0]  ;;  %v4650_v59 = vor.u32 %v4932_v51, %v4649_v50  ;;  %3012 = vmatpush.bf16.msrb.mxu1 %v4394_v55 }
 0x148   : > { %v4377_v57 = vld [vmem:[%s5669_s18 + $0x5a0] sm:$0xf]  ;;  %v4864_v58 = vld [vmem:[%s5669_s18 + $0x5ac] sm:$0xf0]  ;;  %v4250_v0 = vor.u32 %v4832_v54, %v4249_v53  ;;  %3025 = vmatpush.bf16.msrb.mxu2 %v4522_v56 }
 0x149   : > { %v4505_v60 = vld [vmem:[%s5669_s18 + $0x6a0] sm:$0xf]  ;;  %v4896_v61 = vld [vmem:[%s5669_s18 + $0x6ac] sm:$0xf0]  ;;  %v4378_v3 = vor.u32 %v4864_v58, %v4377_v57  ;;  %3038 = vmatpush.bf16.msrb.mxu3 %v4650_v59  ;;  %v1364_v59 = vunpack.c.l.bf16 %v1363_v40 }
 0x14a   : > { %v4633_v62 = vld [vmem:[%s5669_s18 + $0x7a0] sm:$0xf]  ;;  %v4928_v63 = vld [vmem:[%s5669_s18 + $0x7ac] sm:$0xf0]  ;;  %v4506_v4 = vor.u32 %v4896_v61, %v4505_v60  ;;  %3000 = vmatpush.bf16.msrb.mxu0 %v4250_v0 }
 0x14b   : > { %v4233_v1 = vld [vmem:[%s5669_s18 + $0x480] sm:$0xf]  ;;  %v4828_v2 = vld [vmem:[%s5669_s18 + $0x48c] sm:$0xf0]  ;;  %v4634_v7 = vor.u32 %v4928_v63, %v4633_v62  ;;  %3013 = vmatpush.bf16.msrb.mxu1 %v4378_v3  ;;  %v1365_v3 = vunpack.c.h.bf16 %v1363_v40  ;;  %v4738_v40 = vld [vmem:[%s5669_s18 + $0x1c4] sm:$0xf] }
 0x14c   : > { %v4361_v5 = vld [vmem:[%s5669_s18 + $0x580] sm:$0xf]  ;;  %v4860_v6 = vld [vmem:[%s5669_s18 + $0x58c] sm:$0xf0]  ;;  %v4234_v12 = vor.u32 %v4828_v2, %v4233_v1  ;;  %3026 = vmatpush.bf16.msrb.mxu2 %v4506_v4 }
 0x14d   : > { %v4489_v8 = vld [vmem:[%s5669_s18 + $0x680] sm:$0xf]  ;;  %v4892_v9 = vld [vmem:[%s5669_s18 + $0x68c] sm:$0xf0]  ;;  %v4362_v14 = vor.u32 %v4860_v6, %v4361_v5  ;;  %3039 = vmatpush.bf16.msrb.mxu3 %v4634_v7  ;;  %v3653_v5 = vld [vmem:[%s3497_s12 + $0x10] sm:$0xff] }
 0x14e   : > { %v4617_v10 = vld [vmem:[%s5669_s18 + $0x780] sm:$0xf]  ;;  %v4924_v11 = vld [vmem:[%s5669_s18 + $0x78c] sm:$0xf0]  ;;  %v4490_v15 = vor.u32 %v4892_v9, %v4489_v8  ;;  %3001 = vmatpush.bf16.msrb.mxu0 %v4234_v12  ;;  %v1372_v8 = vunpack.c.l.bf16 %v3653_v5 }
 0x14f   : > { %v4217_v13 = vld [vmem:[%s5669_s18 + $0x460] sm:$0xf]  ;;  %v4824_v16 = vld [vmem:[%s5669_s18 + $0x46c] sm:$0xf0]  ;;  %v4618_v18 = vor.u32 %v4924_v11, %v4617_v10  ;;  %3014 = vmatpush.bf16.msrb.mxu1 %v4362_v14  ;;  %v1373_v10 = vunpack.c.h.bf16 %v3653_v5  ;;  %v4107_v5 = vld [vmem:[%s5669_s18 + $0x390] sm:$0xf0] }
 0x150   : > { %v4345_v17 = vld [vmem:[%s5669_s18 + $0x560] sm:$0xf]  ;;  %v4856_v19 = vld [vmem:[%s5669_s18 + $0x56c] sm:$0xf0]  ;;  %v4218_v24 = vor.u32 %v4824_v16, %v4217_v13  ;;  %3027 = vmatpush.bf16.msrb.mxu2 %v4490_v15 }
 0x151   : > { %v4473_v20 = vld [vmem:[%s5669_s18 + $0x660] sm:$0xf]  ;;  %v4888_v21 = vld [vmem:[%s5669_s18 + $0x66c] sm:$0xf0]  ;;  %v4346_v25 = vor.u32 %v4856_v19, %v4345_v17  ;;  %3040 = vmatpush.bf16.msrb.mxu3 %v4618_v18  ;;  %v4710_v18 = vld [vmem:[%s5669_s18 + $0xe4] sm:$0xf] }
 0x152   : > { %v4601_v22 = vld [vmem:[%s5669_s18 + $0x760] sm:$0xf]  ;;  %v4920_v23 = vld [vmem:[%s5669_s18 + $0x76c] sm:$0xf0]  ;;  %v4474_v26 = vor.u32 %v4888_v21, %v4473_v20  ;;  %3002 = vmatpush.bf16.msrb.mxu0 %v4218_v24  ;;  %v3771_v19 = vld [vmem:[%s5669_s18 + $0xf0] sm:$0xf0] }
 0x153   : > { %v4602_v27 = vor.u32 %v4920_v23, %v4601_v22  ;;  %3015 = vmatpush.bf16.msrb.mxu1 %v4346_v25  ;;  %v4201_v28 = vld [vmem:[%s5669_s18 + $0x440] sm:$0xf]  ;;  %v4820_v29 = vld [vmem:[%s5669_s18 + $0x44c] sm:$0xf0]  ;;  %v4742_v20 = vld [vmem:[%s5669_s18 + $0x1e4] sm:$0xf] }
 0x154   : > { %3028 = vmatpush.bf16.msrb.mxu2 %v4474_v26  ;;  %v4202_v30 = vor.u32 %v4820_v29, %v4201_v28  ;;  %v4329_v31 = vld [vmem:[%s5669_s18 + $0x540] sm:$0xf]  ;;  %v4852_v32 = vld [vmem:[%s5669_s18 + $0x54c] sm:$0xf0]  ;;  %v3899_v21 = vld [vmem:[%s5669_s18 + $0x1f0] sm:$0xf0] }
 0x155   : > { %3041 = vmatpush.bf16.msrb.mxu3 %v4602_v27  ;;  %v4330_v33 = vor.u32 %v4852_v32, %v4329_v31  ;;  %v4457_v34 = vld [vmem:[%s5669_s18 + $0x640] sm:$0xf]  ;;  %v4884_v35 = vld [vmem:[%s5669_s18 + $0x64c] sm:$0xf0]  ;;  %v4774_v22 = vld [vmem:[%s5669_s18 + $0x2e4] sm:$0xf] }
 0x156   : > { %v4585_v36 = vld [vmem:[%s5669_s18 + $0x740] sm:$0xf]  ;;  %3003 = vmatpush.bf16.msrb.mxu0 %v4202_v30  ;;  %v4458_v37 = vor.u32 %v4884_v35, %v4457_v34  ;;  %v4916_v38 = vld [vmem:[%s5669_s18 + $0x74c] sm:$0xf0]  ;;  %v4027_v23 = vld [vmem:[%s5669_s18 + $0x2f0] sm:$0xf0]  ;;  %v3774_v34 = vor.u32 %v4710_v18, %v3771_v19  ;;  %v3902_v35 = vor.u32 %v4742_v20, %v3899_v21 }
 0x157   : > { %v4185_v39 = vld [vmem:[%s5669_s18 + $0x420] sm:$0xf]  ;;  %3016 = vmatpush.bf16.msrb.mxu1 %v4330_v33  ;;  %v4586_v41 = vor.u32 %v4916_v38, %v4585_v36  ;;  %v4816_v42 = vld [vmem:[%s5669_s18 + $0x42c] sm:$0xf0]  ;;  %v4806_v24 = vld [vmem:[%s5669_s18 + $0x3e4] sm:$0xf]  ;;  %v4030_v38 = vor.u32 %v4774_v22, %v4027_v23 }
 0x158   : > { %v4313_v43 = vld [vmem:[%s5669_s18 + $0x520] sm:$0xf]  ;;  %3029 = vmatpush.bf16.msrb.mxu2 %v4458_v37  ;;  %v4186_v44 = vor.u32 %v4816_v42, %v4185_v39  ;;  %v4848_v45 = vld [vmem:[%s5669_s18 + $0x52c] sm:$0xf0]  ;;  %v4155_v25 = vld [vmem:[%s5669_s18 + $0x3f0] sm:$0xf0] }
 0x159   : > { %v4441_v46 = vld [vmem:[%s5669_s18 + $0x620] sm:$0xf]  ;;  %3042 = vmatpush.bf16.msrb.mxu3 %v4586_v41  ;;  %v4314_v47 = vor.u32 %v4848_v45, %v4313_v43  ;;  %v4880_v48 = vld [vmem:[%s5669_s18 + $0x62c] sm:$0xf0]  ;;  %v4706_v28 = vld [vmem:[%s5669_s18 + $0xc4] sm:$0xf]  ;;  %v4158_v39 = vor.u32 %v4806_v24, %v4155_v25 }
 0x15a   : > { %v4569_v49 = vld [vmem:[%s5669_s18 + $0x720] sm:$0xf]  ;;  %v4912_v50 = vld [vmem:[%s5669_s18 + $0x72c] sm:$0xf0]  ;;  %3004 = vmatpush.bf16.msrb.mxu0 %v4186_v44  ;;  %v4442_v52 = vor.u32 %v4880_v48, %v4441_v46  ;;  %v3755_v29 = vld [vmem:[%s5669_s18 + $0xd0] sm:$0xf0] }
 0x15b   : > { %v3652_v51 = vld [vmem:[%s3492_s17 + $0x8] sm:$0xff]  ;;  %v4570_v53 = vor.u32 %v4912_v50, %v4569_v49  ;;  %v4812_v55 = vld [vmem:[%s5669_s18 + $0x40c] sm:$0xf0]  ;;  %3017 = vmatpush.bf16.msrb.mxu1 %v4314_v47  ;;  %v3883_v41 = vld [vmem:[%s5669_s18 + $0x1d0] sm:$0xf0]  ;;  %v3758_v46 = vor.u32 %v4706_v28, %v3755_v29 }
 0x15c   : > { %v4169_v54 = vld [vmem:[%s5669_s18 + $0x400] sm:$0xf]  ;;  %v4844_v58 = vld [vmem:[%s5669_s18 + $0x50c] sm:$0xf0]  ;;  %3030 = vmatpush.bf16.msrb.mxu2 %v4442_v52  ;;  %v1367_v63 = vunpack.c.l.bf16 %v3652_v51  ;;  %v1368_v4 = vunpack.c.h.bf16 %v3652_v51  ;;  %v4770_v42 = vld [vmem:[%s5669_s18 + $0x2c4] sm:$0xf]  ;;  %v3886_v47 = vor.u32 %v4738_v40, %v3883_v41 }
 0x15d   : > { %v4170_v56 = vor.u32 %v4812_v55, %v4169_v54  ;;  %v4297_v57 = vld [vmem:[%s5669_s18 + $0x500] sm:$0xf]  ;;  %v4876_v62 = vld [vmem:[%s5669_s18 + $0x60c] sm:$0xf0]  ;;  %3043 = vmatpush.bf16.msrb.mxu3 %v4570_v53  ;;  %v4011_v43 = vld [vmem:[%s5669_s18 + $0x2d0] sm:$0xf0] }
 0x15e   : > { %v4298_v60 = vor.u32 %v4844_v58, %v4297_v57  ;;  %v4425_v61 = vld [vmem:[%s5669_s18 + $0x600] sm:$0xf]  ;;  %v4908_v2 = vld [vmem:[%s5669_s18 + $0x70c] sm:$0xf0]  ;;  %v1369_v7 = vadd.f32 %v1367_v63, %v1364_v59  ;;  %v1370_v9 = vadd.f32 %v1368_v4, %v1365_v3  ;;  %v4802_v44 = vld [vmem:[%s5669_s18 + $0x3c4] sm:$0xf]  ;;  %v4014_v50 = vor.u32 %v4770_v42, %v4011_v43 }
 0x15f   : > { %v4426_v0 = vor.u32 %v4876_v62, %v4425_v61  ;;  %v4553_v1 = vld [vmem:[%s5669_s18 + $0x700] sm:$0xf]  ;;  %3005 = vmatpush.bf16.msrb.mxu0 %v4170_v56  ;;  %v3654_v13 = vld [vmem:[%s3502_s15 + $0x18] sm:$0xff]  ;;  %v4702_v48 = vld [vmem:[%s5669_s18 + $0xa4] sm:$0xf] }
 0x160   : > { %v4554_v6 = vor.u32 %v4908_v2, %v4553_v1  ;;  %3018 = vmatpush.bf16.msrb.mxu1 %v4298_v60  ;;  %v1374_v11 = vadd.f32 %v1372_v8, %v1369_v7  ;;  %v1375_v12 = vadd.f32 %v1373_v10, %v1370_v9  ;;  %v1377_v14 = vunpack.c.l.bf16 %v3654_v13  ;;  %v4139_v45 = vld [vmem:[%s5669_s18 + $0x3d0] sm:$0xf0]  ;;  %v4734_v52 = vld [vmem:[%s5669_s18 + $0x1a4] sm:$0xf] }
 0x161   : > { %3031 = vmatpush.bf16.msrb.mxu2 %v4426_v0  ;;  %v1378_v15 = vunpack.c.h.bf16 %v3654_v13  ;;  %v3739_v49 = vld [vmem:[%s5669_s18 + $0xb0] sm:$0xf0]  ;;  %v4142_v51 = vor.u32 %v4802_v44, %v4139_v45  ;;  %v4766_v54 = vld [vmem:[%s5669_s18 + $0x2a4] sm:$0xf] }
 0x162   : > { %3044 = vmatpush.bf16.msrb.mxu3 %v4554_v6  ;;  %v1379_v16 = vadd.f32 %v1377_v14, %v1374_v11  ;;  %v3867_v53 = vld [vmem:[%s5669_s18 + $0x1b0] sm:$0xf0]  ;;  %v4798_v56 = vld [vmem:[%s5669_s18 + $0x3a4] sm:$0xf]  ;;  %v3742_v58 = vor.u32 %v4702_v48, %v3739_v49 }
 0x163   : > { %v1380_v17 = vadd.f32 %v1378_v15, %v1375_v12  ;;  %v3995_v55 = vld [vmem:[%s5669_s18 + $0x2b0] sm:$0xf0]  ;;  %v3870_v59 = vor.u32 %v4734_v52, %v3867_v53  ;;  %v4698_v60 = vld [vmem:[%s5669_s18 + $0x84] sm:$0xf] }
 0x164   : > { %1383 = vst [vmem:[#allocation1] ss:$4 sm:$0xff] %v1379_v16  ;;  %v4123_v57 = vld [vmem:[%s5669_s18 + $0x3b0] sm:$0xf0]  ;;  %v3998_v62 = vor.u32 %v4766_v54, %v3995_v55  ;;  %v4730_v0 = vld [vmem:[%s5669_s18 + $0x184] sm:$0xf] }
 0x165   : > { %1385 = vst [vmem:[#allocation1 + $0x20] ss:$4 sm:$0xff] %v1380_v17  ;;  %v3723_v61 = vld [vmem:[%s5669_s18 + $0x90] sm:$0xf0]  ;;  %v4126_v63 = vor.u32 %v4798_v56, %v4123_v57  ;;  %v4762_v2 = vld [vmem:[%s5669_s18 + $0x284] sm:$0xf] }
 0x166   : > { %v3851_v1 = vld [vmem:[%s5669_s18 + $0x190] sm:$0xf0]  ;;  %v4794_v4 = vld [vmem:[%s5669_s18 + $0x384] sm:$0xf]  ;;  %v3726_v12 = vor.u32 %v4698_v60, %v3723_v61 }
 0x167   : > { %v3979_v3 = vld [vmem:[%s5669_s18 + $0x290] sm:$0xf0]  ;;  %v4694_v8 = vld [vmem:[%s5669_s18 + $0x64] sm:$0xf]  ;;  %v3854_v13 = vor.u32 %v4730_v0, %v3851_v1  ;;  %v4110_v15 = vor.u32 %v4794_v4, %v4107_v5 }
 0x168   : > { %v3707_v9 = vld [vmem:[%s5669_s18 + $0x70] sm:$0xf0]  ;;  %v3982_v14 = vor.u32 %v4762_v2, %v3979_v3  ;;  %v4726_v16 = vld [vmem:[%s5669_s18 + $0x164] sm:$0xf] }
 0x169   : > { %v3835_v17 = vld [vmem:[%s5669_s18 + $0x170] sm:$0xf0]  ;;  %v4758_v18 = vld [vmem:[%s5669_s18 + $0x264] sm:$0xf] }
 0x16a   : > { %v3963_v21 = vld [vmem:[%s5669_s18 + $0x270] sm:$0xf0]  ;;  %v4790_v22 = vld [vmem:[%s5669_s18 + $0x364] sm:$0xf] }
 0x16b   : > { %v1388_v26 = vld.sshfl [vmem:[#allocation1 + $0x10] sm:$0xff pattern:$0x73625140]  ;;  %v1386_v27 = vld.sshfl [vmem:[#allocation1] sm:$0xff pattern:$0x73625140] }
 0x16c   : > { %v5861_v30 = vpack.c.bf16 %v1388_v26, %v1388_v26  ;;  %v5863_v31 = vpack.c.bf16 %v1386_v27, %v1386_v27  ;;  %v1389_v32 = vld.sshfl [vmem:[#allocation1 + $0x18] sm:$0xff pattern:$0x73625140]  ;;  %v1387_v33 = vld.sshfl [vmem:[#allocation1 + $0x8] sm:$0xff pattern:$0x73625140]  ;;  %v3710_v26 = vor.u32 %v4694_v8, %v3707_v9  ;;  %v3838_v27 = vor.u32 %v4726_v16, %v3835_v17 }
 0x16d   : > { %v5865_v36 = vpack.c.bf16 %v1389_v32, %v1389_v32  ;;  %v5867_v37 = vpack.c.bf16 %v1387_v33, %v1387_v33  ;;  %v1392_v6 = vld.sshfl [vmem:[#allocation1 + $0x30] sm:$0xff pattern:$0x73625140]  ;;  %v1390_v7 = vld.sshfl [vmem:[#allocation1 + $0x20] sm:$0xff pattern:$0x73625140]  ;;  %v3966_v32 = vor.u32 %v4758_v18, %v3963_v21 }
 0x16e   : > { %2980 = vmatmul.bf16.vlgmr.msra.gmra.mxu2 %v5861_v30  ;;  %2954 = vmatmul.bf16.vlgmr.msra.gmra.mxu0 %v5863_v31  ;;  %v1393_v10 = vld.sshfl [vmem:[#allocation1 + $0x38] sm:$0xff pattern:$0x73625140]  ;;  %v1391_v11 = vld.sshfl [vmem:[#allocation1 + $0x28] sm:$0xff pattern:$0x73625140]  ;;  %v5900_v19 = vpack.c.bf16 %v1392_v6, %v1392_v6  ;;  %v5902_v20 = vpack.c.bf16 %v1390_v7, %v1390_v7 }
 0x16f   : > { %2993 = vmatmul.bf16.vlgmr.msra.gmra.mxu3 %v5865_v36  ;;  %2967 = vmatmul.bf16.vlgmr.msra.gmra.mxu1 %v5867_v37  ;;  %v4091_v23 = vld [vmem:[%s5669_s18 + $0x370] sm:$0xf0]  ;;  %v5907_v24 = vpack.c.bf16 %v1393_v10, %v1393_v10  ;;  %v5909_v25 = vpack.c.bf16 %v1391_v11, %v1391_v11  ;;  %v4690_v28 = vld [vmem:[%s5669_s18 + $0x44] sm:$0xf] }
 0x170   : > { %3050 = vmatpush.bf16.msra.mxu0 %v3774_v34  ;;  %3063 = vmatpush.bf16.msra.mxu1 %v3902_v35  ;;  %v3691_v29 = vld [vmem:[%s5669_s18 + $0x50] sm:$0xf0]  ;;  %v4094_v33 = vor.u32 %v4790_v22, %v4091_v23  ;;  %v4722_v34 = vld [vmem:[%s5669_s18 + $0x144] sm:$0xf] }
 0x171   : > { %3076 = vmatpush.bf16.msra.mxu2 %v4030_v38  ;;  %3089 = vmatpush.bf16.msra.mxu3 %v4158_v39  ;;  %v3819_v35 = vld [vmem:[%s5669_s18 + $0x150] sm:$0xf0]  ;;  %v4754_v38 = vld [vmem:[%s5669_s18 + $0x244] sm:$0xf]  ;;  %v3694_v42 = vor.u32 %v4690_v28, %v3691_v29 }
 0x172   : > { %v3947_v39 = vld [vmem:[%s5669_s18 + $0x250] sm:$0xf0]  ;;  %v4786_v40 = vld [vmem:[%s5669_s18 + $0x344] sm:$0xf]  ;;  %v3822_v43 = vor.u32 %v4722_v34, %v3819_v35 }
 0x173   : > { %v4075_v41 = vld [vmem:[%s5669_s18 + $0x350] sm:$0xf0]  ;;  %v4686_v44 = vld [vmem:[%s5669_s18 + $0x24] sm:$0xf] }
 0x174   : > { %3051 = vmatpush.bf16.msra.mxu0 %v3758_v46  ;;  %3064 = vmatpush.bf16.msra.mxu1 %v3886_v47  ;;  %v3675_v45 = vld [vmem:[%s5669_s18 + $0x30] sm:$0xf0]  ;;  %v3950_v46 = vor.u32 %v4754_v38, %v3947_v39  ;;  %v4078_v47 = vor.u32 %v4786_v40, %v4075_v41  ;;  %v4718_v48 = vld [vmem:[%s5669_s18 + $0x124] sm:$0xf] }
 0x175   : > { %3077 = vmatpush.bf16.msra.mxu2 %v4014_v50  ;;  %3090 = vmatpush.bf16.msra.mxu3 %v4142_v51  ;;  %v3803_v49 = vld [vmem:[%s5669_s18 + $0x130] sm:$0xf0]  ;;  %v4750_v50 = vld [vmem:[%s5669_s18 + $0x224] sm:$0xf]  ;;  %v3678_v55 = vor.u32 %v4686_v44, %v3675_v45 }
 0x176   : > { %v3931_v51 = vld [vmem:[%s5669_s18 + $0x230] sm:$0xf0]  ;;  %v4782_v52 = vld [vmem:[%s5669_s18 + $0x324] sm:$0xf]  ;;  %v3806_v56 = vor.u32 %v4718_v48, %v3803_v49 }
 0x177   : > { %v4059_v53 = vld [vmem:[%s5669_s18 + $0x330] sm:$0xf0]  ;;  %v4682_v54 = vld [vmem:[%s5669_s18 + $0x4] sm:$0xf]  ;;  %v3934_v60 = vor.u32 %v4750_v50, %v3931_v51 }
 0x178   : > { %3052 = vmatpush.bf16.msra.mxu0 %v3742_v58  ;;  %3065 = vmatpush.bf16.msra.mxu1 %v3870_v59  ;;  %v3659_v57 = vld [vmem:[%s5669_s18 + $0x10] sm:$0xf0]  ;;  %v4714_v58 = vld [vmem:[%s5669_s18 + $0x104] sm:$0xf]  ;;  %v4062_v61 = vor.u32 %v4782_v52, %v4059_v53 }
 0x179   : > { %3078 = vmatpush.bf16.msra.mxu2 %v3998_v62  ;;  %3091 = vmatpush.bf16.msra.mxu3 %v4126_v63  ;;  %v3787_v59 = vld [vmem:[%s5669_s18 + $0x110] sm:$0xf0]  ;;  %v4746_v62 = vld [vmem:[%s5669_s18 + $0x204] sm:$0xf]  ;;  %v3662_v7 = vor.u32 %v4682_v54, %v3659_v57 }
 0x17a   : > { %v3915_v63 = vld [vmem:[%s5669_s18 + $0x210] sm:$0xf0]  ;;  %v4778_v0 = vld [vmem:[%s5669_s18 + $0x304] sm:$0xf]  ;;  %v3790_v8 = vor.u32 %v4714_v58, %v3787_v59 }
 0x17b   : > { %v4043_v1 = vld [vmem:[%s5669_s18 + $0x310] sm:$0xf0]  ;;  %v4838_v2 = vld [vmem:[%s5669_s18 + $0x4e4] sm:$0xf] }
 0x17c   : > { %3053 = vmatpush.bf16.msra.mxu0 %v3726_v12  ;;  %3066 = vmatpush.bf16.msra.mxu1 %v3854_v13  ;;  %v4283_v3 = vld [vmem:[%s5669_s18 + $0x4f0] sm:$0xf0]  ;;  %v4870_v4 = vld [vmem:[%s5669_s18 + $0x5e4] sm:$0xf]  ;;  %v3918_v12 = vor.u32 %v4746_v62, %v3915_v63  ;;  %v4046_v13 = vor.u32 %v4778_v0, %v4043_v1 }
 0x17d   : > { %3079 = vmatpush.bf16.msra.mxu2 %v3982_v14  ;;  %3092 = vmatpush.bf16.msra.mxu3 %v4110_v15  ;;  %v4411_v5 = vld [vmem:[%s5669_s18 + $0x5f0] sm:$0xf0]  ;;  %v4902_v6 = vld [vmem:[%s5669_s18 + $0x6e4] sm:$0xf]  ;;  %v4286_v14 = vor.u32 %v4838_v2, %v4283_v3 }
 0x17e   : > { %3032 = vmatmul.bf16.vlgmr.msrb.gmra.mxu2 %v5900_v19  ;;  %3006 = vmatmul.bf16.vlgmr.msrb.gmra.mxu0 %v5902_v20  ;;  %v4539_v9 = vld [vmem:[%s5669_s18 + $0x6f0] sm:$0xf0]  ;;  %v4934_v10 = vld [vmem:[%s5669_s18 + $0x7e4] sm:$0xf]  ;;  %v4414_v15 = vor.u32 %v4870_v4, %v4411_v5 }
 0x17f   : > { %3045 = vmatmul.bf16.vlgmr.msrb.gmra.mxu3 %v5907_v24  ;;  %3019 = vmatmul.bf16.vlgmr.msrb.gmra.mxu1 %v5909_v25  ;;  %v4667_v11 = vld [vmem:[%s5669_s18 + $0x7f0] sm:$0xf0]  ;;  %v4834_v16 = vld [vmem:[%s5669_s18 + $0x4c4] sm:$0xf]  ;;  %v4542_v18 = vor.u32 %v4902_v6, %v4539_v9 }
 0x180   : > { %3054 = vmatpush.bf16.msra.mxu0 %v3710_v26  ;;  %3067 = vmatpush.bf16.msra.mxu1 %v3838_v27  ;;  %v4267_v17 = vld [vmem:[%s5669_s18 + $0x4d0] sm:$0xf0]  ;;  %v4670_v21 = vor.u32 %v4934_v10, %v4667_v11  ;;  %v4866_v22 = vld [vmem:[%s5669_s18 + $0x5c4] sm:$0xf] }
 0x181   : > { %3080 = vmatpush.bf16.msra.mxu2 %v3966_v32  ;;  %3093 = vmatpush.bf16.msra.mxu3 %v4094_v33  ;;  %v4395_v23 = vld [vmem:[%s5669_s18 + $0x5d0] sm:$0xf0]  ;;  %v4898_v26 = vld [vmem:[%s5669_s18 + $0x6c4] sm:$0xf]  ;;  %v4270_v32 = vor.u32 %v4834_v16, %v4267_v17 }
 0x182   : > { %v4523_v27 = vld [vmem:[%s5669_s18 + $0x6d0] sm:$0xf0]  ;;  %v4930_v28 = vld [vmem:[%s5669_s18 + $0x7c4] sm:$0xf]  ;;  %v4398_v33 = vor.u32 %v4866_v22, %v4395_v23 }
 0x183   : > { %v4651_v29 = vld [vmem:[%s5669_s18 + $0x7d0] sm:$0xf0]  ;;  %v4830_v34 = vld [vmem:[%s5669_s18 + $0x4a4] sm:$0xf]  ;;  %v4526_v38 = vor.u32 %v4898_v26, %v4523_v27 }
 0x184   : > { %3055 = vmatpush.bf16.msra.mxu0 %v3694_v42  ;;  %3068 = vmatpush.bf16.msra.mxu1 %v3822_v43  ;;  %v4251_v35 = vld [vmem:[%s5669_s18 + $0x4b0] sm:$0xf0]  ;;  %v4654_v39 = vor.u32 %v4930_v28, %v4651_v29  ;;  %v4862_v40 = vld [vmem:[%s5669_s18 + $0x5a4] sm:$0xf] }
 0x185   : > { %3081 = vmatpush.bf16.msra.mxu2 %v3950_v46  ;;  %3094 = vmatpush.bf16.msra.mxu3 %v4078_v47  ;;  %v4379_v41 = vld [vmem:[%s5669_s18 + $0x5b0] sm:$0xf0]  ;;  %v4894_v42 = vld [vmem:[%s5669_s18 + $0x6a4] sm:$0xf]  ;;  %v4254_v46 = vor.u32 %v4830_v34, %v4251_v35 }
 0x186   : > { %v4507_v43 = vld [vmem:[%s5669_s18 + $0x6b0] sm:$0xf0]  ;;  %v4926_v44 = vld [vmem:[%s5669_s18 + $0x7a4] sm:$0xf]  ;;  %v4382_v47 = vor.u32 %v4862_v40, %v4379_v41 }
 0x187   : > { %v4635_v45 = vld [vmem:[%s5669_s18 + $0x7b0] sm:$0xf0]  ;;  %v4826_v48 = vld [vmem:[%s5669_s18 + $0x484] sm:$0xf]  ;;  %v4510_v50 = vor.u32 %v4894_v42, %v4507_v43 }
 0x188   : > { %3056 = vmatpush.bf16.msra.mxu0 %v3678_v55  ;;  %3069 = vmatpush.bf16.msra.mxu1 %v3806_v56  ;;  %v4235_v49 = vld [vmem:[%s5669_s18 + $0x490] sm:$0xf0]  ;;  %v4638_v51 = vor.u32 %v4926_v44, %v4635_v45  ;;  %v4858_v52 = vld [vmem:[%s5669_s18 + $0x584] sm:$0xf] }
 0x189   : > { %3082 = vmatpush.bf16.msra.mxu2 %v3934_v60  ;;  %3095 = vmatpush.bf16.msra.mxu3 %v4062_v61  ;;  %v4363_v53 = vld [vmem:[%s5669_s18 + $0x590] sm:$0xf0]  ;;  %v4890_v54 = vld [vmem:[%s5669_s18 + $0x684] sm:$0xf]  ;;  %v4238_v58 = vor.u32 %v4826_v48, %v4235_v49 }
 0x18a   : > { %v4491_v55 = vld [vmem:[%s5669_s18 + $0x690] sm:$0xf0]  ;;  %v4922_v56 = vld [vmem:[%s5669_s18 + $0x784] sm:$0xf]  ;;  %v4366_v59 = vor.u32 %v4858_v52, %v4363_v53  ;;  %v3905_v52 = vld [vmem:[%s5669_s18 + $0x1e8] sm:$0xf] }
 0x18b   : > { %v4619_v57 = vld [vmem:[%s5669_s18 + $0x790] sm:$0xf0]  ;;  %v4822_v60 = vld [vmem:[%s5669_s18 + $0x464] sm:$0xf]  ;;  %v4494_v62 = vor.u32 %v4890_v54, %v4491_v55  ;;  %v4745_v53 = vld [vmem:[%s5669_s18 + $0x1f4] sm:$0xf0] }
 0x18c   : > { %3057 = vmatpush.bf16.msra.mxu0 %v3662_v7  ;;  %3070 = vmatpush.bf16.msra.mxu1 %v3790_v8  ;;  %v4219_v61 = vld [vmem:[%s5669_s18 + $0x470] sm:$0xf0]  ;;  %v4622_v63 = vor.u32 %v4922_v56, %v4619_v57  ;;  %v4854_v0 = vld [vmem:[%s5669_s18 + $0x564] sm:$0xf]  ;;  %v4033_v54 = vld [vmem:[%s5669_s18 + $0x2e8] sm:$0xf] }
 0x18d   : > { %3083 = vmatpush.bf16.msra.mxu2 %v3918_v12  ;;  %3096 = vmatpush.bf16.msra.mxu3 %v4046_v13  ;;  %v4347_v1 = vld [vmem:[%s5669_s18 + $0x570] sm:$0xf0]  ;;  %v4886_v2 = vld [vmem:[%s5669_s18 + $0x664] sm:$0xf]  ;;  %v4222_v6 = vor.u32 %v4822_v60, %v4219_v61  ;;  %v4777_v57 = vld [vmem:[%s5669_s18 + $0x2f4] sm:$0xf0] }
 0x18e   : > { %v4475_v3 = vld [vmem:[%s5669_s18 + $0x670] sm:$0xf0]  ;;  %v4918_v4 = vld [vmem:[%s5669_s18 + $0x764] sm:$0xf]  ;;  %v4350_v7 = vor.u32 %v4854_v0, %v4347_v1  ;;  %v3761_v0 = vld [vmem:[%s5669_s18 + $0xc8] sm:$0xf] }
 0x18f   : > { %3058 = vmatmul.bf16.vlgmr.msra.gmra.mxu0 %v5863_v31  ;;  %3071 = vmatmul.bf16.vlgmr.msra.gmra.mxu1 %v5867_v37  ;;  %v4603_v5 = vld [vmem:[%s5669_s18 + $0x770] sm:$0xf0]  ;;  %v4818_v8 = vld [vmem:[%s5669_s18 + $0x444] sm:$0xf]  ;;  %v4478_v10 = vor.u32 %v4886_v2, %v4475_v3  ;;  %v4709_v1 = vld [vmem:[%s5669_s18 + $0xd4] sm:$0xf0]  ;;  %v4034_v2 = vor.u32 %v4777_v57, %v4033_v54 }
 0x190   : > { %3102 = vmatpush.bf16.msrb.mxu0 %v4286_v14  ;;  %3115 = vmatpush.bf16.msrb.mxu1 %v4414_v15  ;;  %v4203_v9 = vld [vmem:[%s5669_s18 + $0x450] sm:$0xf0]  ;;  %v4606_v11 = vor.u32 %v4918_v4, %v4603_v5  ;;  %v4850_v12 = vld [vmem:[%s5669_s18 + $0x544] sm:$0xf]  ;;  %v3889_v4 = vld [vmem:[%s5669_s18 + $0x1c8] sm:$0xf] }
 0x191   : > { %3128 = vmatpush.bf16.msrb.mxu2 %v4542_v18  ;;  %3141 = vmatpush.bf16.msrb.mxu3 %v4670_v21  ;;  %v4331_v13 = vld [vmem:[%s5669_s18 + $0x550] sm:$0xf0]  ;;  %v4882_v14 = vld [vmem:[%s5669_s18 + $0x644] sm:$0xf]  ;;  %v4206_v18 = vor.u32 %v4818_v8, %v4203_v9  ;;  %v4741_v5 = vld [vmem:[%s5669_s18 + $0x1d4] sm:$0xf0] }
 0x192   : > { %3084 = vmatmul.bf16.vlgmr.msra.gmra.mxu2 %v5861_v30  ;;  %3097 = vmatmul.bf16.vlgmr.msra.gmra.mxu3 %v5865_v36  ;;  %v4459_v15 = vld [vmem:[%s5669_s18 + $0x650] sm:$0xf0]  ;;  %v4914_v16 = vld [vmem:[%s5669_s18 + $0x744] sm:$0xf]  ;;  %v4334_v21 = vor.u32 %v4850_v12, %v4331_v13  ;;  %v4145_v8 = vld [vmem:[%s5669_s18 + $0x3c8] sm:$0xf] }
 0x193   : > { %v4587_v17 = vld [vmem:[%s5669_s18 + $0x750] sm:$0xf0]  ;;  %v4814_v22 = vld [vmem:[%s5669_s18 + $0x424] sm:$0xf]  ;;  %v4462_v26 = vor.u32 %v4882_v14, %v4459_v15  ;;  %v4805_v9 = vld [vmem:[%s5669_s18 + $0x3d4] sm:$0xf0] }
 0x194   : > { %3103 = vmatpush.bf16.msrb.mxu0 %v4270_v32  ;;  %3116 = vmatpush.bf16.msrb.mxu1 %v4398_v33  ;;  %v4187_v23 = vld [vmem:[%s5669_s18 + $0x430] sm:$0xf0]  ;;  %v4590_v27 = vor.u32 %v4914_v16, %v4587_v17  ;;  %v4846_v28 = vld [vmem:[%s5669_s18 + $0x524] sm:$0xf]  ;;  %v3745_v12 = vld [vmem:[%s5669_s18 + $0xa8] sm:$0xf]  ;;  %v4146_v15 = vor.u32 %v4805_v9, %v4145_v8 }
 0x195   : > { %3129 = vmatpush.bf16.msrb.mxu2 %v4526_v38  ;;  %3142 = vmatpush.bf16.msrb.mxu3 %v4654_v39  ;;  %v4315_v29 = vld [vmem:[%s5669_s18 + $0x530] sm:$0xf0]  ;;  %v4878_v32 = vld [vmem:[%s5669_s18 + $0x624] sm:$0xf]  ;;  %v4190_v39 = vor.u32 %v4814_v22, %v4187_v23  ;;  %v4705_v13 = vld [vmem:[%s5669_s18 + $0xb4] sm:$0xf0] }
 0x196   : > { %v4443_v33 = vld [vmem:[%s5669_s18 + $0x630] sm:$0xf0]  ;;  %v4910_v34 = vld [vmem:[%s5669_s18 + $0x724] sm:$0xf]  ;;  %v4318_v40 = vor.u32 %v4846_v28, %v4315_v29  ;;  %v3873_v16 = vld [vmem:[%s5669_s18 + $0x1a8] sm:$0xf] }
 0x197   : > { %v4571_v35 = vld [vmem:[%s5669_s18 + $0x730] sm:$0xf0]  ;;  %v4810_v38 = vld [vmem:[%s5669_s18 + $0x404] sm:$0xf]  ;;  %v4446_v44 = vor.u32 %v4878_v32, %v4443_v33  ;;  %v4737_v17 = vld [vmem:[%s5669_s18 + $0x1b4] sm:$0xf0] }
 0x198   : > { %3104 = vmatpush.bf16.msrb.mxu0 %v4254_v46  ;;  %3117 = vmatpush.bf16.msrb.mxu1 %v4382_v47  ;;  %v4171_v41 = vld [vmem:[%s5669_s18 + $0x410] sm:$0xf0]  ;;  %v4842_v42 = vld [vmem:[%s5669_s18 + $0x504] sm:$0xf]  ;;  %v4574_v45 = vor.u32 %v4910_v34, %v4571_v35  ;;  %v4129_v22 = vld [vmem:[%s5669_s18 + $0x3a8] sm:$0xf] }
 0x199   : > { %3130 = vmatpush.bf16.msrb.mxu2 %v4510_v50  ;;  %3143 = vmatpush.bf16.msrb.mxu3 %v4638_v51  ;;  %v4299_v43 = vld [vmem:[%s5669_s18 + $0x510] sm:$0xf0]  ;;  %v4874_v46 = vld [vmem:[%s5669_s18 + $0x604] sm:$0xf]  ;;  %v3777_v50 = vld [vmem:[%s5669_s18 + $0xe8] sm:$0xf]  ;;  %v4174_v55 = vor.u32 %v4810_v38, %v4171_v41 }
 0x19a   : > { %v4427_v47 = vld [vmem:[%s5669_s18 + $0x610] sm:$0xf0]  ;;  %v4906_v48 = vld [vmem:[%s5669_s18 + $0x704] sm:$0xf]  ;;  %v4713_v51 = vld [vmem:[%s5669_s18 + $0xf4] sm:$0xf0]  ;;  %v4302_v56 = vor.u32 %v4842_v42, %v4299_v43 }
 0x19b   : > { %v4555_v49 = vld [vmem:[%s5669_s18 + $0x710] sm:$0xf0]  ;;  %v4430_v60 = vor.u32 %v4874_v46, %v4427_v47  ;;  %v4801_v23 = vld [vmem:[%s5669_s18 + $0x3b4] sm:$0xf0]  ;;  %v3729_v28 = vld [vmem:[%s5669_s18 + $0x88] sm:$0xf] }
 0x19c   : > { %3105 = vmatpush.bf16.msrb.mxu0 %v4238_v58  ;;  %3118 = vmatpush.bf16.msrb.mxu1 %v4366_v59  ;;  %v4161_v58 = vld [vmem:[%s5669_s18 + $0x3e8] sm:$0xf]  ;;  %v4809_v59 = vld [vmem:[%s5669_s18 + $0x3f4] sm:$0xf0]  ;;  %v4558_v61 = vor.u32 %v4906_v48, %v4555_v49  ;;  %v4130_v33 = vor.u32 %v4801_v23, %v4129_v22 }
 0x19d   : > { %3131 = vmatpush.bf16.msrb.mxu2 %v4494_v62  ;;  %3144 = vmatpush.bf16.msrb.mxu3 %v4622_v63  ;;  %v3778_v62 = vor.u32 %v4713_v51, %v3777_v50  ;;  %v3906_v63 = vor.u32 %v4745_v53, %v3905_v52  ;;  %v4162_v3 = vor.u32 %v4809_v59, %v4161_v58  ;;  %v4701_v29 = vld [vmem:[%s5669_s18 + $0x94] sm:$0xf0]  ;;  %v3857_v34 = vld [vmem:[%s5669_s18 + $0x188] sm:$0xf] }
 0x19e   : > { %v4733_v35 = vld [vmem:[%s5669_s18 + $0x194] sm:$0xf0]  ;;  %v3985_v38 = vld [vmem:[%s5669_s18 + $0x288] sm:$0xf]  ;;  %v3730_v42 = vor.u32 %v4701_v29, %v3729_v28 }
 0x19f   : > { %v4797_v41 = vld [vmem:[%s5669_s18 + $0x394] sm:$0xf0]  ;;  %v3858_v43 = vor.u32 %v4733_v35, %v3857_v34  ;;  %v3841_v48 = vld [vmem:[%s5669_s18 + $0x168] sm:$0xf] }
 0x1a0   : > { %3106 = vmatpush.bf16.msrb.mxu0 %v4222_v6  ;;  %3119 = vmatpush.bf16.msrb.mxu1 %v4350_v7  ;;  %v4017_v6 = vld [vmem:[%s5669_s18 + $0x2c8] sm:$0xf]  ;;  %v4773_v7 = vld [vmem:[%s5669_s18 + $0x2d4] sm:$0xf0] }
 0x1a1   : > { %3132 = vmatpush.bf16.msrb.mxu2 %v4478_v10  ;;  %3145 = vmatpush.bf16.msrb.mxu3 %v4606_v11  ;;  %v3762_v10 = vor.u32 %v4709_v1, %v3761_v0  ;;  %v3890_v11 = vor.u32 %v4741_v5, %v3889_v4  ;;  %v4018_v14 = vor.u32 %v4773_v7, %v4017_v6  ;;  %v4729_v49 = vld [vmem:[%s5669_s18 + $0x174] sm:$0xf0]  ;;  %v3969_v50 = vld [vmem:[%s5669_s18 + $0x268] sm:$0xf] }
 0x1a2   : > { %v4761_v51 = vld [vmem:[%s5669_s18 + $0x274] sm:$0xf0]  ;;  %v4097_v52 = vld [vmem:[%s5669_s18 + $0x368] sm:$0xf] }
 0x1a3   : > { %v4793_v53 = vld [vmem:[%s5669_s18 + $0x374] sm:$0xf0]  ;;  %v3970_v58 = vor.u32 %v4761_v51, %v3969_v50  ;;  %v4081_v0 = vld [vmem:[%s5669_s18 + $0x348] sm:$0xf] }
 0x1a4   : > { %3107 = vmatpush.bf16.msrb.mxu0 %v4206_v18  ;;  %3120 = vmatpush.bf16.msrb.mxu1 %v4334_v21  ;;  %v4001_v18 = vld [vmem:[%s5669_s18 + $0x2a8] sm:$0xf]  ;;  %v4769_v21 = vld [vmem:[%s5669_s18 + $0x2b4] sm:$0xf0]  ;;  %v4098_v59 = vor.u32 %v4793_v53, %v4097_v52 }
 0x1a5   : > { %3133 = vmatpush.bf16.msrb.mxu2 %v4462_v26  ;;  %3146 = vmatpush.bf16.msrb.mxu3 %v4590_v27  ;;  %v3746_v26 = vor.u32 %v4705_v13, %v3745_v12  ;;  %v3874_v27 = vor.u32 %v4737_v17, %v3873_v16  ;;  %v4002_v32 = vor.u32 %v4769_v21, %v4001_v18  ;;  %v4693_v57 = vld [vmem:[%s5669_s18 + $0x54] sm:$0xf0]  ;;  %v3681_v4 = vld [vmem:[%s5669_s18 + $0x28] sm:$0xf] }
 0x1a6   : > { %v4789_v1 = vld [vmem:[%s5669_s18 + $0x354] sm:$0xf0]  ;;  %v3809_v8 = vld [vmem:[%s5669_s18 + $0x128] sm:$0xf] }
 0x1a7   : > { %v4689_v5 = vld [vmem:[%s5669_s18 + $0x34] sm:$0xf0]  ;;  %v4082_v7 = vor.u32 %v4789_v1, %v4081_v0  ;;  %v4065_v12 = vld [vmem:[%s5669_s18 + $0x328] sm:$0xf] }
 0x1a8   : > { %3108 = vmatpush.bf16.msrb.mxu0 %v4190_v39  ;;  %3121 = vmatpush.bf16.msrb.mxu1 %v4318_v40  ;;  %v4765_v39 = vld [vmem:[%s5669_s18 + $0x294] sm:$0xf0]  ;;  %v4113_v40 = vld [vmem:[%s5669_s18 + $0x388] sm:$0xf] }
 0x1a9   : > { %3134 = vmatpush.bf16.msrb.mxu2 %v4446_v44  ;;  %3147 = vmatpush.bf16.msrb.mxu3 %v4574_v45  ;;  %v3713_v44 = vld [vmem:[%s5669_s18 + $0x68] sm:$0xf]  ;;  %v4697_v45 = vld [vmem:[%s5669_s18 + $0x74] sm:$0xf0]  ;;  %v3986_v46 = vor.u32 %v4765_v39, %v3985_v38  ;;  %v4114_v47 = vor.u32 %v4797_v41, %v4113_v40 }
 0x1aa   : > { %v3714_v54 = vor.u32 %v4697_v45, %v3713_v44  ;;  %v4721_v9 = vld [vmem:[%s5669_s18 + $0x134] sm:$0xf0]  ;;  %v3793_v18 = vld [vmem:[%s5669_s18 + $0x108] sm:$0xf] }
 0x1ab   : > { %v4785_v13 = vld [vmem:[%s5669_s18 + $0x334] sm:$0xf0]  ;;  %v3810_v16 = vor.u32 %v4721_v9, %v3809_v8  ;;  %v4049_v28 = vld [vmem:[%s5669_s18 + $0x308] sm:$0xf] }
 0x1ac   : > { %3109 = vmatpush.bf16.msrb.mxu0 %v4174_v55  ;;  %3122 = vmatpush.bf16.msrb.mxu1 %v4302_v56  ;;  %v3842_v55 = vor.u32 %v4729_v49, %v3841_v48  ;;  %v3697_v56 = vld [vmem:[%s5669_s18 + $0x48] sm:$0xf]  ;;  %v4685_v17 = vld [vmem:[%s5669_s18 + $0x14] sm:$0xf0]  ;;  %v4066_v23 = vor.u32 %v4785_v13, %v4065_v12 }
 0x1ad   : > { %3135 = vmatpush.bf16.msrb.mxu2 %v4430_v60  ;;  %3148 = vmatpush.bf16.msrb.mxu3 %v4558_v61  ;;  %v3825_v60 = vld [vmem:[%s5669_s18 + $0x148] sm:$0xf]  ;;  %v4725_v61 = vld [vmem:[%s5669_s18 + $0x154] sm:$0xf0] }
 0x1ae   : > { %v4717_v21 = vld [vmem:[%s5669_s18 + $0x114] sm:$0xf0]  ;;  %v4417_v34 = vld [vmem:[%s5669_s18 + $0x5e8] sm:$0xf] }
 0x1af   : > { %3110 = vmatmul.bf16.vlgmr.msrb.gmra.mxu0 %v5902_v20  ;;  %3123 = vmatmul.bf16.vlgmr.msrb.gmra.mxu1 %v5909_v25  ;;  %v4781_v29 = vld [vmem:[%s5669_s18 + $0x314] sm:$0xf0]  ;;  %v4545_v38 = vld [vmem:[%s5669_s18 + $0x6e8] sm:$0xf]  ;;  %v3794_v40 = vor.u32 %v4717_v21, %v3793_v18 }
 0x1b0   : > { %3154 = vmatpush.bf16.msra.mxu0 %v3778_v62  ;;  %3167 = vmatpush.bf16.msra.mxu1 %v3906_v63  ;;  %v3953_v62 = vld [vmem:[%s5669_s18 + $0x248] sm:$0xf]  ;;  %v4757_v63 = vld [vmem:[%s5669_s18 + $0x254] sm:$0xf0]  ;;  %v4050_v45 = vor.u32 %v4781_v29, %v4049_v28 }
 0x1b1   : > { %3180 = vmatpush.bf16.msra.mxu2 %v4034_v2  ;;  %3193 = vmatpush.bf16.msra.mxu3 %v4162_v3  ;;  %v3698_v2 = vor.u32 %v4693_v57, %v3697_v56  ;;  %v3826_v3 = vor.u32 %v4725_v61, %v3825_v60  ;;  %v3954_v6 = vor.u32 %v4757_v63, %v3953_v62  ;;  %v4873_v35 = vld [vmem:[%s5669_s18 + $0x5f4] sm:$0xf0]  ;;  %v4273_v48 = vld [vmem:[%s5669_s18 + $0x4c8] sm:$0xf] }
 0x1b2   : > { %3136 = vmatmul.bf16.vlgmr.msrb.gmra.mxu2 %v5900_v19  ;;  %3149 = vmatmul.bf16.vlgmr.msrb.gmra.mxu3 %v5907_v24  ;;  %v4905_v41 = vld [vmem:[%s5669_s18 + $0x6f4] sm:$0xf0]  ;;  %v4401_v52 = vld [vmem:[%s5669_s18 + $0x5c8] sm:$0xf] }
 0x1b3   : > { %v4837_v49 = vld [vmem:[%s5669_s18 + $0x4d4] sm:$0xf0]  ;;  %v4546_v50 = vor.u32 %v4905_v41, %v4545_v38  ;;  %v4657_v56 = vld [vmem:[%s5669_s18 + $0x7c8] sm:$0xf] }
 0x1b4   : > { %3155 = vmatpush.bf16.msra.mxu0 %v3762_v10  ;;  %3168 = vmatpush.bf16.msra.mxu1 %v3890_v11  ;;  %v3937_v10 = vld [vmem:[%s5669_s18 + $0x228] sm:$0xf]  ;;  %v4753_v11 = vld [vmem:[%s5669_s18 + $0x234] sm:$0xf0] }
 0x1b5   : > { %3181 = vmatpush.bf16.msra.mxu2 %v4018_v14  ;;  %3194 = vmatpush.bf16.msra.mxu3 %v4146_v15  ;;  %v3665_v14 = vld [vmem:[%s5669_s18 + $0x8] sm:$0xf]  ;;  %v3682_v15 = vor.u32 %v4689_v5, %v3681_v4  ;;  %v3938_v22 = vor.u32 %v4753_v11, %v3937_v10  ;;  %v4869_v53 = vld [vmem:[%s5669_s18 + $0x5d4] sm:$0xf0] }
 0x1b6   : > { %v3666_v39 = vor.u32 %v4685_v17, %v3665_v14  ;;  %v4933_v57 = vld [vmem:[%s5669_s18 + $0x7d4] sm:$0xf0]  ;;  %v4257_v60 = vld [vmem:[%s5669_s18 + $0x4a8] sm:$0xf] }
 0x1b7   : > { %v4833_v61 = vld [vmem:[%s5669_s18 + $0x4b4] sm:$0xf0]  ;;  %v4658_v63 = vor.u32 %v4933_v57, %v4657_v56  ;;  %v4385_v0 = vld [vmem:[%s5669_s18 + $0x5a8] sm:$0xf] }
 0x1b8   : > { %3156 = vmatpush.bf16.msra.mxu0 %v3746_v26  ;;  %3169 = vmatpush.bf16.msra.mxu1 %v3874_v27  ;;  %v3921_v26 = vld [vmem:[%s5669_s18 + $0x208] sm:$0xf]  ;;  %v4749_v27 = vld [vmem:[%s5669_s18 + $0x214] sm:$0xf0] }
 0x1b9   : > { %3182 = vmatpush.bf16.msra.mxu2 %v4002_v32  ;;  %3195 = vmatpush.bf16.msra.mxu3 %v4130_v33  ;;  %v4289_v32 = vld [vmem:[%s5669_s18 + $0x4e8] sm:$0xf]  ;;  %v4841_v33 = vld [vmem:[%s5669_s18 + $0x4f4] sm:$0xf0]  ;;  %v3922_v44 = vor.u32 %v4749_v27, %v3921_v26 }
 0x1ba   : > { %v4865_v1 = vld [vmem:[%s5669_s18 + $0x5b4] sm:$0xf0]  ;;  %v4641_v4 = vld [vmem:[%s5669_s18 + $0x7a8] sm:$0xf] }
 0x1bb   : > { %v4929_v5 = vld [vmem:[%s5669_s18 + $0x7b4] sm:$0xf0]  ;;  %v4241_v8 = vld [vmem:[%s5669_s18 + $0x488] sm:$0xf] }
 0x1bc   : > { %3157 = vmatpush.bf16.msra.mxu0 %v3730_v42  ;;  %3170 = vmatpush.bf16.msra.mxu1 %v3858_v43  ;;  %v4673_v42 = vld [vmem:[%s5669_s18 + $0x7e8] sm:$0xf]  ;;  %v4937_v43 = vld [vmem:[%s5669_s18 + $0x7f4] sm:$0xf0]  ;;  %v4642_v11 = vor.u32 %v4929_v5, %v4641_v4 }
 0x1bd   : > { %3183 = vmatpush.bf16.msra.mxu2 %v3986_v46  ;;  %3196 = vmatpush.bf16.msra.mxu3 %v4114_v47  ;;  %v4290_v46 = vor.u32 %v4841_v33, %v4289_v32  ;;  %v4418_v47 = vor.u32 %v4873_v35, %v4417_v34  ;;  %v4674_v51 = vor.u32 %v4937_v43, %v4673_v42  ;;  %v4829_v9 = vld [vmem:[%s5669_s18 + $0x494] sm:$0xf0]  ;;  %v4369_v12 = vld [vmem:[%s5669_s18 + $0x588] sm:$0xf] }
 0x1be   : > { %v4861_v13 = vld [vmem:[%s5669_s18 + $0x594] sm:$0xf0]  ;;  %v4497_v14 = vld [vmem:[%s5669_s18 + $0x688] sm:$0xf]  ;;  %v4242_v18 = vor.u32 %v4829_v9, %v4241_v8 }
 0x1bf   : > { %v4925_v17 = vld [vmem:[%s5669_s18 + $0x794] sm:$0xf0]  ;;  %v4370_v21 = vor.u32 %v4861_v13, %v4369_v12  ;;  %v4353_v28 = vld [vmem:[%s5669_s18 + $0x568] sm:$0xf]  ;;  %v4743_v12 = vld [vmem:[%s5669_s18 + $0x1ec] sm:$0xf] }
 0x1c0   : > { %3158 = vmatpush.bf16.msra.mxu0 %v3714_v54  ;;  %3171 = vmatpush.bf16.msra.mxu1 %v3842_v55  ;;  %v4529_v54 = vld [vmem:[%s5669_s18 + $0x6c8] sm:$0xf]  ;;  %v4901_v55 = vld [vmem:[%s5669_s18 + $0x6d4] sm:$0xf0]  ;;  %v3907_v13 = vld [vmem:[%s5669_s18 + $0x1f8] sm:$0xf0] }
 0x1c1   : > { %3184 = vmatpush.bf16.msra.mxu2 %v3970_v58  ;;  %3197 = vmatpush.bf16.msra.mxu3 %v4098_v59  ;;  %v4274_v58 = vor.u32 %v4837_v49, %v4273_v48  ;;  %v4402_v59 = vor.u32 %v4869_v53, %v4401_v52  ;;  %v4530_v62 = vor.u32 %v4901_v55, %v4529_v54  ;;  %v4857_v29 = vld [vmem:[%s5669_s18 + $0x574] sm:$0xf0]  ;;  %v4481_v32 = vld [vmem:[%s5669_s18 + $0x668] sm:$0xf] }
 0x1c2   : > { %v4889_v33 = vld [vmem:[%s5669_s18 + $0x674] sm:$0xf0]  ;;  %v4609_v34 = vld [vmem:[%s5669_s18 + $0x768] sm:$0xf] }
 0x1c3   : > { %v4921_v35 = vld [vmem:[%s5669_s18 + $0x774] sm:$0xf0]  ;;  %v4482_v42 = vor.u32 %v4889_v33, %v4481_v32  ;;  %v4593_v48 = vld [vmem:[%s5669_s18 + $0x748] sm:$0xf] }
 0x1c4   : > { %3159 = vmatpush.bf16.msra.mxu0 %v3698_v2  ;;  %3172 = vmatpush.bf16.msra.mxu1 %v3826_v3  ;;  %v4513_v2 = vld [vmem:[%s5669_s18 + $0x6a8] sm:$0xf]  ;;  %v4897_v3 = vld [vmem:[%s5669_s18 + $0x6b4] sm:$0xf0]  ;;  %v4610_v43 = vor.u32 %v4921_v35, %v4609_v34  ;;  %v4739_v34 = vld [vmem:[%s5669_s18 + $0x1cc] sm:$0xf] }
 0x1c5   : > { %3185 = vmatpush.bf16.msra.mxu2 %v3954_v6  ;;  %3198 = vmatpush.bf16.msra.mxu3 %v4082_v7  ;;  %v4258_v6 = vor.u32 %v4833_v61, %v4257_v60  ;;  %v4386_v7 = vor.u32 %v4865_v1, %v4385_v0  ;;  %v4514_v10 = vor.u32 %v4897_v3, %v4513_v2  ;;  %v4821_v41 = vld [vmem:[%s5669_s18 + $0x454] sm:$0xf0]  ;;  %v4193_v52 = vld [vmem:[%s5669_s18 + $0x428] sm:$0xf]  ;;  %v3891_v35 = vld [vmem:[%s5669_s18 + $0x1d8] sm:$0xf0] }
 0x1c6   : > { %v4917_v49 = vld [vmem:[%s5669_s18 + $0x754] sm:$0xf0]  ;;  %v4321_v56 = vld [vmem:[%s5669_s18 + $0x528] sm:$0xf] }
 0x1c7   : > { %v4817_v53 = vld [vmem:[%s5669_s18 + $0x434] sm:$0xf0]  ;;  %v4594_v55 = vor.u32 %v4917_v49, %v4593_v48  ;;  %v4577_v60 = vld [vmem:[%s5669_s18 + $0x728] sm:$0xf]  ;;  %v4735_v48 = vld [vmem:[%s5669_s18 + $0x1ac] sm:$0xf] }
 0x1c8   : > { %3160 = vmatpush.bf16.msra.mxu0 %v3682_v15  ;;  %3173 = vmatpush.bf16.msra.mxu1 %v3810_v16  ;;  %v4893_v15 = vld [vmem:[%s5669_s18 + $0x694] sm:$0xf0]  ;;  %v4625_v16 = vld [vmem:[%s5669_s18 + $0x788] sm:$0xf]  ;;  %v3875_v49 = vld [vmem:[%s5669_s18 + $0x1b8] sm:$0xf0] }
 0x1c9   : > { %3186 = vmatpush.bf16.msra.mxu2 %v3938_v22  ;;  %3199 = vmatpush.bf16.msra.mxu3 %v4066_v23  ;;  %v4225_v22 = vld [vmem:[%s5669_s18 + $0x468] sm:$0xf]  ;;  %v4825_v23 = vld [vmem:[%s5669_s18 + $0x474] sm:$0xf0]  ;;  %v4498_v26 = vor.u32 %v4893_v15, %v4497_v14  ;;  %v4626_v27 = vor.u32 %v4925_v17, %v4625_v16  ;;  %v4775_v14 = vld [vmem:[%s5669_s18 + $0x2ec] sm:$0xf] }
 0x1ca   : > { %v4226_v38 = vor.u32 %v4825_v23, %v4225_v22  ;;  %v4849_v57 = vld [vmem:[%s5669_s18 + $0x534] sm:$0xf0]  ;;  %v4305_v2 = vld [vmem:[%s5669_s18 + $0x508] sm:$0xf]  ;;  %v4035_v17 = vld [vmem:[%s5669_s18 + $0x2f8] sm:$0xf0] }
 0x1cb   : > { %v4913_v61 = vld [vmem:[%s5669_s18 + $0x734] sm:$0xf0]  ;;  %v4322_v0 = vor.u32 %v4849_v57, %v4321_v56  ;;  %v4561_v8 = vld [vmem:[%s5669_s18 + $0x708] sm:$0xf]  ;;  %v4038_v32 = vor.u32 %v4775_v14, %v4035_v17  ;;  %v3878_v57 = vor.u32 %v4735_v48, %v3875_v49  ;;  %v4759_v14 = vld [vmem:[%s5669_s18 + $0x26c] sm:$0xf] }
 0x1cc   : > { %3161 = vmatpush.bf16.msra.mxu0 %v3666_v39  ;;  %3174 = vmatpush.bf16.msra.mxu1 %v3794_v40  ;;  %v4354_v39 = vor.u32 %v4857_v29, %v4353_v28  ;;  %v4209_v40 = vld [vmem:[%s5669_s18 + $0x448] sm:$0xf]  ;;  %v4813_v1 = vld [vmem:[%s5669_s18 + $0x414] sm:$0xf0]  ;;  %v4578_v5 = vor.u32 %v4913_v61, %v4577_v60  ;;  %v4707_v28 = vld [vmem:[%s5669_s18 + $0xcc] sm:$0xf] }
 0x1cd   : > { %3187 = vmatpush.bf16.msra.mxu2 %v3922_v44  ;;  %3200 = vmatpush.bf16.msra.mxu3 %v4050_v45  ;;  %v4337_v44 = vld [vmem:[%s5669_s18 + $0x548] sm:$0xf]  ;;  %v4853_v45 = vld [vmem:[%s5669_s18 + $0x554] sm:$0xf0]  ;;  %v3763_v29 = vld [vmem:[%s5669_s18 + $0xd8] sm:$0xf0] }
 0x1ce   : > { %v4845_v3 = vld [vmem:[%s5669_s18 + $0x514] sm:$0xf0]  ;;  %v3971_v17 = vld [vmem:[%s5669_s18 + $0x278] sm:$0xf0] }
 0x1cf   : > { %3162 = vmatmul.bf16.vlgmr.msra.gmra.mxu0 %v5863_v31  ;;  %3175 = vmatmul.bf16.vlgmr.msra.gmra.mxu1 %v5867_v37  ;;  %v4909_v9 = vld [vmem:[%s5669_s18 + $0x714] sm:$0xf0]  ;;  %v4306_v16 = vor.u32 %v4845_v3, %v4305_v2  ;;  %v3987_v2 = vld [vmem:[%s5669_s18 + $0x298] sm:$0xf0]  ;;  %v4795_v3 = vld [vmem:[%s5669_s18 + $0x38c] sm:$0xf] }
 0x1d0   : > { %3206 = vmatpush.bf16.msrb.mxu0 %v4290_v46  ;;  %3219 = vmatpush.bf16.msrb.mxu1 %v4418_v47  ;;  %v4465_v46 = vld [vmem:[%s5669_s18 + $0x648] sm:$0xf]  ;;  %v4885_v47 = vld [vmem:[%s5669_s18 + $0x654] sm:$0xf0]  ;;  %v4562_v23 = vor.u32 %v4909_v9, %v4561_v8  ;;  %v3715_v8 = vld [vmem:[%s5669_s18 + $0x78] sm:$0xf0] }
 0x1d1   : > { %3232 = vmatpush.bf16.msrb.mxu2 %v4546_v50  ;;  %3245 = vmatpush.bf16.msrb.mxu3 %v4674_v51  ;;  %v4210_v50 = vor.u32 %v4821_v41, %v4209_v40  ;;  %v4338_v51 = vor.u32 %v4853_v45, %v4337_v44  ;;  %v4466_v54 = vor.u32 %v4885_v47, %v4465_v46  ;;  %v4803_v40 = vld [vmem:[%s5669_s18 + $0x3cc] sm:$0xf]  ;;  %v4147_v41 = vld [vmem:[%s5669_s18 + $0x3d8] sm:$0xf0] }
 0x1d2   : > { %3188 = vmatmul.bf16.vlgmr.msra.gmra.mxu2 %v5861_v30  ;;  %3201 = vmatmul.bf16.vlgmr.msra.gmra.mxu3 %v5865_v36  ;;  %v4703_v44 = vld [vmem:[%s5669_s18 + $0xac] sm:$0xf]  ;;  %v3747_v45 = vld [vmem:[%s5669_s18 + $0xb8] sm:$0xf0]  ;;  %v4150_v47 = vor.u32 %v4803_v40, %v4147_v41 }
 0x1d3   : > { %v3750_v56 = vor.u32 %v4703_v44, %v3747_v45  ;;  %v3955_v40 = vld [vmem:[%s5669_s18 + $0x258] sm:$0xf0]  ;;  %v4787_v41 = vld [vmem:[%s5669_s18 + $0x34c] sm:$0xf] }
 0x1d4   : > { %3207 = vmatpush.bf16.msrb.mxu0 %v4274_v58  ;;  %3220 = vmatpush.bf16.msrb.mxu1 %v4402_v59  ;;  %v4449_v58 = vld [vmem:[%s5669_s18 + $0x628] sm:$0xf]  ;;  %v4881_v59 = vld [vmem:[%s5669_s18 + $0x634] sm:$0xf0]  ;;  %v4687_v45 = vld [vmem:[%s5669_s18 + $0x2c] sm:$0xf] }
 0x1d5   : > { %3233 = vmatpush.bf16.msrb.mxu2 %v4530_v62  ;;  %3246 = vmatpush.bf16.msrb.mxu3 %v4658_v63  ;;  %v4177_v62 = vld [vmem:[%s5669_s18 + $0x408] sm:$0xf]  ;;  %v4194_v63 = vor.u32 %v4817_v53, %v4193_v52  ;;  %v4450_v4 = vor.u32 %v4881_v59, %v4449_v58  ;;  %v4799_v52 = vld [vmem:[%s5669_s18 + $0x3ac] sm:$0xf]  ;;  %v4131_v53 = vld [vmem:[%s5669_s18 + $0x3b8] sm:$0xf0] }
 0x1d6   : > { %v4178_v15 = vor.u32 %v4813_v1, %v4177_v62  ;;  %v4699_v58 = vld [vmem:[%s5669_s18 + $0x8c] sm:$0xf]  ;;  %v3731_v59 = vld [vmem:[%s5669_s18 + $0x98] sm:$0xf0]  ;;  %v4134_v62 = vor.u32 %v4799_v52, %v4131_v53 }
 0x1d7   : > { %v4763_v1 = vld [vmem:[%s5669_s18 + $0x28c] sm:$0xf] }
 0x1d8   : > { %3208 = vmatpush.bf16.msrb.mxu0 %v4258_v6  ;;  %3221 = vmatpush.bf16.msrb.mxu1 %v4386_v7  ;;  %v4433_v6 = vld [vmem:[%s5669_s18 + $0x608] sm:$0xf]  ;;  %v4877_v7 = vld [vmem:[%s5669_s18 + $0x614] sm:$0xf0]  ;;  %v4751_v52 = vld [vmem:[%s5669_s18 + $0x22c] sm:$0xf] }
 0x1d9   : > { %3234 = vmatpush.bf16.msrb.mxu2 %v4514_v10  ;;  %3247 = vmatpush.bf16.msrb.mxu3 %v4642_v11  ;;  %v4711_v10 = vld [vmem:[%s5669_s18 + $0xec] sm:$0xf]  ;;  %v3779_v11 = vld [vmem:[%s5669_s18 + $0xf8] sm:$0xf0]  ;;  %v4434_v22 = vor.u32 %v4877_v7, %v4433_v6 }
 0x1da   : > { %v4695_v7 = vld [vmem:[%s5669_s18 + $0x6c] sm:$0xf] }
 0x1dc   : > { %3209 = vmatpush.bf16.msrb.mxu0 %v4242_v18  ;;  %3222 = vmatpush.bf16.msrb.mxu1 %v4370_v21  ;;  %v4807_v18 = vld [vmem:[%s5669_s18 + $0x3ec] sm:$0xf]  ;;  %v4163_v21 = vld [vmem:[%s5669_s18 + $0x3f8] sm:$0xf0] }
 0x1dd   : > { %3235 = vmatpush.bf16.msrb.mxu2 %v4498_v26  ;;  %3248 = vmatpush.bf16.msrb.mxu3 %v4626_v27  ;;  %v3782_v26 = vor.u32 %v4711_v10, %v3779_v11  ;;  %v3910_v27 = vor.u32 %v4743_v12, %v3907_v13  ;;  %v4166_v33 = vor.u32 %v4807_v18, %v4163_v21  ;;  %v4727_v12 = vld [vmem:[%s5669_s18 + $0x16c] sm:$0xf]  ;;  %v3843_v13 = vld [vmem:[%s5669_s18 + $0x178] sm:$0xf0] }
 0x1de   : > { %v3990_v10 = vor.u32 %v4763_v1, %v3987_v2  ;;  %v4791_v18 = vld [vmem:[%s5669_s18 + $0x36c] sm:$0xf]  ;;  %v4099_v21 = vld [vmem:[%s5669_s18 + $0x378] sm:$0xf0] }
 0x1df   : > { %v3795_v1 = vld [vmem:[%s5669_s18 + $0x118] sm:$0xf0] }
 0x1e0   : > { %3210 = vmatpush.bf16.msrb.mxu0 %v4226_v38  ;;  %3223 = vmatpush.bf16.msrb.mxu1 %v4354_v39  ;;  %v4771_v38 = vld [vmem:[%s5669_s18 + $0x2cc] sm:$0xf]  ;;  %v4019_v39 = vld [vmem:[%s5669_s18 + $0x2d8] sm:$0xf0] }
 0x1e1   : > { %3236 = vmatpush.bf16.msrb.mxu2 %v4482_v42  ;;  %3249 = vmatpush.bf16.msrb.mxu3 %v4610_v43  ;;  %v3766_v42 = vor.u32 %v4707_v28, %v3763_v29  ;;  %v3894_v43 = vor.u32 %v4739_v34, %v3891_v35  ;;  %v4022_v46 = vor.u32 %v4771_v38, %v4019_v39  ;;  %v4691_v29 = vld [vmem:[%s5669_s18 + $0x4c] sm:$0xf]  ;;  %v3827_v38 = vld [vmem:[%s5669_s18 + $0x158] sm:$0xf0] }
 0x1e2   : > { %v3846_v28 = vor.u32 %v4727_v12, %v3843_v13  ;;  %v4102_v34 = vor.u32 %v4791_v18, %v4099_v21  ;;  %v4723_v35 = vld [vmem:[%s5669_s18 + $0x14c] sm:$0xf]  ;;  %v4419_v12 = vld [vmem:[%s5669_s18 + $0x5f8] sm:$0xf0] }
 0x1e3   : > { %v4755_v39 = vld [vmem:[%s5669_s18 + $0x24c] sm:$0xf]  ;;  %v3830_v44 = vor.u32 %v4723_v35, %v3827_v38  ;;  %v4675_v18 = vld [vmem:[%s5669_s18 + $0x7f8] sm:$0xf0] }
 0x1e4   : > { %3211 = vmatpush.bf16.msrb.mxu0 %v4210_v50  ;;  %3224 = vmatpush.bf16.msrb.mxu1 %v4338_v51  ;;  %v4767_v50 = vld [vmem:[%s5669_s18 + $0x2ac] sm:$0xf]  ;;  %v4003_v51 = vld [vmem:[%s5669_s18 + $0x2b8] sm:$0xf0]  ;;  %v3958_v48 = vor.u32 %v4755_v39, %v3955_v40 }
 0x1e5   : > { %3237 = vmatpush.bf16.msrb.mxu2 %v4466_v54  ;;  %3250 = vmatpush.bf16.msrb.mxu3 %v4594_v55  ;;  %v4006_v61 = vor.u32 %v4767_v50, %v4003_v51  ;;  %v4719_v50 = vld [vmem:[%s5669_s18 + $0x12c] sm:$0xf]  ;;  %v3811_v51 = vld [vmem:[%s5669_s18 + $0x138] sm:$0xf0] }
 0x1e6   : > { %v4903_v13 = vld [vmem:[%s5669_s18 + $0x6ec] sm:$0xf]  ;;  %v4403_v39 = vld [vmem:[%s5669_s18 + $0x5d8] sm:$0xf0] }
 0x1e7   : > { %v4867_v38 = vld [vmem:[%s5669_s18 + $0x5cc] sm:$0xf] }
 0x1e8   : > { %3212 = vmatpush.bf16.msrb.mxu0 %v4194_v63  ;;  %3225 = vmatpush.bf16.msrb.mxu1 %v4322_v0  ;;  %v4731_v63 = vld [vmem:[%s5669_s18 + $0x18c] sm:$0xf]  ;;  %v3859_v0 = vld [vmem:[%s5669_s18 + $0x198] sm:$0xf0] }
 0x1e9   : > { %3238 = vmatpush.bf16.msrb.mxu2 %v4450_v4  ;;  %3251 = vmatpush.bf16.msrb.mxu3 %v4578_v5  ;;  %v4115_v4 = vld [vmem:[%s5669_s18 + $0x398] sm:$0xf0]  ;;  %v3734_v5 = vor.u32 %v4699_v58, %v3731_v59  ;;  %v3862_v6 = vor.u32 %v4731_v63, %v3859_v0  ;;  %v4683_v58 = vld [vmem:[%s5669_s18 + $0xc] sm:$0xf] }
 0x1ea   : > { %v4118_v11 = vor.u32 %v4795_v3, %v4115_v4  ;;  %v3667_v63 = vld [vmem:[%s5669_s18 + $0x18] sm:$0xf0]  ;;  %v4715_v0 = vld [vmem:[%s5669_s18 + $0x10c] sm:$0xf] }
 0x1eb   : > { %v2955_v54 = vpop.f32.mrf.mxu0  ;;  %v4747_v4 = vld [vmem:[%s5669_s18 + $0x20c] sm:$0xf] }
 0x1ec   : > { %3213 = vmatpush.bf16.msrb.mxu0 %v4178_v15  ;;  %3226 = vmatpush.bf16.msrb.mxu1 %v4306_v16  ;;  %v2968_v55 = vpop.f32.mrf.mxu1  ;;  %v4899_v40 = vld [vmem:[%s5669_s18 + $0x6cc] sm:$0xf] }
 0x1ed   : > { %3239 = vmatpush.bf16.msrb.mxu2 %v4434_v22  ;;  %3252 = vmatpush.bf16.msrb.mxu3 %v4562_v23  ;;  %v2969_v60 = vadd.f32 %v2968_v55, %v2955_v54  ;;  %v3939_v54 = vld [vmem:[%s5669_s18 + $0x238] sm:$0xf0]  ;;  %v4783_v55 = vld [vmem:[%s5669_s18 + $0x32c] sm:$0xf] }
 0x1ee   : > { %v3942_v2 = vor.u32 %v4751_v52, %v3939_v54  ;;  %v4387_v54 = vld [vmem:[%s5669_s18 + $0x5b8] sm:$0xf0] }
 0x1ef   : > { %3214 = vmatmul.bf16.vlgmr.msrb.gmra.mxu0 %v5902_v20  ;;  %3227 = vmatmul.bf16.vlgmr.msrb.gmra.mxu1 %v5909_v25 }
 0x1f0   : > { %3258 = vmatpush.bf16.msra.mxu0 %v3782_v26  ;;  %3271 = vmatpush.bf16.msra.mxu1 %v3910_v27  ;;  %v3718_v27 = vor.u32 %v4695_v7, %v3715_v8  ;;  %v4051_v8 = vld [vmem:[%s5669_s18 + $0x318] sm:$0xf0] }
 0x1f1   : > { %3284 = vmatpush.bf16.msra.mxu2 %v4038_v32  ;;  %3297 = vmatpush.bf16.msra.mxu3 %v4166_v33  ;;  %v2981_v9 = vpop.f32.mrf.mxu2  ;;  %v3699_v32 = vld [vmem:[%s5669_s18 + $0x58] sm:$0xf0]  ;;  %v3974_v33 = vor.u32 %v4759_v14, %v3971_v17  ;;  %v3670_v14 = vor.u32 %v4683_v58, %v3667_v63  ;;  %v4935_v17 = vld [vmem:[%s5669_s18 + $0x7ec] sm:$0xf] }
 0x1f2   : > { %3240 = vmatmul.bf16.vlgmr.msrb.gmra.mxu2 %v5900_v19  ;;  %3253 = vmatmul.bf16.vlgmr.msrb.gmra.mxu3 %v5907_v24  ;;  %v2982_v15 = vadd.f32 %v2981_v9, %v2969_v60  ;;  %v2994_v16 = vpop.f32.mrf.mxu3  ;;  %v4839_v9 = vld [vmem:[%s5669_s18 + $0x4ec] sm:$0xf]  ;;  %v4678_v35 = vor.u32 %v4935_v17, %v4675_v18  ;;  %v4643_v58 = vld [vmem:[%s5669_s18 + $0x7b8] sm:$0xf0] }
 0x1f3   : > { %v2957_v22 = vpop.f32.mrf.mxu0  ;;  %v4483_v17 = vld [vmem:[%s5669_s18 + $0x678] sm:$0xf0]  ;;  %v4919_v18 = vld [vmem:[%s5669_s18 + $0x76c] sm:$0xf] }
 0x1f4   : > { %3259 = vmatpush.bf16.msra.mxu0 %v3766_v42  ;;  %3272 = vmatpush.bf16.msra.mxu1 %v3894_v43  ;;  %v2995_v23 = vadd.f32 %v2994_v16, %v2982_v15  ;;  %v2970_v26 = vpop.f32.mrf.mxu1  ;;  %v4083_v42 = vld [vmem:[%s5669_s18 + $0x358] sm:$0xf0]  ;;  %v3702_v43 = vor.u32 %v4691_v29, %v3699_v32  ;;  %v3798_v15 = vor.u32 %v4715_v0, %v3795_v1  ;;  %v4835_v32 = vld [vmem:[%s5669_s18 + $0x4cc] sm:$0xf] }
 0x1f5   : > { %3285 = vmatpush.bf16.msra.mxu2 %v4022_v46  ;;  %3298 = vmatpush.bf16.msra.mxu3 %v4150_v47  ;;  %v3683_v46 = vld [vmem:[%s5669_s18 + $0x38] sm:$0xf0]  ;;  %v4086_v49 = vor.u32 %v4787_v41, %v4083_v42  ;;  %v4859_v0 = vld [vmem:[%s5669_s18 + $0x58c] sm:$0xf] }
 0x1f6   : > { %v4547_v16 = vld [vmem:[%s5669_s18 + $0x6f8] sm:$0xf0] }
 0x1f7   : > { %v4371_v1 = vld [vmem:[%s5669_s18 + $0x598] sm:$0xf0] }
 0x1f8   : > { %3260 = vmatpush.bf16.msra.mxu0 %v3750_v56  ;;  %3273 = vmatpush.bf16.msra.mxu1 %v3878_v57  ;;  %v4067_v56 = vld [vmem:[%s5669_s18 + $0x338] sm:$0xf0] }
 0x1f9   : > { %3286 = vmatpush.bf16.msra.mxu2 %v4006_v61  ;;  %3299 = vmatpush.bf16.msra.mxu3 %v4134_v62  ;;  %v2983_v47 = vpop.f32.mrf.mxu2  ;;  %v3686_v61 = vor.u32 %v4687_v45, %v3683_v46  ;;  %v3814_v62 = vor.u32 %v4719_v50, %v3811_v51  ;;  %v4070_v3 = vor.u32 %v4783_v55, %v4067_v56  ;;  %v4659_v45 = vld [vmem:[%s5669_s18 + $0x7d8] sm:$0xf0]  ;;  %v4895_v55 = vld [vmem:[%s5669_s18 + $0x6ac] sm:$0xf] }
 0x1fa   : > { %v2996_v53 = vpop.f32.mrf.mxu3  ;;  %v4259_v50 = vld [vmem:[%s5669_s18 + $0x4b8] sm:$0xf0] }
 0x1fb   : > { %v3007_v57 = vpop.f32.mrf.mxu0  ;;  %v4863_v53 = vld [vmem:[%s5669_s18 + $0x5ac] sm:$0xf]  ;;  %v4515_v56 = vld [vmem:[%s5669_s18 + $0x6b8] sm:$0xf0] }
 0x1fc   : > { %3261 = vmatpush.bf16.msra.mxu0 %v3734_v5  ;;  %3274 = vmatpush.bf16.msra.mxu1 %v3862_v6  ;;  %v3008_v59 = vadd.f32 %v3007_v57, %v2995_v23  ;;  %v3020_v60 = vpop.f32.mrf.mxu1  ;;  %v3923_v5 = vld [vmem:[%s5669_s18 + $0x218] sm:$0xf0]  ;;  %v4779_v6 = vld [vmem:[%s5669_s18 + $0x30c] sm:$0xf] }
 0x1fd   : > { %3287 = vmatpush.bf16.msra.mxu2 %v3990_v10  ;;  %3300 = vmatpush.bf16.msra.mxu3 %v4118_v11  ;;  %v4291_v10 = vld [vmem:[%s5669_s18 + $0x4f8] sm:$0xf0]  ;;  %v4871_v11 = vld [vmem:[%s5669_s18 + $0x5ec] sm:$0xf]  ;;  %v3926_v22 = vor.u32 %v4747_v4, %v3923_v5  ;;  %v4054_v23 = vor.u32 %v4779_v6, %v4051_v8 }
 0x1fe   : > { %v3021_v7 = vadd.f32 %v3020_v60, %v3008_v59  ;;  %v4422_v29 = vor.u32 %v4871_v11, %v4419_v12  ;;  %v4927_v57 = vld [vmem:[%s5669_s18 + $0x7ac] sm:$0xf]  ;;  %v4627_v4 = vld [vmem:[%s5669_s18 + $0x798] sm:$0xf0] }
 0x1ff   : > { %v4823_v8 = vld [vmem:[%s5669_s18 + $0x46c] sm:$0xf] }
 0x200   : > { %3262 = vmatpush.bf16.msra.mxu0 %v3718_v27  ;;  %3275 = vmatpush.bf16.msra.mxu1 %v3846_v28  ;;  %v4294_v28 = vor.u32 %v4839_v9, %v4291_v10  ;;  %v4227_v9 = vld [vmem:[%s5669_s18 + $0x478] sm:$0xf0] }
 0x201   : > { %3288 = vmatpush.bf16.msra.mxu2 %v3974_v33  ;;  %3301 = vmatpush.bf16.msra.mxu3 %v4102_v34  ;;  %v3033_v21 = vpop.f32.mrf.mxu2  ;;  %v4275_v33 = vld [vmem:[%s5669_s18 + $0x4d8] sm:$0xf0]  ;;  %v4550_v34 = vor.u32 %v4903_v13, %v4547_v16  ;;  %v4855_v13 = vld [vmem:[%s5669_s18 + $0x56c] sm:$0xf] }
 0x202   : > { %v3034_v26 = vadd.f32 %v3033_v21, %v3021_v7  ;;  %v3046_v27 = vpop.f32.mrf.mxu3  ;;  %v4278_v47 = vor.u32 %v4835_v32, %v4275_v33  ;;  %v4374_v7 = vor.u32 %v4859_v0, %v4371_v1  ;;  %v4611_v21 = vld [vmem:[%s5669_s18 + $0x778] sm:$0xf0]  ;;  %v4851_v32 = vld [vmem:[%s5669_s18 + $0x54c] sm:$0xf] }
 0x203   : > { %v3009_v41 = vpop.f32.mrf.mxu0  ;;  %v4339_v33 = vld [vmem:[%s5669_s18 + $0x558] sm:$0xf0]  ;;  %v4875_v0 = vld [vmem:[%s5669_s18 + $0x60c] sm:$0xf] }
 0x204   : > { %3263 = vmatpush.bf16.msra.mxu0 %v3702_v43  ;;  %3276 = vmatpush.bf16.msra.mxu1 %v3830_v44  ;;  %v6224_v42 = vadd.f32 %v3046_v27, %v3034_v26  ;;  %v4531_v43 = vld [vmem:[%s5669_s18 + $0x6d8] sm:$0xf0]  ;;  %v4931_v44 = vld [vmem:[%s5669_s18 + $0x7cc] sm:$0xf]  ;;  %v3022_v46 = vpop.f32.mrf.mxu1 }
 0x205   : > { %3289 = vmatpush.bf16.msra.mxu2 %v3958_v48  ;;  %3302 = vmatpush.bf16.msra.mxu3 %v4086_v49  ;;  %v4406_v48 = vor.u32 %v4867_v38, %v4403_v39  ;;  %v4831_v49 = vld [vmem:[%s5669_s18 + $0x4ac] sm:$0xf]  ;;  %v4534_v51 = vor.u32 %v4899_v40, %v4531_v43  ;;  %v4662_v52 = vor.u32 %v4931_v44, %v4659_v45  ;;  %v4211_v27 = vld [vmem:[%s5669_s18 + $0x458] sm:$0xf0] }
 0x206   : > { %v4262_v60 = vor.u32 %v4831_v49, %v4259_v50  ;;  %v4819_v26 = vld [vmem:[%s5669_s18 + $0x44c] sm:$0xf]  ;;  %v4467_v38 = vld [vmem:[%s5669_s18 + $0x658] sm:$0xf0]  ;;  %v4342_v46 = vor.u32 %v4851_v32, %v4339_v33 }
 0x207   : > { %v4915_v39 = vld [vmem:[%s5669_s18 + $0x74c] sm:$0xf]  ;;  %v4595_v40 = vld [vmem:[%s5669_s18 + $0x758] sm:$0xf0]  ;;  %v4214_v45 = vor.u32 %v4819_v26, %v4211_v27 }
 0x208   : > { %3264 = vmatpush.bf16.msra.mxu0 %v3686_v61  ;;  %3277 = vmatpush.bf16.msra.mxu1 %v3814_v62  ;;  %v4827_v61 = vld [vmem:[%s5669_s18 + $0x48c] sm:$0xf]  ;;  %v4243_v62 = vld [vmem:[%s5669_s18 + $0x498] sm:$0xf0] }
 0x209   : > { %3290 = vmatpush.bf16.msra.mxu2 %v3942_v2  ;;  %3303 = vmatpush.bf16.msra.mxu3 %v4070_v3  ;;  %v3035_v59 = vpop.f32.mrf.mxu2  ;;  %v4499_v2 = vld [vmem:[%s5669_s18 + $0x698] sm:$0xf0]  ;;  %v4923_v3 = vld [vmem:[%s5669_s18 + $0x78c] sm:$0xf]  ;;  %v4246_v6 = vor.u32 %v4827_v61, %v4243_v62 }
 0x20a   : > { %v3048_v63 = vpop.f32.mrf.mxu3  ;;  %v4630_v12 = vor.u32 %v4923_v3, %v4627_v4  ;;  %v4179_v61 = vld [vmem:[%s5669_s18 + $0x418] sm:$0xf0] }
 0x20b   : > { %v4563_v3 = vld [vmem:[%s5669_s18 + $0x718] sm:$0xf0] }
 0x20c   : > { %3265 = vmatpush.bf16.msra.mxu0 %v3670_v14  ;;  %3278 = vmatpush.bf16.msra.mxu1 %v3798_v15  ;;  %v3059_v5 = vpop.f32.mrf.mxu0  ;;  %v3072_v10 = vpop.f32.mrf.mxu1  ;;  %v4355_v14 = vld [vmem:[%s5669_s18 + $0x578] sm:$0xf0]  ;;  %v4887_v15 = vld [vmem:[%s5669_s18 + $0x66c] sm:$0xf] }
 0x20d   : > { %3291 = vmatpush.bf16.msra.mxu2 %v3926_v22  ;;  %3304 = vmatpush.bf16.msra.mxu3 %v4054_v23  ;;  %v3073_v16 = vadd.f32 %v3072_v10, %v3059_v5  ;;  %v4230_v22 = vor.u32 %v4823_v8, %v4227_v9  ;;  %v4358_v23 = vor.u32 %v4855_v13, %v4355_v14 }
 0x20f   : > { %3266 = vmatmul.bf16.vlgmr.msra.gmra.mxu0 %v5863_v31  ;;  %3279 = vmatmul.bf16.vlgmr.msra.gmra.mxu1 %v5867_v37  ;;  %v4518_v31 = vor.u32 %v4895_v55, %v4515_v56  ;;  %v4891_v37 = vld [vmem:[%s5669_s18 + $0x68c] sm:$0xf]  ;;  %v4451_v56 = vld [vmem:[%s5669_s18 + $0x638] sm:$0xf0] }
 0x210   : > { %3310 = vmatpush.bf16.msrb.mxu0 %v4294_v28  ;;  %3323 = vmatpush.bf16.msrb.mxu1 %v4422_v29  ;;  %v4502_v11 = vor.u32 %v4891_v37, %v4499_v2  ;;  %v4486_v28 = vor.u32 %v4887_v15, %v4483_v17  ;;  %v4614_v29 = vor.u32 %v4919_v18, %v4611_v21  ;;  %v4879_v55 = vld [vmem:[%s5669_s18 + $0x62c] sm:$0xf]  ;;  %v4435_v37 = vld [vmem:[%s5669_s18 + $0x618] sm:$0xf0] }
 0x211   : > { %3336 = vmatpush.bf16.msrb.mxu2 %v4550_v34  ;;  %3349 = vmatpush.bf16.msrb.mxu3 %v4678_v35  ;;  %v4883_v34 = vld [vmem:[%s5669_s18 + $0x64c] sm:$0xf]  ;;  %v4454_v62 = vor.u32 %v4879_v55, %v4451_v56 }
 0x212   : > { %3292 = vmatmul.bf16.vlgmr.msra.gmra.mxu2 %v5861_v30  ;;  %3305 = vmatmul.bf16.vlgmr.msra.gmra.mxu3 %v5865_v36  ;;  %v4390_v30 = vor.u32 %v4863_v53, %v4387_v54  ;;  %v4646_v36 = vor.u32 %v4927_v57, %v4643_v58  ;;  %v4847_v53 = vld [vmem:[%s5669_s18 + $0x52c] sm:$0xf]  ;;  %v4323_v54 = vld [vmem:[%s5669_s18 + $0x538] sm:$0xf0] }
 0x213   : > { %v4911_v57 = vld [vmem:[%s5669_s18 + $0x72c] sm:$0xf]  ;;  %v4579_v58 = vld [vmem:[%s5669_s18 + $0x738] sm:$0xf0] }
 0x214   : > { %3311 = vmatpush.bf16.msrb.mxu0 %v4278_v47  ;;  %3324 = vmatpush.bf16.msrb.mxu1 %v4406_v48  ;;  %v3061_v44 = vpop.f32.mrf.mxu0  ;;  %v4815_v47 = vld [vmem:[%s5669_s18 + $0x42c] sm:$0xf]  ;;  %v4195_v48 = vld [vmem:[%s5669_s18 + $0x438] sm:$0xf0]  ;;  %v3074_v50 = vpop.f32.mrf.mxu1  ;;  %v4582_v63 = vor.u32 %v4911_v57, %v4579_v58 }
 0x215   : > { %3337 = vmatpush.bf16.msrb.mxu2 %v4534_v51  ;;  %3350 = vmatpush.bf16.msrb.mxu3 %v4662_v52  ;;  %v3085_v35 = vpop.f32.mrf.mxu2  ;;  %v3098_v43 = vpop.f32.mrf.mxu3  ;;  %v4470_v51 = vor.u32 %v4883_v34, %v4467_v38  ;;  %v4598_v52 = vor.u32 %v4915_v39, %v4595_v40  ;;  %v4198_v59 = vor.u32 %v4815_v47, %v4195_v48  ;;  %v4907_v2 = vld [vmem:[%s5669_s18 + $0x70c] sm:$0xf] }
 0x216   : > { %v3086_v41 = vadd.f32 %v3085_v35, %v3073_v16  ;;  %v4566_v8 = vor.u32 %v4907_v2, %v4563_v3 }
 0x218   : > { %3312 = vmatpush.bf16.msrb.mxu0 %v4262_v60  ;;  %3325 = vmatpush.bf16.msrb.mxu1 %v4390_v30  ;;  %v3099_v49 = vadd.f32 %v3098_v43, %v3086_v41  ;;  %v4326_v60 = vor.u32 %v4847_v53, %v4323_v54  ;;  %v4811_v30 = vld [vmem:[%s5669_s18 + $0x40c] sm:$0xf] }
 0x219   : > { %3338 = vmatpush.bf16.msrb.mxu2 %v4518_v31  ;;  %3351 = vmatpush.bf16.msrb.mxu3 %v4646_v36  ;;  %v4843_v31 = vld [vmem:[%s5669_s18 + $0x50c] sm:$0xf]  ;;  %v4307_v36 = vld [vmem:[%s5669_s18 + $0x518] sm:$0xf0]  ;;  %v4182_v5 = vor.u32 %v4811_v30, %v4179_v61  ;;  %s3646_s18 = sshll.u32 %s5040_s23, 2 }
 0x21a   : > { %p1340_p9 = scmp.lt.s32.totalorder %s3646_s18, 15 }
 0x21c   : > { %3313 = vmatpush.bf16.msrb.mxu0 %v4246_v6  ;;  %3326 = vmatpush.bf16.msrb.mxu1 %v4374_v7  ;;  %v4310_v6 = vor.u32 %v4843_v31, %v4307_v36  ;;  %v4438_v7 = vor.u32 %v4875_v0, %v4435_v37  ;;  %s6365_s18 = smov (!%p1340_p9, %s3646_s18), 15 }
 0x21d   : > { %3339 = vmatpush.bf16.msrb.mxu2 %v4502_v11  ;;  %3352 = vmatpush.bf16.msrb.mxu3 %v4630_v12  ;;  %v3087_v1 = vpop.f32.mrf.mxu2  ;;  %v3100_v4 = vpop.f32.mrf.mxu3  ;;  %s1345_s16 = sadd.s32 %s3647_s10, %s6365_s18 }
 0x21e   : > { %s3648_s17 = sshll.u32 %s1345_s16, 1 }
 0x21f   : > { %s1347_s20 = scalar_lea.vmem %s6324_s5, %s3648_s17  ;;  %s1361_s30 = scalar_lea.vmem %s6325_s6, %s3648_s17 }
 0x220   : > { %3314 = vmatpush.bf16.msrb.mxu0 %v4230_v22  ;;  %3327 = vmatpush.bf16.msrb.mxu1 %v4358_v23 }
 0x221   : > { %3340 = vmatpush.bf16.msrb.mxu2 %v4486_v28  ;;  %3353 = vmatpush.bf16.msrb.mxu3 %v4614_v29 }
 0x224   : > { %3315 = vmatpush.bf16.msrb.mxu0 %v4214_v45  ;;  %3328 = vmatpush.bf16.msrb.mxu1 %v4342_v46 }
 0x225   : > { %3341 = vmatpush.bf16.msrb.mxu2 %v4470_v51  ;;  %3354 = vmatpush.bf16.msrb.mxu3 %v4598_v52 }
 0x228   : > { %3316 = vmatpush.bf16.msrb.mxu0 %v4198_v59  ;;  %3329 = vmatpush.bf16.msrb.mxu1 %v4326_v60 }
 0x229   : > { %3342 = vmatpush.bf16.msrb.mxu2 %v4454_v62  ;;  %3355 = vmatpush.bf16.msrb.mxu3 %v4582_v63 }
 0x22c   : > { %3317 = vmatpush.bf16.msrb.mxu0 %v4182_v5  ;;  %3330 = vmatpush.bf16.msrb.mxu1 %v4310_v6  ;;  %v3111_v9 = vpop.f32.mrf.mxu0  ;;  %v3124_v11 = vpop.f32.mrf.mxu1 }
 0x22d   : > { %3343 = vmatpush.bf16.msrb.mxu2 %v4438_v7  ;;  %3356 = vmatpush.bf16.msrb.mxu3 %v4566_v8  ;;  %v3112_v10 = vadd.f32 %v3111_v9, %v3099_v49 }
 0x22f   : > { %3318 = vmatmul.bf16.vlgmr.msrb.gmra.mxu0 %v5902_v20  ;;  %3331 = vmatmul.bf16.vlgmr.msrb.gmra.mxu1 %v5909_v25  ;;  %v3125_v12 = vadd.f32 %v3124_v11, %v3112_v10  ;;  %v3362_v11 = vld [vmem:[%s1347_s20] sm:$0xff] }
 0x230   : > { %3344 = vmatmul.bf16.vlgmr.msrb.gmra.mxu2 %v5900_v19  ;;  %3357 = vmatmul.bf16.vlgmr.msrb.gmra.mxu3 %v5907_v24 }
 0x234   : > { %v3113_v16 = vpop.f32.mrf.mxu0  ;;  %v3126_v18 = vpop.f32.mrf.mxu1 }
 0x235   : > { %v3137_v13 = vpop.f32.mrf.mxu2  ;;  %v3150_v15 = vpop.f32.mrf.mxu3 }
 0x236   : > { %v3138_v14 = vadd.f32 %v3137_v13, %v3125_v12 }
 0x238   : > { %v3151_v17 = vadd.f32 %v3150_v15, %v3138_v14 }
 0x23a   : > { %4994 = vtanh.f32 %v3151_v17 }
 0x23b   : > { %4996 = vtanh.f32 %v6224_v42 }
 0x23d   : > { %v3139_v20 = vpop.f32.mrf.mxu2  ;;  %v3152_v21 = vpop.f32.mrf.mxu3 }
 0x240   : > { %v4995_v25 = vpop.eup %4994 }
 0x241   : > { %v3371_v19 = vrot.slane %v4995_v25, 6  ;;  %v4997_v22 = vpop.eup %4996 }
 0x243   : > { %v6286_v24 = vsel %vm3374_vm0, %v4997_v22, %v3371_v19 }
 0x24c   : > { %v3163_v23 = vpop.f32.mrf.mxu0  ;;  %v3176_v26 = vpop.f32.mrf.mxu1 }
 0x24d   : > { %v3177_v27 = vadd.f32 %v3176_v26, %v3163_v23 }
 0x254   : > { %v3165_v33 = vpop.f32.mrf.mxu0  ;;  %v3178_v35 = vpop.f32.mrf.mxu1 }
 0x255   : > { %v3189_v28 = vpop.f32.mrf.mxu2  ;;  %v3202_v32 = vpop.f32.mrf.mxu3 }
 0x256   : > { %v3190_v29 = vadd.f32 %v3189_v28, %v3177_v27 }
 0x258   : > { %v3203_v34 = vadd.f32 %v3202_v32, %v3190_v29 }
 0x25d   : > { %v3191_v38 = vpop.f32.mrf.mxu2  ;;  %v3204_v39 = vpop.f32.mrf.mxu3 }
 0x26c   : > { %v3215_v42 = vpop.f32.mrf.mxu0  ;;  %v3228_v40 = vpop.f32.mrf.mxu1 }
 0x26d   : > { %v3216_v57 = vadd.f32 %v3215_v42, %v3203_v34 }
 0x26f   : > { %v3229_v59 = vadd.f32 %v3228_v40, %v3216_v57 }
 0x274   : > { %v3217_v44 = vpop.f32.mrf.mxu0  ;;  %v3230_v45 = vpop.f32.mrf.mxu1 }
 0x275   : > { %v3241_v41 = vpop.f32.mrf.mxu2  ;;  %v3254_v43 = vpop.f32.mrf.mxu3 }
 0x276   : > { %v3242_v62 = vadd.f32 %v3241_v41, %v3229_v59 }
 0x278   : > { %v3255_v31 = vadd.f32 %v3254_v43, %v3242_v62 }
 0x27a   : > { %4998 = vtanh.f32 %v3255_v31 }
 0x27d   : > { %v3243_v46 = vpop.f32.mrf.mxu2  ;;  %v3256_v47 = vpop.f32.mrf.mxu3 }
 0x280   : > { %v4999_v7 = vpop.eup %4998 }
 0x281   : > { %v3372_v9 = vrot.slane %v4999_v7, 4 }
 0x28c   : > { %v3267_v48 = vpop.f32.mrf.mxu0  ;;  %v3280_v49 = vpop.f32.mrf.mxu1 }
 0x28d   : > { %v3281_v56 = vadd.f32 %v3280_v49, %v3267_v48 }
 0x294   : > { %v3269_v52 = vpop.f32.mrf.mxu0  ;;  %v3282_v53 = vpop.f32.mrf.mxu1 }
 0x295   : > { %v3293_v50 = vpop.f32.mrf.mxu2  ;;  %v3306_v51 = vpop.f32.mrf.mxu3 }
 0x296   : > { %v3294_v58 = vadd.f32 %v3293_v50, %v3281_v56 }
 0x298   : > { %v3307_v60 = vadd.f32 %v3306_v51, %v3294_v58 }
 0x29d   : > { %v3295_v54 = vpop.f32.mrf.mxu2  ;;  %v3308_v55 = vpop.f32.mrf.mxu3 }
 0x2ac   : > { %v3319_v30 = vpop.f32.mrf.mxu0  ;;  %v3332_v61 = vpop.f32.mrf.mxu1 }
 0x2ad   : > { %v3320_v63 = vadd.f32 %v3319_v30, %v3307_v60 }
 0x2af   : > { %v3333_v36 = vadd.f32 %v3332_v61, %v3320_v63 }
 0x2b3   : > { %v3345_v0 = vpop.f32.mrf.mxu2  ;;  %v3358_v1 = vpop.f32.mrf.mxu3 }
 0x2b4   : > { %v3346_v37 = vadd.f32 %v3345_v0, %v3333_v36  ;;  %v3321_v2 = vpop.f32.mrf.mxu0  ;;  %v3334_v3 = vpop.f32.mrf.mxu1 }
 0x2b6   : > { %v3359_v4 = vadd.f32 %v3358_v1, %v3346_v37 }
 0x2b8   : > { %5000 = vtanh.f32 %v3359_v4 }
 0x2bb   : > { %v3347_v5 = vpop.f32.mrf.mxu2  ;;  %v3360_v6 = vpop.f32.mrf.mxu3 }
 0x2be   : > { %v5001_v8 = vpop.eup %5000 }
 0x2bf   : > { %v3373_v10 = vrot.slane %v5001_v8, 2 }
 0x2c1   : > { %v3377_v12 = vsel %vm3376_vm1, %v3372_v9, %v3373_v10 }
 0x2c2   : > { %v3379_v13 = vsel %vm3378_vm2, %v6286_v24, %v3377_v12 }
 0x2c3   : > { %v3381_v14 = vmul.f32 %v3379_v13, %v3362_v11 }
 0x2c5   : > { %3382 = vst [vmem:[%s1361_s30] sm:$0xff] %v3381_v14 }
 0x2c6 PF: > { %s16_s27 = sadd.s32 1, %s5056_s27   ;;  %s6326_s21 = smov %s5036_s22 }
 0x2c7   : > { %p13_p10 = scmp.ge.s32.totalorder %s16_s27, 18   ;;  %s6327_s22 = smov %s5142_s8 }
 0x2c8   : > { %s6328_s23 = smov %s5048_s25  ;;  %s6329_s24 = smov %s5052_s26 }
 0x2c9   : > { %s6330_s25 = smov %s6333_s28  ;;  %s6331_s26 = smov %s6337_s29 }
 0x2ca   :  { %15 = sbr.rel (!%p13_p10) target bundleno = 4 (0x4), region = 118 }

</bundles_post_ra>
